<compile_context>
chip_gen: v6e
topology: v6e:2x2x1
jax: 0.10.0
libtpu: 0.0.40
codegen_flags: <defaults>
</compile_context>

<pallas_src>
import jax
import jax.numpy as jnp
from jax import lax
from jax.experimental import pallas as pl
from jax.experimental.pallas import tpu as pltpu

NEG_SLOPE = 0.01      # nn.LeakyReLU default negative slope
BS, BL = 8, 128       # batch images per sublane / per lane
BB = BS * BL          # 1024 images per grid step


def _leaky(x):
    return jnp.where(x > 0, x, NEG_SLOPE * x)


def _hpool(a):
    """Horizontal 2->1 max pool over the leading (column) axis.

    a: (2n, BS, BL) -> (n, BS, BL). Leading-dim reshape + elementwise max only
    (pure vreg-tile re-indexing, no relayout, no masked stores)."""
    n = a.shape[0] // 2
    a = a.reshape(n, 2, BS, BL)
    return jnp.maximum(a[:, 0], a[:, 1])


def conv2lin1_kernel(x_ref, w1_ref, b1_ref, w2_ref, b2_ref, wl_ref, bl_ref,
                     out_ref, xpad_ref, p1pad_ref, p2_ref):
    # x_ref:      (16, 16, BS, BL)     raw input block, batch in (sublane, lane)
    # w*/b*_ref:  flattened f32 parameters in SMEM (scalar loads)
    # out_ref:    (10, BS, BL)         logits, lane-dense
    # xpad_ref:   (18, 18, BS, BL)     conv1 'same'-padded input (built here)
    # p1pad_ref:  (8, 12, 12, BS, BL)  zero-bordered pool1 output (conv2 input)
    # p2_ref:     (256, BS, BL)        flattened pool2 output (linear input)

    # ---- build the 'same'-padded conv1 input: zero border + interior copy ----
    xpad_ref[0, :, :, :] = jnp.zeros((18, BS, BL), jnp.float32)
    xpad_ref[17, :, :, :] = jnp.zeros((18, BS, BL), jnp.float32)
    xpad_ref[1:17, 0:1, :, :] = jnp.zeros((16, 1, BS, BL), jnp.float32)
    xpad_ref[1:17, 17:18, :, :] = jnp.zeros((16, 1, BS, BL), jnp.float32)
    xpad_ref[1:17, 1:17, :, :] = x_ref[...]

    # ---- zero only the 2-wide border of the conv2 'same'-pad scratch ----
    zr = jnp.zeros((8, 2, 12, BS, BL), jnp.float32)
    zc = jnp.zeros((8, 8, 2, BS, BL), jnp.float32)
    p1pad_ref[:, 0:2, :, :, :] = zr
    p1pad_ref[:, 10:12, :, :, :] = zr
    p1pad_ref[:, 2:10, 0:2, :, :] = zc
    p1pad_ref[:, 2:10, 10:12, :, :] = zc

    # ---- conv1 (1->8, 3x3 'same') + LeakyReLU + 2x2 maxpool, fused ----
    # Loops: pooled row y2 (8) x oc-pair g (4) x half-row h (2), all rolled;
    # the 9 taps are unrolled. Live accumulator = 16 vregs; each patch load
    # (8 vregs) feeds 2 output channels.
    def conv1_y2(y2, c0):
        def conv1_pair(g, c1):
            oc0 = 2 * g
            oc1 = oc0 + 1

            def conv1_half(h, c2):
                col0 = 8 * h                       # raw output column base

                def conv_row(row):                 # raw output row (padded row == row+dy)
                    a0 = jnp.zeros((8, BS, BL), jnp.float32)
                    a1 = jnp.zeros((8, BS, BL), jnp.float32)
                    for dy in range(3):
                        for dx in range(3):
                            patch = xpad_ref[row + dy, pl.ds(col0 + dx, 8), :, :]
                            a0 = a0 + w1_ref[oc0 * 9 + dy * 3 + dx] * patch
                            a1 = a1 + w1_ref[oc1 * 9 + dy * 3 + dx] * patch
                    return _hpool(a0), _hpool(a1)  # (4, BS, BL) each

                hA0, hA1 = conv_row(2 * y2)
                hB0, hB1 = conv_row(2 * y2 + 1)
                # pool(leaky(z+b)) == leaky(pool(z)+b): pool first, then bias+leaky.
                p0 = _leaky(jnp.maximum(hA0, hB0) + b1_ref[oc0])
                p1 = _leaky(jnp.maximum(hA1, hB1) + b1_ref[oc1])
                # pool1 pixel (y2, 4h..4h+3) lives at p1pad[oc, 2+y2, 2+4h ..]
                p1pad_ref[oc0, 2 + y2, pl.ds(2 + 4 * h, 4), :, :] = p0
                p1pad_ref[oc1, 2 + y2, pl.ds(2 + 4 * h, 4), :, :] = p1
                return c2

            return lax.fori_loop(0, 2, conv1_half, c1)

        return lax.fori_loop(0, 4, conv1_pair, c0)

    lax.fori_loop(0, 8, conv1_y2, 0)

    # ---- conv2 (8->16, 5x5 'same') + LeakyReLU + 2x2 maxpool, fused ----
    # Loops: pooled row y2 (4) x oc-pair g (8), rolled; per raw row the ic loop
    # (8) is rolled and the 25 spatial taps are unrolled with additive weight
    # indexing. Live accumulator = 16 vregs; each patch feeds 2 output channels.
    def conv2_y2(y2, c0):
        def conv2_pair(g, c1):
            oc0 = 2 * g
            oc1 = oc0 + 1

            def conv_row(row):                     # raw conv2 output row 0..7
                def ic_body(ic, accs):
                    a0, a1 = accs
                    wb0 = oc0 * 200 + ic * 25
                    wb1 = oc1 * 200 + ic * 25
                    for dy in range(5):
                        for dx in range(5):
                            patch = p1pad_ref[ic, row + dy, pl.ds(dx, 8), :, :]
                            a0 = a0 + w2_ref[wb0 + dy * 5 + dx] * patch
                            a1 = a1 + w2_ref[wb1 + dy * 5 + dx] * patch
                    return a0, a1

                a0, a1 = lax.fori_loop(
                    0, 8, ic_body,
                    (jnp.zeros((8, BS, BL), jnp.float32),
                     jnp.zeros((8, BS, BL), jnp.float32)))
                return _hpool(a0), _hpool(a1)      # (4, BS, BL) each

            hA0, hA1 = conv_row(2 * y2)
            hB0, hB1 = conv_row(2 * y2 + 1)
            p0 = _leaky(jnp.maximum(hA0, hB0) + b2_ref[oc0])
            p1 = _leaky(jnp.maximum(hA1, hB1) + b2_ref[oc1])
            # PyTorch (C,H,W) flatten order: feature = oc*16 + y2*4 + x2.
            p2_ref[pl.ds(oc0 * 16 + y2 * 4, 4), :, :] = p0
            p2_ref[pl.ds(oc1 * 16 + y2 * 4, 4), :, :] = p1
            return c1

        return lax.fori_loop(0, 8, conv2_pair, c0)

    lax.fori_loop(0, 4, conv2_y2, 0)

    # ---- linear 256 -> 10 (10 lane-dense accumulators stay in vregs) ----
    def lin(f, accs):
        v = p2_ref[f]                              # (BS, BL)
        return tuple(accs[c] + wl_ref[c * 256 + f] * v for c in range(10))

    accs = lax.fori_loop(
        0, 256, lin,
        tuple(jnp.zeros((BS, BL), jnp.float32) for _ in range(10)))
    for c in range(10):
        out_ref[c] = accs[c] + bl_ref[c]


def conv2lin1_forward(x_nchw, w1, b1, w2, b2, wl, bl, *, min_grid_steps=1):
    """Forward pass of Conv2Lin1Net.

    x_nchw: (N,1,16,16) f32; params in PyTorch layouts. Returns (N,10) logits.
    min_grid_steps: set to >=2 on TPU v7x (2 TensorCores/chip) when N is large
    enough, so the "parallel" batch-grid axis can be sharded across both cores.
    """
    N = x_nchw.shape[0]
    nb = max(pl.cdiv(N, BB), int(min_grid_steps))
    npad = nb * BB

    # (N,1,16,16) -> pad batch to npad, then move batch into the trailing
    # (sublane, lane) axes. No host-side spatial padding (done in-kernel).
    x = x_nchw.reshape(N, 16, 16).astype(jnp.float32)
    x = jnp.pad(x, ((0, npad - N), (0, 0), (0, 0)))
    x = x.reshape(nb, BS, BL, 16, 16).transpose(0, 3, 4, 1, 2)    # (nb,16,16,BS,BL)

    def flat(a):
        return a.reshape(-1).astype(jnp.float32)

    def smem_spec():
        return pl.BlockSpec(memory_space=pltpu.MemorySpace.SMEM)

    out = pl.pallas_call(
        conv2lin1_kernel,
        out_shape=jax.ShapeDtypeStruct((nb, 10, BS, BL), jnp.float32),
        grid_spec=pltpu.PrefetchScalarGridSpec(
            num_scalar_prefetch=0,
            grid=(nb,),
            in_specs=[
                pl.BlockSpec((None, 16, 16, BS, BL),
                             lambda b: (b, 0, 0, 0, 0)),
                smem_spec(),   # w1  (72,)
                smem_spec(),   # b1  (8,)
                smem_spec(),   # w2  (3200,)
                smem_spec(),   # b2  (16,)
                smem_spec(),   # wl  (2560,)
                smem_spec(),   # bl  (10,)
            ],
            out_specs=pl.BlockSpec((None, 10, BS, BL),
                                   lambda b: (b, 0, 0, 0)),
            scratch_shapes=[
                pltpu.VMEM((18, 18, BS, BL), jnp.float32),     # padded conv1 input
                pltpu.VMEM((8, 12, 12, BS, BL), jnp.float32),  # padded pool1 (conv2 input)
                pltpu.VMEM((256, BS, BL), jnp.float32),        # flattened pool2 (linear input)
            ],
        ),
        compiler_params=pltpu.CompilerParams(
            dimension_semantics=("parallel",),
            vmem_limit_bytes=32 * 1024 * 1024),
    )(x, flat(w1), flat(b1), flat(w2), flat(b2), flat(wl), flat(bl))

    # (nb,10,BS,BL) -> (npad,10) -> drop batch padding.
    return out.transpose(0, 2, 3, 1).reshape(npad, 10)[:N]


def torch_reference(x, w1, b1, w2, b2, wl, bl):
    """Pure-JAX re-implementation of the PyTorch forward (NCHW) for validation."""
    dn = ("NCHW", "OIHW", "NCHW")
    h = lax.conv_general_dilated(x, w1, (1, 1), "SAME", dimension_numbers=dn)
    h = _leaky(h + b1[None, :, None, None])
    h = lax.reduce_window(h, -jnp.inf, lax.max, (1, 1, 2, 2), (1, 1, 2, 2), "VALID")
    h = lax.conv_general_dilated(h, w2, (1, 1), "SAME", dimension_numbers=dn)
    h = _leaky(h + b2[None, :, None, None])
    h = lax.reduce_window(h, -jnp.inf, lax.max, (1, 1, 2, 2), (1, 1, 2, 2), "VALID")
    flat = h.reshape(h.shape[0], -1)        # NCHW flatten == torch nn.Flatten
    return flat @ wl.T + bl


if __name__ == "__main__":
    key = jax.random.PRNGKey(0)
    ks = jax.random.split(key, 7)
    # Deterministic synthetic parameters (PyTorch shapes).
    w1 = 0.3 * jax.random.normal(ks[0], (8, 1, 3, 3), jnp.float32)
    b1 = 0.1 * jax.random.normal(ks[1], (8,), jnp.float32)
    w2 = 0.1 * jax.random.normal(ks[2], (16, 8, 5, 5), jnp.float32)
    b2 = 0.1 * jax.random.normal(ks[3], (16,), jnp.float32)
    wl = 0.1 * jax.random.normal(ks[4], (10, 256), jnp.float32)
    bl = 0.1 * jax.random.normal(ks[5], (10,), jnp.float32)
    x = jax.random.normal(ks[6], (2, 1, 16, 16), jnp.float32)   # NCHW input

    out = jax.block_until_ready(conv2lin1_forward(x, w1, b1, w2, b2, wl, bl))
    ref = torch_reference(x, w1, b1, w2, b2, wl, bl)
    assert out.shape == (2, 10)
    assert bool(jnp.allclose(out, ref, atol=1e-3, rtol=1e-3)), "mismatch vs reference"
    print("KERNEL_OK")
</pallas_src>

<mosaic_0001>
module attributes {stable_mosaic.version = 11 : i64} {
  func.func @conv2lin1_kernel(%arg0: i32, %arg1: memref<1x16x16x8x128xf32, #tpu.memory_space<vmem>>, %arg2: memref<72xf32, #tpu.memory_space<smem>>, %arg3: memref<8xf32, #tpu.memory_space<smem>>, %arg4: memref<3200xf32, #tpu.memory_space<smem>>, %arg5: memref<16xf32, #tpu.memory_space<smem>>, %arg6: memref<2560xf32, #tpu.memory_space<smem>>, %arg7: memref<10xf32, #tpu.memory_space<smem>>, %arg8: memref<1x10x8x128xf32, #tpu.memory_space<vmem>>, %arg9: memref<18x18x8x128xf32, #tpu.memory_space<vmem>>, %arg10: memref<8x12x12x8x128xf32, #tpu.memory_space<vmem>>, %arg11: memref<256x8x128xf32, #tpu.memory_space<vmem>>) attributes {dimension_semantics = [#tpu.dimension_semantics<parallel>], iteration_bounds = array<i64: 1>, scalar_prefetch = 0 : i64, scratch_operands = 3 : i64, tpu.core_type = #tpu.core_type<tc>, window_params = [{transform_indices = @transform_0, window_bounds = array<i64: 1, 16, 16, 8, 128>}, {transform_indices = @transform_1, window_bounds = array<i64: 72>}, {transform_indices = @transform_2, window_bounds = array<i64: 8>}, {transform_indices = @transform_3, window_bounds = array<i64: 3200>}, {transform_indices = @transform_4, window_bounds = array<i64: 16>}, {transform_indices = @transform_5, window_bounds = array<i64: 2560>}, {transform_indices = @transform_6, window_bounds = array<i64: 10>}, {transform_indices = @transform_7, window_bounds = array<i64: 1, 10, 8, 128>}]} {
    %cst = arith.constant 0.000000e+00 : f32
    %0 = vector.broadcast %cst : f32 to vector<18x8x128xf32>
    %c0 = arith.constant 0 : index
    %c0_0 = arith.constant 0 : index
    %c0_1 = arith.constant 0 : index
    %c0_2 = arith.constant 0 : index
    %1 = vector.load %arg9[%c0, %c0_0, %c0_1, %c0_2] : memref<18x18x8x128xf32, #tpu.memory_space<vmem>>, vector<1x18x8x128xf32>
    %2 = vector.shape_cast %1 : vector<1x18x8x128xf32> to vector<18x8x128xf32>
    %3 = vector.shape_cast %0 : vector<18x8x128xf32> to vector<1x18x8x128xf32>
    tpu.vector_store %arg9[%c0, %c0_0, %c0_1, %c0_2], %3 {strides = array<i32>} : memref<18x18x8x128xf32, #tpu.memory_space<vmem>>, vector<1x18x8x128xf32>,
    %cst_3 = arith.constant 0.000000e+00 : f32
    %4 = vector.broadcast %cst_3 : f32 to vector<18x8x128xf32>
    %c17 = arith.constant 17 : index
    %c0_4 = arith.constant 0 : index
    %c0_5 = arith.constant 0 : index
    %c0_6 = arith.constant 0 : index
    %5 = vector.load %arg9[%c17, %c0_4, %c0_5, %c0_6] : memref<18x18x8x128xf32, #tpu.memory_space<vmem>>, vector<1x18x8x128xf32>
    %6 = vector.shape_cast %5 : vector<1x18x8x128xf32> to vector<18x8x128xf32>
    %7 = vector.shape_cast %4 : vector<18x8x128xf32> to vector<1x18x8x128xf32>
    tpu.vector_store %arg9[%c17, %c0_4, %c0_5, %c0_6], %7 {strides = array<i32>} : memref<18x18x8x128xf32, #tpu.memory_space<vmem>>, vector<1x18x8x128xf32>,
    %cst_7 = arith.constant 0.000000e+00 : f32
    %8 = vector.broadcast %cst_7 : f32 to vector<16x1x8x128xf32>
    %c1 = arith.constant 1 : index
    %c0_8 = arith.constant 0 : index
    %c0_9 = arith.constant 0 : index
    %c0_10 = arith.constant 0 : index
    %9 = vector.load %arg9[%c1, %c0_8, %c0_9, %c0_10] : memref<18x18x8x128xf32, #tpu.memory_space<vmem>>, vector<16x1x8x128xf32>
    tpu.vector_store %arg9[%c1, %c0_8, %c0_9, %c0_10], %8 {strides = array<i32>} : memref<18x18x8x128xf32, #tpu.memory_space<vmem>>, vector<16x1x8x128xf32>,
    %cst_11 = arith.constant 0.000000e+00 : f32
    %10 = vector.broadcast %cst_11 : f32 to vector<16x1x8x128xf32>
    %c1_12 = arith.constant 1 : index
    %c17_13 = arith.constant 17 : index
    %c0_14 = arith.constant 0 : index
    %c0_15 = arith.constant 0 : index
    %11 = vector.load %arg9[%c1_12, %c17_13, %c0_14, %c0_15] : memref<18x18x8x128xf32, #tpu.memory_space<vmem>>, vector<16x1x8x128xf32>
    tpu.vector_store %arg9[%c1_12, %c17_13, %c0_14, %c0_15], %10 {strides = array<i32>} : memref<18x18x8x128xf32, #tpu.memory_space<vmem>>, vector<16x1x8x128xf32>,
    %c0_16 = arith.constant 0 : index
    %c0_17 = arith.constant 0 : index
    %c0_18 = arith.constant 0 : index
    %c0_19 = arith.constant 0 : index
    %c0_20 = arith.constant 0 : index
    %12 = vector.load %arg1[%c0_16, %c0_17, %c0_18, %c0_19, %c0_20] : memref<1x16x16x8x128xf32, #tpu.memory_space<vmem>>, vector<1x16x16x8x128xf32>
    %13 = vector.shape_cast %12 : vector<1x16x16x8x128xf32> to vector<16x16x8x128xf32>
    %c1_21 = arith.constant 1 : index
    %c1_22 = arith.constant 1 : index
    %c0_23 = arith.constant 0 : index
    %c0_24 = arith.constant 0 : index
    %14 = vector.load %arg9[%c1_21, %c1_22, %c0_23, %c0_24] : memref<18x18x8x128xf32, #tpu.memory_space<vmem>>, vector<16x16x8x128xf32>
    tpu.vector_store %arg9[%c1_21, %c1_22, %c0_23, %c0_24], %13 {strides = array<i32>} : memref<18x18x8x128xf32, #tpu.memory_space<vmem>>, vector<16x16x8x128xf32>,
    %cst_25 = arith.constant 0.000000e+00 : f32
    %15 = vector.broadcast %cst_25 : f32 to vector<8x2x12x8x128xf32>
    %cst_26 = arith.constant 0.000000e+00 : f32
    %16 = vector.broadcast %cst_26 : f32 to vector<8x8x2x8x128xf32>
    %c0_27 = arith.constant 0 : index
    %c0_28 = arith.constant 0 : index
    %c0_29 = arith.constant 0 : index
    %c0_30 = arith.constant 0 : index
    %c0_31 = arith.constant 0 : index
    %17 = vector.load %arg10[%c0_27, %c0_28, %c0_29, %c0_30, %c0_31] : memref<8x12x12x8x128xf32, #tpu.memory_space<vmem>>, vector<8x2x12x8x128xf32>
    tpu.vector_store %arg10[%c0_27, %c0_28, %c0_29, %c0_30, %c0_31], %15 {strides = array<i32>} : memref<8x12x12x8x128xf32, #tpu.memory_space<vmem>>, vector<8x2x12x8x128xf32>,
    %c0_32 = arith.constant 0 : index
    %c10 = arith.constant 10 : index
    %c0_33 = arith.constant 0 : index
    %c0_34 = arith.constant 0 : index
    %c0_35 = arith.constant 0 : index
    %18 = vector.load %arg10[%c0_32, %c10, %c0_33, %c0_34, %c0_35] : memref<8x12x12x8x128xf32, #tpu.memory_space<vmem>>, vector<8x2x12x8x128xf32>
    tpu.vector_store %arg10[%c0_32, %c10, %c0_33, %c0_34, %c0_35], %15 {strides = array<i32>} : memref<8x12x12x8x128xf32, #tpu.memory_space<vmem>>, vector<8x2x12x8x128xf32>,
    %c0_36 = arith.constant 0 : index
    %c2 = arith.constant 2 : index
    %c0_37 = arith.constant 0 : index
    %c0_38 = arith.constant 0 : index
    %c0_39 = arith.constant 0 : index
    %19 = vector.load %arg10[%c0_36, %c2, %c0_37, %c0_38, %c0_39] : memref<8x12x12x8x128xf32, #tpu.memory_space<vmem>>, vector<8x8x2x8x128xf32>
    tpu.vector_store %arg10[%c0_36, %c2, %c0_37, %c0_38, %c0_39], %16 {strides = array<i32>} : memref<8x12x12x8x128xf32, #tpu.memory_space<vmem>>, vector<8x8x2x8x128xf32>,
    %c0_40 = arith.constant 0 : index
    %c2_41 = arith.constant 2 : index
    %c10_42 = arith.constant 10 : index
    %c0_43 = arith.constant 0 : index
    %c0_44 = arith.constant 0 : index
    %20 = vector.load %arg10[%c0_40, %c2_41, %c10_42, %c0_43, %c0_44] : memref<8x12x12x8x128xf32, #tpu.memory_space<vmem>>, vector<8x8x2x8x128xf32>
    tpu.vector_store %arg10[%c0_40, %c2_41, %c10_42, %c0_43, %c0_44], %16 {strides = array<i32>} : memref<8x12x12x8x128xf32, #tpu.memory_space<vmem>>, vector<8x8x2x8x128xf32>,
    %c0_i32 = arith.constant 0 : i32
    %c8_i32 = arith.constant 8 : i32
    %21 = arith.addi %c0_i32, %c8_i32 : i32
    %c1_i32 = arith.constant 1 : i32
    scf.for %arg12 = %c0_i32 to %21 step %c1_i32  : i32 {
      %c0_i32_105 = arith.constant 0 : i32
      %c4_i32_106 = arith.constant 4 : i32
      %95 = arith.addi %c0_i32_105, %c4_i32_106 : i32
      %c1_i32_107 = arith.constant 1 : i32
      scf.for %arg13 = %c0_i32_105 to %95 step %c1_i32_107  : i32 {
        %c2_i32 = arith.constant 2 : i32
        %96 = arith.muli %c2_i32, %arg13 : i32
        %c1_i32_109 = arith.constant 1 : i32
        %97 = arith.addi %96, %c1_i32_109 : i32
        %c0_i32_110 = arith.constant 0 : i32
        %c2_i32_111 = arith.constant 2 : i32
        %98 = arith.addi %c0_i32_110, %c2_i32_111 : i32
        %c1_i32_112 = arith.constant 1 : i32
        scf.for %arg14 = %c0_i32_110 to %98 step %c1_i32_112  : i32 {
          %c8_i32_114 = arith.constant 8 : i32
          %99 = arith.muli %c8_i32_114, %arg14 : i32
          %c2_i32_115 = arith.constant 2 : i32
          %100 = arith.muli %c2_i32_115, %arg12 : i32
          %cst_116 = arith.constant 0.000000e+00 : f32
          %101 = vector.broadcast %cst_116 : f32 to vector<8x8x128xf32>
          %cst_117 = arith.constant 0.000000e+00 : f32
          %102 = vector.broadcast %cst_117 : f32 to vector<8x8x128xf32>
          %c0_i32_118 = arith.constant 0 : i32
          %103 = arith.addi %100, %c0_i32_118 : i32
          %c0_i32_119 = arith.constant 0 : i32
          %104 = arith.addi %99, %c0_i32_119 : i32
          %105 = arith.index_cast %103 : i32 to index
          %106 = arith.index_cast %104 : i32 to index
          %c0_120 = arith.constant 0 : index
          %c0_121 = arith.constant 0 : index
          %107 = vector.load %arg9[%105, %106, %c0_120, %c0_121] : memref<18x18x8x128xf32, #tpu.memory_space<vmem>>, vector<1x8x8x128xf32>
          %108 = vector.shape_cast %107 : vector<1x8x8x128xf32> to vector<8x8x128xf32>
          %c9_i32 = arith.constant 9 : i32
          %109 = arith.muli %96, %c9_i32 : i32
          %c0_i32_122 = arith.constant 0 : i32
          %110 = arith.addi %109, %c0_i32_122 : i32
          %c0_i32_123 = arith.constant 0 : i32
          %111 = arith.addi %110, %c0_i32_123 : i32
          %112 = arith.index_cast %111 : i32 to index
          %113 = memref.load %arg2[%112] : memref<72xf32, #tpu.memory_space<smem>>
          %114 = vector.broadcast %113 : f32 to vector<8x8x128xf32>
          %115 = arith.mulf %114, %108 : vector<8x8x128xf32>
          %116 = arith.addf %101, %115 : vector<8x8x128xf32>
          %c9_i32_124 = arith.constant 9 : i32
          %117 = arith.muli %97, %c9_i32_124 : i32
          %c0_i32_125 = arith.constant 0 : i32
          %118 = arith.addi %117, %c0_i32_125 : i32
          %c0_i32_126 = arith.constant 0 : i32
          %119 = arith.addi %118, %c0_i32_126 : i32
          %120 = arith.index_cast %119 : i32 to index
          %121 = memref.load %arg2[%120] : memref<72xf32, #tpu.memory_space<smem>>
          %122 = vector.broadcast %121 : f32 to vector<8x8x128xf32>
          %123 = arith.mulf %122, %108 : vector<8x8x128xf32>
          %124 = arith.addf %102, %123 : vector<8x8x128xf32>
          %c0_i32_127 = arith.constant 0 : i32
          %125 = arith.addi %100, %c0_i32_127 : i32
          %c1_i32_128 = arith.constant 1 : i32
          %126 = arith.addi %99, %c1_i32_128 : i32
          %127 = arith.index_cast %125 : i32 to index
          %128 = arith.index_cast %126 : i32 to index
          %c0_129 = arith.constant 0 : index
          %c0_130 = arith.constant 0 : index
          %129 = vector.load %arg9[%127, %128, %c0_129, %c0_130] : memref<18x18x8x128xf32, #tpu.memory_space<vmem>>, vector<1x8x8x128xf32>
          %130 = vector.shape_cast %129 : vector<1x8x8x128xf32> to vector<8x8x128xf32>
          %c9_i32_131 = arith.constant 9 : i32
          %131 = arith.muli %96, %c9_i32_131 : i32
          %c0_i32_132 = arith.constant 0 : i32
          %132 = arith.addi %131, %c0_i32_132 : i32
          %c1_i32_133 = arith.constant 1 : i32
          %133 = arith.addi %132, %c1_i32_133 : i32
          %134 = arith.index_cast %133 : i32 to index
          %135 = memref.load %arg2[%134] : memref<72xf32, #tpu.memory_space<smem>>
          %136 = vector.broadcast %135 : f32 to vector<8x8x128xf32>
          %137 = arith.mulf %136, %130 : vector<8x8x128xf32>
          %138 = arith.addf %116, %137 : vector<8x8x128xf32>
          %c9_i32_134 = arith.constant 9 : i32
          %139 = arith.muli %97, %c9_i32_134 : i32
          %c0_i32_135 = arith.constant 0 : i32
          %140 = arith.addi %139, %c0_i32_135 : i32
          %c1_i32_136 = arith.constant 1 : i32
          %141 = arith.addi %140, %c1_i32_136 : i32
          %142 = arith.index_cast %141 : i32 to index
          %143 = memref.load %arg2[%142] : memref<72xf32, #tpu.memory_space<smem>>
          %144 = vector.broadcast %143 : f32 to vector<8x8x128xf32>
          %145 = arith.mulf %144, %130 : vector<8x8x128xf32>
          %146 = arith.addf %124, %145 : vector<8x8x128xf32>
          %c0_i32_137 = arith.constant 0 : i32
          %147 = arith.addi %100, %c0_i32_137 : i32
          %c2_i32_138 = arith.constant 2 : i32
          %148 = arith.addi %99, %c2_i32_138 : i32
          %149 = arith.index_cast %147 : i32 to index
          %150 = arith.index_cast %148 : i32 to index
          %c0_139 = arith.constant 0 : index
          %c0_140 = arith.constant 0 : index
          %151 = vector.load %arg9[%149, %150, %c0_139, %c0_140] : memref<18x18x8x128xf32, #tpu.memory_space<vmem>>, vector<1x8x8x128xf32>
          %152 = vector.shape_cast %151 : vector<1x8x8x128xf32> to vector<8x8x128xf32>
          %c9_i32_141 = arith.constant 9 : i32
          %153 = arith.muli %96, %c9_i32_141 : i32
          %c0_i32_142 = arith.constant 0 : i32
          %154 = arith.addi %153, %c0_i32_142 : i32
          %c2_i32_143 = arith.constant 2 : i32
          %155 = arith.addi %154, %c2_i32_143 : i32
          %156 = arith.index_cast %155 : i32 to index
          %157 = memref.load %arg2[%156] : memref<72xf32, #tpu.memory_space<smem>>
          %158 = vector.broadcast %157 : f32 to vector<8x8x128xf32>
          %159 = arith.mulf %158, %152 : vector<8x8x128xf32>
          %160 = arith.addf %138, %159 : vector<8x8x128xf32>
          %c9_i32_144 = arith.constant 9 : i32
          %161 = arith.muli %97, %c9_i32_144 : i32
          %c0_i32_145 = arith.constant 0 : i32
          %162 = arith.addi %161, %c0_i32_145 : i32
          %c2_i32_146 = arith.constant 2 : i32
          %163 = arith.addi %162, %c2_i32_146 : i32
          %164 = arith.index_cast %163 : i32 to index
          %165 = memref.load %arg2[%164] : memref<72xf32, #tpu.memory_space<smem>>
          %166 = vector.broadcast %165 : f32 to vector<8x8x128xf32>
          %167 = arith.mulf %166, %152 : vector<8x8x128xf32>
          %168 = arith.addf %146, %167 : vector<8x8x128xf32>
          %c1_i32_147 = arith.constant 1 : i32
          %169 = arith.addi %100, %c1_i32_147 : i32
          %c0_i32_148 = arith.constant 0 : i32
          %170 = arith.addi %99, %c0_i32_148 : i32
          %171 = arith.index_cast %169 : i32 to index
          %172 = arith.index_cast %170 : i32 to index
          %c0_149 = arith.constant 0 : index
          %c0_150 = arith.constant 0 : index
          %173 = vector.load %arg9[%171, %172, %c0_149, %c0_150] : memref<18x18x8x128xf32, #tpu.memory_space<vmem>>, vector<1x8x8x128xf32>
          %174 = vector.shape_cast %173 : vector<1x8x8x128xf32> to vector<8x8x128xf32>
          %c9_i32_151 = arith.constant 9 : i32
          %175 = arith.muli %96, %c9_i32_151 : i32
          %c3_i32 = arith.constant 3 : i32
          %176 = arith.addi %175, %c3_i32 : i32
          %c0_i32_152 = arith.constant 0 : i32
          %177 = arith.addi %176, %c0_i32_152 : i32
          %178 = arith.index_cast %177 : i32 to index
          %179 = memref.load %arg2[%178] : memref<72xf32, #tpu.memory_space<smem>>
          %180 = vector.broadcast %179 : f32 to vector<8x8x128xf32>
          %181 = arith.mulf %180, %174 : vector<8x8x128xf32>
          %182 = arith.addf %160, %181 : vector<8x8x128xf32>
          %c9_i32_153 = arith.constant 9 : i32
          %183 = arith.muli %97, %c9_i32_153 : i32
          %c3_i32_154 = arith.constant 3 : i32
          %184 = arith.addi %183, %c3_i32_154 : i32
          %c0_i32_155 = arith.constant 0 : i32
          %185 = arith.addi %184, %c0_i32_155 : i32
          %186 = arith.index_cast %185 : i32 to index
          %187 = memref.load %arg2[%186] : memref<72xf32, #tpu.memory_space<smem>>
          %188 = vector.broadcast %187 : f32 to vector<8x8x128xf32>
          %189 = arith.mulf %188, %174 : vector<8x8x128xf32>
          %190 = arith.addf %168, %189 : vector<8x8x128xf32>
          %c1_i32_156 = arith.constant 1 : i32
          %191 = arith.addi %100, %c1_i32_156 : i32
          %c1_i32_157 = arith.constant 1 : i32
          %192 = arith.addi %99, %c1_i32_157 : i32
          %193 = arith.index_cast %191 : i32 to index
          %194 = arith.index_cast %192 : i32 to index
          %c0_158 = arith.constant 0 : index
          %c0_159 = arith.constant 0 : index
          %195 = vector.load %arg9[%193, %194, %c0_158, %c0_159] : memref<18x18x8x128xf32, #tpu.memory_space<vmem>>, vector<1x8x8x128xf32>
          %196 = vector.shape_cast %195 : vector<1x8x8x128xf32> to vector<8x8x128xf32>
          %c9_i32_160 = arith.constant 9 : i32
          %197 = arith.muli %96, %c9_i32_160 : i32
          %c3_i32_161 = arith.constant 3 : i32
          %198 = arith.addi %197, %c3_i32_161 : i32
          %c1_i32_162 = arith.constant 1 : i32
          %199 = arith.addi %198, %c1_i32_162 : i32
          %200 = arith.index_cast %199 : i32 to index
          %201 = memref.load %arg2[%200] : memref<72xf32, #tpu.memory_space<smem>>
          %202 = vector.broadcast %201 : f32 to vector<8x8x128xf32>
          %203 = arith.mulf %202, %196 : vector<8x8x128xf32>
          %204 = arith.addf %182, %203 : vector<8x8x128xf32>
          %c9_i32_163 = arith.constant 9 : i32
          %205 = arith.muli %97, %c9_i32_163 : i32
          %c3_i32_164 = arith.constant 3 : i32
          %206 = arith.addi %205, %c3_i32_164 : i32
          %c1_i32_165 = arith.constant 1 : i32
          %207 = arith.addi %206, %c1_i32_165 : i32
          %208 = arith.index_cast %207 : i32 to index
          %209 = memref.load %arg2[%208] : memref<72xf32, #tpu.memory_space<smem>>
          %210 = vector.broadcast %209 : f32 to vector<8x8x128xf32>
          %211 = arith.mulf %210, %196 : vector<8x8x128xf32>
          %212 = arith.addf %190, %211 : vector<8x8x128xf32>
          %c1_i32_166 = arith.constant 1 : i32
          %213 = arith.addi %100, %c1_i32_166 : i32
          %c2_i32_167 = arith.constant 2 : i32
          %214 = arith.addi %99, %c2_i32_167 : i32
          %215 = arith.index_cast %213 : i32 to index
          %216 = arith.index_cast %214 : i32 to index
          %c0_168 = arith.constant 0 : index
          %c0_169 = arith.constant 0 : index
          %217 = vector.load %arg9[%215, %216, %c0_168, %c0_169] : memref<18x18x8x128xf32, #tpu.memory_space<vmem>>, vector<1x8x8x128xf32>
          %218 = vector.shape_cast %217 : vector<1x8x8x128xf32> to vector<8x8x128xf32>
          %c9_i32_170 = arith.constant 9 : i32
          %219 = arith.muli %96, %c9_i32_170 : i32
          %c3_i32_171 = arith.constant 3 : i32
          %220 = arith.addi %219, %c3_i32_171 : i32
          %c2_i32_172 = arith.constant 2 : i32
          %221 = arith.addi %220, %c2_i32_172 : i32
          %222 = arith.index_cast %221 : i32 to index
          %223 = memref.load %arg2[%222] : memref<72xf32, #tpu.memory_space<smem>>
          %224 = vector.broadcast %223 : f32 to vector<8x8x128xf32>
          %225 = arith.mulf %224, %218 : vector<8x8x128xf32>
          %226 = arith.addf %204, %225 : vector<8x8x128xf32>
          %c9_i32_173 = arith.constant 9 : i32
          %227 = arith.muli %97, %c9_i32_173 : i32
          %c3_i32_174 = arith.constant 3 : i32
          %228 = arith.addi %227, %c3_i32_174 : i32
          %c2_i32_175 = arith.constant 2 : i32
          %229 = arith.addi %228, %c2_i32_175 : i32
          %230 = arith.index_cast %229 : i32 to index
          %231 = memref.load %arg2[%230] : memref<72xf32, #tpu.memory_space<smem>>
          %232 = vector.broadcast %231 : f32 to vector<8x8x128xf32>
          %233 = arith.mulf %232, %218 : vector<8x8x128xf32>
          %234 = arith.addf %212, %233 : vector<8x8x128xf32>
          %c2_i32_176 = arith.constant 2 : i32
          %235 = arith.addi %100, %c2_i32_176 : i32
          %c0_i32_177 = arith.constant 0 : i32
          %236 = arith.addi %99, %c0_i32_177 : i32
          %237 = arith.index_cast %235 : i32 to index
          %238 = arith.index_cast %236 : i32 to index
          %c0_178 = arith.constant 0 : index
          %c0_179 = arith.constant 0 : index
          %239 = vector.load %arg9[%237, %238, %c0_178, %c0_179] : memref<18x18x8x128xf32, #tpu.memory_space<vmem>>, vector<1x8x8x128xf32>
          %240 = vector.shape_cast %239 : vector<1x8x8x128xf32> to vector<8x8x128xf32>
          %c9_i32_180 = arith.constant 9 : i32
          %241 = arith.muli %96, %c9_i32_180 : i32
          %c6_i32 = arith.constant 6 : i32
          %242 = arith.addi %241, %c6_i32 : i32
          %c0_i32_181 = arith.constant 0 : i32
          %243 = arith.addi %242, %c0_i32_181 : i32
          %244 = arith.index_cast %243 : i32 to index
          %245 = memref.load %arg2[%244] : memref<72xf32, #tpu.memory_space<smem>>
          %246 = vector.broadcast %245 : f32 to vector<8x8x128xf32>
          %247 = arith.mulf %246, %240 : vector<8x8x128xf32>
          %248 = arith.addf %226, %247 : vector<8x8x128xf32>
          %c9_i32_182 = arith.constant 9 : i32
          %249 = arith.muli %97, %c9_i32_182 : i32
          %c6_i32_183 = arith.constant 6 : i32
          %250 = arith.addi %249, %c6_i32_183 : i32
          %c0_i32_184 = arith.constant 0 : i32
          %251 = arith.addi %250, %c0_i32_184 : i32
          %252 = arith.index_cast %251 : i32 to index
          %253 = memref.load %arg2[%252] : memref<72xf32, #tpu.memory_space<smem>>
          %254 = vector.broadcast %253 : f32 to vector<8x8x128xf32>
          %255 = arith.mulf %254, %240 : vector<8x8x128xf32>
          %256 = arith.addf %234, %255 : vector<8x8x128xf32>
          %c2_i32_185 = arith.constant 2 : i32
          %257 = arith.addi %100, %c2_i32_185 : i32
          %c1_i32_186 = arith.constant 1 : i32
          %258 = arith.addi %99, %c1_i32_186 : i32
          %259 = arith.index_cast %257 : i32 to index
          %260 = arith.index_cast %258 : i32 to index
          %c0_187 = arith.constant 0 : index
          %c0_188 = arith.constant 0 : index
          %261 = vector.load %arg9[%259, %260, %c0_187, %c0_188] : memref<18x18x8x128xf32, #tpu.memory_space<vmem>>, vector<1x8x8x128xf32>
          %262 = vector.shape_cast %261 : vector<1x8x8x128xf32> to vector<8x8x128xf32>
          %c9_i32_189 = arith.constant 9 : i32
          %263 = arith.muli %96, %c9_i32_189 : i32
          %c6_i32_190 = arith.constant 6 : i32
          %264 = arith.addi %263, %c6_i32_190 : i32
          %c1_i32_191 = arith.constant 1 : i32
          %265 = arith.addi %264, %c1_i32_191 : i32
          %266 = arith.index_cast %265 : i32 to index
          %267 = memref.load %arg2[%266] : memref<72xf32, #tpu.memory_space<smem>>
          %268 = vector.broadcast %267 : f32 to vector<8x8x128xf32>
          %269 = arith.mulf %268, %262 : vector<8x8x128xf32>
          %270 = arith.addf %248, %269 : vector<8x8x128xf32>
          %c9_i32_192 = arith.constant 9 : i32
          %271 = arith.muli %97, %c9_i32_192 : i32
          %c6_i32_193 = arith.constant 6 : i32
          %272 = arith.addi %271, %c6_i32_193 : i32
          %c1_i32_194 = arith.constant 1 : i32
          %273 = arith.addi %272, %c1_i32_194 : i32
          %274 = arith.index_cast %273 : i32 to index
          %275 = memref.load %arg2[%274] : memref<72xf32, #tpu.memory_space<smem>>
          %276 = vector.broadcast %275 : f32 to vector<8x8x128xf32>
          %277 = arith.mulf %276, %262 : vector<8x8x128xf32>
          %278 = arith.addf %256, %277 : vector<8x8x128xf32>
          %c2_i32_195 = arith.constant 2 : i32
          %279 = arith.addi %100, %c2_i32_195 : i32
          %c2_i32_196 = arith.constant 2 : i32
          %280 = arith.addi %99, %c2_i32_196 : i32
          %281 = arith.index_cast %279 : i32 to index
          %282 = arith.index_cast %280 : i32 to index
          %c0_197 = arith.constant 0 : index
          %c0_198 = arith.constant 0 : index
          %283 = vector.load %arg9[%281, %282, %c0_197, %c0_198] : memref<18x18x8x128xf32, #tpu.memory_space<vmem>>, vector<1x8x8x128xf32>
          %284 = vector.shape_cast %283 : vector<1x8x8x128xf32> to vector<8x8x128xf32>
          %c9_i32_199 = arith.constant 9 : i32
          %285 = arith.muli %96, %c9_i32_199 : i32
          %c6_i32_200 = arith.constant 6 : i32
          %286 = arith.addi %285, %c6_i32_200 : i32
          %c2_i32_201 = arith.constant 2 : i32
          %287 = arith.addi %286, %c2_i32_201 : i32
          %288 = arith.index_cast %287 : i32 to index
          %289 = memref.load %arg2[%288] : memref<72xf32, #tpu.memory_space<smem>>
          %290 = vector.broadcast %289 : f32 to vector<8x8x128xf32>
          %291 = arith.mulf %290, %284 : vector<8x8x128xf32>
          %292 = arith.addf %270, %291 : vector<8x8x128xf32>
          %c9_i32_202 = arith.constant 9 : i32
          %293 = arith.muli %97, %c9_i32_202 : i32
          %c6_i32_203 = arith.constant 6 : i32
          %294 = arith.addi %293, %c6_i32_203 : i32
          %c2_i32_204 = arith.constant 2 : i32
          %295 = arith.addi %294, %c2_i32_204 : i32
          %296 = arith.index_cast %295 : i32 to index
          %297 = memref.load %arg2[%296] : memref<72xf32, #tpu.memory_space<smem>>
          %298 = vector.broadcast %297 : f32 to vector<8x8x128xf32>
          %299 = arith.mulf %298, %284 : vector<8x8x128xf32>
          %300 = arith.addf %278, %299 : vector<8x8x128xf32>
          %301 = vector.shape_cast %292 : vector<8x8x128xf32> to vector<4x2x8x128xf32>
          %302 = vector.extract_strided_slice %301 {offsets = [0, 0, 0, 0], sizes = [4, 1, 8, 128], strides = [1, 1, 1, 1]} : vector<4x2x8x128xf32> to vector<4x1x8x128xf32>
          %303 = vector.shape_cast %302 : vector<4x1x8x128xf32> to vector<4x8x128xf32>
          %304 = vector.extract_strided_slice %301 {offsets = [0, 1, 0, 0], sizes = [4, 1, 8, 128], strides = [1, 1, 1, 1]} : vector<4x2x8x128xf32> to vector<4x1x8x128xf32>
          %305 = vector.shape_cast %304 : vector<4x1x8x128xf32> to vector<4x8x128xf32>
          %306 = arith.maximumf %303, %305 : vector<4x8x128xf32>
          %307 = vector.shape_cast %300 : vector<8x8x128xf32> to vector<4x2x8x128xf32>
          %308 = vector.extract_strided_slice %307 {offsets = [0, 0, 0, 0], sizes = [4, 1, 8, 128], strides = [1, 1, 1, 1]} : vector<4x2x8x128xf32> to vector<4x1x8x128xf32>
          %309 = vector.shape_cast %308 : vector<4x1x8x128xf32> to vector<4x8x128xf32>
          %310 = vector.extract_strided_slice %307 {offsets = [0, 1, 0, 0], sizes = [4, 1, 8, 128], strides = [1, 1, 1, 1]} : vector<4x2x8x128xf32> to vector<4x1x8x128xf32>
          %311 = vector.shape_cast %310 : vector<4x1x8x128xf32> to vector<4x8x128xf32>
          %312 = arith.maximumf %309, %311 : vector<4x8x128xf32>
          %c2_i32_205 = arith.constant 2 : i32
          %313 = arith.muli %c2_i32_205, %arg12 : i32
          %c1_i32_206 = arith.constant 1 : i32
          %314 = arith.addi %313, %c1_i32_206 : i32
          %cst_207 = arith.constant 0.000000e+00 : f32
          %315 = vector.broadcast %cst_207 : f32 to vector<8x8x128xf32>
          %cst_208 = arith.constant 0.000000e+00 : f32
          %316 = vector.broadcast %cst_208 : f32 to vector<8x8x128xf32>
          %c0_i32_209 = arith.constant 0 : i32
          %317 = arith.addi %314, %c0_i32_209 : i32
          %c0_i32_210 = arith.constant 0 : i32
          %318 = arith.addi %99, %c0_i32_210 : i32
          %319 = arith.index_cast %317 : i32 to index
          %320 = arith.index_cast %318 : i32 to index
          %c0_211 = arith.constant 0 : index
          %c0_212 = arith.constant 0 : index
          %321 = vector.load %arg9[%319, %320, %c0_211, %c0_212] : memref<18x18x8x128xf32, #tpu.memory_space<vmem>>, vector<1x8x8x128xf32>
          %322 = vector.shape_cast %321 : vector<1x8x8x128xf32> to vector<8x8x128xf32>
          %c9_i32_213 = arith.constant 9 : i32
          %323 = arith.muli %96, %c9_i32_213 : i32
          %c0_i32_214 = arith.constant 0 : i32
          %324 = arith.addi %323, %c0_i32_214 : i32
          %c0_i32_215 = arith.constant 0 : i32
          %325 = arith.addi %324, %c0_i32_215 : i32
          %326 = arith.index_cast %325 : i32 to index
          %327 = memref.load %arg2[%326] : memref<72xf32, #tpu.memory_space<smem>>
          %328 = vector.broadcast %327 : f32 to vector<8x8x128xf32>
          %329 = arith.mulf %328, %322 : vector<8x8x128xf32>
          %330 = arith.addf %315, %329 : vector<8x8x128xf32>
          %c9_i32_216 = arith.constant 9 : i32
          %331 = arith.muli %97, %c9_i32_216 : i32
          %c0_i32_217 = arith.constant 0 : i32
          %332 = arith.addi %331, %c0_i32_217 : i32
          %c0_i32_218 = arith.constant 0 : i32
          %333 = arith.addi %332, %c0_i32_218 : i32
          %334 = arith.index_cast %333 : i32 to index
          %335 = memref.load %arg2[%334] : memref<72xf32, #tpu.memory_space<smem>>
          %336 = vector.broadcast %335 : f32 to vector<8x8x128xf32>
          %337 = arith.mulf %336, %322 : vector<8x8x128xf32>
          %338 = arith.addf %316, %337 : vector<8x8x128xf32>
          %c0_i32_219 = arith.constant 0 : i32
          %339 = arith.addi %314, %c0_i32_219 : i32
          %c1_i32_220 = arith.constant 1 : i32
          %340 = arith.addi %99, %c1_i32_220 : i32
          %341 = arith.index_cast %339 : i32 to index
          %342 = arith.index_cast %340 : i32 to index
          %c0_221 = arith.constant 0 : index
          %c0_222 = arith.constant 0 : index
          %343 = vector.load %arg9[%341, %342, %c0_221, %c0_222] : memref<18x18x8x128xf32, #tpu.memory_space<vmem>>, vector<1x8x8x128xf32>
          %344 = vector.shape_cast %343 : vector<1x8x8x128xf32> to vector<8x8x128xf32>
          %c9_i32_223 = arith.constant 9 : i32
          %345 = arith.muli %96, %c9_i32_223 : i32
          %c0_i32_224 = arith.constant 0 : i32
          %346 = arith.addi %345, %c0_i32_224 : i32
          %c1_i32_225 = arith.constant 1 : i32
          %347 = arith.addi %346, %c1_i32_225 : i32
          %348 = arith.index_cast %347 : i32 to index
          %349 = memref.load %arg2[%348] : memref<72xf32, #tpu.memory_space<smem>>
          %350 = vector.broadcast %349 : f32 to vector<8x8x128xf32>
          %351 = arith.mulf %350, %344 : vector<8x8x128xf32>
          %352 = arith.addf %330, %351 : vector<8x8x128xf32>
          %c9_i32_226 = arith.constant 9 : i32
          %353 = arith.muli %97, %c9_i32_226 : i32
          %c0_i32_227 = arith.constant 0 : i32
          %354 = arith.addi %353, %c0_i32_227 : i32
          %c1_i32_228 = arith.constant 1 : i32
          %355 = arith.addi %354, %c1_i32_228 : i32
          %356 = arith.index_cast %355 : i32 to index
          %357 = memref.load %arg2[%356] : memref<72xf32, #tpu.memory_space<smem>>
          %358 = vector.broadcast %357 : f32 to vector<8x8x128xf32>
          %359 = arith.mulf %358, %344 : vector<8x8x128xf32>
          %360 = arith.addf %338, %359 : vector<8x8x128xf32>
          %c0_i32_229 = arith.constant 0 : i32
          %361 = arith.addi %314, %c0_i32_229 : i32
          %c2_i32_230 = arith.constant 2 : i32
          %362 = arith.addi %99, %c2_i32_230 : i32
          %363 = arith.index_cast %361 : i32 to index
          %364 = arith.index_cast %362 : i32 to index
          %c0_231 = arith.constant 0 : index
          %c0_232 = arith.constant 0 : index
          %365 = vector.load %arg9[%363, %364, %c0_231, %c0_232] : memref<18x18x8x128xf32, #tpu.memory_space<vmem>>, vector<1x8x8x128xf32>
          %366 = vector.shape_cast %365 : vector<1x8x8x128xf32> to vector<8x8x128xf32>
          %c9_i32_233 = arith.constant 9 : i32
          %367 = arith.muli %96, %c9_i32_233 : i32
          %c0_i32_234 = arith.constant 0 : i32
          %368 = arith.addi %367, %c0_i32_234 : i32
          %c2_i32_235 = arith.constant 2 : i32
          %369 = arith.addi %368, %c2_i32_235 : i32
          %370 = arith.index_cast %369 : i32 to index
          %371 = memref.load %arg2[%370] : memref<72xf32, #tpu.memory_space<smem>>
          %372 = vector.broadcast %371 : f32 to vector<8x8x128xf32>
          %373 = arith.mulf %372, %366 : vector<8x8x128xf32>
          %374 = arith.addf %352, %373 : vector<8x8x128xf32>
          %c9_i32_236 = arith.constant 9 : i32
          %375 = arith.muli %97, %c9_i32_236 : i32
          %c0_i32_237 = arith.constant 0 : i32
          %376 = arith.addi %375, %c0_i32_237 : i32
          %c2_i32_238 = arith.constant 2 : i32
          %377 = arith.addi %376, %c2_i32_238 : i32
          %378 = arith.index_cast %377 : i32 to index
          %379 = memref.load %arg2[%378] : memref<72xf32, #tpu.memory_space<smem>>
          %380 = vector.broadcast %379 : f32 to vector<8x8x128xf32>
          %381 = arith.mulf %380, %366 : vector<8x8x128xf32>
          %382 = arith.addf %360, %381 : vector<8x8x128xf32>
          %c1_i32_239 = arith.constant 1 : i32
          %383 = arith.addi %314, %c1_i32_239 : i32
          %c0_i32_240 = arith.constant 0 : i32
          %384 = arith.addi %99, %c0_i32_240 : i32
          %385 = arith.index_cast %383 : i32 to index
          %386 = arith.index_cast %384 : i32 to index
          %c0_241 = arith.constant 0 : index
          %c0_242 = arith.constant 0 : index
          %387 = vector.load %arg9[%385, %386, %c0_241, %c0_242] : memref<18x18x8x128xf32, #tpu.memory_space<vmem>>, vector<1x8x8x128xf32>
          %388 = vector.shape_cast %387 : vector<1x8x8x128xf32> to vector<8x8x128xf32>
          %c9_i32_243 = arith.constant 9 : i32
          %389 = arith.muli %96, %c9_i32_243 : i32
          %c3_i32_244 = arith.constant 3 : i32
          %390 = arith.addi %389, %c3_i32_244 : i32
          %c0_i32_245 = arith.constant 0 : i32
          %391 = arith.addi %390, %c0_i32_245 : i32
          %392 = arith.index_cast %391 : i32 to index
          %393 = memref.load %arg2[%392] : memref<72xf32, #tpu.memory_space<smem>>
          %394 = vector.broadcast %393 : f32 to vector<8x8x128xf32>
          %395 = arith.mulf %394, %388 : vector<8x8x128xf32>
          %396 = arith.addf %374, %395 : vector<8x8x128xf32>
          %c9_i32_246 = arith.constant 9 : i32
          %397 = arith.muli %97, %c9_i32_246 : i32
          %c3_i32_247 = arith.constant 3 : i32
          %398 = arith.addi %397, %c3_i32_247 : i32
          %c0_i32_248 = arith.constant 0 : i32
          %399 = arith.addi %398, %c0_i32_248 : i32
          %400 = arith.index_cast %399 : i32 to index
          %401 = memref.load %arg2[%400] : memref<72xf32, #tpu.memory_space<smem>>
          %402 = vector.broadcast %401 : f32 to vector<8x8x128xf32>
          %403 = arith.mulf %402, %388 : vector<8x8x128xf32>
          %404 = arith.addf %382, %403 : vector<8x8x128xf32>
          %c1_i32_249 = arith.constant 1 : i32
          %405 = arith.addi %314, %c1_i32_249 : i32
          %c1_i32_250 = arith.constant 1 : i32
          %406 = arith.addi %99, %c1_i32_250 : i32
          %407 = arith.index_cast %405 : i32 to index
          %408 = arith.index_cast %406 : i32 to index
          %c0_251 = arith.constant 0 : index
          %c0_252 = arith.constant 0 : index
          %409 = vector.load %arg9[%407, %408, %c0_251, %c0_252] : memref<18x18x8x128xf32, #tpu.memory_space<vmem>>, vector<1x8x8x128xf32>
          %410 = vector.shape_cast %409 : vector<1x8x8x128xf32> to vector<8x8x128xf32>
          %c9_i32_253 = arith.constant 9 : i32
          %411 = arith.muli %96, %c9_i32_253 : i32
          %c3_i32_254 = arith.constant 3 : i32
          %412 = arith.addi %411, %c3_i32_254 : i32
          %c1_i32_255 = arith.constant 1 : i32
          %413 = arith.addi %412, %c1_i32_255 : i32
          %414 = arith.index_cast %413 : i32 to index
          %415 = memref.load %arg2[%414] : memref<72xf32, #tpu.memory_space<smem>>
          %416 = vector.broadcast %415 : f32 to vector<8x8x128xf32>
          %417 = arith.mulf %416, %410 : vector<8x8x128xf32>
          %418 = arith.addf %396, %417 : vector<8x8x128xf32>
          %c9_i32_256 = arith.constant 9 : i32
          %419 = arith.muli %97, %c9_i32_256 : i32
          %c3_i32_257 = arith.constant 3 : i32
          %420 = arith.addi %419, %c3_i32_257 : i32
          %c1_i32_258 = arith.constant 1 : i32
          %421 = arith.addi %420, %c1_i32_258 : i32
          %422 = arith.index_cast %421 : i32 to index
          %423 = memref.load %arg2[%422] : memref<72xf32, #tpu.memory_space<smem>>
          %424 = vector.broadcast %423 : f32 to vector<8x8x128xf32>
          %425 = arith.mulf %424, %410 : vector<8x8x128xf32>
          %426 = arith.addf %404, %425 : vector<8x8x128xf32>
          %c1_i32_259 = arith.constant 1 : i32
          %427 = arith.addi %314, %c1_i32_259 : i32
          %c2_i32_260 = arith.constant 2 : i32
          %428 = arith.addi %99, %c2_i32_260 : i32
          %429 = arith.index_cast %427 : i32 to index
          %430 = arith.index_cast %428 : i32 to index
          %c0_261 = arith.constant 0 : index
          %c0_262 = arith.constant 0 : index
          %431 = vector.load %arg9[%429, %430, %c0_261, %c0_262] : memref<18x18x8x128xf32, #tpu.memory_space<vmem>>, vector<1x8x8x128xf32>
          %432 = vector.shape_cast %431 : vector<1x8x8x128xf32> to vector<8x8x128xf32>
          %c9_i32_263 = arith.constant 9 : i32
          %433 = arith.muli %96, %c9_i32_263 : i32
          %c3_i32_264 = arith.constant 3 : i32
          %434 = arith.addi %433, %c3_i32_264 : i32
          %c2_i32_265 = arith.constant 2 : i32
          %435 = arith.addi %434, %c2_i32_265 : i32
          %436 = arith.index_cast %435 : i32 to index
          %437 = memref.load %arg2[%436] : memref<72xf32, #tpu.memory_space<smem>>
          %438 = vector.broadcast %437 : f32 to vector<8x8x128xf32>
          %439 = arith.mulf %438, %432 : vector<8x8x128xf32>
          %440 = arith.addf %418, %439 : vector<8x8x128xf32>
          %c9_i32_266 = arith.constant 9 : i32
          %441 = arith.muli %97, %c9_i32_266 : i32
          %c3_i32_267 = arith.constant 3 : i32
          %442 = arith.addi %441, %c3_i32_267 : i32
          %c2_i32_268 = arith.constant 2 : i32
          %443 = arith.addi %442, %c2_i32_268 : i32
          %444 = arith.index_cast %443 : i32 to index
          %445 = memref.load %arg2[%444] : memref<72xf32, #tpu.memory_space<smem>>
          %446 = vector.broadcast %445 : f32 to vector<8x8x128xf32>
          %447 = arith.mulf %446, %432 : vector<8x8x128xf32>
          %448 = arith.addf %426, %447 : vector<8x8x128xf32>
          %c2_i32_269 = arith.constant 2 : i32
          %449 = arith.addi %314, %c2_i32_269 : i32
          %c0_i32_270 = arith.constant 0 : i32
          %450 = arith.addi %99, %c0_i32_270 : i32
          %451 = arith.index_cast %449 : i32 to index
          %452 = arith.index_cast %450 : i32 to index
          %c0_271 = arith.constant 0 : index
          %c0_272 = arith.constant 0 : index
          %453 = vector.load %arg9[%451, %452, %c0_271, %c0_272] : memref<18x18x8x128xf32, #tpu.memory_space<vmem>>, vector<1x8x8x128xf32>
          %454 = vector.shape_cast %453 : vector<1x8x8x128xf32> to vector<8x8x128xf32>
          %c9_i32_273 = arith.constant 9 : i32
          %455 = arith.muli %96, %c9_i32_273 : i32
          %c6_i32_274 = arith.constant 6 : i32
          %456 = arith.addi %455, %c6_i32_274 : i32
          %c0_i32_275 = arith.constant 0 : i32
          %457 = arith.addi %456, %c0_i32_275 : i32
          %458 = arith.index_cast %457 : i32 to index
          %459 = memref.load %arg2[%458] : memref<72xf32, #tpu.memory_space<smem>>
          %460 = vector.broadcast %459 : f32 to vector<8x8x128xf32>
          %461 = arith.mulf %460, %454 : vector<8x8x128xf32>
          %462 = arith.addf %440, %461 : vector<8x8x128xf32>
          %c9_i32_276 = arith.constant 9 : i32
          %463 = arith.muli %97, %c9_i32_276 : i32
          %c6_i32_277 = arith.constant 6 : i32
          %464 = arith.addi %463, %c6_i32_277 : i32
          %c0_i32_278 = arith.constant 0 : i32
          %465 = arith.addi %464, %c0_i32_278 : i32
          %466 = arith.index_cast %465 : i32 to index
          %467 = memref.load %arg2[%466] : memref<72xf32, #tpu.memory_space<smem>>
          %468 = vector.broadcast %467 : f32 to vector<8x8x128xf32>
          %469 = arith.mulf %468, %454 : vector<8x8x128xf32>
          %470 = arith.addf %448, %469 : vector<8x8x128xf32>
          %c2_i32_279 = arith.constant 2 : i32
          %471 = arith.addi %314, %c2_i32_279 : i32
          %c1_i32_280 = arith.constant 1 : i32
          %472 = arith.addi %99, %c1_i32_280 : i32
          %473 = arith.index_cast %471 : i32 to index
          %474 = arith.index_cast %472 : i32 to index
          %c0_281 = arith.constant 0 : index
          %c0_282 = arith.constant 0 : index
          %475 = vector.load %arg9[%473, %474, %c0_281, %c0_282] : memref<18x18x8x128xf32, #tpu.memory_space<vmem>>, vector<1x8x8x128xf32>
          %476 = vector.shape_cast %475 : vector<1x8x8x128xf32> to vector<8x8x128xf32>
          %c9_i32_283 = arith.constant 9 : i32
          %477 = arith.muli %96, %c9_i32_283 : i32
          %c6_i32_284 = arith.constant 6 : i32
          %478 = arith.addi %477, %c6_i32_284 : i32
          %c1_i32_285 = arith.constant 1 : i32
          %479 = arith.addi %478, %c1_i32_285 : i32
          %480 = arith.index_cast %479 : i32 to index
          %481 = memref.load %arg2[%480] : memref<72xf32, #tpu.memory_space<smem>>
          %482 = vector.broadcast %481 : f32 to vector<8x8x128xf32>
          %483 = arith.mulf %482, %476 : vector<8x8x128xf32>
          %484 = arith.addf %462, %483 : vector<8x8x128xf32>
          %c9_i32_286 = arith.constant 9 : i32
          %485 = arith.muli %97, %c9_i32_286 : i32
          %c6_i32_287 = arith.constant 6 : i32
          %486 = arith.addi %485, %c6_i32_287 : i32
          %c1_i32_288 = arith.constant 1 : i32
          %487 = arith.addi %486, %c1_i32_288 : i32
          %488 = arith.index_cast %487 : i32 to index
          %489 = memref.load %arg2[%488] : memref<72xf32, #tpu.memory_space<smem>>
          %490 = vector.broadcast %489 : f32 to vector<8x8x128xf32>
          %491 = arith.mulf %490, %476 : vector<8x8x128xf32>
          %492 = arith.addf %470, %491 : vector<8x8x128xf32>
          %c2_i32_289 = arith.constant 2 : i32
          %493 = arith.addi %314, %c2_i32_289 : i32
          %c2_i32_290 = arith.constant 2 : i32
          %494 = arith.addi %99, %c2_i32_290 : i32
          %495 = arith.index_cast %493 : i32 to index
          %496 = arith.index_cast %494 : i32 to index
          %c0_291 = arith.constant 0 : index
          %c0_292 = arith.constant 0 : index
          %497 = vector.load %arg9[%495, %496, %c0_291, %c0_292] : memref<18x18x8x128xf32, #tpu.memory_space<vmem>>, vector<1x8x8x128xf32>
          %498 = vector.shape_cast %497 : vector<1x8x8x128xf32> to vector<8x8x128xf32>
          %c9_i32_293 = arith.constant 9 : i32
          %499 = arith.muli %96, %c9_i32_293 : i32
          %c6_i32_294 = arith.constant 6 : i32
          %500 = arith.addi %499, %c6_i32_294 : i32
          %c2_i32_295 = arith.constant 2 : i32
          %501 = arith.addi %500, %c2_i32_295 : i32
          %502 = arith.index_cast %501 : i32 to index
          %503 = memref.load %arg2[%502] : memref<72xf32, #tpu.memory_space<smem>>
          %504 = vector.broadcast %503 : f32 to vector<8x8x128xf32>
          %505 = arith.mulf %504, %498 : vector<8x8x128xf32>
          %506 = arith.addf %484, %505 : vector<8x8x128xf32>
          %c9_i32_296 = arith.constant 9 : i32
          %507 = arith.muli %97, %c9_i32_296 : i32
          %c6_i32_297 = arith.constant 6 : i32
          %508 = arith.addi %507, %c6_i32_297 : i32
          %c2_i32_298 = arith.constant 2 : i32
          %509 = arith.addi %508, %c2_i32_298 : i32
          %510 = arith.index_cast %509 : i32 to index
          %511 = memref.load %arg2[%510] : memref<72xf32, #tpu.memory_space<smem>>
          %512 = vector.broadcast %511 : f32 to vector<8x8x128xf32>
          %513 = arith.mulf %512, %498 : vector<8x8x128xf32>
          %514 = arith.addf %492, %513 : vector<8x8x128xf32>
          %515 = vector.shape_cast %506 : vector<8x8x128xf32> to vector<4x2x8x128xf32>
          %516 = vector.extract_strided_slice %515 {offsets = [0, 0, 0, 0], sizes = [4, 1, 8, 128], strides = [1, 1, 1, 1]} : vector<4x2x8x128xf32> to vector<4x1x8x128xf32>
          %517 = vector.shape_cast %516 : vector<4x1x8x128xf32> to vector<4x8x128xf32>
          %518 = vector.extract_strided_slice %515 {offsets = [0, 1, 0, 0], sizes = [4, 1, 8, 128], strides = [1, 1, 1, 1]} : vector<4x2x8x128xf32> to vector<4x1x8x128xf32>
          %519 = vector.shape_cast %518 : vector<4x1x8x128xf32> to vector<4x8x128xf32>
          %520 = arith.maximumf %517, %519 : vector<4x8x128xf32>
          %521 = vector.shape_cast %514 : vector<8x8x128xf32> to vector<4x2x8x128xf32>
          %522 = vector.extract_strided_slice %521 {offsets = [0, 0, 0, 0], sizes = [4, 1, 8, 128], strides = [1, 1, 1, 1]} : vector<4x2x8x128xf32> to vector<4x1x8x128xf32>
          %523 = vector.shape_cast %522 : vector<4x1x8x128xf32> to vector<4x8x128xf32>
          %524 = vector.extract_strided_slice %521 {offsets = [0, 1, 0, 0], sizes = [4, 1, 8, 128], strides = [1, 1, 1, 1]} : vector<4x2x8x128xf32> to vector<4x1x8x128xf32>
          %525 = vector.shape_cast %524 : vector<4x1x8x128xf32> to vector<4x8x128xf32>
          %526 = arith.maximumf %523, %525 : vector<4x8x128xf32>
          %527 = arith.maximumf %306, %520 : vector<4x8x128xf32>
          %528 = arith.index_cast %96 : i32 to index
          %529 = memref.load %arg3[%528] : memref<8xf32, #tpu.memory_space<smem>>
          %530 = vector.broadcast %529 : f32 to vector<4x8x128xf32>
          %531 = arith.addf %527, %530 : vector<4x8x128xf32>
          %cst_299 = arith.constant 0.000000e+00 : f32
          %532 = vector.broadcast %cst_299 : f32 to vector<4x8x128xf32>
          %533 = arith.cmpf ogt, %531, %532 : vector<4x8x128xf32>
          %cst_300 = arith.constant 0.00999999977 : f32
          %534 = vector.broadcast %cst_300 : f32 to vector<4x8x128xf32>
          %535 = arith.mulf %534, %531 : vector<4x8x128xf32>
          %536 = arith.select %533, %531, %535 : vector<4x8x128xi1>, vector<4x8x128xf32>
          %537 = arith.maximumf %312, %526 : vector<4x8x128xf32>
          %538 = arith.index_cast %97 : i32 to index
          %539 = memref.load %arg3[%538] : memref<8xf32, #tpu.memory_space<smem>>
          %540 = vector.broadcast %539 : f32 to vector<4x8x128xf32>
          %541 = arith.addf %537, %540 : vector<4x8x128xf32>
          %cst_301 = arith.constant 0.000000e+00 : f32
          %542 = vector.broadcast %cst_301 : f32 to vector<4x8x128xf32>
          %543 = arith.cmpf ogt, %541, %542 : vector<4x8x128xf32>
          %cst_302 = arith.constant 0.00999999977 : f32
          %544 = vector.broadcast %cst_302 : f32 to vector<4x8x128xf32>
          %545 = arith.mulf %544, %541 : vector<4x8x128xf32>
          %546 = arith.select %543, %541, %545 : vector<4x8x128xi1>, vector<4x8x128xf32>
          %c2_i32_303 = arith.constant 2 : i32
          %547 = arith.addi %c2_i32_303, %arg12 : i32
          %c4_i32_304 = arith.constant 4 : i32
          %548 = arith.muli %c4_i32_304, %arg14 : i32
          %c2_i32_305 = arith.constant 2 : i32
          %549 = arith.addi %c2_i32_305, %548 : i32
          %550 = arith.index_cast %96 : i32 to index
          %551 = arith.index_cast %547 : i32 to index
          %552 = arith.index_cast %549 : i32 to index
          %c0_306 = arith.constant 0 : index
          %c0_307 = arith.constant 0 : index
          %553 = vector.load %arg10[%550, %551, %552, %c0_306, %c0_307] : memref<8x12x12x8x128xf32, #tpu.memory_space<vmem>>, vector<1x1x4x8x128xf32>
          %554 = vector.shape_cast %553 : vector<1x1x4x8x128xf32> to vector<4x8x128xf32>
          %555 = vector.shape_cast %536 : vector<4x8x128xf32> to vector<1x1x4x8x128xf32>
          tpu.vector_store %arg10[%550, %551, %552, %c0_306, %c0_307], %555 {strides = array<i32>} : memref<8x12x12x8x128xf32, #tpu.memory_space<vmem>>, vector<1x1x4x8x128xf32>,
          %c2_i32_308 = arith.constant 2 : i32
          %556 = arith.addi %c2_i32_308, %arg12 : i32
          %c4_i32_309 = arith.constant 4 : i32
          %557 = arith.muli %c4_i32_309, %arg14 : i32
          %c2_i32_310 = arith.constant 2 : i32
          %558 = arith.addi %c2_i32_310, %557 : i32
          %559 = arith.index_cast %97 : i32 to index
          %560 = arith.index_cast %556 : i32 to index
          %561 = arith.index_cast %558 : i32 to index
          %c0_311 = arith.constant 0 : index
          %c0_312 = arith.constant 0 : index
          %562 = vector.load %arg10[%559, %560, %561, %c0_311, %c0_312] : memref<8x12x12x8x128xf32, #tpu.memory_space<vmem>>, vector<1x1x4x8x128xf32>
          %563 = vector.shape_cast %562 : vector<1x1x4x8x128xf32> to vector<4x8x128xf32>
          %564 = vector.shape_cast %546 : vector<4x8x128xf32> to vector<1x1x4x8x128xf32>
          tpu.vector_store %arg10[%559, %560, %561, %c0_311, %c0_312], %564 {strides = array<i32>} : memref<8x12x12x8x128xf32, #tpu.memory_space<vmem>>, vector<1x1x4x8x128xf32>,
        }
        %c2_i32_113 = arith.constant 2 : i32
      }
      %c4_i32_108 = arith.constant 4 : i32
    }
    %c8_i32_45 = arith.constant 8 : i32
    %c0_i32_46 = arith.constant 0 : i32
    %c4_i32 = arith.constant 4 : i32
    %22 = arith.addi %c0_i32_46, %c4_i32 : i32
    %c1_i32_47 = arith.constant 1 : i32
    scf.for %arg12 = %c0_i32_46 to %22 step %c1_i32_47  : i32 {
      %c0_i32_105 = arith.constant 0 : i32
      %c8_i32_106 = arith.constant 8 : i32
      %95 = arith.addi %c0_i32_105, %c8_i32_106 : i32
      %c1_i32_107 = arith.constant 1 : i32
      scf.for %arg13 = %c0_i32_105 to %95 step %c1_i32_107  : i32 {
        %c2_i32 = arith.constant 2 : i32
        %96 = arith.muli %c2_i32, %arg13 : i32
        %c1_i32_109 = arith.constant 1 : i32
        %97 = arith.addi %96, %c1_i32_109 : i32
        %c2_i32_110 = arith.constant 2 : i32
        %98 = arith.muli %c2_i32_110, %arg12 : i32
        %cst_111 = arith.constant 0.000000e+00 : f32
        %99 = vector.broadcast %cst_111 : f32 to vector<8x8x128xf32>
        %cst_112 = arith.constant 0.000000e+00 : f32
        %100 = vector.broadcast %cst_112 : f32 to vector<8x8x128xf32>
        %c0_i32_113 = arith.constant 0 : i32
        %c8_i32_114 = arith.constant 8 : i32
        %101 = arith.addi %c0_i32_113, %c8_i32_114 : i32
        %c1_i32_115 = arith.constant 1 : i32
        %102:2 = scf.for %arg14 = %c0_i32_113 to %101 step %c1_i32_115 iter_args(%arg15 = %99, %arg16 = %100) -> (vector<8x8x128xf32>, vector<8x8x128xf32>)  : i32 {
          %c200_i32 = arith.constant 200 : i32
          %163 = arith.muli %96, %c200_i32 : i32
          %c25_i32 = arith.constant 25 : i32
          %164 = arith.muli %arg14, %c25_i32 : i32
          %165 = arith.addi %163, %164 : i32
          %c200_i32_136 = arith.constant 200 : i32
          %166 = arith.muli %97, %c200_i32_136 : i32
          %c25_i32_137 = arith.constant 25 : i32
          %167 = arith.muli %arg14, %c25_i32_137 : i32
          %168 = arith.addi %166, %167 : i32
          %c0_i32_138 = arith.constant 0 : i32
          %169 = arith.addi %98, %c0_i32_138 : i32
          %170 = arith.index_cast %arg14 : i32 to index
          %171 = arith.index_cast %169 : i32 to index
          %c0_139 = arith.constant 0 : index
          %c0_140 = arith.constant 0 : index
          %c0_141 = arith.constant 0 : index
          %172 = vector.load %arg10[%170, %171, %c0_139, %c0_140, %c0_141] : memref<8x12x12x8x128xf32, #tpu.memory_space<vmem>>, vector<1x1x8x8x128xf32>
          %173 = vector.shape_cast %172 : vector<1x1x8x8x128xf32> to vector<8x8x128xf32>
          %c0_i32_142 = arith.constant 0 : i32
          %174 = arith.addi %165, %c0_i32_142 : i32
          %c0_i32_143 = arith.constant 0 : i32
          %175 = arith.addi %174, %c0_i32_143 : i32
          %176 = arith.index_cast %175 : i32 to index
          %177 = memref.load %arg4[%176] : memref<3200xf32, #tpu.memory_space<smem>>
          %178 = vector.broadcast %177 : f32 to vector<8x8x128xf32>
          %179 = arith.mulf %178, %173 : vector<8x8x128xf32>
          %180 = arith.addf %arg15, %179 : vector<8x8x128xf32>
          %c0_i32_144 = arith.constant 0 : i32
          %181 = arith.addi %168, %c0_i32_144 : i32
          %c0_i32_145 = arith.constant 0 : i32
          %182 = arith.addi %181, %c0_i32_145 : i32
          %183 = arith.index_cast %182 : i32 to index
          %184 = memref.load %arg4[%183] : memref<3200xf32, #tpu.memory_space<smem>>
          %185 = vector.broadcast %184 : f32 to vector<8x8x128xf32>
          %186 = arith.mulf %185, %173 : vector<8x8x128xf32>
          %187 = arith.addf %arg16, %186 : vector<8x8x128xf32>
          %c0_i32_146 = arith.constant 0 : i32
          %188 = arith.addi %98, %c0_i32_146 : i32
          %189 = arith.index_cast %arg14 : i32 to index
          %190 = arith.index_cast %188 : i32 to index
          %c1_147 = arith.constant 1 : index
          %c0_148 = arith.constant 0 : index
          %c0_149 = arith.constant 0 : index
          %191 = vector.load %arg10[%189, %190, %c1_147, %c0_148, %c0_149] : memref<8x12x12x8x128xf32, #tpu.memory_space<vmem>>, vector<1x1x8x8x128xf32>
          %192 = vector.shape_cast %191 : vector<1x1x8x8x128xf32> to vector<8x8x128xf32>
          %c0_i32_150 = arith.constant 0 : i32
          %193 = arith.addi %165, %c0_i32_150 : i32
          %c1_i32_151 = arith.constant 1 : i32
          %194 = arith.addi %193, %c1_i32_151 : i32
          %195 = arith.index_cast %194 : i32 to index
          %196 = memref.load %arg4[%195] : memref<3200xf32, #tpu.memory_space<smem>>
          %197 = vector.broadcast %196 : f32 to vector<8x8x128xf32>
          %198 = arith.mulf %197, %192 : vector<8x8x128xf32>
          %199 = arith.addf %180, %198 : vector<8x8x128xf32>
          %c0_i32_152 = arith.constant 0 : i32
          %200 = arith.addi %168, %c0_i32_152 : i32
          %c1_i32_153 = arith.constant 1 : i32
          %201 = arith.addi %200, %c1_i32_153 : i32
          %202 = arith.index_cast %201 : i32 to index
          %203 = memref.load %arg4[%202] : memref<3200xf32, #tpu.memory_space<smem>>
          %204 = vector.broadcast %203 : f32 to vector<8x8x128xf32>
          %205 = arith.mulf %204, %192 : vector<8x8x128xf32>
          %206 = arith.addf %187, %205 : vector<8x8x128xf32>
          %c0_i32_154 = arith.constant 0 : i32
          %207 = arith.addi %98, %c0_i32_154 : i32
          %208 = arith.index_cast %arg14 : i32 to index
          %209 = arith.index_cast %207 : i32 to index
          %c2_155 = arith.constant 2 : index
          %c0_156 = arith.constant 0 : index
          %c0_157 = arith.constant 0 : index
          %210 = vector.load %arg10[%208, %209, %c2_155, %c0_156, %c0_157] : memref<8x12x12x8x128xf32, #tpu.memory_space<vmem>>, vector<1x1x8x8x128xf32>
          %211 = vector.shape_cast %210 : vector<1x1x8x8x128xf32> to vector<8x8x128xf32>
          %c0_i32_158 = arith.constant 0 : i32
          %212 = arith.addi %165, %c0_i32_158 : i32
          %c2_i32_159 = arith.constant 2 : i32
          %213 = arith.addi %212, %c2_i32_159 : i32
          %214 = arith.index_cast %213 : i32 to index
          %215 = memref.load %arg4[%214] : memref<3200xf32, #tpu.memory_space<smem>>
          %216 = vector.broadcast %215 : f32 to vector<8x8x128xf32>
          %217 = arith.mulf %216, %211 : vector<8x8x128xf32>
          %218 = arith.addf %199, %217 : vector<8x8x128xf32>
          %c0_i32_160 = arith.constant 0 : i32
          %219 = arith.addi %168, %c0_i32_160 : i32
          %c2_i32_161 = arith.constant 2 : i32
          %220 = arith.addi %219, %c2_i32_161 : i32
          %221 = arith.index_cast %220 : i32 to index
          %222 = memref.load %arg4[%221] : memref<3200xf32, #tpu.memory_space<smem>>
          %223 = vector.broadcast %222 : f32 to vector<8x8x128xf32>
          %224 = arith.mulf %223, %211 : vector<8x8x128xf32>
          %225 = arith.addf %206, %224 : vector<8x8x128xf32>
          %c0_i32_162 = arith.constant 0 : i32
          %226 = arith.addi %98, %c0_i32_162 : i32
          %227 = arith.index_cast %arg14 : i32 to index
          %228 = arith.index_cast %226 : i32 to index
          %c3_163 = arith.constant 3 : index
          %c0_164 = arith.constant 0 : index
          %c0_165 = arith.constant 0 : index
          %229 = vector.load %arg10[%227, %228, %c3_163, %c0_164, %c0_165] : memref<8x12x12x8x128xf32, #tpu.memory_space<vmem>>, vector<1x1x8x8x128xf32>
          %230 = vector.shape_cast %229 : vector<1x1x8x8x128xf32> to vector<8x8x128xf32>
          %c0_i32_166 = arith.constant 0 : i32
          %231 = arith.addi %165, %c0_i32_166 : i32
          %c3_i32 = arith.constant 3 : i32
          %232 = arith.addi %231, %c3_i32 : i32
          %233 = arith.index_cast %232 : i32 to index
          %234 = memref.load %arg4[%233] : memref<3200xf32, #tpu.memory_space<smem>>
          %235 = vector.broadcast %234 : f32 to vector<8x8x128xf32>
          %236 = arith.mulf %235, %230 : vector<8x8x128xf32>
          %237 = arith.addf %218, %236 : vector<8x8x128xf32>
          %c0_i32_167 = arith.constant 0 : i32
          %238 = arith.addi %168, %c0_i32_167 : i32
          %c3_i32_168 = arith.constant 3 : i32
          %239 = arith.addi %238, %c3_i32_168 : i32
          %240 = arith.index_cast %239 : i32 to index
          %241 = memref.load %arg4[%240] : memref<3200xf32, #tpu.memory_space<smem>>
          %242 = vector.broadcast %241 : f32 to vector<8x8x128xf32>
          %243 = arith.mulf %242, %230 : vector<8x8x128xf32>
          %244 = arith.addf %225, %243 : vector<8x8x128xf32>
          %c0_i32_169 = arith.constant 0 : i32
          %245 = arith.addi %98, %c0_i32_169 : i32
          %246 = arith.index_cast %arg14 : i32 to index
          %247 = arith.index_cast %245 : i32 to index
          %c4_170 = arith.constant 4 : index
          %c0_171 = arith.constant 0 : index
          %c0_172 = arith.constant 0 : index
          %248 = vector.load %arg10[%246, %247, %c4_170, %c0_171, %c0_172] : memref<8x12x12x8x128xf32, #tpu.memory_space<vmem>>, vector<1x1x8x8x128xf32>
          %249 = vector.shape_cast %248 : vector<1x1x8x8x128xf32> to vector<8x8x128xf32>
          %c0_i32_173 = arith.constant 0 : i32
          %250 = arith.addi %165, %c0_i32_173 : i32
          %c4_i32_174 = arith.constant 4 : i32
          %251 = arith.addi %250, %c4_i32_174 : i32
          %252 = arith.index_cast %251 : i32 to index
          %253 = memref.load %arg4[%252] : memref<3200xf32, #tpu.memory_space<smem>>
          %254 = vector.broadcast %253 : f32 to vector<8x8x128xf32>
          %255 = arith.mulf %254, %249 : vector<8x8x128xf32>
          %256 = arith.addf %237, %255 : vector<8x8x128xf32>
          %c0_i32_175 = arith.constant 0 : i32
          %257 = arith.addi %168, %c0_i32_175 : i32
          %c4_i32_176 = arith.constant 4 : i32
          %258 = arith.addi %257, %c4_i32_176 : i32
          %259 = arith.index_cast %258 : i32 to index
          %260 = memref.load %arg4[%259] : memref<3200xf32, #tpu.memory_space<smem>>
          %261 = vector.broadcast %260 : f32 to vector<8x8x128xf32>
          %262 = arith.mulf %261, %249 : vector<8x8x128xf32>
          %263 = arith.addf %244, %262 : vector<8x8x128xf32>
          %c1_i32_177 = arith.constant 1 : i32
          %264 = arith.addi %98, %c1_i32_177 : i32
          %265 = arith.index_cast %arg14 : i32 to index
          %266 = arith.index_cast %264 : i32 to index
          %c0_178 = arith.constant 0 : index
          %c0_179 = arith.constant 0 : index
          %c0_180 = arith.constant 0 : index
          %267 = vector.load %arg10[%265, %266, %c0_178, %c0_179, %c0_180] : memref<8x12x12x8x128xf32, #tpu.memory_space<vmem>>, vector<1x1x8x8x128xf32>
          %268 = vector.shape_cast %267 : vector<1x1x8x8x128xf32> to vector<8x8x128xf32>
          %c5_i32 = arith.constant 5 : i32
          %269 = arith.addi %165, %c5_i32 : i32
          %c0_i32_181 = arith.constant 0 : i32
          %270 = arith.addi %269, %c0_i32_181 : i32
          %271 = arith.index_cast %270 : i32 to index
          %272 = memref.load %arg4[%271] : memref<3200xf32, #tpu.memory_space<smem>>
          %273 = vector.broadcast %272 : f32 to vector<8x8x128xf32>
          %274 = arith.mulf %273, %268 : vector<8x8x128xf32>
          %275 = arith.addf %256, %274 : vector<8x8x128xf32>
          %c5_i32_182 = arith.constant 5 : i32
          %276 = arith.addi %168, %c5_i32_182 : i32
          %c0_i32_183 = arith.constant 0 : i32
          %277 = arith.addi %276, %c0_i32_183 : i32
          %278 = arith.index_cast %277 : i32 to index
          %279 = memref.load %arg4[%278] : memref<3200xf32, #tpu.memory_space<smem>>
          %280 = vector.broadcast %279 : f32 to vector<8x8x128xf32>
          %281 = arith.mulf %280, %268 : vector<8x8x128xf32>
          %282 = arith.addf %263, %281 : vector<8x8x128xf32>
          %c1_i32_184 = arith.constant 1 : i32
          %283 = arith.addi %98, %c1_i32_184 : i32
          %284 = arith.index_cast %arg14 : i32 to index
          %285 = arith.index_cast %283 : i32 to index
          %c1_185 = arith.constant 1 : index
          %c0_186 = arith.constant 0 : index
          %c0_187 = arith.constant 0 : index
          %286 = vector.load %arg10[%284, %285, %c1_185, %c0_186, %c0_187] : memref<8x12x12x8x128xf32, #tpu.memory_space<vmem>>, vector<1x1x8x8x128xf32>
          %287 = vector.shape_cast %286 : vector<1x1x8x8x128xf32> to vector<8x8x128xf32>
          %c5_i32_188 = arith.constant 5 : i32
          %288 = arith.addi %165, %c5_i32_188 : i32
          %c1_i32_189 = arith.constant 1 : i32
          %289 = arith.addi %288, %c1_i32_189 : i32
          %290 = arith.index_cast %289 : i32 to index
          %291 = memref.load %arg4[%290] : memref<3200xf32, #tpu.memory_space<smem>>
          %292 = vector.broadcast %291 : f32 to vector<8x8x128xf32>
          %293 = arith.mulf %292, %287 : vector<8x8x128xf32>
          %294 = arith.addf %275, %293 : vector<8x8x128xf32>
          %c5_i32_190 = arith.constant 5 : i32
          %295 = arith.addi %168, %c5_i32_190 : i32
          %c1_i32_191 = arith.constant 1 : i32
          %296 = arith.addi %295, %c1_i32_191 : i32
          %297 = arith.index_cast %296 : i32 to index
          %298 = memref.load %arg4[%297] : memref<3200xf32, #tpu.memory_space<smem>>
          %299 = vector.broadcast %298 : f32 to vector<8x8x128xf32>
          %300 = arith.mulf %299, %287 : vector<8x8x128xf32>
          %301 = arith.addf %282, %300 : vector<8x8x128xf32>
          %c1_i32_192 = arith.constant 1 : i32
          %302 = arith.addi %98, %c1_i32_192 : i32
          %303 = arith.index_cast %arg14 : i32 to index
          %304 = arith.index_cast %302 : i32 to index
          %c2_193 = arith.constant 2 : index
          %c0_194 = arith.constant 0 : index
          %c0_195 = arith.constant 0 : index
          %305 = vector.load %arg10[%303, %304, %c2_193, %c0_194, %c0_195] : memref<8x12x12x8x128xf32, #tpu.memory_space<vmem>>, vector<1x1x8x8x128xf32>
          %306 = vector.shape_cast %305 : vector<1x1x8x8x128xf32> to vector<8x8x128xf32>
          %c5_i32_196 = arith.constant 5 : i32
          %307 = arith.addi %165, %c5_i32_196 : i32
          %c2_i32_197 = arith.constant 2 : i32
          %308 = arith.addi %307, %c2_i32_197 : i32
          %309 = arith.index_cast %308 : i32 to index
          %310 = memref.load %arg4[%309] : memref<3200xf32, #tpu.memory_space<smem>>
          %311 = vector.broadcast %310 : f32 to vector<8x8x128xf32>
          %312 = arith.mulf %311, %306 : vector<8x8x128xf32>
          %313 = arith.addf %294, %312 : vector<8x8x128xf32>
          %c5_i32_198 = arith.constant 5 : i32
          %314 = arith.addi %168, %c5_i32_198 : i32
          %c2_i32_199 = arith.constant 2 : i32
          %315 = arith.addi %314, %c2_i32_199 : i32
          %316 = arith.index_cast %315 : i32 to index
          %317 = memref.load %arg4[%316] : memref<3200xf32, #tpu.memory_space<smem>>
          %318 = vector.broadcast %317 : f32 to vector<8x8x128xf32>
          %319 = arith.mulf %318, %306 : vector<8x8x128xf32>
          %320 = arith.addf %301, %319 : vector<8x8x128xf32>
          %c1_i32_200 = arith.constant 1 : i32
          %321 = arith.addi %98, %c1_i32_200 : i32
          %322 = arith.index_cast %arg14 : i32 to index
          %323 = arith.index_cast %321 : i32 to index
          %c3_201 = arith.constant 3 : index
          %c0_202 = arith.constant 0 : index
          %c0_203 = arith.constant 0 : index
          %324 = vector.load %arg10[%322, %323, %c3_201, %c0_202, %c0_203] : memref<8x12x12x8x128xf32, #tpu.memory_space<vmem>>, vector<1x1x8x8x128xf32>
          %325 = vector.shape_cast %324 : vector<1x1x8x8x128xf32> to vector<8x8x128xf32>
          %c5_i32_204 = arith.constant 5 : i32
          %326 = arith.addi %165, %c5_i32_204 : i32
          %c3_i32_205 = arith.constant 3 : i32
          %327 = arith.addi %326, %c3_i32_205 : i32
          %328 = arith.index_cast %327 : i32 to index
          %329 = memref.load %arg4[%328] : memref<3200xf32, #tpu.memory_space<smem>>
          %330 = vector.broadcast %329 : f32 to vector<8x8x128xf32>
          %331 = arith.mulf %330, %325 : vector<8x8x128xf32>
          %332 = arith.addf %313, %331 : vector<8x8x128xf32>
          %c5_i32_206 = arith.constant 5 : i32
          %333 = arith.addi %168, %c5_i32_206 : i32
          %c3_i32_207 = arith.constant 3 : i32
          %334 = arith.addi %333, %c3_i32_207 : i32
          %335 = arith.index_cast %334 : i32 to index
          %336 = memref.load %arg4[%335] : memref<3200xf32, #tpu.memory_space<smem>>
          %337 = vector.broadcast %336 : f32 to vector<8x8x128xf32>
          %338 = arith.mulf %337, %325 : vector<8x8x128xf32>
          %339 = arith.addf %320, %338 : vector<8x8x128xf32>
          %c1_i32_208 = arith.constant 1 : i32
          %340 = arith.addi %98, %c1_i32_208 : i32
          %341 = arith.index_cast %arg14 : i32 to index
          %342 = arith.index_cast %340 : i32 to index
          %c4_209 = arith.constant 4 : index
          %c0_210 = arith.constant 0 : index
          %c0_211 = arith.constant 0 : index
          %343 = vector.load %arg10[%341, %342, %c4_209, %c0_210, %c0_211] : memref<8x12x12x8x128xf32, #tpu.memory_space<vmem>>, vector<1x1x8x8x128xf32>
          %344 = vector.shape_cast %343 : vector<1x1x8x8x128xf32> to vector<8x8x128xf32>
          %c5_i32_212 = arith.constant 5 : i32
          %345 = arith.addi %165, %c5_i32_212 : i32
          %c4_i32_213 = arith.constant 4 : i32
          %346 = arith.addi %345, %c4_i32_213 : i32
          %347 = arith.index_cast %346 : i32 to index
          %348 = memref.load %arg4[%347] : memref<3200xf32, #tpu.memory_space<smem>>
          %349 = vector.broadcast %348 : f32 to vector<8x8x128xf32>
          %350 = arith.mulf %349, %344 : vector<8x8x128xf32>
          %351 = arith.addf %332, %350 : vector<8x8x128xf32>
          %c5_i32_214 = arith.constant 5 : i32
          %352 = arith.addi %168, %c5_i32_214 : i32
          %c4_i32_215 = arith.constant 4 : i32
          %353 = arith.addi %352, %c4_i32_215 : i32
          %354 = arith.index_cast %353 : i32 to index
          %355 = memref.load %arg4[%354] : memref<3200xf32, #tpu.memory_space<smem>>
          %356 = vector.broadcast %355 : f32 to vector<8x8x128xf32>
          %357 = arith.mulf %356, %344 : vector<8x8x128xf32>
          %358 = arith.addf %339, %357 : vector<8x8x128xf32>
          %c2_i32_216 = arith.constant 2 : i32
          %359 = arith.addi %98, %c2_i32_216 : i32
          %360 = arith.index_cast %arg14 : i32 to index
          %361 = arith.index_cast %359 : i32 to index
          %c0_217 = arith.constant 0 : index
          %c0_218 = arith.constant 0 : index
          %c0_219 = arith.constant 0 : index
          %362 = vector.load %arg10[%360, %361, %c0_217, %c0_218, %c0_219] : memref<8x12x12x8x128xf32, #tpu.memory_space<vmem>>, vector<1x1x8x8x128xf32>
          %363 = vector.shape_cast %362 : vector<1x1x8x8x128xf32> to vector<8x8x128xf32>
          %c10_i32 = arith.constant 10 : i32
          %364 = arith.addi %165, %c10_i32 : i32
          %c0_i32_220 = arith.constant 0 : i32
          %365 = arith.addi %364, %c0_i32_220 : i32
          %366 = arith.index_cast %365 : i32 to index
          %367 = memref.load %arg4[%366] : memref<3200xf32, #tpu.memory_space<smem>>
          %368 = vector.broadcast %367 : f32 to vector<8x8x128xf32>
          %369 = arith.mulf %368, %363 : vector<8x8x128xf32>
          %370 = arith.addf %351, %369 : vector<8x8x128xf32>
          %c10_i32_221 = arith.constant 10 : i32
          %371 = arith.addi %168, %c10_i32_221 : i32
          %c0_i32_222 = arith.constant 0 : i32
          %372 = arith.addi %371, %c0_i32_222 : i32
          %373 = arith.index_cast %372 : i32 to index
          %374 = memref.load %arg4[%373] : memref<3200xf32, #tpu.memory_space<smem>>
          %375 = vector.broadcast %374 : f32 to vector<8x8x128xf32>
          %376 = arith.mulf %375, %363 : vector<8x8x128xf32>
          %377 = arith.addf %358, %376 : vector<8x8x128xf32>
          %c2_i32_223 = arith.constant 2 : i32
          %378 = arith.addi %98, %c2_i32_223 : i32
          %379 = arith.index_cast %arg14 : i32 to index
          %380 = arith.index_cast %378 : i32 to index
          %c1_224 = arith.constant 1 : index
          %c0_225 = arith.constant 0 : index
          %c0_226 = arith.constant 0 : index
          %381 = vector.load %arg10[%379, %380, %c1_224, %c0_225, %c0_226] : memref<8x12x12x8x128xf32, #tpu.memory_space<vmem>>, vector<1x1x8x8x128xf32>
          %382 = vector.shape_cast %381 : vector<1x1x8x8x128xf32> to vector<8x8x128xf32>
          %c10_i32_227 = arith.constant 10 : i32
          %383 = arith.addi %165, %c10_i32_227 : i32
          %c1_i32_228 = arith.constant 1 : i32
          %384 = arith.addi %383, %c1_i32_228 : i32
          %385 = arith.index_cast %384 : i32 to index
          %386 = memref.load %arg4[%385] : memref<3200xf32, #tpu.memory_space<smem>>
          %387 = vector.broadcast %386 : f32 to vector<8x8x128xf32>
          %388 = arith.mulf %387, %382 : vector<8x8x128xf32>
          %389 = arith.addf %370, %388 : vector<8x8x128xf32>
          %c10_i32_229 = arith.constant 10 : i32
          %390 = arith.addi %168, %c10_i32_229 : i32
          %c1_i32_230 = arith.constant 1 : i32
          %391 = arith.addi %390, %c1_i32_230 : i32
          %392 = arith.index_cast %391 : i32 to index
          %393 = memref.load %arg4[%392] : memref<3200xf32, #tpu.memory_space<smem>>
          %394 = vector.broadcast %393 : f32 to vector<8x8x128xf32>
          %395 = arith.mulf %394, %382 : vector<8x8x128xf32>
          %396 = arith.addf %377, %395 : vector<8x8x128xf32>
          %c2_i32_231 = arith.constant 2 : i32
          %397 = arith.addi %98, %c2_i32_231 : i32
          %398 = arith.index_cast %arg14 : i32 to index
          %399 = arith.index_cast %397 : i32 to index
          %c2_232 = arith.constant 2 : index
          %c0_233 = arith.constant 0 : index
          %c0_234 = arith.constant 0 : index
          %400 = vector.load %arg10[%398, %399, %c2_232, %c0_233, %c0_234] : memref<8x12x12x8x128xf32, #tpu.memory_space<vmem>>, vector<1x1x8x8x128xf32>
          %401 = vector.shape_cast %400 : vector<1x1x8x8x128xf32> to vector<8x8x128xf32>
          %c10_i32_235 = arith.constant 10 : i32
          %402 = arith.addi %165, %c10_i32_235 : i32
          %c2_i32_236 = arith.constant 2 : i32
          %403 = arith.addi %402, %c2_i32_236 : i32
          %404 = arith.index_cast %403 : i32 to index
          %405 = memref.load %arg4[%404] : memref<3200xf32, #tpu.memory_space<smem>>
          %406 = vector.broadcast %405 : f32 to vector<8x8x128xf32>
          %407 = arith.mulf %406, %401 : vector<8x8x128xf32>
          %408 = arith.addf %389, %407 : vector<8x8x128xf32>
          %c10_i32_237 = arith.constant 10 : i32
          %409 = arith.addi %168, %c10_i32_237 : i32
          %c2_i32_238 = arith.constant 2 : i32
          %410 = arith.addi %409, %c2_i32_238 : i32
          %411 = arith.index_cast %410 : i32 to index
          %412 = memref.load %arg4[%411] : memref<3200xf32, #tpu.memory_space<smem>>
          %413 = vector.broadcast %412 : f32 to vector<8x8x128xf32>
          %414 = arith.mulf %413, %401 : vector<8x8x128xf32>
          %415 = arith.addf %396, %414 : vector<8x8x128xf32>
          %c2_i32_239 = arith.constant 2 : i32
          %416 = arith.addi %98, %c2_i32_239 : i32
          %417 = arith.index_cast %arg14 : i32 to index
          %418 = arith.index_cast %416 : i32 to index
          %c3_240 = arith.constant 3 : index
          %c0_241 = arith.constant 0 : index
          %c0_242 = arith.constant 0 : index
          %419 = vector.load %arg10[%417, %418, %c3_240, %c0_241, %c0_242] : memref<8x12x12x8x128xf32, #tpu.memory_space<vmem>>, vector<1x1x8x8x128xf32>
          %420 = vector.shape_cast %419 : vector<1x1x8x8x128xf32> to vector<8x8x128xf32>
          %c10_i32_243 = arith.constant 10 : i32
          %421 = arith.addi %165, %c10_i32_243 : i32
          %c3_i32_244 = arith.constant 3 : i32
          %422 = arith.addi %421, %c3_i32_244 : i32
          %423 = arith.index_cast %422 : i32 to index
          %424 = memref.load %arg4[%423] : memref<3200xf32, #tpu.memory_space<smem>>
          %425 = vector.broadcast %424 : f32 to vector<8x8x128xf32>
          %426 = arith.mulf %425, %420 : vector<8x8x128xf32>
          %427 = arith.addf %408, %426 : vector<8x8x128xf32>
          %c10_i32_245 = arith.constant 10 : i32
          %428 = arith.addi %168, %c10_i32_245 : i32
          %c3_i32_246 = arith.constant 3 : i32
          %429 = arith.addi %428, %c3_i32_246 : i32
          %430 = arith.index_cast %429 : i32 to index
          %431 = memref.load %arg4[%430] : memref<3200xf32, #tpu.memory_space<smem>>
          %432 = vector.broadcast %431 : f32 to vector<8x8x128xf32>
          %433 = arith.mulf %432, %420 : vector<8x8x128xf32>
          %434 = arith.addf %415, %433 : vector<8x8x128xf32>
          %c2_i32_247 = arith.constant 2 : i32
          %435 = arith.addi %98, %c2_i32_247 : i32
          %436 = arith.index_cast %arg14 : i32 to index
          %437 = arith.index_cast %435 : i32 to index
          %c4_248 = arith.constant 4 : index
          %c0_249 = arith.constant 0 : index
          %c0_250 = arith.constant 0 : index
          %438 = vector.load %arg10[%436, %437, %c4_248, %c0_249, %c0_250] : memref<8x12x12x8x128xf32, #tpu.memory_space<vmem>>, vector<1x1x8x8x128xf32>
          %439 = vector.shape_cast %438 : vector<1x1x8x8x128xf32> to vector<8x8x128xf32>
          %c10_i32_251 = arith.constant 10 : i32
          %440 = arith.addi %165, %c10_i32_251 : i32
          %c4_i32_252 = arith.constant 4 : i32
          %441 = arith.addi %440, %c4_i32_252 : i32
          %442 = arith.index_cast %441 : i32 to index
          %443 = memref.load %arg4[%442] : memref<3200xf32, #tpu.memory_space<smem>>
          %444 = vector.broadcast %443 : f32 to vector<8x8x128xf32>
          %445 = arith.mulf %444, %439 : vector<8x8x128xf32>
          %446 = arith.addf %427, %445 : vector<8x8x128xf32>
          %c10_i32_253 = arith.constant 10 : i32
          %447 = arith.addi %168, %c10_i32_253 : i32
          %c4_i32_254 = arith.constant 4 : i32
          %448 = arith.addi %447, %c4_i32_254 : i32
          %449 = arith.index_cast %448 : i32 to index
          %450 = memref.load %arg4[%449] : memref<3200xf32, #tpu.memory_space<smem>>
          %451 = vector.broadcast %450 : f32 to vector<8x8x128xf32>
          %452 = arith.mulf %451, %439 : vector<8x8x128xf32>
          %453 = arith.addf %434, %452 : vector<8x8x128xf32>
          %c3_i32_255 = arith.constant 3 : i32
          %454 = arith.addi %98, %c3_i32_255 : i32
          %455 = arith.index_cast %arg14 : i32 to index
          %456 = arith.index_cast %454 : i32 to index
          %c0_256 = arith.constant 0 : index
          %c0_257 = arith.constant 0 : index
          %c0_258 = arith.constant 0 : index
          %457 = vector.load %arg10[%455, %456, %c0_256, %c0_257, %c0_258] : memref<8x12x12x8x128xf32, #tpu.memory_space<vmem>>, vector<1x1x8x8x128xf32>
          %458 = vector.shape_cast %457 : vector<1x1x8x8x128xf32> to vector<8x8x128xf32>
          %c15_i32 = arith.constant 15 : i32
          %459 = arith.addi %165, %c15_i32 : i32
          %c0_i32_259 = arith.constant 0 : i32
          %460 = arith.addi %459, %c0_i32_259 : i32
          %461 = arith.index_cast %460 : i32 to index
          %462 = memref.load %arg4[%461] : memref<3200xf32, #tpu.memory_space<smem>>
          %463 = vector.broadcast %462 : f32 to vector<8x8x128xf32>
          %464 = arith.mulf %463, %458 : vector<8x8x128xf32>
          %465 = arith.addf %446, %464 : vector<8x8x128xf32>
          %c15_i32_260 = arith.constant 15 : i32
          %466 = arith.addi %168, %c15_i32_260 : i32
          %c0_i32_261 = arith.constant 0 : i32
          %467 = arith.addi %466, %c0_i32_261 : i32
          %468 = arith.index_cast %467 : i32 to index
          %469 = memref.load %arg4[%468] : memref<3200xf32, #tpu.memory_space<smem>>
          %470 = vector.broadcast %469 : f32 to vector<8x8x128xf32>
          %471 = arith.mulf %470, %458 : vector<8x8x128xf32>
          %472 = arith.addf %453, %471 : vector<8x8x128xf32>
          %c3_i32_262 = arith.constant 3 : i32
          %473 = arith.addi %98, %c3_i32_262 : i32
          %474 = arith.index_cast %arg14 : i32 to index
          %475 = arith.index_cast %473 : i32 to index
          %c1_263 = arith.constant 1 : index
          %c0_264 = arith.constant 0 : index
          %c0_265 = arith.constant 0 : index
          %476 = vector.load %arg10[%474, %475, %c1_263, %c0_264, %c0_265] : memref<8x12x12x8x128xf32, #tpu.memory_space<vmem>>, vector<1x1x8x8x128xf32>
          %477 = vector.shape_cast %476 : vector<1x1x8x8x128xf32> to vector<8x8x128xf32>
          %c15_i32_266 = arith.constant 15 : i32
          %478 = arith.addi %165, %c15_i32_266 : i32
          %c1_i32_267 = arith.constant 1 : i32
          %479 = arith.addi %478, %c1_i32_267 : i32
          %480 = arith.index_cast %479 : i32 to index
          %481 = memref.load %arg4[%480] : memref<3200xf32, #tpu.memory_space<smem>>
          %482 = vector.broadcast %481 : f32 to vector<8x8x128xf32>
          %483 = arith.mulf %482, %477 : vector<8x8x128xf32>
          %484 = arith.addf %465, %483 : vector<8x8x128xf32>
          %c15_i32_268 = arith.constant 15 : i32
          %485 = arith.addi %168, %c15_i32_268 : i32
          %c1_i32_269 = arith.constant 1 : i32
          %486 = arith.addi %485, %c1_i32_269 : i32
          %487 = arith.index_cast %486 : i32 to index
          %488 = memref.load %arg4[%487] : memref<3200xf32, #tpu.memory_space<smem>>
          %489 = vector.broadcast %488 : f32 to vector<8x8x128xf32>
          %490 = arith.mulf %489, %477 : vector<8x8x128xf32>
          %491 = arith.addf %472, %490 : vector<8x8x128xf32>
          %c3_i32_270 = arith.constant 3 : i32
          %492 = arith.addi %98, %c3_i32_270 : i32
          %493 = arith.index_cast %arg14 : i32 to index
          %494 = arith.index_cast %492 : i32 to index
          %c2_271 = arith.constant 2 : index
          %c0_272 = arith.constant 0 : index
          %c0_273 = arith.constant 0 : index
          %495 = vector.load %arg10[%493, %494, %c2_271, %c0_272, %c0_273] : memref<8x12x12x8x128xf32, #tpu.memory_space<vmem>>, vector<1x1x8x8x128xf32>
          %496 = vector.shape_cast %495 : vector<1x1x8x8x128xf32> to vector<8x8x128xf32>
          %c15_i32_274 = arith.constant 15 : i32
          %497 = arith.addi %165, %c15_i32_274 : i32
          %c2_i32_275 = arith.constant 2 : i32
          %498 = arith.addi %497, %c2_i32_275 : i32
          %499 = arith.index_cast %498 : i32 to index
          %500 = memref.load %arg4[%499] : memref<3200xf32, #tpu.memory_space<smem>>
          %501 = vector.broadcast %500 : f32 to vector<8x8x128xf32>
          %502 = arith.mulf %501, %496 : vector<8x8x128xf32>
          %503 = arith.addf %484, %502 : vector<8x8x128xf32>
          %c15_i32_276 = arith.constant 15 : i32
          %504 = arith.addi %168, %c15_i32_276 : i32
          %c2_i32_277 = arith.constant 2 : i32
          %505 = arith.addi %504, %c2_i32_277 : i32
          %506 = arith.index_cast %505 : i32 to index
          %507 = memref.load %arg4[%506] : memref<3200xf32, #tpu.memory_space<smem>>
          %508 = vector.broadcast %507 : f32 to vector<8x8x128xf32>
          %509 = arith.mulf %508, %496 : vector<8x8x128xf32>
          %510 = arith.addf %491, %509 : vector<8x8x128xf32>
          %c3_i32_278 = arith.constant 3 : i32
          %511 = arith.addi %98, %c3_i32_278 : i32
          %512 = arith.index_cast %arg14 : i32 to index
          %513 = arith.index_cast %511 : i32 to index
          %c3_279 = arith.constant 3 : index
          %c0_280 = arith.constant 0 : index
          %c0_281 = arith.constant 0 : index
          %514 = vector.load %arg10[%512, %513, %c3_279, %c0_280, %c0_281] : memref<8x12x12x8x128xf32, #tpu.memory_space<vmem>>, vector<1x1x8x8x128xf32>
          %515 = vector.shape_cast %514 : vector<1x1x8x8x128xf32> to vector<8x8x128xf32>
          %c15_i32_282 = arith.constant 15 : i32
          %516 = arith.addi %165, %c15_i32_282 : i32
          %c3_i32_283 = arith.constant 3 : i32
          %517 = arith.addi %516, %c3_i32_283 : i32
          %518 = arith.index_cast %517 : i32 to index
          %519 = memref.load %arg4[%518] : memref<3200xf32, #tpu.memory_space<smem>>
          %520 = vector.broadcast %519 : f32 to vector<8x8x128xf32>
          %521 = arith.mulf %520, %515 : vector<8x8x128xf32>
          %522 = arith.addf %503, %521 : vector<8x8x128xf32>
          %c15_i32_284 = arith.constant 15 : i32
          %523 = arith.addi %168, %c15_i32_284 : i32
          %c3_i32_285 = arith.constant 3 : i32
          %524 = arith.addi %523, %c3_i32_285 : i32
          %525 = arith.index_cast %524 : i32 to index
          %526 = memref.load %arg4[%525] : memref<3200xf32, #tpu.memory_space<smem>>
          %527 = vector.broadcast %526 : f32 to vector<8x8x128xf32>
          %528 = arith.mulf %527, %515 : vector<8x8x128xf32>
          %529 = arith.addf %510, %528 : vector<8x8x128xf32>
          %c3_i32_286 = arith.constant 3 : i32
          %530 = arith.addi %98, %c3_i32_286 : i32
          %531 = arith.index_cast %arg14 : i32 to index
          %532 = arith.index_cast %530 : i32 to index
          %c4_287 = arith.constant 4 : index
          %c0_288 = arith.constant 0 : index
          %c0_289 = arith.constant 0 : index
          %533 = vector.load %arg10[%531, %532, %c4_287, %c0_288, %c0_289] : memref<8x12x12x8x128xf32, #tpu.memory_space<vmem>>, vector<1x1x8x8x128xf32>
          %534 = vector.shape_cast %533 : vector<1x1x8x8x128xf32> to vector<8x8x128xf32>
          %c15_i32_290 = arith.constant 15 : i32
          %535 = arith.addi %165, %c15_i32_290 : i32
          %c4_i32_291 = arith.constant 4 : i32
          %536 = arith.addi %535, %c4_i32_291 : i32
          %537 = arith.index_cast %536 : i32 to index
          %538 = memref.load %arg4[%537] : memref<3200xf32, #tpu.memory_space<smem>>
          %539 = vector.broadcast %538 : f32 to vector<8x8x128xf32>
          %540 = arith.mulf %539, %534 : vector<8x8x128xf32>
          %541 = arith.addf %522, %540 : vector<8x8x128xf32>
          %c15_i32_292 = arith.constant 15 : i32
          %542 = arith.addi %168, %c15_i32_292 : i32
          %c4_i32_293 = arith.constant 4 : i32
          %543 = arith.addi %542, %c4_i32_293 : i32
          %544 = arith.index_cast %543 : i32 to index
          %545 = memref.load %arg4[%544] : memref<3200xf32, #tpu.memory_space<smem>>
          %546 = vector.broadcast %545 : f32 to vector<8x8x128xf32>
          %547 = arith.mulf %546, %534 : vector<8x8x128xf32>
          %548 = arith.addf %529, %547 : vector<8x8x128xf32>
          %c4_i32_294 = arith.constant 4 : i32
          %549 = arith.addi %98, %c4_i32_294 : i32
          %550 = arith.index_cast %arg14 : i32 to index
          %551 = arith.index_cast %549 : i32 to index
          %c0_295 = arith.constant 0 : index
          %c0_296 = arith.constant 0 : index
          %c0_297 = arith.constant 0 : index
          %552 = vector.load %arg10[%550, %551, %c0_295, %c0_296, %c0_297] : memref<8x12x12x8x128xf32, #tpu.memory_space<vmem>>, vector<1x1x8x8x128xf32>
          %553 = vector.shape_cast %552 : vector<1x1x8x8x128xf32> to vector<8x8x128xf32>
          %c20_i32 = arith.constant 20 : i32
          %554 = arith.addi %165, %c20_i32 : i32
          %c0_i32_298 = arith.constant 0 : i32
          %555 = arith.addi %554, %c0_i32_298 : i32
          %556 = arith.index_cast %555 : i32 to index
          %557 = memref.load %arg4[%556] : memref<3200xf32, #tpu.memory_space<smem>>
          %558 = vector.broadcast %557 : f32 to vector<8x8x128xf32>
          %559 = arith.mulf %558, %553 : vector<8x8x128xf32>
          %560 = arith.addf %541, %559 : vector<8x8x128xf32>
          %c20_i32_299 = arith.constant 20 : i32
          %561 = arith.addi %168, %c20_i32_299 : i32
          %c0_i32_300 = arith.constant 0 : i32
          %562 = arith.addi %561, %c0_i32_300 : i32
          %563 = arith.index_cast %562 : i32 to index
          %564 = memref.load %arg4[%563] : memref<3200xf32, #tpu.memory_space<smem>>
          %565 = vector.broadcast %564 : f32 to vector<8x8x128xf32>
          %566 = arith.mulf %565, %553 : vector<8x8x128xf32>
          %567 = arith.addf %548, %566 : vector<8x8x128xf32>
          %c4_i32_301 = arith.constant 4 : i32
          %568 = arith.addi %98, %c4_i32_301 : i32
          %569 = arith.index_cast %arg14 : i32 to index
          %570 = arith.index_cast %568 : i32 to index
          %c1_302 = arith.constant 1 : index
          %c0_303 = arith.constant 0 : index
          %c0_304 = arith.constant 0 : index
          %571 = vector.load %arg10[%569, %570, %c1_302, %c0_303, %c0_304] : memref<8x12x12x8x128xf32, #tpu.memory_space<vmem>>, vector<1x1x8x8x128xf32>
          %572 = vector.shape_cast %571 : vector<1x1x8x8x128xf32> to vector<8x8x128xf32>
          %c20_i32_305 = arith.constant 20 : i32
          %573 = arith.addi %165, %c20_i32_305 : i32
          %c1_i32_306 = arith.constant 1 : i32
          %574 = arith.addi %573, %c1_i32_306 : i32
          %575 = arith.index_cast %574 : i32 to index
          %576 = memref.load %arg4[%575] : memref<3200xf32, #tpu.memory_space<smem>>
          %577 = vector.broadcast %576 : f32 to vector<8x8x128xf32>
          %578 = arith.mulf %577, %572 : vector<8x8x128xf32>
          %579 = arith.addf %560, %578 : vector<8x8x128xf32>
          %c20_i32_307 = arith.constant 20 : i32
          %580 = arith.addi %168, %c20_i32_307 : i32
          %c1_i32_308 = arith.constant 1 : i32
          %581 = arith.addi %580, %c1_i32_308 : i32
          %582 = arith.index_cast %581 : i32 to index
          %583 = memref.load %arg4[%582] : memref<3200xf32, #tpu.memory_space<smem>>
          %584 = vector.broadcast %583 : f32 to vector<8x8x128xf32>
          %585 = arith.mulf %584, %572 : vector<8x8x128xf32>
          %586 = arith.addf %567, %585 : vector<8x8x128xf32>
          %c4_i32_309 = arith.constant 4 : i32
          %587 = arith.addi %98, %c4_i32_309 : i32
          %588 = arith.index_cast %arg14 : i32 to index
          %589 = arith.index_cast %587 : i32 to index
          %c2_310 = arith.constant 2 : index
          %c0_311 = arith.constant 0 : index
          %c0_312 = arith.constant 0 : index
          %590 = vector.load %arg10[%588, %589, %c2_310, %c0_311, %c0_312] : memref<8x12x12x8x128xf32, #tpu.memory_space<vmem>>, vector<1x1x8x8x128xf32>
          %591 = vector.shape_cast %590 : vector<1x1x8x8x128xf32> to vector<8x8x128xf32>
          %c20_i32_313 = arith.constant 20 : i32
          %592 = arith.addi %165, %c20_i32_313 : i32
          %c2_i32_314 = arith.constant 2 : i32
          %593 = arith.addi %592, %c2_i32_314 : i32
          %594 = arith.index_cast %593 : i32 to index
          %595 = memref.load %arg4[%594] : memref<3200xf32, #tpu.memory_space<smem>>
          %596 = vector.broadcast %595 : f32 to vector<8x8x128xf32>
          %597 = arith.mulf %596, %591 : vector<8x8x128xf32>
          %598 = arith.addf %579, %597 : vector<8x8x128xf32>
          %c20_i32_315 = arith.constant 20 : i32
          %599 = arith.addi %168, %c20_i32_315 : i32
          %c2_i32_316 = arith.constant 2 : i32
          %600 = arith.addi %599, %c2_i32_316 : i32
          %601 = arith.index_cast %600 : i32 to index
          %602 = memref.load %arg4[%601] : memref<3200xf32, #tpu.memory_space<smem>>
          %603 = vector.broadcast %602 : f32 to vector<8x8x128xf32>
          %604 = arith.mulf %603, %591 : vector<8x8x128xf32>
          %605 = arith.addf %586, %604 : vector<8x8x128xf32>
          %c4_i32_317 = arith.constant 4 : i32
          %606 = arith.addi %98, %c4_i32_317 : i32
          %607 = arith.index_cast %arg14 : i32 to index
          %608 = arith.index_cast %606 : i32 to index
          %c3_318 = arith.constant 3 : index
          %c0_319 = arith.constant 0 : index
          %c0_320 = arith.constant 0 : index
          %609 = vector.load %arg10[%607, %608, %c3_318, %c0_319, %c0_320] : memref<8x12x12x8x128xf32, #tpu.memory_space<vmem>>, vector<1x1x8x8x128xf32>
          %610 = vector.shape_cast %609 : vector<1x1x8x8x128xf32> to vector<8x8x128xf32>
          %c20_i32_321 = arith.constant 20 : i32
          %611 = arith.addi %165, %c20_i32_321 : i32
          %c3_i32_322 = arith.constant 3 : i32
          %612 = arith.addi %611, %c3_i32_322 : i32
          %613 = arith.index_cast %612 : i32 to index
          %614 = memref.load %arg4[%613] : memref<3200xf32, #tpu.memory_space<smem>>
          %615 = vector.broadcast %614 : f32 to vector<8x8x128xf32>
          %616 = arith.mulf %615, %610 : vector<8x8x128xf32>
          %617 = arith.addf %598, %616 : vector<8x8x128xf32>
          %c20_i32_323 = arith.constant 20 : i32
          %618 = arith.addi %168, %c20_i32_323 : i32
          %c3_i32_324 = arith.constant 3 : i32
          %619 = arith.addi %618, %c3_i32_324 : i32
          %620 = arith.index_cast %619 : i32 to index
          %621 = memref.load %arg4[%620] : memref<3200xf32, #tpu.memory_space<smem>>
          %622 = vector.broadcast %621 : f32 to vector<8x8x128xf32>
          %623 = arith.mulf %622, %610 : vector<8x8x128xf32>
          %624 = arith.addf %605, %623 : vector<8x8x128xf32>
          %c4_i32_325 = arith.constant 4 : i32
          %625 = arith.addi %98, %c4_i32_325 : i32
          %626 = arith.index_cast %arg14 : i32 to index
          %627 = arith.index_cast %625 : i32 to index
          %c4_326 = arith.constant 4 : index
          %c0_327 = arith.constant 0 : index
          %c0_328 = arith.constant 0 : index
          %628 = vector.load %arg10[%626, %627, %c4_326, %c0_327, %c0_328] : memref<8x12x12x8x128xf32, #tpu.memory_space<vmem>>, vector<1x1x8x8x128xf32>
          %629 = vector.shape_cast %628 : vector<1x1x8x8x128xf32> to vector<8x8x128xf32>
          %c20_i32_329 = arith.constant 20 : i32
          %630 = arith.addi %165, %c20_i32_329 : i32
          %c4_i32_330 = arith.constant 4 : i32
          %631 = arith.addi %630, %c4_i32_330 : i32
          %632 = arith.index_cast %631 : i32 to index
          %633 = memref.load %arg4[%632] : memref<3200xf32, #tpu.memory_space<smem>>
          %634 = vector.broadcast %633 : f32 to vector<8x8x128xf32>
          %635 = arith.mulf %634, %629 : vector<8x8x128xf32>
          %636 = arith.addf %617, %635 : vector<8x8x128xf32>
          %c20_i32_331 = arith.constant 20 : i32
          %637 = arith.addi %168, %c20_i32_331 : i32
          %c4_i32_332 = arith.constant 4 : i32
          %638 = arith.addi %637, %c4_i32_332 : i32
          %639 = arith.index_cast %638 : i32 to index
          %640 = memref.load %arg4[%639] : memref<3200xf32, #tpu.memory_space<smem>>
          %641 = vector.broadcast %640 : f32 to vector<8x8x128xf32>
          %642 = arith.mulf %641, %629 : vector<8x8x128xf32>
          %643 = arith.addf %624, %642 : vector<8x8x128xf32>
          scf.yield %636, %643 : vector<8x8x128xf32>, vector<8x8x128xf32>
        }
        %c8_i32_116 = arith.constant 8 : i32
        %103 = vector.shape_cast %102#0 : vector<8x8x128xf32> to vector<4x2x8x128xf32>
        %104 = vector.extract_strided_slice %103 {offsets = [0, 0, 0, 0], sizes = [4, 1, 8, 128], strides = [1, 1, 1, 1]} : vector<4x2x8x128xf32> to vector<4x1x8x128xf32>
        %105 = vector.shape_cast %104 : vector<4x1x8x128xf32> to vector<4x8x128xf32>
        %106 = vector.extract_strided_slice %103 {offsets = [0, 1, 0, 0], sizes = [4, 1, 8, 128], strides = [1, 1, 1, 1]} : vector<4x2x8x128xf32> to vector<4x1x8x128xf32>
        %107 = vector.shape_cast %106 : vector<4x1x8x128xf32> to vector<4x8x128xf32>
        %108 = arith.maximumf %105, %107 : vector<4x8x128xf32>
        %109 = vector.shape_cast %102#1 : vector<8x8x128xf32> to vector<4x2x8x128xf32>
        %110 = vector.extract_strided_slice %109 {offsets = [0, 0, 0, 0], sizes = [4, 1, 8, 128], strides = [1, 1, 1, 1]} : vector<4x2x8x128xf32> to vector<4x1x8x128xf32>
        %111 = vector.shape_cast %110 : vector<4x1x8x128xf32> to vector<4x8x128xf32>
        %112 = vector.extract_strided_slice %109 {offsets = [0, 1, 0, 0], sizes = [4, 1, 8, 128], strides = [1, 1, 1, 1]} : vector<4x2x8x128xf32> to vector<4x1x8x128xf32>
        %113 = vector.shape_cast %112 : vector<4x1x8x128xf32> to vector<4x8x128xf32>
        %114 = arith.maximumf %111, %113 : vector<4x8x128xf32>
        %c2_i32_117 = arith.constant 2 : i32
        %115 = arith.muli %c2_i32_117, %arg12 : i32
        %c1_i32_118 = arith.constant 1 : i32
        %116 = arith.addi %115, %c1_i32_118 : i32
        %cst_119 = arith.constant 0.000000e+00 : f32
        %117 = vector.broadcast %cst_119 : f32 to vector<8x8x128xf32>
        %cst_120 = arith.constant 0.000000e+00 : f32
        %118 = vector.broadcast %cst_120 : f32 to vector<8x8x128xf32>
        %c0_i32_121 = arith.constant 0 : i32
        %c8_i32_122 = arith.constant 8 : i32
        %119 = arith.addi %c0_i32_121, %c8_i32_122 : i32
        %c1_i32_123 = arith.constant 1 : i32
        %120:2 = scf.for %arg14 = %c0_i32_121 to %119 step %c1_i32_123 iter_args(%arg15 = %117, %arg16 = %118) -> (vector<8x8x128xf32>, vector<8x8x128xf32>)  : i32 {
          %c200_i32 = arith.constant 200 : i32
          %163 = arith.muli %96, %c200_i32 : i32
          %c25_i32 = arith.constant 25 : i32
          %164 = arith.muli %arg14, %c25_i32 : i32
          %165 = arith.addi %163, %164 : i32
          %c200_i32_136 = arith.constant 200 : i32
          %166 = arith.muli %97, %c200_i32_136 : i32
          %c25_i32_137 = arith.constant 25 : i32
          %167 = arith.muli %arg14, %c25_i32_137 : i32
          %168 = arith.addi %166, %167 : i32
          %c0_i32_138 = arith.constant 0 : i32
          %169 = arith.addi %116, %c0_i32_138 : i32
          %170 = arith.index_cast %arg14 : i32 to index
          %171 = arith.index_cast %169 : i32 to index
          %c0_139 = arith.constant 0 : index
          %c0_140 = arith.constant 0 : index
          %c0_141 = arith.constant 0 : index
          %172 = vector.load %arg10[%170, %171, %c0_139, %c0_140, %c0_141] : memref<8x12x12x8x128xf32, #tpu.memory_space<vmem>>, vector<1x1x8x8x128xf32>
          %173 = vector.shape_cast %172 : vector<1x1x8x8x128xf32> to vector<8x8x128xf32>
          %c0_i32_142 = arith.constant 0 : i32
          %174 = arith.addi %165, %c0_i32_142 : i32
          %c0_i32_143 = arith.constant 0 : i32
          %175 = arith.addi %174, %c0_i32_143 : i32
          %176 = arith.index_cast %175 : i32 to index
          %177 = memref.load %arg4[%176] : memref<3200xf32, #tpu.memory_space<smem>>
          %178 = vector.broadcast %177 : f32 to vector<8x8x128xf32>
          %179 = arith.mulf %178, %173 : vector<8x8x128xf32>
          %180 = arith.addf %arg15, %179 : vector<8x8x128xf32>
          %c0_i32_144 = arith.constant 0 : i32
          %181 = arith.addi %168, %c0_i32_144 : i32
          %c0_i32_145 = arith.constant 0 : i32
          %182 = arith.addi %181, %c0_i32_145 : i32
          %183 = arith.index_cast %182 : i32 to index
          %184 = memref.load %arg4[%183] : memref<3200xf32, #tpu.memory_space<smem>>
          %185 = vector.broadcast %184 : f32 to vector<8x8x128xf32>
          %186 = arith.mulf %185, %173 : vector<8x8x128xf32>
          %187 = arith.addf %arg16, %186 : vector<8x8x128xf32>
          %c0_i32_146 = arith.constant 0 : i32
          %188 = arith.addi %116, %c0_i32_146 : i32
          %189 = arith.index_cast %arg14 : i32 to index
          %190 = arith.index_cast %188 : i32 to index
          %c1_147 = arith.constant 1 : index
          %c0_148 = arith.constant 0 : index
          %c0_149 = arith.constant 0 : index
          %191 = vector.load %arg10[%189, %190, %c1_147, %c0_148, %c0_149] : memref<8x12x12x8x128xf32, #tpu.memory_space<vmem>>, vector<1x1x8x8x128xf32>
          %192 = vector.shape_cast %191 : vector<1x1x8x8x128xf32> to vector<8x8x128xf32>
          %c0_i32_150 = arith.constant 0 : i32
          %193 = arith.addi %165, %c0_i32_150 : i32
          %c1_i32_151 = arith.constant 1 : i32
          %194 = arith.addi %193, %c1_i32_151 : i32
          %195 = arith.index_cast %194 : i32 to index
          %196 = memref.load %arg4[%195] : memref<3200xf32, #tpu.memory_space<smem>>
          %197 = vector.broadcast %196 : f32 to vector<8x8x128xf32>
          %198 = arith.mulf %197, %192 : vector<8x8x128xf32>
          %199 = arith.addf %180, %198 : vector<8x8x128xf32>
          %c0_i32_152 = arith.constant 0 : i32
          %200 = arith.addi %168, %c0_i32_152 : i32
          %c1_i32_153 = arith.constant 1 : i32
          %201 = arith.addi %200, %c1_i32_153 : i32
          %202 = arith.index_cast %201 : i32 to index
          %203 = memref.load %arg4[%202] : memref<3200xf32, #tpu.memory_space<smem>>
          %204 = vector.broadcast %203 : f32 to vector<8x8x128xf32>
          %205 = arith.mulf %204, %192 : vector<8x8x128xf32>
          %206 = arith.addf %187, %205 : vector<8x8x128xf32>
          %c0_i32_154 = arith.constant 0 : i32
          %207 = arith.addi %116, %c0_i32_154 : i32
          %208 = arith.index_cast %arg14 : i32 to index
          %209 = arith.index_cast %207 : i32 to index
          %c2_155 = arith.constant 2 : index
          %c0_156 = arith.constant 0 : index
          %c0_157 = arith.constant 0 : index
          %210 = vector.load %arg10[%208, %209, %c2_155, %c0_156, %c0_157] : memref<8x12x12x8x128xf32, #tpu.memory_space<vmem>>, vector<1x1x8x8x128xf32>
          %211 = vector.shape_cast %210 : vector<1x1x8x8x128xf32> to vector<8x8x128xf32>
          %c0_i32_158 = arith.constant 0 : i32
          %212 = arith.addi %165, %c0_i32_158 : i32
          %c2_i32_159 = arith.constant 2 : i32
          %213 = arith.addi %212, %c2_i32_159 : i32
          %214 = arith.index_cast %213 : i32 to index
          %215 = memref.load %arg4[%214] : memref<3200xf32, #tpu.memory_space<smem>>
          %216 = vector.broadcast %215 : f32 to vector<8x8x128xf32>
          %217 = arith.mulf %216, %211 : vector<8x8x128xf32>
          %218 = arith.addf %199, %217 : vector<8x8x128xf32>
          %c0_i32_160 = arith.constant 0 : i32
          %219 = arith.addi %168, %c0_i32_160 : i32
          %c2_i32_161 = arith.constant 2 : i32
          %220 = arith.addi %219, %c2_i32_161 : i32
          %221 = arith.index_cast %220 : i32 to index
          %222 = memref.load %arg4[%221] : memref<3200xf32, #tpu.memory_space<smem>>
          %223 = vector.broadcast %222 : f32 to vector<8x8x128xf32>
          %224 = arith.mulf %223, %211 : vector<8x8x128xf32>
          %225 = arith.addf %206, %224 : vector<8x8x128xf32>
          %c0_i32_162 = arith.constant 0 : i32
          %226 = arith.addi %116, %c0_i32_162 : i32
          %227 = arith.index_cast %arg14 : i32 to index
          %228 = arith.index_cast %226 : i32 to index
          %c3_163 = arith.constant 3 : index
          %c0_164 = arith.constant 0 : index
          %c0_165 = arith.constant 0 : index
          %229 = vector.load %arg10[%227, %228, %c3_163, %c0_164, %c0_165] : memref<8x12x12x8x128xf32, #tpu.memory_space<vmem>>, vector<1x1x8x8x128xf32>
          %230 = vector.shape_cast %229 : vector<1x1x8x8x128xf32> to vector<8x8x128xf32>
          %c0_i32_166 = arith.constant 0 : i32
          %231 = arith.addi %165, %c0_i32_166 : i32
          %c3_i32 = arith.constant 3 : i32
          %232 = arith.addi %231, %c3_i32 : i32
          %233 = arith.index_cast %232 : i32 to index
          %234 = memref.load %arg4[%233] : memref<3200xf32, #tpu.memory_space<smem>>
          %235 = vector.broadcast %234 : f32 to vector<8x8x128xf32>
          %236 = arith.mulf %235, %230 : vector<8x8x128xf32>
          %237 = arith.addf %218, %236 : vector<8x8x128xf32>
          %c0_i32_167 = arith.constant 0 : i32
          %238 = arith.addi %168, %c0_i32_167 : i32
          %c3_i32_168 = arith.constant 3 : i32
          %239 = arith.addi %238, %c3_i32_168 : i32
          %240 = arith.index_cast %239 : i32 to index
          %241 = memref.load %arg4[%240] : memref<3200xf32, #tpu.memory_space<smem>>
          %242 = vector.broadcast %241 : f32 to vector<8x8x128xf32>
          %243 = arith.mulf %242, %230 : vector<8x8x128xf32>
          %244 = arith.addf %225, %243 : vector<8x8x128xf32>
          %c0_i32_169 = arith.constant 0 : i32
          %245 = arith.addi %116, %c0_i32_169 : i32
          %246 = arith.index_cast %arg14 : i32 to index
          %247 = arith.index_cast %245 : i32 to index
          %c4_170 = arith.constant 4 : index
          %c0_171 = arith.constant 0 : index
          %c0_172 = arith.constant 0 : index
          %248 = vector.load %arg10[%246, %247, %c4_170, %c0_171, %c0_172] : memref<8x12x12x8x128xf32, #tpu.memory_space<vmem>>, vector<1x1x8x8x128xf32>
          %249 = vector.shape_cast %248 : vector<1x1x8x8x128xf32> to vector<8x8x128xf32>
          %c0_i32_173 = arith.constant 0 : i32
          %250 = arith.addi %165, %c0_i32_173 : i32
          %c4_i32_174 = arith.constant 4 : i32
          %251 = arith.addi %250, %c4_i32_174 : i32
          %252 = arith.index_cast %251 : i32 to index
          %253 = memref.load %arg4[%252] : memref<3200xf32, #tpu.memory_space<smem>>
          %254 = vector.broadcast %253 : f32 to vector<8x8x128xf32>
          %255 = arith.mulf %254, %249 : vector<8x8x128xf32>
          %256 = arith.addf %237, %255 : vector<8x8x128xf32>
          %c0_i32_175 = arith.constant 0 : i32
          %257 = arith.addi %168, %c0_i32_175 : i32
          %c4_i32_176 = arith.constant 4 : i32
          %258 = arith.addi %257, %c4_i32_176 : i32
          %259 = arith.index_cast %258 : i32 to index
          %260 = memref.load %arg4[%259] : memref<3200xf32, #tpu.memory_space<smem>>
          %261 = vector.broadcast %260 : f32 to vector<8x8x128xf32>
          %262 = arith.mulf %261, %249 : vector<8x8x128xf32>
          %263 = arith.addf %244, %262 : vector<8x8x128xf32>
          %c1_i32_177 = arith.constant 1 : i32
          %264 = arith.addi %116, %c1_i32_177 : i32
          %265 = arith.index_cast %arg14 : i32 to index
          %266 = arith.index_cast %264 : i32 to index
          %c0_178 = arith.constant 0 : index
          %c0_179 = arith.constant 0 : index
          %c0_180 = arith.constant 0 : index
          %267 = vector.load %arg10[%265, %266, %c0_178, %c0_179, %c0_180] : memref<8x12x12x8x128xf32, #tpu.memory_space<vmem>>, vector<1x1x8x8x128xf32>
          %268 = vector.shape_cast %267 : vector<1x1x8x8x128xf32> to vector<8x8x128xf32>
          %c5_i32 = arith.constant 5 : i32
          %269 = arith.addi %165, %c5_i32 : i32
          %c0_i32_181 = arith.constant 0 : i32
          %270 = arith.addi %269, %c0_i32_181 : i32
          %271 = arith.index_cast %270 : i32 to index
          %272 = memref.load %arg4[%271] : memref<3200xf32, #tpu.memory_space<smem>>
          %273 = vector.broadcast %272 : f32 to vector<8x8x128xf32>
          %274 = arith.mulf %273, %268 : vector<8x8x128xf32>
          %275 = arith.addf %256, %274 : vector<8x8x128xf32>
          %c5_i32_182 = arith.constant 5 : i32
          %276 = arith.addi %168, %c5_i32_182 : i32
          %c0_i32_183 = arith.constant 0 : i32
          %277 = arith.addi %276, %c0_i32_183 : i32
          %278 = arith.index_cast %277 : i32 to index
          %279 = memref.load %arg4[%278] : memref<3200xf32, #tpu.memory_space<smem>>
          %280 = vector.broadcast %279 : f32 to vector<8x8x128xf32>
          %281 = arith.mulf %280, %268 : vector<8x8x128xf32>
          %282 = arith.addf %263, %281 : vector<8x8x128xf32>
          %c1_i32_184 = arith.constant 1 : i32
          %283 = arith.addi %116, %c1_i32_184 : i32
          %284 = arith.index_cast %arg14 : i32 to index
          %285 = arith.index_cast %283 : i32 to index
          %c1_185 = arith.constant 1 : index
          %c0_186 = arith.constant 0 : index
          %c0_187 = arith.constant 0 : index
          %286 = vector.load %arg10[%284, %285, %c1_185, %c0_186, %c0_187] : memref<8x12x12x8x128xf32, #tpu.memory_space<vmem>>, vector<1x1x8x8x128xf32>
          %287 = vector.shape_cast %286 : vector<1x1x8x8x128xf32> to vector<8x8x128xf32>
          %c5_i32_188 = arith.constant 5 : i32
          %288 = arith.addi %165, %c5_i32_188 : i32
          %c1_i32_189 = arith.constant 1 : i32
          %289 = arith.addi %288, %c1_i32_189 : i32
          %290 = arith.index_cast %289 : i32 to index
          %291 = memref.load %arg4[%290] : memref<3200xf32, #tpu.memory_space<smem>>
          %292 = vector.broadcast %291 : f32 to vector<8x8x128xf32>
          %293 = arith.mulf %292, %287 : vector<8x8x128xf32>
          %294 = arith.addf %275, %293 : vector<8x8x128xf32>
          %c5_i32_190 = arith.constant 5 : i32
          %295 = arith.addi %168, %c5_i32_190 : i32
          %c1_i32_191 = arith.constant 1 : i32
          %296 = arith.addi %295, %c1_i32_191 : i32
          %297 = arith.index_cast %296 : i32 to index
          %298 = memref.load %arg4[%297] : memref<3200xf32, #tpu.memory_space<smem>>
          %299 = vector.broadcast %298 : f32 to vector<8x8x128xf32>
          %300 = arith.mulf %299, %287 : vector<8x8x128xf32>
          %301 = arith.addf %282, %300 : vector<8x8x128xf32>
          %c1_i32_192 = arith.constant 1 : i32
          %302 = arith.addi %116, %c1_i32_192 : i32
          %303 = arith.index_cast %arg14 : i32 to index
          %304 = arith.index_cast %302 : i32 to index
          %c2_193 = arith.constant 2 : index
          %c0_194 = arith.constant 0 : index
          %c0_195 = arith.constant 0 : index
          %305 = vector.load %arg10[%303, %304, %c2_193, %c0_194, %c0_195] : memref<8x12x12x8x128xf32, #tpu.memory_space<vmem>>, vector<1x1x8x8x128xf32>
          %306 = vector.shape_cast %305 : vector<1x1x8x8x128xf32> to vector<8x8x128xf32>
          %c5_i32_196 = arith.constant 5 : i32
          %307 = arith.addi %165, %c5_i32_196 : i32
          %c2_i32_197 = arith.constant 2 : i32
          %308 = arith.addi %307, %c2_i32_197 : i32
          %309 = arith.index_cast %308 : i32 to index
          %310 = memref.load %arg4[%309] : memref<3200xf32, #tpu.memory_space<smem>>
          %311 = vector.broadcast %310 : f32 to vector<8x8x128xf32>
          %312 = arith.mulf %311, %306 : vector<8x8x128xf32>
          %313 = arith.addf %294, %312 : vector<8x8x128xf32>
          %c5_i32_198 = arith.constant 5 : i32
          %314 = arith.addi %168, %c5_i32_198 : i32
          %c2_i32_199 = arith.constant 2 : i32
          %315 = arith.addi %314, %c2_i32_199 : i32
          %316 = arith.index_cast %315 : i32 to index
          %317 = memref.load %arg4[%316] : memref<3200xf32, #tpu.memory_space<smem>>
          %318 = vector.broadcast %317 : f32 to vector<8x8x128xf32>
          %319 = arith.mulf %318, %306 : vector<8x8x128xf32>
          %320 = arith.addf %301, %319 : vector<8x8x128xf32>
          %c1_i32_200 = arith.constant 1 : i32
          %321 = arith.addi %116, %c1_i32_200 : i32
          %322 = arith.index_cast %arg14 : i32 to index
          %323 = arith.index_cast %321 : i32 to index
          %c3_201 = arith.constant 3 : index
          %c0_202 = arith.constant 0 : index
          %c0_203 = arith.constant 0 : index
          %324 = vector.load %arg10[%322, %323, %c3_201, %c0_202, %c0_203] : memref<8x12x12x8x128xf32, #tpu.memory_space<vmem>>, vector<1x1x8x8x128xf32>
          %325 = vector.shape_cast %324 : vector<1x1x8x8x128xf32> to vector<8x8x128xf32>
          %c5_i32_204 = arith.constant 5 : i32
          %326 = arith.addi %165, %c5_i32_204 : i32
          %c3_i32_205 = arith.constant 3 : i32
          %327 = arith.addi %326, %c3_i32_205 : i32
          %328 = arith.index_cast %327 : i32 to index
          %329 = memref.load %arg4[%328] : memref<3200xf32, #tpu.memory_space<smem>>
          %330 = vector.broadcast %329 : f32 to vector<8x8x128xf32>
          %331 = arith.mulf %330, %325 : vector<8x8x128xf32>
          %332 = arith.addf %313, %331 : vector<8x8x128xf32>
          %c5_i32_206 = arith.constant 5 : i32
          %333 = arith.addi %168, %c5_i32_206 : i32
          %c3_i32_207 = arith.constant 3 : i32
          %334 = arith.addi %333, %c3_i32_207 : i32
          %335 = arith.index_cast %334 : i32 to index
          %336 = memref.load %arg4[%335] : memref<3200xf32, #tpu.memory_space<smem>>
          %337 = vector.broadcast %336 : f32 to vector<8x8x128xf32>
          %338 = arith.mulf %337, %325 : vector<8x8x128xf32>
          %339 = arith.addf %320, %338 : vector<8x8x128xf32>
          %c1_i32_208 = arith.constant 1 : i32
          %340 = arith.addi %116, %c1_i32_208 : i32
          %341 = arith.index_cast %arg14 : i32 to index
          %342 = arith.index_cast %340 : i32 to index
          %c4_209 = arith.constant 4 : index
          %c0_210 = arith.constant 0 : index
          %c0_211 = arith.constant 0 : index
          %343 = vector.load %arg10[%341, %342, %c4_209, %c0_210, %c0_211] : memref<8x12x12x8x128xf32, #tpu.memory_space<vmem>>, vector<1x1x8x8x128xf32>
          %344 = vector.shape_cast %343 : vector<1x1x8x8x128xf32> to vector<8x8x128xf32>
          %c5_i32_212 = arith.constant 5 : i32
          %345 = arith.addi %165, %c5_i32_212 : i32
          %c4_i32_213 = arith.constant 4 : i32
          %346 = arith.addi %345, %c4_i32_213 : i32
          %347 = arith.index_cast %346 : i32 to index
          %348 = memref.load %arg4[%347] : memref<3200xf32, #tpu.memory_space<smem>>
          %349 = vector.broadcast %348 : f32 to vector<8x8x128xf32>
          %350 = arith.mulf %349, %344 : vector<8x8x128xf32>
          %351 = arith.addf %332, %350 : vector<8x8x128xf32>
          %c5_i32_214 = arith.constant 5 : i32
          %352 = arith.addi %168, %c5_i32_214 : i32
          %c4_i32_215 = arith.constant 4 : i32
          %353 = arith.addi %352, %c4_i32_215 : i32
          %354 = arith.index_cast %353 : i32 to index
          %355 = memref.load %arg4[%354] : memref<3200xf32, #tpu.memory_space<smem>>
          %356 = vector.broadcast %355 : f32 to vector<8x8x128xf32>
          %357 = arith.mulf %356, %344 : vector<8x8x128xf32>
          %358 = arith.addf %339, %357 : vector<8x8x128xf32>
          %c2_i32_216 = arith.constant 2 : i32
          %359 = arith.addi %116, %c2_i32_216 : i32
          %360 = arith.index_cast %arg14 : i32 to index
          %361 = arith.index_cast %359 : i32 to index
          %c0_217 = arith.constant 0 : index
          %c0_218 = arith.constant 0 : index
          %c0_219 = arith.constant 0 : index
          %362 = vector.load %arg10[%360, %361, %c0_217, %c0_218, %c0_219] : memref<8x12x12x8x128xf32, #tpu.memory_space<vmem>>, vector<1x1x8x8x128xf32>
          %363 = vector.shape_cast %362 : vector<1x1x8x8x128xf32> to vector<8x8x128xf32>
          %c10_i32 = arith.constant 10 : i32
          %364 = arith.addi %165, %c10_i32 : i32
          %c0_i32_220 = arith.constant 0 : i32
          %365 = arith.addi %364, %c0_i32_220 : i32
          %366 = arith.index_cast %365 : i32 to index
          %367 = memref.load %arg4[%366] : memref<3200xf32, #tpu.memory_space<smem>>
          %368 = vector.broadcast %367 : f32 to vector<8x8x128xf32>
          %369 = arith.mulf %368, %363 : vector<8x8x128xf32>
          %370 = arith.addf %351, %369 : vector<8x8x128xf32>
          %c10_i32_221 = arith.constant 10 : i32
          %371 = arith.addi %168, %c10_i32_221 : i32
          %c0_i32_222 = arith.constant 0 : i32
          %372 = arith.addi %371, %c0_i32_222 : i32
          %373 = arith.index_cast %372 : i32 to index
          %374 = memref.load %arg4[%373] : memref<3200xf32, #tpu.memory_space<smem>>
          %375 = vector.broadcast %374 : f32 to vector<8x8x128xf32>
          %376 = arith.mulf %375, %363 : vector<8x8x128xf32>
          %377 = arith.addf %358, %376 : vector<8x8x128xf32>
          %c2_i32_223 = arith.constant 2 : i32
          %378 = arith.addi %116, %c2_i32_223 : i32
          %379 = arith.index_cast %arg14 : i32 to index
          %380 = arith.index_cast %378 : i32 to index
          %c1_224 = arith.constant 1 : index
          %c0_225 = arith.constant 0 : index
          %c0_226 = arith.constant 0 : index
          %381 = vector.load %arg10[%379, %380, %c1_224, %c0_225, %c0_226] : memref<8x12x12x8x128xf32, #tpu.memory_space<vmem>>, vector<1x1x8x8x128xf32>
          %382 = vector.shape_cast %381 : vector<1x1x8x8x128xf32> to vector<8x8x128xf32>
          %c10_i32_227 = arith.constant 10 : i32
          %383 = arith.addi %165, %c10_i32_227 : i32
          %c1_i32_228 = arith.constant 1 : i32
          %384 = arith.addi %383, %c1_i32_228 : i32
          %385 = arith.index_cast %384 : i32 to index
          %386 = memref.load %arg4[%385] : memref<3200xf32, #tpu.memory_space<smem>>
          %387 = vector.broadcast %386 : f32 to vector<8x8x128xf32>
          %388 = arith.mulf %387, %382 : vector<8x8x128xf32>
          %389 = arith.addf %370, %388 : vector<8x8x128xf32>
          %c10_i32_229 = arith.constant 10 : i32
          %390 = arith.addi %168, %c10_i32_229 : i32
          %c1_i32_230 = arith.constant 1 : i32
          %391 = arith.addi %390, %c1_i32_230 : i32
          %392 = arith.index_cast %391 : i32 to index
          %393 = memref.load %arg4[%392] : memref<3200xf32, #tpu.memory_space<smem>>
          %394 = vector.broadcast %393 : f32 to vector<8x8x128xf32>
          %395 = arith.mulf %394, %382 : vector<8x8x128xf32>
          %396 = arith.addf %377, %395 : vector<8x8x128xf32>
          %c2_i32_231 = arith.constant 2 : i32
          %397 = arith.addi %116, %c2_i32_231 : i32
          %398 = arith.index_cast %arg14 : i32 to index
          %399 = arith.index_cast %397 : i32 to index
          %c2_232 = arith.constant 2 : index
          %c0_233 = arith.constant 0 : index
          %c0_234 = arith.constant 0 : index
          %400 = vector.load %arg10[%398, %399, %c2_232, %c0_233, %c0_234] : memref<8x12x12x8x128xf32, #tpu.memory_space<vmem>>, vector<1x1x8x8x128xf32>
          %401 = vector.shape_cast %400 : vector<1x1x8x8x128xf32> to vector<8x8x128xf32>
          %c10_i32_235 = arith.constant 10 : i32
          %402 = arith.addi %165, %c10_i32_235 : i32
          %c2_i32_236 = arith.constant 2 : i32
          %403 = arith.addi %402, %c2_i32_236 : i32
          %404 = arith.index_cast %403 : i32 to index
          %405 = memref.load %arg4[%404] : memref<3200xf32, #tpu.memory_space<smem>>
          %406 = vector.broadcast %405 : f32 to vector<8x8x128xf32>
          %407 = arith.mulf %406, %401 : vector<8x8x128xf32>
          %408 = arith.addf %389, %407 : vector<8x8x128xf32>
          %c10_i32_237 = arith.constant 10 : i32
          %409 = arith.addi %168, %c10_i32_237 : i32
          %c2_i32_238 = arith.constant 2 : i32
          %410 = arith.addi %409, %c2_i32_238 : i32
          %411 = arith.index_cast %410 : i32 to index
          %412 = memref.load %arg4[%411] : memref<3200xf32, #tpu.memory_space<smem>>
          %413 = vector.broadcast %412 : f32 to vector<8x8x128xf32>
          %414 = arith.mulf %413, %401 : vector<8x8x128xf32>
          %415 = arith.addf %396, %414 : vector<8x8x128xf32>
          %c2_i32_239 = arith.constant 2 : i32
          %416 = arith.addi %116, %c2_i32_239 : i32
          %417 = arith.index_cast %arg14 : i32 to index
          %418 = arith.index_cast %416 : i32 to index
          %c3_240 = arith.constant 3 : index
          %c0_241 = arith.constant 0 : index
          %c0_242 = arith.constant 0 : index
          %419 = vector.load %arg10[%417, %418, %c3_240, %c0_241, %c0_242] : memref<8x12x12x8x128xf32, #tpu.memory_space<vmem>>, vector<1x1x8x8x128xf32>
          %420 = vector.shape_cast %419 : vector<1x1x8x8x128xf32> to vector<8x8x128xf32>
          %c10_i32_243 = arith.constant 10 : i32
          %421 = arith.addi %165, %c10_i32_243 : i32
          %c3_i32_244 = arith.constant 3 : i32
          %422 = arith.addi %421, %c3_i32_244 : i32
          %423 = arith.index_cast %422 : i32 to index
          %424 = memref.load %arg4[%423] : memref<3200xf32, #tpu.memory_space<smem>>
          %425 = vector.broadcast %424 : f32 to vector<8x8x128xf32>
          %426 = arith.mulf %425, %420 : vector<8x8x128xf32>
          %427 = arith.addf %408, %426 : vector<8x8x128xf32>
          %c10_i32_245 = arith.constant 10 : i32
          %428 = arith.addi %168, %c10_i32_245 : i32
          %c3_i32_246 = arith.constant 3 : i32
          %429 = arith.addi %428, %c3_i32_246 : i32
          %430 = arith.index_cast %429 : i32 to index
          %431 = memref.load %arg4[%430] : memref<3200xf32, #tpu.memory_space<smem>>
          %432 = vector.broadcast %431 : f32 to vector<8x8x128xf32>
          %433 = arith.mulf %432, %420 : vector<8x8x128xf32>
          %434 = arith.addf %415, %433 : vector<8x8x128xf32>
          %c2_i32_247 = arith.constant 2 : i32
          %435 = arith.addi %116, %c2_i32_247 : i32
          %436 = arith.index_cast %arg14 : i32 to index
          %437 = arith.index_cast %435 : i32 to index
          %c4_248 = arith.constant 4 : index
          %c0_249 = arith.constant 0 : index
          %c0_250 = arith.constant 0 : index
          %438 = vector.load %arg10[%436, %437, %c4_248, %c0_249, %c0_250] : memref<8x12x12x8x128xf32, #tpu.memory_space<vmem>>, vector<1x1x8x8x128xf32>
          %439 = vector.shape_cast %438 : vector<1x1x8x8x128xf32> to vector<8x8x128xf32>
          %c10_i32_251 = arith.constant 10 : i32
          %440 = arith.addi %165, %c10_i32_251 : i32
          %c4_i32_252 = arith.constant 4 : i32
          %441 = arith.addi %440, %c4_i32_252 : i32
          %442 = arith.index_cast %441 : i32 to index
          %443 = memref.load %arg4[%442] : memref<3200xf32, #tpu.memory_space<smem>>
          %444 = vector.broadcast %443 : f32 to vector<8x8x128xf32>
          %445 = arith.mulf %444, %439 : vector<8x8x128xf32>
          %446 = arith.addf %427, %445 : vector<8x8x128xf32>
          %c10_i32_253 = arith.constant 10 : i32
          %447 = arith.addi %168, %c10_i32_253 : i32
          %c4_i32_254 = arith.constant 4 : i32
          %448 = arith.addi %447, %c4_i32_254 : i32
          %449 = arith.index_cast %448 : i32 to index
          %450 = memref.load %arg4[%449] : memref<3200xf32, #tpu.memory_space<smem>>
          %451 = vector.broadcast %450 : f32 to vector<8x8x128xf32>
          %452 = arith.mulf %451, %439 : vector<8x8x128xf32>
          %453 = arith.addf %434, %452 : vector<8x8x128xf32>
          %c3_i32_255 = arith.constant 3 : i32
          %454 = arith.addi %116, %c3_i32_255 : i32
          %455 = arith.index_cast %arg14 : i32 to index
          %456 = arith.index_cast %454 : i32 to index
          %c0_256 = arith.constant 0 : index
          %c0_257 = arith.constant 0 : index
          %c0_258 = arith.constant 0 : index
          %457 = vector.load %arg10[%455, %456, %c0_256, %c0_257, %c0_258] : memref<8x12x12x8x128xf32, #tpu.memory_space<vmem>>, vector<1x1x8x8x128xf32>
          %458 = vector.shape_cast %457 : vector<1x1x8x8x128xf32> to vector<8x8x128xf32>
          %c15_i32 = arith.constant 15 : i32
          %459 = arith.addi %165, %c15_i32 : i32
          %c0_i32_259 = arith.constant 0 : i32
          %460 = arith.addi %459, %c0_i32_259 : i32
          %461 = arith.index_cast %460 : i32 to index
          %462 = memref.load %arg4[%461] : memref<3200xf32, #tpu.memory_space<smem>>
          %463 = vector.broadcast %462 : f32 to vector<8x8x128xf32>
          %464 = arith.mulf %463, %458 : vector<8x8x128xf32>
          %465 = arith.addf %446, %464 : vector<8x8x128xf32>
          %c15_i32_260 = arith.constant 15 : i32
          %466 = arith.addi %168, %c15_i32_260 : i32
          %c0_i32_261 = arith.constant 0 : i32
          %467 = arith.addi %466, %c0_i32_261 : i32
          %468 = arith.index_cast %467 : i32 to index
          %469 = memref.load %arg4[%468] : memref<3200xf32, #tpu.memory_space<smem>>
          %470 = vector.broadcast %469 : f32 to vector<8x8x128xf32>
          %471 = arith.mulf %470, %458 : vector<8x8x128xf32>
          %472 = arith.addf %453, %471 : vector<8x8x128xf32>
          %c3_i32_262 = arith.constant 3 : i32
          %473 = arith.addi %116, %c3_i32_262 : i32
          %474 = arith.index_cast %arg14 : i32 to index
          %475 = arith.index_cast %473 : i32 to index
          %c1_263 = arith.constant 1 : index
          %c0_264 = arith.constant 0 : index
          %c0_265 = arith.constant 0 : index
          %476 = vector.load %arg10[%474, %475, %c1_263, %c0_264, %c0_265] : memref<8x12x12x8x128xf32, #tpu.memory_space<vmem>>, vector<1x1x8x8x128xf32>
          %477 = vector.shape_cast %476 : vector<1x1x8x8x128xf32> to vector<8x8x128xf32>
          %c15_i32_266 = arith.constant 15 : i32
          %478 = arith.addi %165, %c15_i32_266 : i32
          %c1_i32_267 = arith.constant 1 : i32
          %479 = arith.addi %478, %c1_i32_267 : i32
          %480 = arith.index_cast %479 : i32 to index
          %481 = memref.load %arg4[%480] : memref<3200xf32, #tpu.memory_space<smem>>
          %482 = vector.broadcast %481 : f32 to vector<8x8x128xf32>
          %483 = arith.mulf %482, %477 : vector<8x8x128xf32>
          %484 = arith.addf %465, %483 : vector<8x8x128xf32>
          %c15_i32_268 = arith.constant 15 : i32
          %485 = arith.addi %168, %c15_i32_268 : i32
          %c1_i32_269 = arith.constant 1 : i32
          %486 = arith.addi %485, %c1_i32_269 : i32
          %487 = arith.index_cast %486 : i32 to index
          %488 = memref.load %arg4[%487] : memref<3200xf32, #tpu.memory_space<smem>>
          %489 = vector.broadcast %488 : f32 to vector<8x8x128xf32>
          %490 = arith.mulf %489, %477 : vector<8x8x128xf32>
          %491 = arith.addf %472, %490 : vector<8x8x128xf32>
          %c3_i32_270 = arith.constant 3 : i32
          %492 = arith.addi %116, %c3_i32_270 : i32
          %493 = arith.index_cast %arg14 : i32 to index
          %494 = arith.index_cast %492 : i32 to index
          %c2_271 = arith.constant 2 : index
          %c0_272 = arith.constant 0 : index
          %c0_273 = arith.constant 0 : index
          %495 = vector.load %arg10[%493, %494, %c2_271, %c0_272, %c0_273] : memref<8x12x12x8x128xf32, #tpu.memory_space<vmem>>, vector<1x1x8x8x128xf32>
          %496 = vector.shape_cast %495 : vector<1x1x8x8x128xf32> to vector<8x8x128xf32>
          %c15_i32_274 = arith.constant 15 : i32
          %497 = arith.addi %165, %c15_i32_274 : i32
          %c2_i32_275 = arith.constant 2 : i32
          %498 = arith.addi %497, %c2_i32_275 : i32
          %499 = arith.index_cast %498 : i32 to index
          %500 = memref.load %arg4[%499] : memref<3200xf32, #tpu.memory_space<smem>>
          %501 = vector.broadcast %500 : f32 to vector<8x8x128xf32>
          %502 = arith.mulf %501, %496 : vector<8x8x128xf32>
          %503 = arith.addf %484, %502 : vector<8x8x128xf32>
          %c15_i32_276 = arith.constant 15 : i32
          %504 = arith.addi %168, %c15_i32_276 : i32
          %c2_i32_277 = arith.constant 2 : i32
          %505 = arith.addi %504, %c2_i32_277 : i32
          %506 = arith.index_cast %505 : i32 to index
          %507 = memref.load %arg4[%506] : memref<3200xf32, #tpu.memory_space<smem>>
          %508 = vector.broadcast %507 : f32 to vector<8x8x128xf32>
          %509 = arith.mulf %508, %496 : vector<8x8x128xf32>
          %510 = arith.addf %491, %509 : vector<8x8x128xf32>
          %c3_i32_278 = arith.constant 3 : i32
          %511 = arith.addi %116, %c3_i32_278 : i32
          %512 = arith.index_cast %arg14 : i32 to index
          %513 = arith.index_cast %511 : i32 to index
          %c3_279 = arith.constant 3 : index
          %c0_280 = arith.constant 0 : index
          %c0_281 = arith.constant 0 : index
          %514 = vector.load %arg10[%512, %513, %c3_279, %c0_280, %c0_281] : memref<8x12x12x8x128xf32, #tpu.memory_space<vmem>>, vector<1x1x8x8x128xf32>
          %515 = vector.shape_cast %514 : vector<1x1x8x8x128xf32> to vector<8x8x128xf32>
          %c15_i32_282 = arith.constant 15 : i32
          %516 = arith.addi %165, %c15_i32_282 : i32
          %c3_i32_283 = arith.constant 3 : i32
          %517 = arith.addi %516, %c3_i32_283 : i32
          %518 = arith.index_cast %517 : i32 to index
          %519 = memref.load %arg4[%518] : memref<3200xf32, #tpu.memory_space<smem>>
          %520 = vector.broadcast %519 : f32 to vector<8x8x128xf32>
          %521 = arith.mulf %520, %515 : vector<8x8x128xf32>
          %522 = arith.addf %503, %521 : vector<8x8x128xf32>
          %c15_i32_284 = arith.constant 15 : i32
          %523 = arith.addi %168, %c15_i32_284 : i32
          %c3_i32_285 = arith.constant 3 : i32
          %524 = arith.addi %523, %c3_i32_285 : i32
          %525 = arith.index_cast %524 : i32 to index
          %526 = memref.load %arg4[%525] : memref<3200xf32, #tpu.memory_space<smem>>
          %527 = vector.broadcast %526 : f32 to vector<8x8x128xf32>
          %528 = arith.mulf %527, %515 : vector<8x8x128xf32>
          %529 = arith.addf %510, %528 : vector<8x8x128xf32>
          %c3_i32_286 = arith.constant 3 : i32
          %530 = arith.addi %116, %c3_i32_286 : i32
          %531 = arith.index_cast %arg14 : i32 to index
          %532 = arith.index_cast %530 : i32 to index
          %c4_287 = arith.constant 4 : index
          %c0_288 = arith.constant 0 : index
          %c0_289 = arith.constant 0 : index
          %533 = vector.load %arg10[%531, %532, %c4_287, %c0_288, %c0_289] : memref<8x12x12x8x128xf32, #tpu.memory_space<vmem>>, vector<1x1x8x8x128xf32>
          %534 = vector.shape_cast %533 : vector<1x1x8x8x128xf32> to vector<8x8x128xf32>
          %c15_i32_290 = arith.constant 15 : i32
          %535 = arith.addi %165, %c15_i32_290 : i32
          %c4_i32_291 = arith.constant 4 : i32
          %536 = arith.addi %535, %c4_i32_291 : i32
          %537 = arith.index_cast %536 : i32 to index
          %538 = memref.load %arg4[%537] : memref<3200xf32, #tpu.memory_space<smem>>
          %539 = vector.broadcast %538 : f32 to vector<8x8x128xf32>
          %540 = arith.mulf %539, %534 : vector<8x8x128xf32>
          %541 = arith.addf %522, %540 : vector<8x8x128xf32>
          %c15_i32_292 = arith.constant 15 : i32
          %542 = arith.addi %168, %c15_i32_292 : i32
          %c4_i32_293 = arith.constant 4 : i32
          %543 = arith.addi %542, %c4_i32_293 : i32
          %544 = arith.index_cast %543 : i32 to index
          %545 = memref.load %arg4[%544] : memref<3200xf32, #tpu.memory_space<smem>>
          %546 = vector.broadcast %545 : f32 to vector<8x8x128xf32>
          %547 = arith.mulf %546, %534 : vector<8x8x128xf32>
          %548 = arith.addf %529, %547 : vector<8x8x128xf32>
          %c4_i32_294 = arith.constant 4 : i32
          %549 = arith.addi %116, %c4_i32_294 : i32
          %550 = arith.index_cast %arg14 : i32 to index
          %551 = arith.index_cast %549 : i32 to index
          %c0_295 = arith.constant 0 : index
          %c0_296 = arith.constant 0 : index
          %c0_297 = arith.constant 0 : index
          %552 = vector.load %arg10[%550, %551, %c0_295, %c0_296, %c0_297] : memref<8x12x12x8x128xf32, #tpu.memory_space<vmem>>, vector<1x1x8x8x128xf32>
          %553 = vector.shape_cast %552 : vector<1x1x8x8x128xf32> to vector<8x8x128xf32>
          %c20_i32 = arith.constant 20 : i32
          %554 = arith.addi %165, %c20_i32 : i32
          %c0_i32_298 = arith.constant 0 : i32
          %555 = arith.addi %554, %c0_i32_298 : i32
          %556 = arith.index_cast %555 : i32 to index
          %557 = memref.load %arg4[%556] : memref<3200xf32, #tpu.memory_space<smem>>
          %558 = vector.broadcast %557 : f32 to vector<8x8x128xf32>
          %559 = arith.mulf %558, %553 : vector<8x8x128xf32>
          %560 = arith.addf %541, %559 : vector<8x8x128xf32>
          %c20_i32_299 = arith.constant 20 : i32
          %561 = arith.addi %168, %c20_i32_299 : i32
          %c0_i32_300 = arith.constant 0 : i32
          %562 = arith.addi %561, %c0_i32_300 : i32
          %563 = arith.index_cast %562 : i32 to index
          %564 = memref.load %arg4[%563] : memref<3200xf32, #tpu.memory_space<smem>>
          %565 = vector.broadcast %564 : f32 to vector<8x8x128xf32>
          %566 = arith.mulf %565, %553 : vector<8x8x128xf32>
          %567 = arith.addf %548, %566 : vector<8x8x128xf32>
          %c4_i32_301 = arith.constant 4 : i32
          %568 = arith.addi %116, %c4_i32_301 : i32
          %569 = arith.index_cast %arg14 : i32 to index
          %570 = arith.index_cast %568 : i32 to index
          %c1_302 = arith.constant 1 : index
          %c0_303 = arith.constant 0 : index
          %c0_304 = arith.constant 0 : index
          %571 = vector.load %arg10[%569, %570, %c1_302, %c0_303, %c0_304] : memref<8x12x12x8x128xf32, #tpu.memory_space<vmem>>, vector<1x1x8x8x128xf32>
          %572 = vector.shape_cast %571 : vector<1x1x8x8x128xf32> to vector<8x8x128xf32>
          %c20_i32_305 = arith.constant 20 : i32
          %573 = arith.addi %165, %c20_i32_305 : i32
          %c1_i32_306 = arith.constant 1 : i32
          %574 = arith.addi %573, %c1_i32_306 : i32
          %575 = arith.index_cast %574 : i32 to index
          %576 = memref.load %arg4[%575] : memref<3200xf32, #tpu.memory_space<smem>>
          %577 = vector.broadcast %576 : f32 to vector<8x8x128xf32>
          %578 = arith.mulf %577, %572 : vector<8x8x128xf32>
          %579 = arith.addf %560, %578 : vector<8x8x128xf32>
          %c20_i32_307 = arith.constant 20 : i32
          %580 = arith.addi %168, %c20_i32_307 : i32
          %c1_i32_308 = arith.constant 1 : i32
          %581 = arith.addi %580, %c1_i32_308 : i32
          %582 = arith.index_cast %581 : i32 to index
          %583 = memref.load %arg4[%582] : memref<3200xf32, #tpu.memory_space<smem>>
          %584 = vector.broadcast %583 : f32 to vector<8x8x128xf32>
          %585 = arith.mulf %584, %572 : vector<8x8x128xf32>
          %586 = arith.addf %567, %585 : vector<8x8x128xf32>
          %c4_i32_309 = arith.constant 4 : i32
          %587 = arith.addi %116, %c4_i32_309 : i32
          %588 = arith.index_cast %arg14 : i32 to index
          %589 = arith.index_cast %587 : i32 to index
          %c2_310 = arith.constant 2 : index
          %c0_311 = arith.constant 0 : index
          %c0_312 = arith.constant 0 : index
          %590 = vector.load %arg10[%588, %589, %c2_310, %c0_311, %c0_312] : memref<8x12x12x8x128xf32, #tpu.memory_space<vmem>>, vector<1x1x8x8x128xf32>
          %591 = vector.shape_cast %590 : vector<1x1x8x8x128xf32> to vector<8x8x128xf32>
          %c20_i32_313 = arith.constant 20 : i32
          %592 = arith.addi %165, %c20_i32_313 : i32
          %c2_i32_314 = arith.constant 2 : i32
          %593 = arith.addi %592, %c2_i32_314 : i32
          %594 = arith.index_cast %593 : i32 to index
          %595 = memref.load %arg4[%594] : memref<3200xf32, #tpu.memory_space<smem>>
          %596 = vector.broadcast %595 : f32 to vector<8x8x128xf32>
          %597 = arith.mulf %596, %591 : vector<8x8x128xf32>
          %598 = arith.addf %579, %597 : vector<8x8x128xf32>
          %c20_i32_315 = arith.constant 20 : i32
          %599 = arith.addi %168, %c20_i32_315 : i32
          %c2_i32_316 = arith.constant 2 : i32
          %600 = arith.addi %599, %c2_i32_316 : i32
          %601 = arith.index_cast %600 : i32 to index
          %602 = memref.load %arg4[%601] : memref<3200xf32, #tpu.memory_space<smem>>
          %603 = vector.broadcast %602 : f32 to vector<8x8x128xf32>
          %604 = arith.mulf %603, %591 : vector<8x8x128xf32>
          %605 = arith.addf %586, %604 : vector<8x8x128xf32>
          %c4_i32_317 = arith.constant 4 : i32
          %606 = arith.addi %116, %c4_i32_317 : i32
          %607 = arith.index_cast %arg14 : i32 to index
          %608 = arith.index_cast %606 : i32 to index
          %c3_318 = arith.constant 3 : index
          %c0_319 = arith.constant 0 : index
          %c0_320 = arith.constant 0 : index
          %609 = vector.load %arg10[%607, %608, %c3_318, %c0_319, %c0_320] : memref<8x12x12x8x128xf32, #tpu.memory_space<vmem>>, vector<1x1x8x8x128xf32>
          %610 = vector.shape_cast %609 : vector<1x1x8x8x128xf32> to vector<8x8x128xf32>
          %c20_i32_321 = arith.constant 20 : i32
          %611 = arith.addi %165, %c20_i32_321 : i32
          %c3_i32_322 = arith.constant 3 : i32
          %612 = arith.addi %611, %c3_i32_322 : i32
          %613 = arith.index_cast %612 : i32 to index
          %614 = memref.load %arg4[%613] : memref<3200xf32, #tpu.memory_space<smem>>
          %615 = vector.broadcast %614 : f32 to vector<8x8x128xf32>
          %616 = arith.mulf %615, %610 : vector<8x8x128xf32>
          %617 = arith.addf %598, %616 : vector<8x8x128xf32>
          %c20_i32_323 = arith.constant 20 : i32
          %618 = arith.addi %168, %c20_i32_323 : i32
          %c3_i32_324 = arith.constant 3 : i32
          %619 = arith.addi %618, %c3_i32_324 : i32
          %620 = arith.index_cast %619 : i32 to index
          %621 = memref.load %arg4[%620] : memref<3200xf32, #tpu.memory_space<smem>>
          %622 = vector.broadcast %621 : f32 to vector<8x8x128xf32>
          %623 = arith.mulf %622, %610 : vector<8x8x128xf32>
          %624 = arith.addf %605, %623 : vector<8x8x128xf32>
          %c4_i32_325 = arith.constant 4 : i32
          %625 = arith.addi %116, %c4_i32_325 : i32
          %626 = arith.index_cast %arg14 : i32 to index
          %627 = arith.index_cast %625 : i32 to index
          %c4_326 = arith.constant 4 : index
          %c0_327 = arith.constant 0 : index
          %c0_328 = arith.constant 0 : index
          %628 = vector.load %arg10[%626, %627, %c4_326, %c0_327, %c0_328] : memref<8x12x12x8x128xf32, #tpu.memory_space<vmem>>, vector<1x1x8x8x128xf32>
          %629 = vector.shape_cast %628 : vector<1x1x8x8x128xf32> to vector<8x8x128xf32>
          %c20_i32_329 = arith.constant 20 : i32
          %630 = arith.addi %165, %c20_i32_329 : i32
          %c4_i32_330 = arith.constant 4 : i32
          %631 = arith.addi %630, %c4_i32_330 : i32
          %632 = arith.index_cast %631 : i32 to index
          %633 = memref.load %arg4[%632] : memref<3200xf32, #tpu.memory_space<smem>>
          %634 = vector.broadcast %633 : f32 to vector<8x8x128xf32>
          %635 = arith.mulf %634, %629 : vector<8x8x128xf32>
          %636 = arith.addf %617, %635 : vector<8x8x128xf32>
          %c20_i32_331 = arith.constant 20 : i32
          %637 = arith.addi %168, %c20_i32_331 : i32
          %c4_i32_332 = arith.constant 4 : i32
          %638 = arith.addi %637, %c4_i32_332 : i32
          %639 = arith.index_cast %638 : i32 to index
          %640 = memref.load %arg4[%639] : memref<3200xf32, #tpu.memory_space<smem>>
          %641 = vector.broadcast %640 : f32 to vector<8x8x128xf32>
          %642 = arith.mulf %641, %629 : vector<8x8x128xf32>
          %643 = arith.addf %624, %642 : vector<8x8x128xf32>
          scf.yield %636, %643 : vector<8x8x128xf32>, vector<8x8x128xf32>
        }
        %c8_i32_124 = arith.constant 8 : i32
        %121 = vector.shape_cast %120#0 : vector<8x8x128xf32> to vector<4x2x8x128xf32>
        %122 = vector.extract_strided_slice %121 {offsets = [0, 0, 0, 0], sizes = [4, 1, 8, 128], strides = [1, 1, 1, 1]} : vector<4x2x8x128xf32> to vector<4x1x8x128xf32>
        %123 = vector.shape_cast %122 : vector<4x1x8x128xf32> to vector<4x8x128xf32>
        %124 = vector.extract_strided_slice %121 {offsets = [0, 1, 0, 0], sizes = [4, 1, 8, 128], strides = [1, 1, 1, 1]} : vector<4x2x8x128xf32> to vector<4x1x8x128xf32>
        %125 = vector.shape_cast %124 : vector<4x1x8x128xf32> to vector<4x8x128xf32>
        %126 = arith.maximumf %123, %125 : vector<4x8x128xf32>
        %127 = vector.shape_cast %120#1 : vector<8x8x128xf32> to vector<4x2x8x128xf32>
        %128 = vector.extract_strided_slice %127 {offsets = [0, 0, 0, 0], sizes = [4, 1, 8, 128], strides = [1, 1, 1, 1]} : vector<4x2x8x128xf32> to vector<4x1x8x128xf32>
        %129 = vector.shape_cast %128 : vector<4x1x8x128xf32> to vector<4x8x128xf32>
        %130 = vector.extract_strided_slice %127 {offsets = [0, 1, 0, 0], sizes = [4, 1, 8, 128], strides = [1, 1, 1, 1]} : vector<4x2x8x128xf32> to vector<4x1x8x128xf32>
        %131 = vector.shape_cast %130 : vector<4x1x8x128xf32> to vector<4x8x128xf32>
        %132 = arith.maximumf %129, %131 : vector<4x8x128xf32>
        %133 = arith.maximumf %108, %126 : vector<4x8x128xf32>
        %134 = arith.index_cast %96 : i32 to index
        %135 = memref.load %arg5[%134] : memref<16xf32, #tpu.memory_space<smem>>
        %136 = vector.broadcast %135 : f32 to vector<4x8x128xf32>
        %137 = arith.addf %133, %136 : vector<4x8x128xf32>
        %cst_125 = arith.constant 0.000000e+00 : f32
        %138 = vector.broadcast %cst_125 : f32 to vector<4x8x128xf32>
        %139 = arith.cmpf ogt, %137, %138 : vector<4x8x128xf32>
        %cst_126 = arith.constant 0.00999999977 : f32
        %140 = vector.broadcast %cst_126 : f32 to vector<4x8x128xf32>
        %141 = arith.mulf %140, %137 : vector<4x8x128xf32>
        %142 = arith.select %139, %137, %141 : vector<4x8x128xi1>, vector<4x8x128xf32>
        %143 = arith.maximumf %114, %132 : vector<4x8x128xf32>
        %144 = arith.index_cast %97 : i32 to index
        %145 = memref.load %arg5[%144] : memref<16xf32, #tpu.memory_space<smem>>
        %146 = vector.broadcast %145 : f32 to vector<4x8x128xf32>
        %147 = arith.addf %143, %146 : vector<4x8x128xf32>
        %cst_127 = arith.constant 0.000000e+00 : f32
        %148 = vector.broadcast %cst_127 : f32 to vector<4x8x128xf32>
        %149 = arith.cmpf ogt, %147, %148 : vector<4x8x128xf32>
        %cst_128 = arith.constant 0.00999999977 : f32
        %150 = vector.broadcast %cst_128 : f32 to vector<4x8x128xf32>
        %151 = arith.mulf %150, %147 : vector<4x8x128xf32>
        %152 = arith.select %149, %147, %151 : vector<4x8x128xi1>, vector<4x8x128xf32>
        %c16_i32 = arith.constant 16 : i32
        %153 = arith.muli %96, %c16_i32 : i32
        %c4_i32_129 = arith.constant 4 : i32
        %154 = arith.muli %arg12, %c4_i32_129 : i32
        %155 = arith.addi %153, %154 : i32
        %156 = arith.index_cast %155 : i32 to index
        %c0_130 = arith.constant 0 : index
        %c0_131 = arith.constant 0 : index
        %157 = vector.load %arg11[%156, %c0_130, %c0_131] : memref<256x8x128xf32, #tpu.memory_space<vmem>>, vector<4x8x128xf32>
        tpu.vector_store %arg11[%156, %c0_130, %c0_131], %142 {strides = array<i32>} : memref<256x8x128xf32, #tpu.memory_space<vmem>>, vector<4x8x128xf32>,
        %c16_i32_132 = arith.constant 16 : i32
        %158 = arith.muli %97, %c16_i32_132 : i32
        %c4_i32_133 = arith.constant 4 : i32
        %159 = arith.muli %arg12, %c4_i32_133 : i32
        %160 = arith.addi %158, %159 : i32
        %161 = arith.index_cast %160 : i32 to index
        %c0_134 = arith.constant 0 : index
        %c0_135 = arith.constant 0 : index
        %162 = vector.load %arg11[%161, %c0_134, %c0_135] : memref<256x8x128xf32, #tpu.memory_space<vmem>>, vector<4x8x128xf32>
        tpu.vector_store %arg11[%161, %c0_134, %c0_135], %152 {strides = array<i32>} : memref<256x8x128xf32, #tpu.memory_space<vmem>>, vector<4x8x128xf32>,
      }
      %c8_i32_108 = arith.constant 8 : i32
    }
    %c4_i32_48 = arith.constant 4 : i32
    %cst_49 = arith.constant 0.000000e+00 : f32
    %23 = vector.broadcast %cst_49 : f32 to vector<8x128xf32>
    %cst_50 = arith.constant 0.000000e+00 : f32
    %24 = vector.broadcast %cst_50 : f32 to vector<8x128xf32>
    %cst_51 = arith.constant 0.000000e+00 : f32
    %25 = vector.broadcast %cst_51 : f32 to vector<8x128xf32>
    %cst_52 = arith.constant 0.000000e+00 : f32
    %26 = vector.broadcast %cst_52 : f32 to vector<8x128xf32>
    %cst_53 = arith.constant 0.000000e+00 : f32
    %27 = vector.broadcast %cst_53 : f32 to vector<8x128xf32>
    %cst_54 = arith.constant 0.000000e+00 : f32
    %28 = vector.broadcast %cst_54 : f32 to vector<8x128xf32>
    %cst_55 = arith.constant 0.000000e+00 : f32
    %29 = vector.broadcast %cst_55 : f32 to vector<8x128xf32>
    %cst_56 = arith.constant 0.000000e+00 : f32
    %30 = vector.broadcast %cst_56 : f32 to vector<8x128xf32>
    %cst_57 = arith.constant 0.000000e+00 : f32
    %31 = vector.broadcast %cst_57 : f32 to vector<8x128xf32>
    %cst_58 = arith.constant 0.000000e+00 : f32
    %32 = vector.broadcast %cst_58 : f32 to vector<8x128xf32>
    %c0_i32_59 = arith.constant 0 : i32
    %c256_i32 = arith.constant 256 : i32
    %33 = arith.addi %c0_i32_59, %c256_i32 : i32
    %c1_i32_60 = arith.constant 1 : i32
    %34:10 = scf.for %arg12 = %c0_i32_59 to %33 step %c1_i32_60 iter_args(%arg13 = %23, %arg14 = %24, %arg15 = %25, %arg16 = %26, %arg17 = %27, %arg18 = %28, %arg19 = %29, %arg20 = %30, %arg21 = %31, %arg22 = %32) -> (vector<8x128xf32>, vector<8x128xf32>, vector<8x128xf32>, vector<8x128xf32>, vector<8x128xf32>, vector<8x128xf32>, vector<8x128xf32>, vector<8x128xf32>, vector<8x128xf32>, vector<8x128xf32>)  : i32 {
      %95 = arith.index_cast %arg12 : i32 to index
      %c0_105 = arith.constant 0 : index
      %c0_106 = arith.constant 0 : index
      %96 = vector.load %arg11[%95, %c0_105, %c0_106] : memref<256x8x128xf32, #tpu.memory_space<vmem>>, vector<1x8x128xf32>
      %97 = vector.shape_cast %96 : vector<1x8x128xf32> to vector<8x128xf32>
      %c0_i32_107 = arith.constant 0 : i32
      %98 = arith.addi %c0_i32_107, %arg12 : i32
      %99 = arith.index_cast %98 : i32 to index
      %100 = memref.load %arg6[%99] : memref<2560xf32, #tpu.memory_space<smem>>
      %101 = vector.broadcast %100 : f32 to vector<8x128xf32>
      %102 = arith.mulf %101, %97 : vector<8x128xf32>
      %103 = arith.addf %arg13, %102 : vector<8x128xf32>
      %c256_i32_108 = arith.constant 256 : i32
      %104 = arith.addi %c256_i32_108, %arg12 : i32
      %105 = arith.index_cast %104 : i32 to index
      %106 = memref.load %arg6[%105] : memref<2560xf32, #tpu.memory_space<smem>>
      %107 = vector.broadcast %106 : f32 to vector<8x128xf32>
      %108 = arith.mulf %107, %97 : vector<8x128xf32>
      %109 = arith.addf %arg14, %108 : vector<8x128xf32>
      %c512_i32 = arith.constant 512 : i32
      %110 = arith.addi %c512_i32, %arg12 : i32
      %111 = arith.index_cast %110 : i32 to index
      %112 = memref.load %arg6[%111] : memref<2560xf32, #tpu.memory_space<smem>>
      %113 = vector.broadcast %112 : f32 to vector<8x128xf32>
      %114 = arith.mulf %113, %97 : vector<8x128xf32>
      %115 = arith.addf %arg15, %114 : vector<8x128xf32>
      %c768_i32 = arith.constant 768 : i32
      %116 = arith.addi %c768_i32, %arg12 : i32
      %117 = arith.index_cast %116 : i32 to index
      %118 = memref.load %arg6[%117] : memref<2560xf32, #tpu.memory_space<smem>>
      %119 = vector.broadcast %118 : f32 to vector<8x128xf32>
      %120 = arith.mulf %119, %97 : vector<8x128xf32>
      %121 = arith.addf %arg16, %120 : vector<8x128xf32>
      %c1024_i32 = arith.constant 1024 : i32
      %122 = arith.addi %c1024_i32, %arg12 : i32
      %123 = arith.index_cast %122 : i32 to index
      %124 = memref.load %arg6[%123] : memref<2560xf32, #tpu.memory_space<smem>>
      %125 = vector.broadcast %124 : f32 to vector<8x128xf32>
      %126 = arith.mulf %125, %97 : vector<8x128xf32>
      %127 = arith.addf %arg17, %126 : vector<8x128xf32>
      %c1280_i32 = arith.constant 1280 : i32
      %128 = arith.addi %c1280_i32, %arg12 : i32
      %129 = arith.index_cast %128 : i32 to index
      %130 = memref.load %arg6[%129] : memref<2560xf32, #tpu.memory_space<smem>>
      %131 = vector.broadcast %130 : f32 to vector<8x128xf32>
      %132 = arith.mulf %131, %97 : vector<8x128xf32>
      %133 = arith.addf %arg18, %132 : vector<8x128xf32>
      %c1536_i32 = arith.constant 1536 : i32
      %134 = arith.addi %c1536_i32, %arg12 : i32
      %135 = arith.index_cast %134 : i32 to index
      %136 = memref.load %arg6[%135] : memref<2560xf32, #tpu.memory_space<smem>>
      %137 = vector.broadcast %136 : f32 to vector<8x128xf32>
      %138 = arith.mulf %137, %97 : vector<8x128xf32>
      %139 = arith.addf %arg19, %138 : vector<8x128xf32>
      %c1792_i32 = arith.constant 1792 : i32
      %140 = arith.addi %c1792_i32, %arg12 : i32
      %141 = arith.index_cast %140 : i32 to index
      %142 = memref.load %arg6[%141] : memref<2560xf32, #tpu.memory_space<smem>>
      %143 = vector.broadcast %142 : f32 to vector<8x128xf32>
      %144 = arith.mulf %143, %97 : vector<8x128xf32>
      %145 = arith.addf %arg20, %144 : vector<8x128xf32>
      %c2048_i32 = arith.constant 2048 : i32
      %146 = arith.addi %c2048_i32, %arg12 : i32
      %147 = arith.index_cast %146 : i32 to index
      %148 = memref.load %arg6[%147] : memref<2560xf32, #tpu.memory_space<smem>>
      %149 = vector.broadcast %148 : f32 to vector<8x128xf32>
      %150 = arith.mulf %149, %97 : vector<8x128xf32>
      %151 = arith.addf %arg21, %150 : vector<8x128xf32>
      %c2304_i32 = arith.constant 2304 : i32
      %152 = arith.addi %c2304_i32, %arg12 : i32
      %153 = arith.index_cast %152 : i32 to index
      %154 = memref.load %arg6[%153] : memref<2560xf32, #tpu.memory_space<smem>>
      %155 = vector.broadcast %154 : f32 to vector<8x128xf32>
      %156 = arith.mulf %155, %97 : vector<8x128xf32>
      %157 = arith.addf %arg22, %156 : vector<8x128xf32>
      scf.yield %103, %109, %115, %121, %127, %133, %139, %145, %151, %157 : vector<8x128xf32>, vector<8x128xf32>, vector<8x128xf32>, vector<8x128xf32>, vector<8x128xf32>, vector<8x128xf32>, vector<8x128xf32>, vector<8x128xf32>, vector<8x128xf32>, vector<8x128xf32>
    }
    %c256_i32_61 = arith.constant 256 : i32
    %c0_62 = arith.constant 0 : index
    %35 = memref.load %arg7[%c0_62] : memref<10xf32, #tpu.memory_space<smem>>
    %36 = vector.broadcast %35 : f32 to vector<8x128xf32>
    %37 = arith.addf %34#0, %36 : vector<8x128xf32>
    %c0_63 = arith.constant 0 : index
    %c0_64 = arith.constant 0 : index
    %c0_65 = arith.constant 0 : index
    %c0_66 = arith.constant 0 : index
    %38 = vector.load %arg8[%c0_63, %c0_64, %c0_65, %c0_66] : memref<1x10x8x128xf32, #tpu.memory_space<vmem>>, vector<1x1x8x128xf32>
    %39 = vector.shape_cast %38 : vector<1x1x8x128xf32> to vector<8x128xf32>
    %40 = vector.shape_cast %37 : vector<8x128xf32> to vector<1x1x8x128xf32>
    tpu.vector_store %arg8[%c0_63, %c0_64, %c0_65, %c0_66], %40 {strides = array<i32>} : memref<1x10x8x128xf32, #tpu.memory_space<vmem>>, vector<1x1x8x128xf32>,
    %c1_67 = arith.constant 1 : index
    %41 = memref.load %arg7[%c1_67] : memref<10xf32, #tpu.memory_space<smem>>
    %42 = vector.broadcast %41 : f32 to vector<8x128xf32>
    %43 = arith.addf %34#1, %42 : vector<8x128xf32>
    %c0_68 = arith.constant 0 : index
    %c1_69 = arith.constant 1 : index
    %c0_70 = arith.constant 0 : index
    %c0_71 = arith.constant 0 : index
    %44 = vector.load %arg8[%c0_68, %c1_69, %c0_70, %c0_71] : memref<1x10x8x128xf32, #tpu.memory_space<vmem>>, vector<1x1x8x128xf32>
    %45 = vector.shape_cast %44 : vector<1x1x8x128xf32> to vector<8x128xf32>
    %46 = vector.shape_cast %43 : vector<8x128xf32> to vector<1x1x8x128xf32>
    tpu.vector_store %arg8[%c0_68, %c1_69, %c0_70, %c0_71], %46 {strides = array<i32>} : memref<1x10x8x128xf32, #tpu.memory_space<vmem>>, vector<1x1x8x128xf32>,
    %c2_72 = arith.constant 2 : index
    %47 = memref.load %arg7[%c2_72] : memref<10xf32, #tpu.memory_space<smem>>
    %48 = vector.broadcast %47 : f32 to vector<8x128xf32>
    %49 = arith.addf %34#2, %48 : vector<8x128xf32>
    %c0_73 = arith.constant 0 : index
    %c2_74 = arith.constant 2 : index
    %c0_75 = arith.constant 0 : index
    %c0_76 = arith.constant 0 : index
    %50 = vector.load %arg8[%c0_73, %c2_74, %c0_75, %c0_76] : memref<1x10x8x128xf32, #tpu.memory_space<vmem>>, vector<1x1x8x128xf32>
    %51 = vector.shape_cast %50 : vector<1x1x8x128xf32> to vector<8x128xf32>
    %52 = vector.shape_cast %49 : vector<8x128xf32> to vector<1x1x8x128xf32>
    tpu.vector_store %arg8[%c0_73, %c2_74, %c0_75, %c0_76], %52 {strides = array<i32>} : memref<1x10x8x128xf32, #tpu.memory_space<vmem>>, vector<1x1x8x128xf32>,
    %c3 = arith.constant 3 : index
    %53 = memref.load %arg7[%c3] : memref<10xf32, #tpu.memory_space<smem>>
    %54 = vector.broadcast %53 : f32 to vector<8x128xf32>
    %55 = arith.addf %34#3, %54 : vector<8x128xf32>
    %c0_77 = arith.constant 0 : index
    %c3_78 = arith.constant 3 : index
    %c0_79 = arith.constant 0 : index
    %c0_80 = arith.constant 0 : index
    %56 = vector.load %arg8[%c0_77, %c3_78, %c0_79, %c0_80] : memref<1x10x8x128xf32, #tpu.memory_space<vmem>>, vector<1x1x8x128xf32>
    %57 = vector.shape_cast %56 : vector<1x1x8x128xf32> to vector<8x128xf32>
    %58 = vector.shape_cast %55 : vector<8x128xf32> to vector<1x1x8x128xf32>
    tpu.vector_store %arg8[%c0_77, %c3_78, %c0_79, %c0_80], %58 {strides = array<i32>} : memref<1x10x8x128xf32, #tpu.memory_space<vmem>>, vector<1x1x8x128xf32>,
    %c4 = arith.constant 4 : index
    %59 = memref.load %arg7[%c4] : memref<10xf32, #tpu.memory_space<smem>>
    %60 = vector.broadcast %59 : f32 to vector<8x128xf32>
    %61 = arith.addf %34#4, %60 : vector<8x128xf32>
    %c0_81 = arith.constant 0 : index
    %c4_82 = arith.constant 4 : index
    %c0_83 = arith.constant 0 : index
    %c0_84 = arith.constant 0 : index
    %62 = vector.load %arg8[%c0_81, %c4_82, %c0_83, %c0_84] : memref<1x10x8x128xf32, #tpu.memory_space<vmem>>, vector<1x1x8x128xf32>
    %63 = vector.shape_cast %62 : vector<1x1x8x128xf32> to vector<8x128xf32>
    %64 = vector.shape_cast %61 : vector<8x128xf32> to vector<1x1x8x128xf32>
    tpu.vector_store %arg8[%c0_81, %c4_82, %c0_83, %c0_84], %64 {strides = array<i32>} : memref<1x10x8x128xf32, #tpu.memory_space<vmem>>, vector<1x1x8x128xf32>,
    %c5 = arith.constant 5 : index
    %65 = memref.load %arg7[%c5] : memref<10xf32, #tpu.memory_space<smem>>
    %66 = vector.broadcast %65 : f32 to vector<8x128xf32>
    %67 = arith.addf %34#5, %66 : vector<8x128xf32>
    %c0_85 = arith.constant 0 : index
    %c5_86 = arith.constant 5 : index
    %c0_87 = arith.constant 0 : index
    %c0_88 = arith.constant 0 : index
    %68 = vector.load %arg8[%c0_85, %c5_86, %c0_87, %c0_88] : memref<1x10x8x128xf32, #tpu.memory_space<vmem>>, vector<1x1x8x128xf32>
    %69 = vector.shape_cast %68 : vector<1x1x8x128xf32> to vector<8x128xf32>
    %70 = vector.shape_cast %67 : vector<8x128xf32> to vector<1x1x8x128xf32>
    tpu.vector_store %arg8[%c0_85, %c5_86, %c0_87, %c0_88], %70 {strides = array<i32>} : memref<1x10x8x128xf32, #tpu.memory_space<vmem>>, vector<1x1x8x128xf32>,
    %c6 = arith.constant 6 : index
    %71 = memref.load %arg7[%c6] : memref<10xf32, #tpu.memory_space<smem>>
    %72 = vector.broadcast %71 : f32 to vector<8x128xf32>
    %73 = arith.addf %34#6, %72 : vector<8x128xf32>
    %c0_89 = arith.constant 0 : index
    %c6_90 = arith.constant 6 : index
    %c0_91 = arith.constant 0 : index
    %c0_92 = arith.constant 0 : index
    %74 = vector.load %arg8[%c0_89, %c6_90, %c0_91, %c0_92] : memref<1x10x8x128xf32, #tpu.memory_space<vmem>>, vector<1x1x8x128xf32>
    %75 = vector.shape_cast %74 : vector<1x1x8x128xf32> to vector<8x128xf32>
    %76 = vector.shape_cast %73 : vector<8x128xf32> to vector<1x1x8x128xf32>
    tpu.vector_store %arg8[%c0_89, %c6_90, %c0_91, %c0_92], %76 {strides = array<i32>} : memref<1x10x8x128xf32, #tpu.memory_space<vmem>>, vector<1x1x8x128xf32>,
    %c7 = arith.constant 7 : index
    %77 = memref.load %arg7[%c7] : memref<10xf32, #tpu.memory_space<smem>>
    %78 = vector.broadcast %77 : f32 to vector<8x128xf32>
    %79 = arith.addf %34#7, %78 : vector<8x128xf32>
    %c0_93 = arith.constant 0 : index
    %c7_94 = arith.constant 7 : index
    %c0_95 = arith.constant 0 : index
    %c0_96 = arith.constant 0 : index
    %80 = vector.load %arg8[%c0_93, %c7_94, %c0_95, %c0_96] : memref<1x10x8x128xf32, #tpu.memory_space<vmem>>, vector<1x1x8x128xf32>
    %81 = vector.shape_cast %80 : vector<1x1x8x128xf32> to vector<8x128xf32>
    %82 = vector.shape_cast %79 : vector<8x128xf32> to vector<1x1x8x128xf32>
    tpu.vector_store %arg8[%c0_93, %c7_94, %c0_95, %c0_96], %82 {strides = array<i32>} : memref<1x10x8x128xf32, #tpu.memory_space<vmem>>, vector<1x1x8x128xf32>,
    %c8 = arith.constant 8 : index
    %83 = memref.load %arg7[%c8] : memref<10xf32, #tpu.memory_space<smem>>
    %84 = vector.broadcast %83 : f32 to vector<8x128xf32>
    %85 = arith.addf %34#8, %84 : vector<8x128xf32>
    %c0_97 = arith.constant 0 : index
    %c8_98 = arith.constant 8 : index
    %c0_99 = arith.constant 0 : index
    %c0_100 = arith.constant 0 : index
    %86 = vector.load %arg8[%c0_97, %c8_98, %c0_99, %c0_100] : memref<1x10x8x128xf32, #tpu.memory_space<vmem>>, vector<1x1x8x128xf32>
    %87 = vector.shape_cast %86 : vector<1x1x8x128xf32> to vector<8x128xf32>
    %88 = vector.shape_cast %85 : vector<8x128xf32> to vector<1x1x8x128xf32>
    tpu.vector_store %arg8[%c0_97, %c8_98, %c0_99, %c0_100], %88 {strides = array<i32>} : memref<1x10x8x128xf32, #tpu.memory_space<vmem>>, vector<1x1x8x128xf32>,
    %c9 = arith.constant 9 : index
    %89 = memref.load %arg7[%c9] : memref<10xf32, #tpu.memory_space<smem>>
    %90 = vector.broadcast %89 : f32 to vector<8x128xf32>
    %91 = arith.addf %34#9, %90 : vector<8x128xf32>
    %c0_101 = arith.constant 0 : index
    %c9_102 = arith.constant 9 : index
    %c0_103 = arith.constant 0 : index
    %c0_104 = arith.constant 0 : index
    %92 = vector.load %arg8[%c0_101, %c9_102, %c0_103, %c0_104] : memref<1x10x8x128xf32, #tpu.memory_space<vmem>>, vector<1x1x8x128xf32>
    %93 = vector.shape_cast %92 : vector<1x1x8x128xf32> to vector<8x128xf32>
    %94 = vector.shape_cast %91 : vector<8x128xf32> to vector<1x1x8x128xf32>
    tpu.vector_store %arg8[%c0_101, %c9_102, %c0_103, %c0_104], %94 {strides = array<i32>} : memref<1x10x8x128xf32, #tpu.memory_space<vmem>>, vector<1x1x8x128xf32>,
    return
  }
  func.func @transform_0(%arg0: i32) -> (i32, i32, i32, i32, i32) {
    %c0_i32 = arith.constant 0 : i32
    %c0_i32_0 = arith.constant 0 : i32
    %c0_i32_1 = arith.constant 0 : i32
    %c0_i32_2 = arith.constant 0 : i32
    %c0_i32_3 = arith.constant 0 : i32
    return %arg0, %c0_i32, %c0_i32_0, %c0_i32_1, %c0_i32_2 : i32, i32, i32, i32, i32
  }
  func.func @transform_1(%arg0: i32) -> i32 {
    %c0_i32 = arith.constant 0 : i32
    %c0_i32_0 = arith.constant 0 : i32
    return %c0_i32 : i32
  }
  func.func @transform_2(%arg0: i32) -> i32 {
    %c0_i32 = arith.constant 0 : i32
    %c0_i32_0 = arith.constant 0 : i32
    return %c0_i32 : i32
  }
  func.func @transform_3(%arg0: i32) -> i32 {
    %c0_i32 = arith.constant 0 : i32
    %c0_i32_0 = arith.constant 0 : i32
    return %c0_i32 : i32
  }
  func.func @transform_4(%arg0: i32) -> i32 {
    %c0_i32 = arith.constant 0 : i32
    %c0_i32_0 = arith.constant 0 : i32
    return %c0_i32 : i32
  }
  func.func @transform_5(%arg0: i32) -> i32 {
    %c0_i32 = arith.constant 0 : i32
    %c0_i32_0 = arith.constant 0 : i32
    return %c0_i32 : i32
  }
  func.func @transform_6(%arg0: i32) -> i32 {
    %c0_i32 = arith.constant 0 : i32
    %c0_i32_0 = arith.constant 0 : i32
    return %c0_i32 : i32
  }
  func.func @transform_7(%arg0: i32) -> (i32, i32, i32, i32) {
    %c0_i32 = arith.constant 0 : i32
    %c0_i32_0 = arith.constant 0 : i32
    %c0_i32_1 = arith.constant 0 : i32
    %c0_i32_2 = arith.constant 0 : i32
    return %arg0, %c0_i32, %c0_i32_0, %c0_i32_1 : i32, i32, i32, i32
  }
}

</mosaic_0001>

<bundles_post_ra>
// kernel: tpu_custom_call.1
= control target key start
LH: loop header
LB: loop body
LE: loop exit
PB: predicated region body
PF: predicated region fallthrough
CT: control target
= control target key end

     0   :  { %12 = vsyncpa [#allocation6], 0  ;;  %s10760_s0 = inlined_call_operand.hbm [shape: f32[1,16,16,8,128], index: 0, kind: input, shape index: {}]   ;;  %s10761_s1 = inlined_call_operand.vmem [shape: f32[72], index: 1, kind: input, shape index: {}]   ;;  %s10762_s2 = inlined_call_operand.vmem [shape: f32[8], index: 2, kind: input, shape index: {}]   ;;  %s10763_s3 = inlined_call_operand.hbm [shape: f32[3200], index: 3, kind: input, shape index: {}]   ;;  %s10764_s4 = inlined_call_operand.vmem [shape: f32[16], index: 4, kind: input, shape index: {}]   ;;  %s10765_s5 = inlined_call_operand.hbm [shape: f32[2560], index: 5, kind: input, shape index: {}]   ;;  %s10766_s6 = inlined_call_operand.vmem [shape: f32[10], index: 6, kind: input, shape index: {}]   ;;  %s10767_s7 = inlined_call_operand.hbm [shape: f32[1,10,8,128], index: 7, kind: output, shape index: {}]  }
   0x1   :  { %13 = vsyncpa [#allocation9], 0 }
   0x2   :  { %14 = vsyncpa [#allocation12], 0 }
   0x3   :  { %15 = vsyncpa [#allocation8], 0 }
   0x4   :  { %16 = vsyncpa [#allocation16], 0 }
   0x5   :  { %17 = vsyncpa [#allocation18], 0  ;;  %s47_s26 = sshll.u32 %s10762_s2, 4  ;;  %s48_s26 = int_to_ptr.vmem [resolvable:$true] %s47_s26 }
   0x6   :  { %18 = vsyncpa [#allocation7], 0  ;;  %s6583_s27 = scalar_lea.vmem %s48_s26, 16  ;;  %p6588_p1 = scmp.lt.s32.totalorder %s48_s26, %s48_s26 }
   0x7   :  { %p6584_p0 = scmp.ne.s32.totalorder %s48_s26, %s6583_s27  ;;  %p6589_p2 = scmp.lt.s32.totalorder %s6583_s27, %s6583_s27 }
   0x9   :  { %p6590_p3 = por %p6589_p2, %p6588_p1 }
   0xb   :  { %p6591_p4 = pnand %p6590_p3, %p6584_p0 }
   0xd   :  { %6594 = shalt.err (!%p6591_p4)
}
   0xe   :  { %s7103_s28 = smov [#allocation11]   ;;  %s7104_s29 = smov [#allocation5]  }
   0xf   :  { %50 = dma.vmem_to_smem %s48_s26, 16, %s7103_s28, [#allocation12]  }
  0x10   :  { %s24_s30 = sshll.u32 %s7104_s29, 4  ;;  %s25_s30 = int_to_ptr.vmem [resolvable:$true] %s24_s30 }
  0x11   :  { %s6603_s8 = scalar_lea.vmem %s25_s30, 32768  ;;  %p6608_p6 = scmp.lt.s32.totalorder %s25_s30, %s25_s30 }
  0x12   :  { %p6604_p5 = scmp.ne.s32.totalorder %s25_s30, %s6603_s8  ;;  %p6609_p7 = scmp.lt.s32.totalorder %s6603_s8, %s6603_s8 }
  0x14   :  { %p6610_p8 = por %p6609_p7, %p6608_p6 }
  0x16   :  { %p6611_p9 = pnand %p6610_p8, %p6604_p5 }
  0x18   :  { %6614 = shalt.err (!%p6611_p9)
}
  0x19   :  { %s7105_s2 = smov 128   ;;  %s7106_s9 = smov 8  }
  0x1a   :  { %30 = dma.hbm_to_vmem [thread:$0]  %s10760_s0, 32768, %s25_s30, [#allocation6], %s7105_s2, %s7105_s2, %s7106_s9  }
  0x1b   :  { %s37_s14 = sshll.u32 %s10761_s1, 4  ;;  %s38_s14 = int_to_ptr.vmem [resolvable:$true] %s37_s14 }
  0x1c   :  { %s6615_s15 = scalar_lea.vmem %s38_s14, 16  ;;  %p6620_p11 = scmp.lt.s32.totalorder %s38_s14, %s38_s14 }
  0x1d   :  { %p6616_p10 = scmp.ne.s32.totalorder %s38_s14, %s6615_s15  ;;  %p6621_p12 = scmp.lt.s32.totalorder %s6615_s15, %s6615_s15 }
  0x1f   :  { %p6622_p13 = por %p6621_p12, %p6620_p11 }
  0x21   :  { %p6623_p0 = pnand %p6622_p13, %p6616_p10 }
  0x23   :  { %6626 = shalt.err (!%p6623_p0)
}
  0x24   :  { %s7107_s16 = smov [#allocation10]   ;;  %s7108_s17 = smov [#allocation13]  }
  0x25   :  { %40 = dma.vmem_to_smem %s38_s14, 16, %s7107_s16, [#allocation9]  }
  0x26   :  { %58 = dma.hbm_to_smem %s10763_s3, 400, %s7108_s17, [#allocation8]  }
  0x27   :  { %s65_s21 = sshll.u32 %s10764_s4, 4  ;;  %s66_s21 = int_to_ptr.vmem [resolvable:$true] %s65_s21 }
  0x28   :  { %s6635_s1 = scalar_lea.vmem %s66_s21, 16  ;;  %p6640_p2 = scmp.lt.s32.totalorder %s66_s21, %s66_s21 }
  0x29   :  { %p6636_p1 = scmp.ne.s32.totalorder %s66_s21, %s6635_s1  ;;  %p6641_p3 = scmp.lt.s32.totalorder %s6635_s1, %s6635_s1 }
  0x2b   :  { %p6642_p4 = por %p6641_p3, %p6640_p2 }
  0x2d   :  { %p6643_p5 = pnand %p6642_p4, %p6636_p1 }
  0x2f   :  { %6646 = shalt.err (!%p6643_p5)
}
  0x30   :  { %s7109_s22 = smov [#allocation14]   ;;  %s7110_s23 = smov [#allocation15]  }
  0x31   :  { %68 = dma.vmem_to_smem %s66_s21, 16, %s7109_s22, [#allocation12]  }
  0x32   :  { %76 = dma.hbm_to_smem %s10765_s5, 320, %s7110_s23, [#allocation16]  }
  0x33   :  { %s83_s27 = sshll.u32 %s10766_s6, 4  ;;  %s84_s27 = int_to_ptr.vmem [resolvable:$true] %s83_s27 }
  0x34   :  { %s6655_s4 = scalar_lea.vmem %s84_s27, 16  ;;  %p6660_p7 = scmp.lt.s32.totalorder %s84_s27, %s84_s27 }
  0x35   :  { %p6656_p6 = scmp.ne.s32.totalorder %s84_s27, %s6655_s4  ;;  %p6661_p8 = scmp.lt.s32.totalorder %s6655_s4, %s6655_s4 }
  0x37   :  { %p6662_p9 = por %p6661_p8, %p6660_p7 }
  0x39   :  { %p6663_p10 = pnand %p6662_p9, %p6656_p6 }
  0x3b   :  { %6666 = shalt.err (!%p6663_p10)
}
  0x3c   :  { %s7111_s28 = smov [#allocation17]  }
  0x3d   :  { %86 = dma.vmem_to_smem %s84_s27, 16, %s7111_s28, [#allocation18]  }
  0x3e   :  { %6887 = dma.done.wait [#allocation6], 32768  }
  0x3f   :  { %6888 = vsyncadd [#allocation6], 4294934528 }
  0x40   :  { %6889 = dma.done.wait [#allocation9], 16  }
  0x41   :  { %6890 = vsyncadd [#allocation9], 4294967280 }
  0x42   :  { %6891 = dma.done.wait [#allocation12], 16  }
  0x43   :  { %6892 = vsyncadd [#allocation12], 4294967280 }
  0x44   :  { %6893 = dma.done.wait [#allocation8], 400  }
  0x45   :  { %6894 = vsyncadd [#allocation8], 4294966896 }
  0x46   :  { %6895 = dma.done.wait [#allocation12], 16  }
  0x47   :  { %6896 = vsyncadd [#allocation12], 4294967280 }
  0x48   :  { %6897 = dma.done.wait [#allocation16], 320  }
  0x49   :  { %6898 = vsyncadd [#allocation16], 4294966976 }
  0x4a   :  { %6899 = dma.done.wait [#allocation18], 16  }
  0x4b   :  { %6900 = vsyncadd [#allocation18], 4294967280 }
  0x4c   :  { %108 = sfence }
  0x4d   :  { %v7178_v0 = vld [vmem:[#allocation5] sm:$0xff]  ;;  %v7180_v1 = vld [vmem:[#allocation5 + $0x8] sm:$0xff]  ;;  %v7182_v2 = vld [vmem:[#allocation5 + $0x10] sm:$0xff]  ;;  %v7112_v3 = vmov 0.0   ;;  %s7897_s5 = smov 0  }
  0x4e   :  { %109 = vst [vmem:[#allocation2] sm:$0xff] %v7112_v3  ;;  %110 = vst [vmem:[#allocation2 + $0x8] sm:$0xff] %v7112_v3  ;;  %v183_v5 = vld [vmem:[#allocation5 + $0x18] sm:$0xff]  ;;  %v184_v6 = vld [vmem:[#allocation5 + $0x20] sm:$0xff] }
  0x4f   :  { %111 = vst [vmem:[#allocation2 + $0x10] sm:$0xff] %v7112_v3  ;;  %112 = vst [vmem:[#allocation2 + $0x18] sm:$0xff] %v7112_v3  ;;  %v185_v7 = vld [vmem:[#allocation5 + $0x28] sm:$0xff]  ;;  %v186_v8 = vld [vmem:[#allocation5 + $0x30] sm:$0xff] }
  0x50   :  { %113 = vst [vmem:[#allocation2 + $0x20] sm:$0xff] %v7112_v3  ;;  %114 = vst [vmem:[#allocation2 + $0x28] sm:$0xff] %v7112_v3  ;;  %v187_v9 = vld [vmem:[#allocation5 + $0x38] sm:$0xff]  ;;  %v188_v10 = vld [vmem:[#allocation5 + $0x40] sm:$0xff] }
  0x51   :  { %115 = vst [vmem:[#allocation2 + $0x30] sm:$0xff] %v7112_v3  ;;  %116 = vst [vmem:[#allocation2 + $0x38] sm:$0xff] %v7112_v3  ;;  %v189_v11 = vld [vmem:[#allocation5 + $0x48] sm:$0xff]  ;;  %v190_v12 = vld [vmem:[#allocation5 + $0x50] sm:$0xff] }
  0x52   :  { %117 = vst [vmem:[#allocation2 + $0x40] sm:$0xff] %v7112_v3  ;;  %118 = vst [vmem:[#allocation2 + $0x48] sm:$0xff] %v7112_v3  ;;  %v191_v13 = vld [vmem:[#allocation5 + $0x58] sm:$0xff]  ;;  %v192_v14 = vld [vmem:[#allocation5 + $0x60] sm:$0xff] }
  0x53   :  { %119 = vst [vmem:[#allocation2 + $0x50] sm:$0xff] %v7112_v3  ;;  %120 = vst [vmem:[#allocation2 + $0x58] sm:$0xff] %v7112_v3  ;;  %v193_v15 = vld [vmem:[#allocation5 + $0x68] sm:$0xff]  ;;  %v194_v16 = vld [vmem:[#allocation5 + $0x70] sm:$0xff] }
  0x54   :  { %121 = vst [vmem:[#allocation2 + $0x60] sm:$0xff] %v7112_v3  ;;  %122 = vst [vmem:[#allocation2 + $0x68] sm:$0xff] %v7112_v3  ;;  %v195_v17 = vld [vmem:[#allocation5 + $0x78] sm:$0xff]  ;;  %v196_v18 = vld [vmem:[#allocation5 + $0x80] sm:$0xff] }
  0x55   :  { %123 = vst [vmem:[#allocation2 + $0x70] sm:$0xff] %v7112_v3  ;;  %124 = vst [vmem:[#allocation2 + $0x78] sm:$0xff] %v7112_v3  ;;  %v7696_v4 = vld [vmem:[#allocation2] sm:$0xff]  ;;  %v197_v19 = vld [vmem:[#allocation5 + $0x88] sm:$0xff] }
  0x56   :  { %125 = vst [vmem:[#allocation2 + $0x80] sm:$0xff] %v7112_v3  ;;  %126 = vst [vmem:[#allocation2 + $0x88] sm:$0xff] %v7112_v3  ;;  %v198_v20 = vld [vmem:[#allocation5 + $0x90] sm:$0xff]  ;;  %v199_v21 = vld [vmem:[#allocation5 + $0x98] sm:$0xff] }
  0x57   :  { %128 = vst [vmem:[#allocation2 + $0x990] sm:$0xff] %v7112_v3  ;;  %129 = vst [vmem:[#allocation2 + $0x998] sm:$0xff] %v7112_v3  ;;  %v200_v22 = vld [vmem:[#allocation5 + $0xa0] sm:$0xff]  ;;  %v201_v23 = vld [vmem:[#allocation5 + $0xa8] sm:$0xff] }
  0x58   :  { %130 = vst [vmem:[#allocation2 + $0x9a0] sm:$0xff] %v7112_v3  ;;  %131 = vst [vmem:[#allocation2 + $0x9a8] sm:$0xff] %v7112_v3  ;;  %v202_v24 = vld [vmem:[#allocation5 + $0xb0] sm:$0xff]  ;;  %v203_v25 = vld [vmem:[#allocation5 + $0xb8] sm:$0xff] }
  0x59   :  { %132 = vst [vmem:[#allocation2 + $0x9b0] sm:$0xff] %v7112_v3  ;;  %133 = vst [vmem:[#allocation2 + $0x9b8] sm:$0xff] %v7112_v3  ;;  %v204_v26 = vld [vmem:[#allocation5 + $0xc0] sm:$0xff]  ;;  %v205_v27 = vld [vmem:[#allocation5 + $0xc8] sm:$0xff] }
  0x5a   :  { %134 = vst [vmem:[#allocation2 + $0x9c0] sm:$0xff] %v7112_v3  ;;  %135 = vst [vmem:[#allocation2 + $0x9c8] sm:$0xff] %v7112_v3  ;;  %v206_v28 = vld [vmem:[#allocation5 + $0xd0] sm:$0xff]  ;;  %v207_v29 = vld [vmem:[#allocation5 + $0xd8] sm:$0xff] }
  0x5b   :  { %136 = vst [vmem:[#allocation2 + $0x9d0] sm:$0xff] %v7112_v3  ;;  %137 = vst [vmem:[#allocation2 + $0x9d8] sm:$0xff] %v7112_v3  ;;  %v208_v30 = vld [vmem:[#allocation5 + $0xe0] sm:$0xff]  ;;  %v209_v31 = vld [vmem:[#allocation5 + $0xe8] sm:$0xff] }
  0x5c   :  { %138 = vst [vmem:[#allocation2 + $0x9e0] sm:$0xff] %v7112_v3  ;;  %139 = vst [vmem:[#allocation2 + $0x9e8] sm:$0xff] %v7112_v3  ;;  %v210_v32 = vld [vmem:[#allocation5 + $0xf0] sm:$0xff]  ;;  %v211_v33 = vld [vmem:[#allocation5 + $0xf8] sm:$0xff] }
  0x5d   :  { %140 = vst [vmem:[#allocation2 + $0x9f0] sm:$0xff] %v7112_v3  ;;  %141 = vst [vmem:[#allocation2 + $0x9f8] sm:$0xff] %v7112_v3  ;;  %v212_v34 = vld [vmem:[#allocation5 + $0x100] sm:$0xff]  ;;  %v213_v35 = vld [vmem:[#allocation5 + $0x108] sm:$0xff] }
  0x5e   :  { %142 = vst [vmem:[#allocation2 + $0xa00] sm:$0xff] %v7112_v3  ;;  %143 = vst [vmem:[#allocation2 + $0xa08] sm:$0xff] %v7112_v3  ;;  %v214_v36 = vld [vmem:[#allocation5 + $0x110] sm:$0xff]  ;;  %v215_v37 = vld [vmem:[#allocation5 + $0x118] sm:$0xff] }
  0x5f   :  { %144 = vst [vmem:[#allocation2 + $0xa10] sm:$0xff] %v7112_v3  ;;  %145 = vst [vmem:[#allocation2 + $0xa18] sm:$0xff] %v7112_v3  ;;  %v216_v38 = vld [vmem:[#allocation5 + $0x120] sm:$0xff]  ;;  %v217_v39 = vld [vmem:[#allocation5 + $0x128] sm:$0xff] }
  0x60   :  { %147 = vst [vmem:[#allocation2 + $0x90] sm:$0xff] %v7112_v3  ;;  %148 = vst [vmem:[#allocation2 + $0x120] sm:$0xff] %v7112_v3  ;;  %v218_v40 = vld [vmem:[#allocation5 + $0x130] sm:$0xff]  ;;  %v219_v41 = vld [vmem:[#allocation5 + $0x138] sm:$0xff] }
  0x61   :  { %149 = vst [vmem:[#allocation2 + $0x1b0] sm:$0xff] %v7112_v3  ;;  %150 = vst [vmem:[#allocation2 + $0x240] sm:$0xff] %v7112_v3  ;;  %v220_v42 = vld [vmem:[#allocation5 + $0x140] sm:$0xff]  ;;  %v221_v43 = vld [vmem:[#allocation5 + $0x148] sm:$0xff] }
  0x62   :  { %151 = vst [vmem:[#allocation2 + $0x2d0] sm:$0xff] %v7112_v3  ;;  %152 = vst [vmem:[#allocation2 + $0x360] sm:$0xff] %v7112_v3  ;;  %v222_v44 = vld [vmem:[#allocation5 + $0x150] sm:$0xff]  ;;  %v223_v45 = vld [vmem:[#allocation5 + $0x158] sm:$0xff] }
  0x63   :  { %153 = vst [vmem:[#allocation2 + $0x3f0] sm:$0xff] %v7112_v3  ;;  %154 = vst [vmem:[#allocation2 + $0x480] sm:$0xff] %v7112_v3  ;;  %v224_v46 = vld [vmem:[#allocation5 + $0x160] sm:$0xff]  ;;  %v225_v47 = vld [vmem:[#allocation5 + $0x168] sm:$0xff] }
  0x64   :  { %155 = vst [vmem:[#allocation2 + $0x510] sm:$0xff] %v7112_v3  ;;  %156 = vst [vmem:[#allocation2 + $0x5a0] sm:$0xff] %v7112_v3  ;;  %v226_v48 = vld [vmem:[#allocation5 + $0x170] sm:$0xff]  ;;  %v227_v49 = vld [vmem:[#allocation5 + $0x178] sm:$0xff] }
  0x65   :  { %157 = vst [vmem:[#allocation2 + $0x630] sm:$0xff] %v7112_v3  ;;  %158 = vst [vmem:[#allocation2 + $0x6c0] sm:$0xff] %v7112_v3  ;;  %v228_v50 = vld [vmem:[#allocation5 + $0x180] sm:$0xff]  ;;  %v229_v51 = vld [vmem:[#allocation5 + $0x188] sm:$0xff] }
  0x66   :  { %159 = vst [vmem:[#allocation2 + $0x750] sm:$0xff] %v7112_v3  ;;  %160 = vst [vmem:[#allocation2 + $0x7e0] sm:$0xff] %v7112_v3  ;;  %v230_v52 = vld [vmem:[#allocation5 + $0x190] sm:$0xff]  ;;  %v231_v53 = vld [vmem:[#allocation5 + $0x198] sm:$0xff] }
  0x67   :  { %161 = vst [vmem:[#allocation2 + $0x870] sm:$0xff] %v7112_v3  ;;  %162 = vst [vmem:[#allocation2 + $0x900] sm:$0xff] %v7112_v3  ;;  %v232_v54 = vld [vmem:[#allocation5 + $0x1a0] sm:$0xff]  ;;  %v233_v55 = vld [vmem:[#allocation5 + $0x1a8] sm:$0xff] }
  0x68   :  { %164 = vst [vmem:[#allocation2 + $0x118] sm:$0xff] %v7112_v3  ;;  %165 = vst [vmem:[#allocation2 + $0x1a8] sm:$0xff] %v7112_v3  ;;  %v234_v56 = vld [vmem:[#allocation5 + $0x1b0] sm:$0xff]  ;;  %v235_v57 = vld [vmem:[#allocation5 + $0x1b8] sm:$0xff] }
  0x69   :  { %166 = vst [vmem:[#allocation2 + $0x238] sm:$0xff] %v7112_v3  ;;  %167 = vst [vmem:[#allocation2 + $0x2c8] sm:$0xff] %v7112_v3  ;;  %v236_v58 = vld [vmem:[#allocation5 + $0x1c0] sm:$0xff]  ;;  %v237_v59 = vld [vmem:[#allocation5 + $0x1c8] sm:$0xff] }
  0x6a   :  { %168 = vst [vmem:[#allocation2 + $0x358] sm:$0xff] %v7112_v3  ;;  %169 = vst [vmem:[#allocation2 + $0x3e8] sm:$0xff] %v7112_v3  ;;  %v238_v60 = vld [vmem:[#allocation5 + $0x1d0] sm:$0xff]  ;;  %v239_v61 = vld [vmem:[#allocation5 + $0x1d8] sm:$0xff] }
  0x6b   :  { %170 = vst [vmem:[#allocation2 + $0x478] sm:$0xff] %v7112_v3  ;;  %171 = vst [vmem:[#allocation2 + $0x508] sm:$0xff] %v7112_v3  ;;  %v240_v62 = vld [vmem:[#allocation5 + $0x1e0] sm:$0xff]  ;;  %v241_v63 = vld [vmem:[#allocation5 + $0x1e8] sm:$0xff] }
  0x6c   :  { %172 = vst [vmem:[#allocation2 + $0x598] sm:$0xff] %v7112_v3  ;;  %173 = vst [vmem:[#allocation2 + $0x628] sm:$0xff] %v7112_v3 }
  0x6d   :  { %174 = vst [vmem:[#allocation2 + $0x6b8] sm:$0xff] %v7112_v3  ;;  %175 = vst [vmem:[#allocation2 + $0x748] sm:$0xff] %v7112_v3 }
  0x6e   :  { %176 = vst [vmem:[#allocation2 + $0x7d8] sm:$0xff] %v7112_v3  ;;  %177 = vst [vmem:[#allocation2 + $0x868] sm:$0xff] %v7112_v3 }
  0x6f   :  { %178 = vst [vmem:[#allocation2 + $0x8f8] sm:$0xff] %v7112_v3  ;;  %179 = vst [vmem:[#allocation2 + $0x988] sm:$0xff] %v7112_v3 }
  0x70   :  { %693 = vst [vmem:[#allocation3] sm:$0xff] %v7112_v3  ;;  %694 = vst [vmem:[#allocation3 + $0x8] sm:$0xff] %v7112_v3 }
  0x71   :  { %695 = vst [vmem:[#allocation3 + $0x10] sm:$0xff] %v7112_v3  ;;  %696 = vst [vmem:[#allocation3 + $0x18] sm:$0xff] %v7112_v3 }
  0x72   :  { %697 = vst [vmem:[#allocation3 + $0x20] sm:$0xff] %v7112_v3  ;;  %698 = vst [vmem:[#allocation3 + $0x28] sm:$0xff] %v7112_v3 }
  0x73   :  { %699 = vst [vmem:[#allocation3 + $0x30] sm:$0xff] %v7112_v3  ;;  %700 = vst [vmem:[#allocation3 + $0x38] sm:$0xff] %v7112_v3 }
  0x74   :  { %701 = vst [vmem:[#allocation3 + $0x40] sm:$0xff] %v7112_v3  ;;  %702 = vst [vmem:[#allocation3 + $0x48] sm:$0xff] %v7112_v3 }
  0x75   :  { %703 = vst [vmem:[#allocation3 + $0x50] sm:$0xff] %v7112_v3  ;;  %704 = vst [vmem:[#allocation3 + $0x58] sm:$0xff] %v7112_v3 }
  0x76   :  { %705 = vst [vmem:[#allocation3 + $0x60] sm:$0xff] %v7112_v3  ;;  %706 = vst [vmem:[#allocation3 + $0x68] sm:$0xff] %v7112_v3 }
  0x77   :  { %707 = vst [vmem:[#allocation3 + $0x70] sm:$0xff] %v7112_v3  ;;  %708 = vst [vmem:[#allocation3 + $0x78] sm:$0xff] %v7112_v3 }
  0x78   :  { %709 = vst [vmem:[#allocation3 + $0x80] sm:$0xff] %v7112_v3  ;;  %710 = vst [vmem:[#allocation3 + $0x88] sm:$0xff] %v7112_v3 }
  0x79   :  { %711 = vst [vmem:[#allocation3 + $0x90] sm:$0xff] %v7112_v3  ;;  %712 = vst [vmem:[#allocation3 + $0x98] sm:$0xff] %v7112_v3 }
  0x7a   :  { %713 = vst [vmem:[#allocation3 + $0xa0] sm:$0xff] %v7112_v3  ;;  %714 = vst [vmem:[#allocation3 + $0xa8] sm:$0xff] %v7112_v3 }
  0x7b   :  { %715 = vst [vmem:[#allocation3 + $0xb0] sm:$0xff] %v7112_v3  ;;  %716 = vst [vmem:[#allocation3 + $0xb8] sm:$0xff] %v7112_v3 }
  0x7c   :  { %717 = vst [vmem:[#allocation3 + $0x480] sm:$0xff] %v7112_v3  ;;  %718 = vst [vmem:[#allocation3 + $0x488] sm:$0xff] %v7112_v3 }
  0x7d   :  { %719 = vst [vmem:[#allocation3 + $0x490] sm:$0xff] %v7112_v3  ;;  %720 = vst [vmem:[#allocation3 + $0x498] sm:$0xff] %v7112_v3 }
  0x7e   :  { %721 = vst [vmem:[#allocation3 + $0x4a0] sm:$0xff] %v7112_v3  ;;  %722 = vst [vmem:[#allocation3 + $0x4a8] sm:$0xff] %v7112_v3 }
  0x7f   :  { %723 = vst [vmem:[#allocation3 + $0x4b0] sm:$0xff] %v7112_v3  ;;  %724 = vst [vmem:[#allocation3 + $0x4b8] sm:$0xff] %v7112_v3 }
  0x80   :  { %725 = vst [vmem:[#allocation3 + $0x4c0] sm:$0xff] %v7112_v3  ;;  %726 = vst [vmem:[#allocation3 + $0x4c8] sm:$0xff] %v7112_v3 }
  0x81   :  { %727 = vst [vmem:[#allocation3 + $0x4d0] sm:$0xff] %v7112_v3  ;;  %728 = vst [vmem:[#allocation3 + $0x4d8] sm:$0xff] %v7112_v3 }
  0x82   :  { %729 = vst [vmem:[#allocation3 + $0x4e0] sm:$0xff] %v7112_v3  ;;  %730 = vst [vmem:[#allocation3 + $0x4e8] sm:$0xff] %v7112_v3 }
  0x83   :  { %731 = vst [vmem:[#allocation3 + $0x4f0] sm:$0xff] %v7112_v3  ;;  %732 = vst [vmem:[#allocation3 + $0x4f8] sm:$0xff] %v7112_v3 }
  0x84   :  { %733 = vst [vmem:[#allocation3 + $0x500] sm:$0xff] %v7112_v3  ;;  %734 = vst [vmem:[#allocation3 + $0x508] sm:$0xff] %v7112_v3 }
  0x85   :  { %735 = vst [vmem:[#allocation3 + $0x510] sm:$0xff] %v7112_v3  ;;  %736 = vst [vmem:[#allocation3 + $0x518] sm:$0xff] %v7112_v3 }
  0x86   :  { %737 = vst [vmem:[#allocation3 + $0x520] sm:$0xff] %v7112_v3  ;;  %738 = vst [vmem:[#allocation3 + $0x528] sm:$0xff] %v7112_v3 }
  0x87   :  { %739 = vst [vmem:[#allocation3 + $0x530] sm:$0xff] %v7112_v3  ;;  %740 = vst [vmem:[#allocation3 + $0x538] sm:$0xff] %v7112_v3 }
  0x88   :  { %741 = vst [vmem:[#allocation3 + $0x900] sm:$0xff] %v7112_v3  ;;  %742 = vst [vmem:[#allocation3 + $0x908] sm:$0xff] %v7112_v3 }
  0x89   :  { %743 = vst [vmem:[#allocation3 + $0x910] sm:$0xff] %v7112_v3  ;;  %744 = vst [vmem:[#allocation3 + $0x918] sm:$0xff] %v7112_v3 }
  0x8a   :  { %745 = vst [vmem:[#allocation3 + $0x920] sm:$0xff] %v7112_v3  ;;  %746 = vst [vmem:[#allocation3 + $0x928] sm:$0xff] %v7112_v3 }
  0x8b   :  { %747 = vst [vmem:[#allocation3 + $0x930] sm:$0xff] %v7112_v3  ;;  %748 = vst [vmem:[#allocation3 + $0x938] sm:$0xff] %v7112_v3 }
  0x8c   :  { %749 = vst [vmem:[#allocation3 + $0x940] sm:$0xff] %v7112_v3  ;;  %750 = vst [vmem:[#allocation3 + $0x948] sm:$0xff] %v7112_v3 }
  0x8d   :  { %751 = vst [vmem:[#allocation3 + $0x950] sm:$0xff] %v7112_v3  ;;  %752 = vst [vmem:[#allocation3 + $0x958] sm:$0xff] %v7112_v3 }
  0x8e   :  { %753 = vst [vmem:[#allocation3 + $0x960] sm:$0xff] %v7112_v3  ;;  %754 = vst [vmem:[#allocation3 + $0x968] sm:$0xff] %v7112_v3 }
  0x8f   :  { %755 = vst [vmem:[#allocation3 + $0x970] sm:$0xff] %v7112_v3  ;;  %756 = vst [vmem:[#allocation3 + $0x978] sm:$0xff] %v7112_v3 }
  0x90   :  { %757 = vst [vmem:[#allocation3 + $0x980] sm:$0xff] %v7112_v3  ;;  %758 = vst [vmem:[#allocation3 + $0x988] sm:$0xff] %v7112_v3 }
  0x91   :  { %759 = vst [vmem:[#allocation3 + $0x990] sm:$0xff] %v7112_v3  ;;  %760 = vst [vmem:[#allocation3 + $0x998] sm:$0xff] %v7112_v3 }
  0x92   :  { %761 = vst [vmem:[#allocation3 + $0x9a0] sm:$0xff] %v7112_v3  ;;  %762 = vst [vmem:[#allocation3 + $0x9a8] sm:$0xff] %v7112_v3 }
  0x93   :  { %763 = vst [vmem:[#allocation3 + $0x9b0] sm:$0xff] %v7112_v3  ;;  %764 = vst [vmem:[#allocation3 + $0x9b8] sm:$0xff] %v7112_v3 }
  0x94   :  { %765 = vst [vmem:[#allocation3 + $0xd80] sm:$0xff] %v7112_v3  ;;  %766 = vst [vmem:[#allocation3 + $0xd88] sm:$0xff] %v7112_v3 }
  0x95   :  { %767 = vst [vmem:[#allocation3 + $0xd90] sm:$0xff] %v7112_v3  ;;  %768 = vst [vmem:[#allocation3 + $0xd98] sm:$0xff] %v7112_v3 }
  0x96   :  { %769 = vst [vmem:[#allocation3 + $0xda0] sm:$0xff] %v7112_v3  ;;  %770 = vst [vmem:[#allocation3 + $0xda8] sm:$0xff] %v7112_v3 }
  0x97   :  { %771 = vst [vmem:[#allocation3 + $0xdb0] sm:$0xff] %v7112_v3  ;;  %772 = vst [vmem:[#allocation3 + $0xdb8] sm:$0xff] %v7112_v3 }
  0x98   :  { %773 = vst [vmem:[#allocation3 + $0xdc0] sm:$0xff] %v7112_v3  ;;  %774 = vst [vmem:[#allocation3 + $0xdc8] sm:$0xff] %v7112_v3 }
  0x99   :  { %775 = vst [vmem:[#allocation3 + $0xdd0] sm:$0xff] %v7112_v3  ;;  %776 = vst [vmem:[#allocation3 + $0xdd8] sm:$0xff] %v7112_v3 }
  0x9a   :  { %777 = vst [vmem:[#allocation3 + $0xde0] sm:$0xff] %v7112_v3  ;;  %778 = vst [vmem:[#allocation3 + $0xde8] sm:$0xff] %v7112_v3 }
  0x9b   :  { %779 = vst [vmem:[#allocation3 + $0xdf0] sm:$0xff] %v7112_v3  ;;  %780 = vst [vmem:[#allocation3 + $0xdf8] sm:$0xff] %v7112_v3 }
  0x9c   :  { %781 = vst [vmem:[#allocation3 + $0xe00] sm:$0xff] %v7112_v3  ;;  %782 = vst [vmem:[#allocation3 + $0xe08] sm:$0xff] %v7112_v3 }
  0x9d   :  { %783 = vst [vmem:[#allocation3 + $0xe10] sm:$0xff] %v7112_v3  ;;  %784 = vst [vmem:[#allocation3 + $0xe18] sm:$0xff] %v7112_v3 }
  0x9e   :  { %785 = vst [vmem:[#allocation3 + $0xe20] sm:$0xff] %v7112_v3  ;;  %786 = vst [vmem:[#allocation3 + $0xe28] sm:$0xff] %v7112_v3 }
  0x9f   :  { %787 = vst [vmem:[#allocation3 + $0xe30] sm:$0xff] %v7112_v3  ;;  %788 = vst [vmem:[#allocation3 + $0xe38] sm:$0xff] %v7112_v3 }
  0xa0   :  { %789 = vst [vmem:[#allocation3 + $0x1200] sm:$0xff] %v7112_v3  ;;  %790 = vst [vmem:[#allocation3 + $0x1208] sm:$0xff] %v7112_v3 }
  0xa1   :  { %791 = vst [vmem:[#allocation3 + $0x1210] sm:$0xff] %v7112_v3  ;;  %792 = vst [vmem:[#allocation3 + $0x1218] sm:$0xff] %v7112_v3 }
  0xa2   :  { %793 = vst [vmem:[#allocation3 + $0x1220] sm:$0xff] %v7112_v3  ;;  %794 = vst [vmem:[#allocation3 + $0x1228] sm:$0xff] %v7112_v3 }
  0xa3   :  { %795 = vst [vmem:[#allocation3 + $0x1230] sm:$0xff] %v7112_v3  ;;  %796 = vst [vmem:[#allocation3 + $0x1238] sm:$0xff] %v7112_v3 }
  0xa4   :  { %797 = vst [vmem:[#allocation3 + $0x1240] sm:$0xff] %v7112_v3  ;;  %798 = vst [vmem:[#allocation3 + $0x1248] sm:$0xff] %v7112_v3 }
  0xa5   :  { %799 = vst [vmem:[#allocation3 + $0x1250] sm:$0xff] %v7112_v3  ;;  %800 = vst [vmem:[#allocation3 + $0x1258] sm:$0xff] %v7112_v3 }
  0xa6   :  { %801 = vst [vmem:[#allocation3 + $0x1260] sm:$0xff] %v7112_v3  ;;  %802 = vst [vmem:[#allocation3 + $0x1268] sm:$0xff] %v7112_v3 }
  0xa7   :  { %803 = vst [vmem:[#allocation3 + $0x1270] sm:$0xff] %v7112_v3  ;;  %804 = vst [vmem:[#allocation3 + $0x1278] sm:$0xff] %v7112_v3 }
  0xa8   :  { %805 = vst [vmem:[#allocation3 + $0x1280] sm:$0xff] %v7112_v3  ;;  %806 = vst [vmem:[#allocation3 + $0x1288] sm:$0xff] %v7112_v3 }
  0xa9   :  { %807 = vst [vmem:[#allocation3 + $0x1290] sm:$0xff] %v7112_v3  ;;  %808 = vst [vmem:[#allocation3 + $0x1298] sm:$0xff] %v7112_v3 }
  0xaa   :  { %809 = vst [vmem:[#allocation3 + $0x12a0] sm:$0xff] %v7112_v3  ;;  %810 = vst [vmem:[#allocation3 + $0x12a8] sm:$0xff] %v7112_v3 }
  0xab   :  { %811 = vst [vmem:[#allocation3 + $0x12b0] sm:$0xff] %v7112_v3  ;;  %812 = vst [vmem:[#allocation3 + $0x12b8] sm:$0xff] %v7112_v3 }
  0xac   :  { %813 = vst [vmem:[#allocation3 + $0x1680] sm:$0xff] %v7112_v3  ;;  %814 = vst [vmem:[#allocation3 + $0x1688] sm:$0xff] %v7112_v3 }
  0xad   :  { %815 = vst [vmem:[#allocation3 + $0x1690] sm:$0xff] %v7112_v3  ;;  %816 = vst [vmem:[#allocation3 + $0x1698] sm:$0xff] %v7112_v3 }
  0xae   :  { %817 = vst [vmem:[#allocation3 + $0x16a0] sm:$0xff] %v7112_v3  ;;  %818 = vst [vmem:[#allocation3 + $0x16a8] sm:$0xff] %v7112_v3 }
  0xaf   :  { %819 = vst [vmem:[#allocation3 + $0x16b0] sm:$0xff] %v7112_v3  ;;  %820 = vst [vmem:[#allocation3 + $0x16b8] sm:$0xff] %v7112_v3 }
  0xb0   :  { %821 = vst [vmem:[#allocation3 + $0x16c0] sm:$0xff] %v7112_v3  ;;  %822 = vst [vmem:[#allocation3 + $0x16c8] sm:$0xff] %v7112_v3 }
  0xb1   :  { %823 = vst [vmem:[#allocation3 + $0x16d0] sm:$0xff] %v7112_v3  ;;  %824 = vst [vmem:[#allocation3 + $0x16d8] sm:$0xff] %v7112_v3 }
  0xb2   :  { %825 = vst [vmem:[#allocation3 + $0x16e0] sm:$0xff] %v7112_v3  ;;  %826 = vst [vmem:[#allocation3 + $0x16e8] sm:$0xff] %v7112_v3 }
  0xb3   :  { %827 = vst [vmem:[#allocation3 + $0x16f0] sm:$0xff] %v7112_v3  ;;  %828 = vst [vmem:[#allocation3 + $0x16f8] sm:$0xff] %v7112_v3 }
  0xb4   :  { %829 = vst [vmem:[#allocation3 + $0x1700] sm:$0xff] %v7112_v3  ;;  %830 = vst [vmem:[#allocation3 + $0x1708] sm:$0xff] %v7112_v3 }
  0xb5   :  { %831 = vst [vmem:[#allocation3 + $0x1710] sm:$0xff] %v7112_v3  ;;  %832 = vst [vmem:[#allocation3 + $0x1718] sm:$0xff] %v7112_v3 }
  0xb6   :  { %833 = vst [vmem:[#allocation3 + $0x1720] sm:$0xff] %v7112_v3  ;;  %834 = vst [vmem:[#allocation3 + $0x1728] sm:$0xff] %v7112_v3 }
  0xb7   :  { %835 = vst [vmem:[#allocation3 + $0x1730] sm:$0xff] %v7112_v3  ;;  %836 = vst [vmem:[#allocation3 + $0x1738] sm:$0xff] %v7112_v3 }
  0xb8   :  { %837 = vst [vmem:[#allocation3 + $0x1b00] sm:$0xff] %v7112_v3  ;;  %838 = vst [vmem:[#allocation3 + $0x1b08] sm:$0xff] %v7112_v3 }
  0xb9   :  { %839 = vst [vmem:[#allocation3 + $0x1b10] sm:$0xff] %v7112_v3  ;;  %840 = vst [vmem:[#allocation3 + $0x1b18] sm:$0xff] %v7112_v3 }
  0xba   :  { %841 = vst [vmem:[#allocation3 + $0x1b20] sm:$0xff] %v7112_v3  ;;  %842 = vst [vmem:[#allocation3 + $0x1b28] sm:$0xff] %v7112_v3 }
  0xbb   :  { %843 = vst [vmem:[#allocation3 + $0x1b30] sm:$0xff] %v7112_v3  ;;  %844 = vst [vmem:[#allocation3 + $0x1b38] sm:$0xff] %v7112_v3 }
  0xbc   :  { %845 = vst [vmem:[#allocation3 + $0x1b40] sm:$0xff] %v7112_v3  ;;  %846 = vst [vmem:[#allocation3 + $0x1b48] sm:$0xff] %v7112_v3 }
  0xbd   :  { %847 = vst [vmem:[#allocation3 + $0x1b50] sm:$0xff] %v7112_v3  ;;  %848 = vst [vmem:[#allocation3 + $0x1b58] sm:$0xff] %v7112_v3 }
  0xbe   :  { %849 = vst [vmem:[#allocation3 + $0x1b60] sm:$0xff] %v7112_v3  ;;  %850 = vst [vmem:[#allocation3 + $0x1b68] sm:$0xff] %v7112_v3 }
  0xbf   :  { %851 = vst [vmem:[#allocation3 + $0x1b70] sm:$0xff] %v7112_v3  ;;  %852 = vst [vmem:[#allocation3 + $0x1b78] sm:$0xff] %v7112_v3 }
  0xc0   :  { %853 = vst [vmem:[#allocation3 + $0x1b80] sm:$0xff] %v7112_v3  ;;  %854 = vst [vmem:[#allocation3 + $0x1b88] sm:$0xff] %v7112_v3 }
  0xc1   :  { %855 = vst [vmem:[#allocation3 + $0x1b90] sm:$0xff] %v7112_v3  ;;  %856 = vst [vmem:[#allocation3 + $0x1b98] sm:$0xff] %v7112_v3 }
  0xc2   :  { %857 = vst [vmem:[#allocation3 + $0x1ba0] sm:$0xff] %v7112_v3  ;;  %858 = vst [vmem:[#allocation3 + $0x1ba8] sm:$0xff] %v7112_v3 }
  0xc3   :  { %859 = vst [vmem:[#allocation3 + $0x1bb0] sm:$0xff] %v7112_v3  ;;  %860 = vst [vmem:[#allocation3 + $0x1bb8] sm:$0xff] %v7112_v3 }
  0xc4   :  { %861 = vst [vmem:[#allocation3 + $0x1f80] sm:$0xff] %v7112_v3  ;;  %862 = vst [vmem:[#allocation3 + $0x1f88] sm:$0xff] %v7112_v3 }
  0xc5   :  { %863 = vst [vmem:[#allocation3 + $0x1f90] sm:$0xff] %v7112_v3  ;;  %864 = vst [vmem:[#allocation3 + $0x1f98] sm:$0xff] %v7112_v3 }
  0xc6   :  { %865 = vst [vmem:[#allocation3 + $0x1fa0] sm:$0xff] %v7112_v3  ;;  %866 = vst [vmem:[#allocation3 + $0x1fa8] sm:$0xff] %v7112_v3 }
  0xc7   :  { %867 = vst [vmem:[#allocation3 + $0x1fb0] sm:$0xff] %v7112_v3  ;;  %868 = vst [vmem:[#allocation3 + $0x1fb8] sm:$0xff] %v7112_v3 }
  0xc8   :  { %869 = vst [vmem:[#allocation3 + $0x1fc0] sm:$0xff] %v7112_v3  ;;  %870 = vst [vmem:[#allocation3 + $0x1fc8] sm:$0xff] %v7112_v3 }
  0xc9   :  { %871 = vst [vmem:[#allocation3 + $0x1fd0] sm:$0xff] %v7112_v3  ;;  %872 = vst [vmem:[#allocation3 + $0x1fd8] sm:$0xff] %v7112_v3 }
  0xca   :  { %873 = vst [vmem:[#allocation3 + $0x1fe0] sm:$0xff] %v7112_v3  ;;  %874 = vst [vmem:[#allocation3 + $0x1fe8] sm:$0xff] %v7112_v3 }
  0xcb   :  { %875 = vst [vmem:[#allocation3 + $0x1ff0] sm:$0xff] %v7112_v3  ;;  %876 = vst [vmem:[#allocation3 + $0x1ff8] sm:$0xff] %v7112_v3 }
  0xcc   :  { %877 = vst [vmem:[#allocation3 + $0x2000] sm:$0xff] %v7112_v3  ;;  %878 = vst [vmem:[#allocation3 + $0x2008] sm:$0xff] %v7112_v3 }
  0xcd   :  { %879 = vst [vmem:[#allocation3 + $0x2010] sm:$0xff] %v7112_v3  ;;  %880 = vst [vmem:[#allocation3 + $0x2018] sm:$0xff] %v7112_v3 }
  0xce   :  { %881 = vst [vmem:[#allocation3 + $0x2020] sm:$0xff] %v7112_v3  ;;  %882 = vst [vmem:[#allocation3 + $0x2028] sm:$0xff] %v7112_v3 }
  0xcf   :  { %883 = vst [vmem:[#allocation3 + $0x2030] sm:$0xff] %v7112_v3  ;;  %884 = vst [vmem:[#allocation3 + $0x2038] sm:$0xff] %v7112_v3 }
  0xd0   :  { %886 = vst [vmem:[#allocation3 + $0x3c0] sm:$0xff] %v7112_v3  ;;  %887 = vst [vmem:[#allocation3 + $0x3c8] sm:$0xff] %v7112_v3 }
  0xd1   :  { %888 = vst [vmem:[#allocation3 + $0x3d0] sm:$0xff] %v7112_v3  ;;  %889 = vst [vmem:[#allocation3 + $0x3d8] sm:$0xff] %v7112_v3 }
  0xd2   :  { %890 = vst [vmem:[#allocation3 + $0x3e0] sm:$0xff] %v7112_v3  ;;  %891 = vst [vmem:[#allocation3 + $0x3e8] sm:$0xff] %v7112_v3 }
  0xd3   :  { %892 = vst [vmem:[#allocation3 + $0x3f0] sm:$0xff] %v7112_v3  ;;  %893 = vst [vmem:[#allocation3 + $0x3f8] sm:$0xff] %v7112_v3 }
  0xd4   :  { %894 = vst [vmem:[#allocation3 + $0x400] sm:$0xff] %v7112_v3  ;;  %895 = vst [vmem:[#allocation3 + $0x408] sm:$0xff] %v7112_v3 }
  0xd5   :  { %896 = vst [vmem:[#allocation3 + $0x410] sm:$0xff] %v7112_v3  ;;  %897 = vst [vmem:[#allocation3 + $0x418] sm:$0xff] %v7112_v3 }
  0xd6   :  { %898 = vst [vmem:[#allocation3 + $0x420] sm:$0xff] %v7112_v3  ;;  %899 = vst [vmem:[#allocation3 + $0x428] sm:$0xff] %v7112_v3 }
  0xd7   :  { %900 = vst [vmem:[#allocation3 + $0x430] sm:$0xff] %v7112_v3  ;;  %901 = vst [vmem:[#allocation3 + $0x438] sm:$0xff] %v7112_v3 }
  0xd8   :  { %902 = vst [vmem:[#allocation3 + $0x440] sm:$0xff] %v7112_v3  ;;  %903 = vst [vmem:[#allocation3 + $0x448] sm:$0xff] %v7112_v3 }
  0xd9   :  { %904 = vst [vmem:[#allocation3 + $0x450] sm:$0xff] %v7112_v3  ;;  %905 = vst [vmem:[#allocation3 + $0x458] sm:$0xff] %v7112_v3 }
  0xda   :  { %906 = vst [vmem:[#allocation3 + $0x460] sm:$0xff] %v7112_v3  ;;  %907 = vst [vmem:[#allocation3 + $0x468] sm:$0xff] %v7112_v3 }
  0xdb   :  { %908 = vst [vmem:[#allocation3 + $0x470] sm:$0xff] %v7112_v3  ;;  %909 = vst [vmem:[#allocation3 + $0x478] sm:$0xff] %v7112_v3 }
  0xdc   :  { %910 = vst [vmem:[#allocation3 + $0x840] sm:$0xff] %v7112_v3  ;;  %911 = vst [vmem:[#allocation3 + $0x848] sm:$0xff] %v7112_v3 }
  0xdd   :  { %912 = vst [vmem:[#allocation3 + $0x850] sm:$0xff] %v7112_v3  ;;  %913 = vst [vmem:[#allocation3 + $0x858] sm:$0xff] %v7112_v3 }
  0xde   :  { %914 = vst [vmem:[#allocation3 + $0x860] sm:$0xff] %v7112_v3  ;;  %915 = vst [vmem:[#allocation3 + $0x868] sm:$0xff] %v7112_v3 }
  0xdf   :  { %916 = vst [vmem:[#allocation3 + $0x870] sm:$0xff] %v7112_v3  ;;  %917 = vst [vmem:[#allocation3 + $0x878] sm:$0xff] %v7112_v3 }
  0xe0   :  { %918 = vst [vmem:[#allocation3 + $0x880] sm:$0xff] %v7112_v3  ;;  %919 = vst [vmem:[#allocation3 + $0x888] sm:$0xff] %v7112_v3 }
  0xe1   :  { %920 = vst [vmem:[#allocation3 + $0x890] sm:$0xff] %v7112_v3  ;;  %921 = vst [vmem:[#allocation3 + $0x898] sm:$0xff] %v7112_v3 }
  0xe2   :  { %922 = vst [vmem:[#allocation3 + $0x8a0] sm:$0xff] %v7112_v3  ;;  %923 = vst [vmem:[#allocation3 + $0x8a8] sm:$0xff] %v7112_v3 }
  0xe3   :  { %924 = vst [vmem:[#allocation3 + $0x8b0] sm:$0xff] %v7112_v3  ;;  %925 = vst [vmem:[#allocation3 + $0x8b8] sm:$0xff] %v7112_v3 }
  0xe4   :  { %926 = vst [vmem:[#allocation3 + $0x8c0] sm:$0xff] %v7112_v3  ;;  %927 = vst [vmem:[#allocation3 + $0x8c8] sm:$0xff] %v7112_v3 }
  0xe5   :  { %928 = vst [vmem:[#allocation3 + $0x8d0] sm:$0xff] %v7112_v3  ;;  %929 = vst [vmem:[#allocation3 + $0x8d8] sm:$0xff] %v7112_v3 }
  0xe6   :  { %930 = vst [vmem:[#allocation3 + $0x8e0] sm:$0xff] %v7112_v3  ;;  %931 = vst [vmem:[#allocation3 + $0x8e8] sm:$0xff] %v7112_v3 }
  0xe7   :  { %932 = vst [vmem:[#allocation3 + $0x8f0] sm:$0xff] %v7112_v3  ;;  %933 = vst [vmem:[#allocation3 + $0x8f8] sm:$0xff] %v7112_v3 }
  0xe8   :  { %934 = vst [vmem:[#allocation3 + $0xcc0] sm:$0xff] %v7112_v3  ;;  %935 = vst [vmem:[#allocation3 + $0xcc8] sm:$0xff] %v7112_v3 }
  0xe9   :  { %936 = vst [vmem:[#allocation3 + $0xcd0] sm:$0xff] %v7112_v3  ;;  %937 = vst [vmem:[#allocation3 + $0xcd8] sm:$0xff] %v7112_v3 }
  0xea   :  { %938 = vst [vmem:[#allocation3 + $0xce0] sm:$0xff] %v7112_v3  ;;  %939 = vst [vmem:[#allocation3 + $0xce8] sm:$0xff] %v7112_v3 }
  0xeb   :  { %940 = vst [vmem:[#allocation3 + $0xcf0] sm:$0xff] %v7112_v3  ;;  %941 = vst [vmem:[#allocation3 + $0xcf8] sm:$0xff] %v7112_v3 }
  0xec   :  { %942 = vst [vmem:[#allocation3 + $0xd00] sm:$0xff] %v7112_v3  ;;  %943 = vst [vmem:[#allocation3 + $0xd08] sm:$0xff] %v7112_v3 }
  0xed   :  { %944 = vst [vmem:[#allocation3 + $0xd10] sm:$0xff] %v7112_v3  ;;  %945 = vst [vmem:[#allocation3 + $0xd18] sm:$0xff] %v7112_v3 }
  0xee   :  { %946 = vst [vmem:[#allocation3 + $0xd20] sm:$0xff] %v7112_v3  ;;  %947 = vst [vmem:[#allocation3 + $0xd28] sm:$0xff] %v7112_v3 }
  0xef   :  { %948 = vst [vmem:[#allocation3 + $0xd30] sm:$0xff] %v7112_v3  ;;  %949 = vst [vmem:[#allocation3 + $0xd38] sm:$0xff] %v7112_v3 }
  0xf0   :  { %950 = vst [vmem:[#allocation3 + $0xd40] sm:$0xff] %v7112_v3  ;;  %951 = vst [vmem:[#allocation3 + $0xd48] sm:$0xff] %v7112_v3 }
  0xf1   :  { %952 = vst [vmem:[#allocation3 + $0xd50] sm:$0xff] %v7112_v3  ;;  %953 = vst [vmem:[#allocation3 + $0xd58] sm:$0xff] %v7112_v3 }
  0xf2   :  { %954 = vst [vmem:[#allocation3 + $0xd60] sm:$0xff] %v7112_v3  ;;  %955 = vst [vmem:[#allocation3 + $0xd68] sm:$0xff] %v7112_v3 }
  0xf3   :  { %956 = vst [vmem:[#allocation3 + $0xd70] sm:$0xff] %v7112_v3  ;;  %957 = vst [vmem:[#allocation3 + $0xd78] sm:$0xff] %v7112_v3 }
  0xf4   :  { %958 = vst [vmem:[#allocation3 + $0x1140] sm:$0xff] %v7112_v3  ;;  %959 = vst [vmem:[#allocation3 + $0x1148] sm:$0xff] %v7112_v3 }
  0xf5   :  { %960 = vst [vmem:[#allocation3 + $0x1150] sm:$0xff] %v7112_v3  ;;  %961 = vst [vmem:[#allocation3 + $0x1158] sm:$0xff] %v7112_v3 }
  0xf6   :  { %962 = vst [vmem:[#allocation3 + $0x1160] sm:$0xff] %v7112_v3  ;;  %963 = vst [vmem:[#allocation3 + $0x1168] sm:$0xff] %v7112_v3 }
  0xf7   :  { %964 = vst [vmem:[#allocation3 + $0x1170] sm:$0xff] %v7112_v3  ;;  %965 = vst [vmem:[#allocation3 + $0x1178] sm:$0xff] %v7112_v3 }
  0xf8   :  { %966 = vst [vmem:[#allocation3 + $0x1180] sm:$0xff] %v7112_v3  ;;  %967 = vst [vmem:[#allocation3 + $0x1188] sm:$0xff] %v7112_v3 }
  0xf9   :  { %968 = vst [vmem:[#allocation3 + $0x1190] sm:$0xff] %v7112_v3  ;;  %969 = vst [vmem:[#allocation3 + $0x1198] sm:$0xff] %v7112_v3 }
  0xfa   :  { %970 = vst [vmem:[#allocation3 + $0x11a0] sm:$0xff] %v7112_v3  ;;  %971 = vst [vmem:[#allocation3 + $0x11a8] sm:$0xff] %v7112_v3 }
  0xfb   :  { %972 = vst [vmem:[#allocation3 + $0x11b0] sm:$0xff] %v7112_v3  ;;  %973 = vst [vmem:[#allocation3 + $0x11b8] sm:$0xff] %v7112_v3 }
  0xfc   :  { %974 = vst [vmem:[#allocation3 + $0x11c0] sm:$0xff] %v7112_v3  ;;  %975 = vst [vmem:[#allocation3 + $0x11c8] sm:$0xff] %v7112_v3 }
  0xfd   :  { %976 = vst [vmem:[#allocation3 + $0x11d0] sm:$0xff] %v7112_v3  ;;  %977 = vst [vmem:[#allocation3 + $0x11d8] sm:$0xff] %v7112_v3 }
  0xfe   :  { %978 = vst [vmem:[#allocation3 + $0x11e0] sm:$0xff] %v7112_v3  ;;  %979 = vst [vmem:[#allocation3 + $0x11e8] sm:$0xff] %v7112_v3 }
  0xff   :  { %980 = vst [vmem:[#allocation3 + $0x11f0] sm:$0xff] %v7112_v3  ;;  %981 = vst [vmem:[#allocation3 + $0x11f8] sm:$0xff] %v7112_v3 }
 0x100   :  { %982 = vst [vmem:[#allocation3 + $0x15c0] sm:$0xff] %v7112_v3  ;;  %983 = vst [vmem:[#allocation3 + $0x15c8] sm:$0xff] %v7112_v3 }
 0x101   :  { %984 = vst [vmem:[#allocation3 + $0x15d0] sm:$0xff] %v7112_v3  ;;  %985 = vst [vmem:[#allocation3 + $0x15d8] sm:$0xff] %v7112_v3 }
 0x102   :  { %986 = vst [vmem:[#allocation3 + $0x15e0] sm:$0xff] %v7112_v3  ;;  %987 = vst [vmem:[#allocation3 + $0x15e8] sm:$0xff] %v7112_v3 }
 0x103   :  { %988 = vst [vmem:[#allocation3 + $0x15f0] sm:$0xff] %v7112_v3  ;;  %989 = vst [vmem:[#allocation3 + $0x15f8] sm:$0xff] %v7112_v3 }
 0x104   :  { %990 = vst [vmem:[#allocation3 + $0x1600] sm:$0xff] %v7112_v3  ;;  %991 = vst [vmem:[#allocation3 + $0x1608] sm:$0xff] %v7112_v3 }
 0x105   :  { %992 = vst [vmem:[#allocation3 + $0x1610] sm:$0xff] %v7112_v3  ;;  %993 = vst [vmem:[#allocation3 + $0x1618] sm:$0xff] %v7112_v3 }
 0x106   :  { %994 = vst [vmem:[#allocation3 + $0x1620] sm:$0xff] %v7112_v3  ;;  %995 = vst [vmem:[#allocation3 + $0x1628] sm:$0xff] %v7112_v3 }
 0x107   :  { %996 = vst [vmem:[#allocation3 + $0x1630] sm:$0xff] %v7112_v3  ;;  %997 = vst [vmem:[#allocation3 + $0x1638] sm:$0xff] %v7112_v3 }
 0x108   :  { %998 = vst [vmem:[#allocation3 + $0x1640] sm:$0xff] %v7112_v3  ;;  %999 = vst [vmem:[#allocation3 + $0x1648] sm:$0xff] %v7112_v3 }
 0x109   :  { %1000 = vst [vmem:[#allocation3 + $0x1650] sm:$0xff] %v7112_v3  ;;  %1001 = vst [vmem:[#allocation3 + $0x1658] sm:$0xff] %v7112_v3 }
 0x10a   :  { %1002 = vst [vmem:[#allocation3 + $0x1660] sm:$0xff] %v7112_v3  ;;  %1003 = vst [vmem:[#allocation3 + $0x1668] sm:$0xff] %v7112_v3 }
 0x10b   :  { %1004 = vst [vmem:[#allocation3 + $0x1670] sm:$0xff] %v7112_v3  ;;  %1005 = vst [vmem:[#allocation3 + $0x1678] sm:$0xff] %v7112_v3 }
 0x10c   :  { %1006 = vst [vmem:[#allocation3 + $0x1a40] sm:$0xff] %v7112_v3  ;;  %1007 = vst [vmem:[#allocation3 + $0x1a48] sm:$0xff] %v7112_v3 }
 0x10d   :  { %1008 = vst [vmem:[#allocation3 + $0x1a50] sm:$0xff] %v7112_v3  ;;  %1009 = vst [vmem:[#allocation3 + $0x1a58] sm:$0xff] %v7112_v3 }
 0x10e   :  { %1010 = vst [vmem:[#allocation3 + $0x1a60] sm:$0xff] %v7112_v3  ;;  %1011 = vst [vmem:[#allocation3 + $0x1a68] sm:$0xff] %v7112_v3 }
 0x10f   :  { %1012 = vst [vmem:[#allocation3 + $0x1a70] sm:$0xff] %v7112_v3  ;;  %1013 = vst [vmem:[#allocation3 + $0x1a78] sm:$0xff] %v7112_v3 }
 0x110   :  { %1014 = vst [vmem:[#allocation3 + $0x1a80] sm:$0xff] %v7112_v3  ;;  %1015 = vst [vmem:[#allocation3 + $0x1a88] sm:$0xff] %v7112_v3 }
 0x111   :  { %1016 = vst [vmem:[#allocation3 + $0x1a90] sm:$0xff] %v7112_v3  ;;  %1017 = vst [vmem:[#allocation3 + $0x1a98] sm:$0xff] %v7112_v3 }
 0x112   :  { %1018 = vst [vmem:[#allocation3 + $0x1aa0] sm:$0xff] %v7112_v3  ;;  %1019 = vst [vmem:[#allocation3 + $0x1aa8] sm:$0xff] %v7112_v3 }
 0x113   :  { %1020 = vst [vmem:[#allocation3 + $0x1ab0] sm:$0xff] %v7112_v3  ;;  %1021 = vst [vmem:[#allocation3 + $0x1ab8] sm:$0xff] %v7112_v3 }
 0x114   :  { %1022 = vst [vmem:[#allocation3 + $0x1ac0] sm:$0xff] %v7112_v3  ;;  %1023 = vst [vmem:[#allocation3 + $0x1ac8] sm:$0xff] %v7112_v3 }
 0x115   :  { %1024 = vst [vmem:[#allocation3 + $0x1ad0] sm:$0xff] %v7112_v3  ;;  %1025 = vst [vmem:[#allocation3 + $0x1ad8] sm:$0xff] %v7112_v3 }
 0x116   :  { %1026 = vst [vmem:[#allocation3 + $0x1ae0] sm:$0xff] %v7112_v3  ;;  %1027 = vst [vmem:[#allocation3 + $0x1ae8] sm:$0xff] %v7112_v3 }
 0x117   :  { %1028 = vst [vmem:[#allocation3 + $0x1af0] sm:$0xff] %v7112_v3  ;;  %1029 = vst [vmem:[#allocation3 + $0x1af8] sm:$0xff] %v7112_v3 }
 0x118   :  { %1030 = vst [vmem:[#allocation3 + $0x1ec0] sm:$0xff] %v7112_v3  ;;  %1031 = vst [vmem:[#allocation3 + $0x1ec8] sm:$0xff] %v7112_v3 }
 0x119   :  { %1032 = vst [vmem:[#allocation3 + $0x1ed0] sm:$0xff] %v7112_v3  ;;  %1033 = vst [vmem:[#allocation3 + $0x1ed8] sm:$0xff] %v7112_v3 }
 0x11a   :  { %1034 = vst [vmem:[#allocation3 + $0x1ee0] sm:$0xff] %v7112_v3  ;;  %1035 = vst [vmem:[#allocation3 + $0x1ee8] sm:$0xff] %v7112_v3 }
 0x11b   :  { %1036 = vst [vmem:[#allocation3 + $0x1ef0] sm:$0xff] %v7112_v3  ;;  %1037 = vst [vmem:[#allocation3 + $0x1ef8] sm:$0xff] %v7112_v3 }
 0x11c   :  { %1038 = vst [vmem:[#allocation3 + $0x1f00] sm:$0xff] %v7112_v3  ;;  %1039 = vst [vmem:[#allocation3 + $0x1f08] sm:$0xff] %v7112_v3 }
 0x11d   :  { %1040 = vst [vmem:[#allocation3 + $0x1f10] sm:$0xff] %v7112_v3  ;;  %1041 = vst [vmem:[#allocation3 + $0x1f18] sm:$0xff] %v7112_v3 }
 0x11e   :  { %1042 = vst [vmem:[#allocation3 + $0x1f20] sm:$0xff] %v7112_v3  ;;  %1043 = vst [vmem:[#allocation3 + $0x1f28] sm:$0xff] %v7112_v3 }
 0x11f   :  { %1044 = vst [vmem:[#allocation3 + $0x1f30] sm:$0xff] %v7112_v3  ;;  %1045 = vst [vmem:[#allocation3 + $0x1f38] sm:$0xff] %v7112_v3 }
 0x120   :  { %1046 = vst [vmem:[#allocation3 + $0x1f40] sm:$0xff] %v7112_v3  ;;  %1047 = vst [vmem:[#allocation3 + $0x1f48] sm:$0xff] %v7112_v3 }
 0x121   :  { %1048 = vst [vmem:[#allocation3 + $0x1f50] sm:$0xff] %v7112_v3  ;;  %1049 = vst [vmem:[#allocation3 + $0x1f58] sm:$0xff] %v7112_v3 }
 0x122   :  { %1050 = vst [vmem:[#allocation3 + $0x1f60] sm:$0xff] %v7112_v3  ;;  %1051 = vst [vmem:[#allocation3 + $0x1f68] sm:$0xff] %v7112_v3 }
 0x123   :  { %1052 = vst [vmem:[#allocation3 + $0x1f70] sm:$0xff] %v7112_v3  ;;  %1053 = vst [vmem:[#allocation3 + $0x1f78] sm:$0xff] %v7112_v3 }
 0x124   :  { %1054 = vst [vmem:[#allocation3 + $0x2340] sm:$0xff] %v7112_v3  ;;  %1055 = vst [vmem:[#allocation3 + $0x2348] sm:$0xff] %v7112_v3 }
 0x125   :  { %1056 = vst [vmem:[#allocation3 + $0x2350] sm:$0xff] %v7112_v3  ;;  %1057 = vst [vmem:[#allocation3 + $0x2358] sm:$0xff] %v7112_v3 }
 0x126   :  { %1058 = vst [vmem:[#allocation3 + $0x2360] sm:$0xff] %v7112_v3  ;;  %1059 = vst [vmem:[#allocation3 + $0x2368] sm:$0xff] %v7112_v3 }
 0x127   :  { %1060 = vst [vmem:[#allocation3 + $0x2370] sm:$0xff] %v7112_v3  ;;  %1061 = vst [vmem:[#allocation3 + $0x2378] sm:$0xff] %v7112_v3 }
 0x128   :  { %1062 = vst [vmem:[#allocation3 + $0x2380] sm:$0xff] %v7112_v3  ;;  %1063 = vst [vmem:[#allocation3 + $0x2388] sm:$0xff] %v7112_v3 }
 0x129   :  { %1064 = vst [vmem:[#allocation3 + $0x2390] sm:$0xff] %v7112_v3  ;;  %1065 = vst [vmem:[#allocation3 + $0x2398] sm:$0xff] %v7112_v3 }
 0x12a   :  { %1066 = vst [vmem:[#allocation3 + $0x23a0] sm:$0xff] %v7112_v3  ;;  %1067 = vst [vmem:[#allocation3 + $0x23a8] sm:$0xff] %v7112_v3 }
 0x12b   :  { %1068 = vst [vmem:[#allocation3 + $0x23b0] sm:$0xff] %v7112_v3  ;;  %1069 = vst [vmem:[#allocation3 + $0x23b8] sm:$0xff] %v7112_v3 }
 0x12c   :  { %1070 = vst [vmem:[#allocation3 + $0x23c0] sm:$0xff] %v7112_v3  ;;  %1071 = vst [vmem:[#allocation3 + $0x23c8] sm:$0xff] %v7112_v3 }
 0x12d   :  { %1072 = vst [vmem:[#allocation3 + $0x23d0] sm:$0xff] %v7112_v3  ;;  %1073 = vst [vmem:[#allocation3 + $0x23d8] sm:$0xff] %v7112_v3 }
 0x12e   :  { %1074 = vst [vmem:[#allocation3 + $0x23e0] sm:$0xff] %v7112_v3  ;;  %1075 = vst [vmem:[#allocation3 + $0x23e8] sm:$0xff] %v7112_v3 }
 0x12f   :  { %1076 = vst [vmem:[#allocation3 + $0x23f0] sm:$0xff] %v7112_v3  ;;  %1077 = vst [vmem:[#allocation3 + $0x23f8] sm:$0xff] %v7112_v3 }
 0x130   :  { %1079 = vst [vmem:[#allocation3 + $0xc0] sm:$0xff] %v7112_v3  ;;  %1080 = vst [vmem:[#allocation3 + $0xc8] sm:$0xff] %v7112_v3 }
 0x131   :  { %1081 = vst [vmem:[#allocation3 + $0x120] sm:$0xff] %v7112_v3  ;;  %1082 = vst [vmem:[#allocation3 + $0x128] sm:$0xff] %v7112_v3 }
 0x132   :  { %1083 = vst [vmem:[#allocation3 + $0x180] sm:$0xff] %v7112_v3  ;;  %1084 = vst [vmem:[#allocation3 + $0x188] sm:$0xff] %v7112_v3 }
 0x133   :  { %1085 = vst [vmem:[#allocation3 + $0x1e0] sm:$0xff] %v7112_v3  ;;  %1086 = vst [vmem:[#allocation3 + $0x1e8] sm:$0xff] %v7112_v3 }
 0x134   :  { %1087 = vst [vmem:[#allocation3 + $0x240] sm:$0xff] %v7112_v3  ;;  %1088 = vst [vmem:[#allocation3 + $0x248] sm:$0xff] %v7112_v3 }
 0x135   :  { %1089 = vst [vmem:[#allocation3 + $0x2a0] sm:$0xff] %v7112_v3  ;;  %1090 = vst [vmem:[#allocation3 + $0x2a8] sm:$0xff] %v7112_v3 }
 0x136   :  { %1091 = vst [vmem:[#allocation3 + $0x300] sm:$0xff] %v7112_v3  ;;  %1092 = vst [vmem:[#allocation3 + $0x308] sm:$0xff] %v7112_v3 }
 0x137   :  { %1093 = vst [vmem:[#allocation3 + $0x360] sm:$0xff] %v7112_v3  ;;  %1094 = vst [vmem:[#allocation3 + $0x368] sm:$0xff] %v7112_v3 }
 0x138   :  { %1095 = vst [vmem:[#allocation3 + $0x540] sm:$0xff] %v7112_v3  ;;  %1096 = vst [vmem:[#allocation3 + $0x548] sm:$0xff] %v7112_v3 }
 0x139   :  { %1097 = vst [vmem:[#allocation3 + $0x5a0] sm:$0xff] %v7112_v3  ;;  %1098 = vst [vmem:[#allocation3 + $0x5a8] sm:$0xff] %v7112_v3 }
 0x13a   :  { %1099 = vst [vmem:[#allocation3 + $0x600] sm:$0xff] %v7112_v3  ;;  %1100 = vst [vmem:[#allocation3 + $0x608] sm:$0xff] %v7112_v3 }
 0x13b   :  { %1101 = vst [vmem:[#allocation3 + $0x660] sm:$0xff] %v7112_v3  ;;  %1102 = vst [vmem:[#allocation3 + $0x668] sm:$0xff] %v7112_v3 }
 0x13c   :  { %1103 = vst [vmem:[#allocation3 + $0x6c0] sm:$0xff] %v7112_v3  ;;  %1104 = vst [vmem:[#allocation3 + $0x6c8] sm:$0xff] %v7112_v3 }
 0x13d   :  { %1105 = vst [vmem:[#allocation3 + $0x720] sm:$0xff] %v7112_v3  ;;  %1106 = vst [vmem:[#allocation3 + $0x728] sm:$0xff] %v7112_v3 }
 0x13e   :  { %1107 = vst [vmem:[#allocation3 + $0x780] sm:$0xff] %v7112_v3  ;;  %1108 = vst [vmem:[#allocation3 + $0x788] sm:$0xff] %v7112_v3 }
 0x13f   :  { %1109 = vst [vmem:[#allocation3 + $0x7e0] sm:$0xff] %v7112_v3  ;;  %1110 = vst [vmem:[#allocation3 + $0x7e8] sm:$0xff] %v7112_v3 }
 0x140   :  { %1111 = vst [vmem:[#allocation3 + $0x9c0] sm:$0xff] %v7112_v3  ;;  %1112 = vst [vmem:[#allocation3 + $0x9c8] sm:$0xff] %v7112_v3 }
 0x141   :  { %1113 = vst [vmem:[#allocation3 + $0xa20] sm:$0xff] %v7112_v3  ;;  %1114 = vst [vmem:[#allocation3 + $0xa28] sm:$0xff] %v7112_v3 }
 0x142   :  { %1115 = vst [vmem:[#allocation3 + $0xa80] sm:$0xff] %v7112_v3  ;;  %1116 = vst [vmem:[#allocation3 + $0xa88] sm:$0xff] %v7112_v3 }
 0x143   :  { %1117 = vst [vmem:[#allocation3 + $0xae0] sm:$0xff] %v7112_v3  ;;  %1118 = vst [vmem:[#allocation3 + $0xae8] sm:$0xff] %v7112_v3 }
 0x144   :  { %1119 = vst [vmem:[#allocation3 + $0xb40] sm:$0xff] %v7112_v3  ;;  %1120 = vst [vmem:[#allocation3 + $0xb48] sm:$0xff] %v7112_v3 }
 0x145   :  { %1121 = vst [vmem:[#allocation3 + $0xba0] sm:$0xff] %v7112_v3  ;;  %1122 = vst [vmem:[#allocation3 + $0xba8] sm:$0xff] %v7112_v3 }
 0x146   :  { %1123 = vst [vmem:[#allocation3 + $0xc00] sm:$0xff] %v7112_v3  ;;  %1124 = vst [vmem:[#allocation3 + $0xc08] sm:$0xff] %v7112_v3 }
 0x147   :  { %1125 = vst [vmem:[#allocation3 + $0xc60] sm:$0xff] %v7112_v3  ;;  %1126 = vst [vmem:[#allocation3 + $0xc68] sm:$0xff] %v7112_v3 }
 0x148   :  { %1127 = vst [vmem:[#allocation3 + $0xe40] sm:$0xff] %v7112_v3  ;;  %1128 = vst [vmem:[#allocation3 + $0xe48] sm:$0xff] %v7112_v3 }
 0x149   :  { %1129 = vst [vmem:[#allocation3 + $0xea0] sm:$0xff] %v7112_v3  ;;  %1130 = vst [vmem:[#allocation3 + $0xea8] sm:$0xff] %v7112_v3 }
 0x14a   :  { %1131 = vst [vmem:[#allocation3 + $0xf00] sm:$0xff] %v7112_v3  ;;  %1132 = vst [vmem:[#allocation3 + $0xf08] sm:$0xff] %v7112_v3 }
 0x14b   :  { %1133 = vst [vmem:[#allocation3 + $0xf60] sm:$0xff] %v7112_v3  ;;  %1134 = vst [vmem:[#allocation3 + $0xf68] sm:$0xff] %v7112_v3 }
 0x14c   :  { %1135 = vst [vmem:[#allocation3 + $0xfc0] sm:$0xff] %v7112_v3  ;;  %1136 = vst [vmem:[#allocation3 + $0xfc8] sm:$0xff] %v7112_v3 }
 0x14d   :  { %1137 = vst [vmem:[#allocation3 + $0x1020] sm:$0xff] %v7112_v3  ;;  %1138 = vst [vmem:[#allocation3 + $0x1028] sm:$0xff] %v7112_v3  ;;  %v245_v3 = vld [vmem:[#allocation5 + $0x208] sm:$0xff] }
 0x14e   :  { %1139 = vst [vmem:[#allocation3 + $0x1080] sm:$0xff] %v7696_v4  ;;  %1140 = vst [vmem:[#allocation3 + $0x1088] sm:$0xff] %v7696_v4 }
 0x14f   :  { %1141 = vst [vmem:[#allocation3 + $0x10e0] sm:$0xff] %v7696_v4  ;;  %1142 = vst [vmem:[#allocation3 + $0x10e8] sm:$0xff] %v7696_v4 }
 0x150   :  { %1143 = vst [vmem:[#allocation3 + $0x12c0] sm:$0xff] %v7696_v4  ;;  %1144 = vst [vmem:[#allocation3 + $0x12c8] sm:$0xff] %v7696_v4 }
 0x151   :  { %1145 = vst [vmem:[#allocation3 + $0x1320] sm:$0xff] %v7696_v4  ;;  %1146 = vst [vmem:[#allocation3 + $0x1328] sm:$0xff] %v7696_v4 }
 0x152   :  { %1147 = vst [vmem:[#allocation3 + $0x1380] sm:$0xff] %v7696_v4  ;;  %1148 = vst [vmem:[#allocation3 + $0x1388] sm:$0xff] %v7696_v4 }
 0x153   :  { %1149 = vst [vmem:[#allocation3 + $0x13e0] sm:$0xff] %v7696_v4  ;;  %1150 = vst [vmem:[#allocation3 + $0x13e8] sm:$0xff] %v7696_v4 }
 0x154   :  { %1151 = vst [vmem:[#allocation3 + $0x1440] sm:$0xff] %v7696_v4  ;;  %1152 = vst [vmem:[#allocation3 + $0x1448] sm:$0xff] %v7696_v4 }
 0x155   :  { %1153 = vst [vmem:[#allocation3 + $0x14a0] sm:$0xff] %v7696_v4  ;;  %1154 = vst [vmem:[#allocation3 + $0x14a8] sm:$0xff] %v7696_v4 }
 0x156   :  { %1155 = vst [vmem:[#allocation3 + $0x1500] sm:$0xff] %v7696_v4  ;;  %1156 = vst [vmem:[#allocation3 + $0x1508] sm:$0xff] %v7696_v4 }
 0x157   :  { %1157 = vst [vmem:[#allocation3 + $0x1560] sm:$0xff] %v7696_v4  ;;  %1158 = vst [vmem:[#allocation3 + $0x1568] sm:$0xff] %v7696_v4 }
 0x158   :  { %1159 = vst [vmem:[#allocation3 + $0x1740] sm:$0xff] %v7696_v4  ;;  %1160 = vst [vmem:[#allocation3 + $0x1748] sm:$0xff] %v7696_v4 }
 0x159   :  { %1161 = vst [vmem:[#allocation3 + $0x17a0] sm:$0xff] %v7696_v4  ;;  %1162 = vst [vmem:[#allocation3 + $0x17a8] sm:$0xff] %v7696_v4 }
 0x15a   :  { %1163 = vst [vmem:[#allocation3 + $0x1800] sm:$0xff] %v7696_v4  ;;  %1164 = vst [vmem:[#allocation3 + $0x1808] sm:$0xff] %v7696_v4 }
 0x15b   :  { %1165 = vst [vmem:[#allocation3 + $0x1860] sm:$0xff] %v7696_v4  ;;  %1166 = vst [vmem:[#allocation3 + $0x1868] sm:$0xff] %v7696_v4 }
 0x15c   :  { %1167 = vst [vmem:[#allocation3 + $0x18c0] sm:$0xff] %v7696_v4  ;;  %1168 = vst [vmem:[#allocation3 + $0x18c8] sm:$0xff] %v7696_v4 }
 0x15d   :  { %1169 = vst [vmem:[#allocation3 + $0x1920] sm:$0xff] %v7696_v4  ;;  %1170 = vst [vmem:[#allocation3 + $0x1928] sm:$0xff] %v7696_v4 }
 0x15e   :  { %1171 = vst [vmem:[#allocation3 + $0x1980] sm:$0xff] %v7696_v4  ;;  %1172 = vst [vmem:[#allocation3 + $0x1988] sm:$0xff] %v7696_v4 }
 0x15f   :  { %1173 = vst [vmem:[#allocation3 + $0x19e0] sm:$0xff] %v7696_v4  ;;  %1174 = vst [vmem:[#allocation3 + $0x19e8] sm:$0xff] %v7696_v4 }
 0x160   :  { %1175 = vst [vmem:[#allocation3 + $0x1bc0] sm:$0xff] %v7696_v4  ;;  %1176 = vst [vmem:[#allocation3 + $0x1bc8] sm:$0xff] %v7696_v4 }
 0x161   :  { %1177 = vst [vmem:[#allocation3 + $0x1c20] sm:$0xff] %v7696_v4  ;;  %1178 = vst [vmem:[#allocation3 + $0x1c28] sm:$0xff] %v7696_v4 }
 0x162   :  { %1179 = vst [vmem:[#allocation3 + $0x1c80] sm:$0xff] %v7696_v4  ;;  %1180 = vst [vmem:[#allocation3 + $0x1c88] sm:$0xff] %v7696_v4 }
 0x163   :  { %1181 = vst [vmem:[#allocation3 + $0x1ce0] sm:$0xff] %v7696_v4  ;;  %1182 = vst [vmem:[#allocation3 + $0x1ce8] sm:$0xff] %v7696_v4 }
 0x164   :  { %1183 = vst [vmem:[#allocation3 + $0x1d40] sm:$0xff] %v7696_v4  ;;  %1184 = vst [vmem:[#allocation3 + $0x1d48] sm:$0xff] %v7696_v4 }
 0x165   :  { %1185 = vst [vmem:[#allocation3 + $0x1da0] sm:$0xff] %v7696_v4  ;;  %1186 = vst [vmem:[#allocation3 + $0x1da8] sm:$0xff] %v7696_v4 }
 0x166   :  { %1187 = vst [vmem:[#allocation3 + $0x1e00] sm:$0xff] %v7696_v4  ;;  %1188 = vst [vmem:[#allocation3 + $0x1e08] sm:$0xff] %v7696_v4 }
 0x167   :  { %1189 = vst [vmem:[#allocation3 + $0x1e60] sm:$0xff] %v7696_v4  ;;  %1190 = vst [vmem:[#allocation3 + $0x1e68] sm:$0xff] %v7696_v4 }
 0x168   :  { %1191 = vst [vmem:[#allocation3 + $0x2040] sm:$0xff] %v7696_v4  ;;  %1192 = vst [vmem:[#allocation3 + $0x2048] sm:$0xff] %v7696_v4 }
 0x169   :  { %1193 = vst [vmem:[#allocation3 + $0x20a0] sm:$0xff] %v7696_v4  ;;  %1194 = vst [vmem:[#allocation3 + $0x20a8] sm:$0xff] %v7696_v4 }
 0x16a   :  { %1195 = vst [vmem:[#allocation3 + $0x2100] sm:$0xff] %v7696_v4  ;;  %1196 = vst [vmem:[#allocation3 + $0x2108] sm:$0xff] %v7696_v4 }
 0x16b   :  { %1197 = vst [vmem:[#allocation3 + $0x2160] sm:$0xff] %v7696_v4  ;;  %1198 = vst [vmem:[#allocation3 + $0x2168] sm:$0xff] %v7696_v4 }
 0x16c   :  { %1199 = vst [vmem:[#allocation3 + $0x21c0] sm:$0xff] %v7696_v4  ;;  %1200 = vst [vmem:[#allocation3 + $0x21c8] sm:$0xff] %v7696_v4 }
 0x16d   :  { %1201 = vst [vmem:[#allocation3 + $0x2220] sm:$0xff] %v7696_v4  ;;  %1202 = vst [vmem:[#allocation3 + $0x2228] sm:$0xff] %v7696_v4 }
 0x16e   :  { %1203 = vst [vmem:[#allocation3 + $0x2280] sm:$0xff] %v7696_v4  ;;  %1204 = vst [vmem:[#allocation3 + $0x2288] sm:$0xff] %v7696_v4 }
 0x16f   :  { %1205 = vst [vmem:[#allocation3 + $0x22e0] sm:$0xff] %v7696_v4  ;;  %1206 = vst [vmem:[#allocation3 + $0x22e8] sm:$0xff] %v7696_v4 }
 0x170   :  { %1208 = vst [vmem:[#allocation3 + $0x110] sm:$0xff] %v7696_v4  ;;  %1209 = vst [vmem:[#allocation3 + $0x118] sm:$0xff] %v7696_v4 }
 0x171   :  { %1210 = vst [vmem:[#allocation3 + $0x170] sm:$0xff] %v7696_v4  ;;  %1211 = vst [vmem:[#allocation3 + $0x178] sm:$0xff] %v7696_v4 }
 0x172   :  { %1212 = vst [vmem:[#allocation3 + $0x1d0] sm:$0xff] %v7696_v4  ;;  %1213 = vst [vmem:[#allocation3 + $0x1d8] sm:$0xff] %v7696_v4 }
 0x173   :  { %1214 = vst [vmem:[#allocation3 + $0x230] sm:$0xff] %v7696_v4  ;;  %1215 = vst [vmem:[#allocation3 + $0x238] sm:$0xff] %v7696_v4 }
 0x174   :  { %1216 = vst [vmem:[#allocation3 + $0x290] sm:$0xff] %v7696_v4  ;;  %1217 = vst [vmem:[#allocation3 + $0x298] sm:$0xff] %v7696_v4 }
 0x175   :  { %1218 = vst [vmem:[#allocation3 + $0x2f0] sm:$0xff] %v7696_v4  ;;  %1219 = vst [vmem:[#allocation3 + $0x2f8] sm:$0xff] %v7696_v4 }
 0x176   :  { %1220 = vst [vmem:[#allocation3 + $0x350] sm:$0xff] %v7696_v4  ;;  %1221 = vst [vmem:[#allocation3 + $0x358] sm:$0xff] %v7696_v4 }
 0x177   :  { %1222 = vst [vmem:[#allocation3 + $0x3b0] sm:$0xff] %v7696_v4  ;;  %1223 = vst [vmem:[#allocation3 + $0x3b8] sm:$0xff] %v7696_v4 }
 0x178   :  { %1224 = vst [vmem:[#allocation3 + $0x590] sm:$0xff] %v7696_v4  ;;  %1225 = vst [vmem:[#allocation3 + $0x598] sm:$0xff] %v7696_v4 }
 0x179   :  { %1226 = vst [vmem:[#allocation3 + $0x5f0] sm:$0xff] %v7696_v4  ;;  %1227 = vst [vmem:[#allocation3 + $0x5f8] sm:$0xff] %v7696_v4 }
 0x17a   :  { %1228 = vst [vmem:[#allocation3 + $0x650] sm:$0xff] %v7696_v4  ;;  %1229 = vst [vmem:[#allocation3 + $0x658] sm:$0xff] %v7696_v4 }
 0x17b   :  { %1230 = vst [vmem:[#allocation3 + $0x6b0] sm:$0xff] %v7696_v4  ;;  %1231 = vst [vmem:[#allocation3 + $0x6b8] sm:$0xff] %v7696_v4 }
 0x17c   :  { %1232 = vst [vmem:[#allocation3 + $0x710] sm:$0xff] %v7696_v4  ;;  %1233 = vst [vmem:[#allocation3 + $0x718] sm:$0xff] %v7696_v4 }
 0x17d   :  { %1234 = vst [vmem:[#allocation3 + $0x770] sm:$0xff] %v7696_v4  ;;  %1235 = vst [vmem:[#allocation3 + $0x778] sm:$0xff] %v7696_v4 }
 0x17e   :  { %1236 = vst [vmem:[#allocation3 + $0x7d0] sm:$0xff] %v7696_v4  ;;  %1237 = vst [vmem:[#allocation3 + $0x7d8] sm:$0xff] %v7696_v4 }
 0x17f   :  { %1238 = vst [vmem:[#allocation3 + $0x830] sm:$0xff] %v7696_v4  ;;  %1239 = vst [vmem:[#allocation3 + $0x838] sm:$0xff] %v7696_v4 }
 0x180   :  { %1240 = vst [vmem:[#allocation3 + $0xa10] sm:$0xff] %v7696_v4  ;;  %1241 = vst [vmem:[#allocation3 + $0xa18] sm:$0xff] %v7696_v4 }
 0x181   :  { %1242 = vst [vmem:[#allocation3 + $0xa70] sm:$0xff] %v7696_v4  ;;  %1243 = vst [vmem:[#allocation3 + $0xa78] sm:$0xff] %v7696_v4 }
 0x182   :  { %1244 = vst [vmem:[#allocation3 + $0xad0] sm:$0xff] %v7696_v4  ;;  %1245 = vst [vmem:[#allocation3 + $0xad8] sm:$0xff] %v7696_v4 }
 0x183   :  { %1246 = vst [vmem:[#allocation3 + $0xb30] sm:$0xff] %v7696_v4  ;;  %1247 = vst [vmem:[#allocation3 + $0xb38] sm:$0xff] %v7696_v4 }
 0x184   :  { %1248 = vst [vmem:[#allocation3 + $0xb90] sm:$0xff] %v7696_v4  ;;  %1249 = vst [vmem:[#allocation3 + $0xb98] sm:$0xff] %v7696_v4 }
 0x185   :  { %1250 = vst [vmem:[#allocation3 + $0xbf0] sm:$0xff] %v7696_v4  ;;  %1251 = vst [vmem:[#allocation3 + $0xbf8] sm:$0xff] %v7696_v4 }
 0x186   :  { %1252 = vst [vmem:[#allocation3 + $0xc50] sm:$0xff] %v7696_v4  ;;  %1253 = vst [vmem:[#allocation3 + $0xc58] sm:$0xff] %v7696_v4 }
 0x187   :  { %1254 = vst [vmem:[#allocation3 + $0xcb0] sm:$0xff] %v7696_v4  ;;  %1255 = vst [vmem:[#allocation3 + $0xcb8] sm:$0xff] %v7696_v4 }
 0x188   :  { %1256 = vst [vmem:[#allocation3 + $0xe90] sm:$0xff] %v7696_v4  ;;  %1257 = vst [vmem:[#allocation3 + $0xe98] sm:$0xff] %v7696_v4 }
 0x189   :  { %1258 = vst [vmem:[#allocation3 + $0xef0] sm:$0xff] %v7696_v4  ;;  %1259 = vst [vmem:[#allocation3 + $0xef8] sm:$0xff] %v7696_v4 }
 0x18a   :  { %1260 = vst [vmem:[#allocation3 + $0xf50] sm:$0xff] %v7696_v4  ;;  %1261 = vst [vmem:[#allocation3 + $0xf58] sm:$0xff] %v7696_v4 }
 0x18b   :  { %1262 = vst [vmem:[#allocation3 + $0xfb0] sm:$0xff] %v7696_v4  ;;  %1263 = vst [vmem:[#allocation3 + $0xfb8] sm:$0xff] %v7696_v4 }
 0x18c   :  { %1264 = vst [vmem:[#allocation3 + $0x1010] sm:$0xff] %v7696_v4  ;;  %1265 = vst [vmem:[#allocation3 + $0x1018] sm:$0xff] %v7696_v4 }
 0x18d   :  { %1266 = vst [vmem:[#allocation3 + $0x1070] sm:$0xff] %v7696_v4  ;;  %1267 = vst [vmem:[#allocation3 + $0x1078] sm:$0xff] %v7696_v4 }
 0x18e   :  { %1268 = vst [vmem:[#allocation3 + $0x10d0] sm:$0xff] %v7696_v4  ;;  %1269 = vst [vmem:[#allocation3 + $0x10d8] sm:$0xff] %v7696_v4 }
 0x18f   :  { %1270 = vst [vmem:[#allocation3 + $0x1130] sm:$0xff] %v7696_v4  ;;  %1271 = vst [vmem:[#allocation3 + $0x1138] sm:$0xff] %v7696_v4 }
 0x190   :  { %1272 = vst [vmem:[#allocation3 + $0x1310] sm:$0xff] %v7696_v4  ;;  %1273 = vst [vmem:[#allocation3 + $0x1318] sm:$0xff] %v7696_v4 }
 0x191   :  { %1274 = vst [vmem:[#allocation3 + $0x1370] sm:$0xff] %v7696_v4  ;;  %1275 = vst [vmem:[#allocation3 + $0x1378] sm:$0xff] %v7696_v4 }
 0x192   :  { %1276 = vst [vmem:[#allocation3 + $0x13d0] sm:$0xff] %v7696_v4  ;;  %1277 = vst [vmem:[#allocation3 + $0x13d8] sm:$0xff] %v7696_v4 }
 0x193   :  { %1278 = vst [vmem:[#allocation3 + $0x1430] sm:$0xff] %v7696_v4  ;;  %1279 = vst [vmem:[#allocation3 + $0x1438] sm:$0xff] %v7696_v4 }
 0x194   :  { %1280 = vst [vmem:[#allocation3 + $0x1490] sm:$0xff] %v7696_v4  ;;  %1281 = vst [vmem:[#allocation3 + $0x1498] sm:$0xff] %v7696_v4 }
 0x195   :  { %1282 = vst [vmem:[#allocation3 + $0x14f0] sm:$0xff] %v7696_v4  ;;  %1283 = vst [vmem:[#allocation3 + $0x14f8] sm:$0xff] %v7696_v4 }
 0x196   :  { %1284 = vst [vmem:[#allocation3 + $0x1550] sm:$0xff] %v7696_v4  ;;  %1285 = vst [vmem:[#allocation3 + $0x1558] sm:$0xff] %v7696_v4 }
 0x197   :  { %1286 = vst [vmem:[#allocation3 + $0x15b0] sm:$0xff] %v7696_v4  ;;  %1287 = vst [vmem:[#allocation3 + $0x15b8] sm:$0xff] %v7696_v4 }
 0x198   :  { %1288 = vst [vmem:[#allocation3 + $0x1790] sm:$0xff] %v7696_v4  ;;  %1289 = vst [vmem:[#allocation3 + $0x1798] sm:$0xff] %v7696_v4 }
 0x199   :  { %1290 = vst [vmem:[#allocation3 + $0x17f0] sm:$0xff] %v7696_v4  ;;  %1291 = vst [vmem:[#allocation3 + $0x17f8] sm:$0xff] %v7696_v4 }
 0x19a   :  { %1292 = vst [vmem:[#allocation3 + $0x1850] sm:$0xff] %v7696_v4  ;;  %1293 = vst [vmem:[#allocation3 + $0x1858] sm:$0xff] %v7696_v4 }
 0x19b   :  { %1294 = vst [vmem:[#allocation3 + $0x18b0] sm:$0xff] %v7696_v4  ;;  %1295 = vst [vmem:[#allocation3 + $0x18b8] sm:$0xff] %v7696_v4 }
 0x19c   :  { %1296 = vst [vmem:[#allocation3 + $0x1910] sm:$0xff] %v7696_v4  ;;  %1297 = vst [vmem:[#allocation3 + $0x1918] sm:$0xff] %v7696_v4 }
 0x19d   :  { %1298 = vst [vmem:[#allocation3 + $0x1970] sm:$0xff] %v7696_v4  ;;  %1299 = vst [vmem:[#allocation3 + $0x1978] sm:$0xff] %v7696_v4 }
 0x19e   :  { %1300 = vst [vmem:[#allocation3 + $0x19d0] sm:$0xff] %v7696_v4  ;;  %1301 = vst [vmem:[#allocation3 + $0x19d8] sm:$0xff] %v7696_v4 }
 0x19f   :  { %1302 = vst [vmem:[#allocation3 + $0x1a30] sm:$0xff] %v7696_v4  ;;  %1303 = vst [vmem:[#allocation3 + $0x1a38] sm:$0xff] %v7696_v4 }
 0x1a0   :  { %1304 = vst [vmem:[#allocation3 + $0x1c10] sm:$0xff] %v7696_v4  ;;  %1305 = vst [vmem:[#allocation3 + $0x1c18] sm:$0xff] %v7696_v4 }
 0x1a1   :  { %1306 = vst [vmem:[#allocation3 + $0x1c70] sm:$0xff] %v7696_v4  ;;  %1307 = vst [vmem:[#allocation3 + $0x1c78] sm:$0xff] %v7696_v4 }
 0x1a2   :  { %1308 = vst [vmem:[#allocation3 + $0x1cd0] sm:$0xff] %v7696_v4  ;;  %1309 = vst [vmem:[#allocation3 + $0x1cd8] sm:$0xff] %v7696_v4 }
 0x1a3   :  { %1310 = vst [vmem:[#allocation3 + $0x1d30] sm:$0xff] %v7696_v4  ;;  %1311 = vst [vmem:[#allocation3 + $0x1d38] sm:$0xff] %v7696_v4 }
 0x1a4   :  { %1312 = vst [vmem:[#allocation3 + $0x1d90] sm:$0xff] %v7696_v4  ;;  %1313 = vst [vmem:[#allocation3 + $0x1d98] sm:$0xff] %v7696_v4 }
 0x1a5   :  { %1314 = vst [vmem:[#allocation3 + $0x1df0] sm:$0xff] %v7696_v4  ;;  %1315 = vst [vmem:[#allocation3 + $0x1df8] sm:$0xff] %v7696_v4 }
 0x1a6   :  { %1316 = vst [vmem:[#allocation3 + $0x1e50] sm:$0xff] %v7696_v4  ;;  %1317 = vst [vmem:[#allocation3 + $0x1e58] sm:$0xff] %v7696_v4 }
 0x1a7   :  { %1318 = vst [vmem:[#allocation3 + $0x1eb0] sm:$0xff] %v7696_v4  ;;  %1319 = vst [vmem:[#allocation3 + $0x1eb8] sm:$0xff] %v7696_v4 }
 0x1a8   :  { %1320 = vst [vmem:[#allocation3 + $0x2090] sm:$0xff] %v7696_v4  ;;  %1321 = vst [vmem:[#allocation3 + $0x2098] sm:$0xff] %v7696_v4 }
 0x1a9   :  { %1322 = vst [vmem:[#allocation3 + $0x20f0] sm:$0xff] %v7696_v4  ;;  %1323 = vst [vmem:[#allocation3 + $0x20f8] sm:$0xff] %v7696_v4 }
 0x1aa   :  { %1324 = vst [vmem:[#allocation3 + $0x2150] sm:$0xff] %v7696_v4  ;;  %1325 = vst [vmem:[#allocation3 + $0x2158] sm:$0xff] %v7696_v4 }
 0x1ab   :  { %1326 = vst [vmem:[#allocation3 + $0x21b0] sm:$0xff] %v7696_v4  ;;  %1327 = vst [vmem:[#allocation3 + $0x21b8] sm:$0xff] %v7696_v4 }
 0x1ac   :  { %1328 = vst [vmem:[#allocation3 + $0x2210] sm:$0xff] %v7696_v4  ;;  %1329 = vst [vmem:[#allocation3 + $0x2218] sm:$0xff] %v7696_v4 }
 0x1ad   :  { %1330 = vst [vmem:[#allocation3 + $0x2270] sm:$0xff] %v7696_v4  ;;  %1331 = vst [vmem:[#allocation3 + $0x2278] sm:$0xff] %v7696_v4 }
 0x1ae   :  { %1332 = vst [vmem:[#allocation3 + $0x22d0] sm:$0xff] %v7696_v4  ;;  %1333 = vst [vmem:[#allocation3 + $0x22d8] sm:$0xff] %v7696_v4 }
 0x1af   :  { %1334 = vst [vmem:[#allocation3 + $0x2330] sm:$0xff] %v7696_v4  ;;  %1335 = vst [vmem:[#allocation3 + $0x2338] sm:$0xff] %v7696_v4  ;;  %v246_v4 = vld [vmem:[#allocation5 + $0x210] sm:$0xff] }
 0x1b0   :  { %437 = vst [vmem:[#allocation2 + $0x98] sm:$0xff] %v7178_v0  ;;  %438 = vst [vmem:[#allocation2 + $0xa0] sm:$0xff] %v7180_v1  ;;  %v242_v0 = vld [vmem:[#allocation5 + $0x1f0] sm:$0xff]  ;;  %v243_v1 = vld [vmem:[#allocation5 + $0x1f8] sm:$0xff] }
 0x1b1   :  { %439 = vst [vmem:[#allocation2 + $0xa8] sm:$0xff] %v7182_v2  ;;  %440 = vst [vmem:[#allocation2 + $0xb0] sm:$0xff] %v183_v5  ;;  %v244_v2 = vld [vmem:[#allocation5 + $0x200] sm:$0xff]  ;;  %v247_v5 = vld [vmem:[#allocation5 + $0x218] sm:$0xff] }
 0x1b2   :  { %441 = vst [vmem:[#allocation2 + $0xb8] sm:$0xff] %v184_v6  ;;  %442 = vst [vmem:[#allocation2 + $0xc0] sm:$0xff] %v185_v7  ;;  %v248_v6 = vld [vmem:[#allocation5 + $0x220] sm:$0xff]  ;;  %v249_v7 = vld [vmem:[#allocation5 + $0x228] sm:$0xff] }
 0x1b3   :  { %443 = vst [vmem:[#allocation2 + $0xc8] sm:$0xff] %v186_v8  ;;  %444 = vst [vmem:[#allocation2 + $0xd0] sm:$0xff] %v187_v9  ;;  %v250_v8 = vld [vmem:[#allocation5 + $0x230] sm:$0xff]  ;;  %v251_v9 = vld [vmem:[#allocation5 + $0x238] sm:$0xff] }
 0x1b4   :  { %445 = vst [vmem:[#allocation2 + $0xd8] sm:$0xff] %v188_v10  ;;  %446 = vst [vmem:[#allocation2 + $0xe0] sm:$0xff] %v189_v11  ;;  %v252_v10 = vld [vmem:[#allocation5 + $0x240] sm:$0xff]  ;;  %v253_v11 = vld [vmem:[#allocation5 + $0x248] sm:$0xff] }
 0x1b5   :  { %447 = vst [vmem:[#allocation2 + $0xe8] sm:$0xff] %v190_v12  ;;  %448 = vst [vmem:[#allocation2 + $0xf0] sm:$0xff] %v191_v13  ;;  %v254_v12 = vld [vmem:[#allocation5 + $0x250] sm:$0xff]  ;;  %v255_v13 = vld [vmem:[#allocation5 + $0x258] sm:$0xff] }
 0x1b6   :  { %449 = vst [vmem:[#allocation2 + $0xf8] sm:$0xff] %v192_v14  ;;  %450 = vst [vmem:[#allocation2 + $0x100] sm:$0xff] %v193_v15  ;;  %v256_v14 = vld [vmem:[#allocation5 + $0x260] sm:$0xff]  ;;  %v257_v15 = vld [vmem:[#allocation5 + $0x268] sm:$0xff] }
 0x1b7   :  { %451 = vst [vmem:[#allocation2 + $0x108] sm:$0xff] %v194_v16  ;;  %452 = vst [vmem:[#allocation2 + $0x110] sm:$0xff] %v195_v17  ;;  %v258_v16 = vld [vmem:[#allocation5 + $0x270] sm:$0xff]  ;;  %v259_v17 = vld [vmem:[#allocation5 + $0x278] sm:$0xff] }
 0x1b8   :  { %453 = vst [vmem:[#allocation2 + $0x128] sm:$0xff] %v196_v18  ;;  %454 = vst [vmem:[#allocation2 + $0x130] sm:$0xff] %v197_v19  ;;  %v260_v18 = vld [vmem:[#allocation5 + $0x280] sm:$0xff]  ;;  %v261_v19 = vld [vmem:[#allocation5 + $0x288] sm:$0xff] }
 0x1b9   :  { %455 = vst [vmem:[#allocation2 + $0x138] sm:$0xff] %v198_v20  ;;  %456 = vst [vmem:[#allocation2 + $0x140] sm:$0xff] %v199_v21  ;;  %v262_v20 = vld [vmem:[#allocation5 + $0x290] sm:$0xff]  ;;  %v263_v21 = vld [vmem:[#allocation5 + $0x298] sm:$0xff] }
 0x1ba   :  { %457 = vst [vmem:[#allocation2 + $0x148] sm:$0xff] %v200_v22  ;;  %458 = vst [vmem:[#allocation2 + $0x150] sm:$0xff] %v201_v23  ;;  %v264_v22 = vld [vmem:[#allocation5 + $0x2a0] sm:$0xff]  ;;  %v265_v23 = vld [vmem:[#allocation5 + $0x2a8] sm:$0xff] }
 0x1bb   :  { %459 = vst [vmem:[#allocation2 + $0x158] sm:$0xff] %v202_v24  ;;  %460 = vst [vmem:[#allocation2 + $0x160] sm:$0xff] %v203_v25  ;;  %v266_v24 = vld [vmem:[#allocation5 + $0x2b0] sm:$0xff]  ;;  %v267_v25 = vld [vmem:[#allocation5 + $0x2b8] sm:$0xff] }
 0x1bc   :  { %461 = vst [vmem:[#allocation2 + $0x168] sm:$0xff] %v204_v26  ;;  %462 = vst [vmem:[#allocation2 + $0x170] sm:$0xff] %v205_v27  ;;  %v268_v26 = vld [vmem:[#allocation5 + $0x2c0] sm:$0xff]  ;;  %v269_v27 = vld [vmem:[#allocation5 + $0x2c8] sm:$0xff] }
 0x1bd   :  { %463 = vst [vmem:[#allocation2 + $0x178] sm:$0xff] %v206_v28  ;;  %464 = vst [vmem:[#allocation2 + $0x180] sm:$0xff] %v207_v29  ;;  %v270_v28 = vld [vmem:[#allocation5 + $0x2d0] sm:$0xff]  ;;  %v271_v29 = vld [vmem:[#allocation5 + $0x2d8] sm:$0xff] }
 0x1be   :  { %465 = vst [vmem:[#allocation2 + $0x188] sm:$0xff] %v208_v30  ;;  %466 = vst [vmem:[#allocation2 + $0x190] sm:$0xff] %v209_v31  ;;  %v272_v30 = vld [vmem:[#allocation5 + $0x2e0] sm:$0xff]  ;;  %v273_v31 = vld [vmem:[#allocation5 + $0x2e8] sm:$0xff] }
 0x1bf   :  { %467 = vst [vmem:[#allocation2 + $0x198] sm:$0xff] %v210_v32  ;;  %468 = vst [vmem:[#allocation2 + $0x1a0] sm:$0xff] %v211_v33  ;;  %v274_v32 = vld [vmem:[#allocation5 + $0x2f0] sm:$0xff]  ;;  %v275_v33 = vld [vmem:[#allocation5 + $0x2f8] sm:$0xff] }
 0x1c0   :  { %469 = vst [vmem:[#allocation2 + $0x1b8] sm:$0xff] %v212_v34  ;;  %470 = vst [vmem:[#allocation2 + $0x1c0] sm:$0xff] %v213_v35  ;;  %v276_v34 = vld [vmem:[#allocation5 + $0x300] sm:$0xff]  ;;  %v277_v35 = vld [vmem:[#allocation5 + $0x308] sm:$0xff] }
 0x1c1   :  { %471 = vst [vmem:[#allocation2 + $0x1c8] sm:$0xff] %v214_v36  ;;  %472 = vst [vmem:[#allocation2 + $0x1d0] sm:$0xff] %v215_v37  ;;  %v278_v36 = vld [vmem:[#allocation5 + $0x310] sm:$0xff]  ;;  %v279_v37 = vld [vmem:[#allocation5 + $0x318] sm:$0xff] }
 0x1c2   :  { %473 = vst [vmem:[#allocation2 + $0x1d8] sm:$0xff] %v216_v38  ;;  %474 = vst [vmem:[#allocation2 + $0x1e0] sm:$0xff] %v217_v39  ;;  %v280_v38 = vld [vmem:[#allocation5 + $0x320] sm:$0xff]  ;;  %v281_v39 = vld [vmem:[#allocation5 + $0x328] sm:$0xff] }
 0x1c3   :  { %475 = vst [vmem:[#allocation2 + $0x1e8] sm:$0xff] %v218_v40  ;;  %476 = vst [vmem:[#allocation2 + $0x1f0] sm:$0xff] %v219_v41  ;;  %v282_v40 = vld [vmem:[#allocation5 + $0x330] sm:$0xff]  ;;  %v283_v41 = vld [vmem:[#allocation5 + $0x338] sm:$0xff] }
 0x1c4   :  { %477 = vst [vmem:[#allocation2 + $0x1f8] sm:$0xff] %v220_v42  ;;  %478 = vst [vmem:[#allocation2 + $0x200] sm:$0xff] %v221_v43  ;;  %v284_v42 = vld [vmem:[#allocation5 + $0x340] sm:$0xff]  ;;  %v285_v43 = vld [vmem:[#allocation5 + $0x348] sm:$0xff] }
 0x1c5   :  { %479 = vst [vmem:[#allocation2 + $0x208] sm:$0xff] %v222_v44  ;;  %480 = vst [vmem:[#allocation2 + $0x210] sm:$0xff] %v223_v45  ;;  %v286_v44 = vld [vmem:[#allocation5 + $0x350] sm:$0xff]  ;;  %v287_v45 = vld [vmem:[#allocation5 + $0x358] sm:$0xff] }
 0x1c6   :  { %481 = vst [vmem:[#allocation2 + $0x218] sm:$0xff] %v224_v46  ;;  %482 = vst [vmem:[#allocation2 + $0x220] sm:$0xff] %v225_v47  ;;  %v288_v46 = vld [vmem:[#allocation5 + $0x360] sm:$0xff]  ;;  %v289_v47 = vld [vmem:[#allocation5 + $0x368] sm:$0xff] }
 0x1c7   :  { %483 = vst [vmem:[#allocation2 + $0x228] sm:$0xff] %v226_v48  ;;  %484 = vst [vmem:[#allocation2 + $0x230] sm:$0xff] %v227_v49  ;;  %v290_v48 = vld [vmem:[#allocation5 + $0x370] sm:$0xff]  ;;  %v291_v49 = vld [vmem:[#allocation5 + $0x378] sm:$0xff] }
 0x1c8   :  { %485 = vst [vmem:[#allocation2 + $0x248] sm:$0xff] %v228_v50  ;;  %486 = vst [vmem:[#allocation2 + $0x250] sm:$0xff] %v229_v51  ;;  %v292_v50 = vld [vmem:[#allocation5 + $0x380] sm:$0xff]  ;;  %v293_v51 = vld [vmem:[#allocation5 + $0x388] sm:$0xff] }
 0x1c9   :  { %487 = vst [vmem:[#allocation2 + $0x258] sm:$0xff] %v230_v52  ;;  %488 = vst [vmem:[#allocation2 + $0x260] sm:$0xff] %v231_v53  ;;  %v294_v52 = vld [vmem:[#allocation5 + $0x390] sm:$0xff]  ;;  %v295_v53 = vld [vmem:[#allocation5 + $0x398] sm:$0xff] }
 0x1ca   :  { %489 = vst [vmem:[#allocation2 + $0x268] sm:$0xff] %v232_v54  ;;  %490 = vst [vmem:[#allocation2 + $0x270] sm:$0xff] %v233_v55  ;;  %v296_v54 = vld [vmem:[#allocation5 + $0x3a0] sm:$0xff]  ;;  %v297_v55 = vld [vmem:[#allocation5 + $0x3a8] sm:$0xff] }
 0x1cb   :  { %491 = vst [vmem:[#allocation2 + $0x278] sm:$0xff] %v234_v56  ;;  %492 = vst [vmem:[#allocation2 + $0x280] sm:$0xff] %v235_v57  ;;  %v298_v56 = vld [vmem:[#allocation5 + $0x3b0] sm:$0xff]  ;;  %v299_v57 = vld [vmem:[#allocation5 + $0x3b8] sm:$0xff] }
 0x1cc   :  { %493 = vst [vmem:[#allocation2 + $0x288] sm:$0xff] %v236_v58  ;;  %494 = vst [vmem:[#allocation2 + $0x290] sm:$0xff] %v237_v59  ;;  %v300_v58 = vld [vmem:[#allocation5 + $0x3c0] sm:$0xff]  ;;  %v301_v59 = vld [vmem:[#allocation5 + $0x3c8] sm:$0xff] }
 0x1cd   :  { %495 = vst [vmem:[#allocation2 + $0x298] sm:$0xff] %v238_v60  ;;  %496 = vst [vmem:[#allocation2 + $0x2a0] sm:$0xff] %v239_v61  ;;  %v302_v60 = vld [vmem:[#allocation5 + $0x3d0] sm:$0xff]  ;;  %v303_v61 = vld [vmem:[#allocation5 + $0x3d8] sm:$0xff] }
 0x1ce   :  { %497 = vst [vmem:[#allocation2 + $0x2a8] sm:$0xff] %v240_v62  ;;  %498 = vst [vmem:[#allocation2 + $0x2b0] sm:$0xff] %v241_v63  ;;  %v304_v62 = vld [vmem:[#allocation5 + $0x3e0] sm:$0xff]  ;;  %v305_v63 = vld [vmem:[#allocation5 + $0x3e8] sm:$0xff] }
 0x1cf   :  { %499 = vst [vmem:[#allocation2 + $0x2b8] sm:$0xff] %v242_v0  ;;  %500 = vst [vmem:[#allocation2 + $0x2c0] sm:$0xff] %v243_v1  ;;  %v306_v0 = vld [vmem:[#allocation5 + $0x3f0] sm:$0xff]  ;;  %v307_v1 = vld [vmem:[#allocation5 + $0x3f8] sm:$0xff] }
 0x1d0   :  { %501 = vst [vmem:[#allocation2 + $0x2d8] sm:$0xff] %v244_v2  ;;  %502 = vst [vmem:[#allocation2 + $0x2e0] sm:$0xff] %v245_v3  ;;  %v308_v2 = vld [vmem:[#allocation5 + $0x400] sm:$0xff]  ;;  %v309_v3 = vld [vmem:[#allocation5 + $0x408] sm:$0xff] }
 0x1d1   :  { %503 = vst [vmem:[#allocation2 + $0x2e8] sm:$0xff] %v246_v4  ;;  %504 = vst [vmem:[#allocation2 + $0x2f0] sm:$0xff] %v247_v5  ;;  %v310_v4 = vld [vmem:[#allocation5 + $0x410] sm:$0xff]  ;;  %v311_v5 = vld [vmem:[#allocation5 + $0x418] sm:$0xff] }
 0x1d2   :  { %505 = vst [vmem:[#allocation2 + $0x2f8] sm:$0xff] %v248_v6  ;;  %506 = vst [vmem:[#allocation2 + $0x300] sm:$0xff] %v249_v7  ;;  %v312_v6 = vld [vmem:[#allocation5 + $0x420] sm:$0xff]  ;;  %v313_v7 = vld [vmem:[#allocation5 + $0x428] sm:$0xff] }
 0x1d3   :  { %507 = vst [vmem:[#allocation2 + $0x308] sm:$0xff] %v250_v8  ;;  %508 = vst [vmem:[#allocation2 + $0x310] sm:$0xff] %v251_v9  ;;  %v314_v8 = vld [vmem:[#allocation5 + $0x430] sm:$0xff]  ;;  %v315_v9 = vld [vmem:[#allocation5 + $0x438] sm:$0xff] }
 0x1d4   :  { %509 = vst [vmem:[#allocation2 + $0x318] sm:$0xff] %v252_v10  ;;  %510 = vst [vmem:[#allocation2 + $0x320] sm:$0xff] %v253_v11  ;;  %v316_v10 = vld [vmem:[#allocation5 + $0x440] sm:$0xff]  ;;  %v317_v11 = vld [vmem:[#allocation5 + $0x448] sm:$0xff] }
 0x1d5   :  { %511 = vst [vmem:[#allocation2 + $0x328] sm:$0xff] %v254_v12  ;;  %512 = vst [vmem:[#allocation2 + $0x330] sm:$0xff] %v255_v13  ;;  %v318_v12 = vld [vmem:[#allocation5 + $0x450] sm:$0xff]  ;;  %v319_v13 = vld [vmem:[#allocation5 + $0x458] sm:$0xff] }
 0x1d6   :  { %513 = vst [vmem:[#allocation2 + $0x338] sm:$0xff] %v256_v14  ;;  %514 = vst [vmem:[#allocation2 + $0x340] sm:$0xff] %v257_v15  ;;  %v320_v14 = vld [vmem:[#allocation5 + $0x460] sm:$0xff]  ;;  %v321_v15 = vld [vmem:[#allocation5 + $0x468] sm:$0xff] }
 0x1d7   :  { %515 = vst [vmem:[#allocation2 + $0x348] sm:$0xff] %v258_v16  ;;  %516 = vst [vmem:[#allocation2 + $0x350] sm:$0xff] %v259_v17  ;;  %v322_v16 = vld [vmem:[#allocation5 + $0x470] sm:$0xff]  ;;  %v323_v17 = vld [vmem:[#allocation5 + $0x478] sm:$0xff] }
 0x1d8   :  { %517 = vst [vmem:[#allocation2 + $0x368] sm:$0xff] %v260_v18  ;;  %518 = vst [vmem:[#allocation2 + $0x370] sm:$0xff] %v261_v19  ;;  %v324_v18 = vld [vmem:[#allocation5 + $0x480] sm:$0xff]  ;;  %v325_v19 = vld [vmem:[#allocation5 + $0x488] sm:$0xff] }
 0x1d9   :  { %519 = vst [vmem:[#allocation2 + $0x378] sm:$0xff] %v262_v20  ;;  %520 = vst [vmem:[#allocation2 + $0x380] sm:$0xff] %v263_v21  ;;  %v326_v20 = vld [vmem:[#allocation5 + $0x490] sm:$0xff]  ;;  %v327_v21 = vld [vmem:[#allocation5 + $0x498] sm:$0xff] }
 0x1da   :  { %521 = vst [vmem:[#allocation2 + $0x388] sm:$0xff] %v264_v22  ;;  %522 = vst [vmem:[#allocation2 + $0x390] sm:$0xff] %v265_v23  ;;  %v328_v22 = vld [vmem:[#allocation5 + $0x4a0] sm:$0xff]  ;;  %v329_v23 = vld [vmem:[#allocation5 + $0x4a8] sm:$0xff] }
 0x1db   :  { %523 = vst [vmem:[#allocation2 + $0x398] sm:$0xff] %v266_v24  ;;  %524 = vst [vmem:[#allocation2 + $0x3a0] sm:$0xff] %v267_v25  ;;  %v330_v24 = vld [vmem:[#allocation5 + $0x4b0] sm:$0xff]  ;;  %v331_v25 = vld [vmem:[#allocation5 + $0x4b8] sm:$0xff] }
 0x1dc   :  { %525 = vst [vmem:[#allocation2 + $0x3a8] sm:$0xff] %v268_v26  ;;  %526 = vst [vmem:[#allocation2 + $0x3b0] sm:$0xff] %v269_v27  ;;  %v332_v26 = vld [vmem:[#allocation5 + $0x4c0] sm:$0xff]  ;;  %v333_v27 = vld [vmem:[#allocation5 + $0x4c8] sm:$0xff] }
 0x1dd   :  { %527 = vst [vmem:[#allocation2 + $0x3b8] sm:$0xff] %v270_v28  ;;  %528 = vst [vmem:[#allocation2 + $0x3c0] sm:$0xff] %v271_v29  ;;  %v334_v28 = vld [vmem:[#allocation5 + $0x4d0] sm:$0xff]  ;;  %v335_v29 = vld [vmem:[#allocation5 + $0x4d8] sm:$0xff] }
 0x1de   :  { %529 = vst [vmem:[#allocation2 + $0x3c8] sm:$0xff] %v272_v30  ;;  %530 = vst [vmem:[#allocation2 + $0x3d0] sm:$0xff] %v273_v31  ;;  %v336_v30 = vld [vmem:[#allocation5 + $0x4e0] sm:$0xff]  ;;  %v337_v31 = vld [vmem:[#allocation5 + $0x4e8] sm:$0xff] }
 0x1df   :  { %531 = vst [vmem:[#allocation2 + $0x3d8] sm:$0xff] %v274_v32  ;;  %532 = vst [vmem:[#allocation2 + $0x3e0] sm:$0xff] %v275_v33  ;;  %v338_v32 = vld [vmem:[#allocation5 + $0x4f0] sm:$0xff]  ;;  %v339_v33 = vld [vmem:[#allocation5 + $0x4f8] sm:$0xff] }
 0x1e0   :  { %533 = vst [vmem:[#allocation2 + $0x3f8] sm:$0xff] %v276_v34  ;;  %534 = vst [vmem:[#allocation2 + $0x400] sm:$0xff] %v277_v35  ;;  %v340_v34 = vld [vmem:[#allocation5 + $0x500] sm:$0xff]  ;;  %v341_v35 = vld [vmem:[#allocation5 + $0x508] sm:$0xff] }
 0x1e1   :  { %535 = vst [vmem:[#allocation2 + $0x408] sm:$0xff] %v278_v36  ;;  %536 = vst [vmem:[#allocation2 + $0x410] sm:$0xff] %v279_v37  ;;  %v342_v36 = vld [vmem:[#allocation5 + $0x510] sm:$0xff]  ;;  %v343_v37 = vld [vmem:[#allocation5 + $0x518] sm:$0xff] }
 0x1e2   :  { %537 = vst [vmem:[#allocation2 + $0x418] sm:$0xff] %v280_v38  ;;  %538 = vst [vmem:[#allocation2 + $0x420] sm:$0xff] %v281_v39  ;;  %v344_v38 = vld [vmem:[#allocation5 + $0x520] sm:$0xff]  ;;  %v345_v39 = vld [vmem:[#allocation5 + $0x528] sm:$0xff] }
 0x1e3   :  { %539 = vst [vmem:[#allocation2 + $0x428] sm:$0xff] %v282_v40  ;;  %540 = vst [vmem:[#allocation2 + $0x430] sm:$0xff] %v283_v41  ;;  %v346_v40 = vld [vmem:[#allocation5 + $0x530] sm:$0xff]  ;;  %v347_v41 = vld [vmem:[#allocation5 + $0x538] sm:$0xff] }
 0x1e4   :  { %541 = vst [vmem:[#allocation2 + $0x438] sm:$0xff] %v284_v42  ;;  %542 = vst [vmem:[#allocation2 + $0x440] sm:$0xff] %v285_v43  ;;  %v348_v42 = vld [vmem:[#allocation5 + $0x540] sm:$0xff]  ;;  %v349_v43 = vld [vmem:[#allocation5 + $0x548] sm:$0xff] }
 0x1e5   :  { %543 = vst [vmem:[#allocation2 + $0x448] sm:$0xff] %v286_v44  ;;  %544 = vst [vmem:[#allocation2 + $0x450] sm:$0xff] %v287_v45  ;;  %v350_v44 = vld [vmem:[#allocation5 + $0x550] sm:$0xff]  ;;  %v351_v45 = vld [vmem:[#allocation5 + $0x558] sm:$0xff] }
 0x1e6   :  { %545 = vst [vmem:[#allocation2 + $0x458] sm:$0xff] %v288_v46  ;;  %546 = vst [vmem:[#allocation2 + $0x460] sm:$0xff] %v289_v47  ;;  %v352_v46 = vld [vmem:[#allocation5 + $0x560] sm:$0xff]  ;;  %v353_v47 = vld [vmem:[#allocation5 + $0x568] sm:$0xff] }
 0x1e7   :  { %547 = vst [vmem:[#allocation2 + $0x468] sm:$0xff] %v290_v48  ;;  %548 = vst [vmem:[#allocation2 + $0x470] sm:$0xff] %v291_v49  ;;  %v354_v48 = vld [vmem:[#allocation5 + $0x570] sm:$0xff]  ;;  %v355_v49 = vld [vmem:[#allocation5 + $0x578] sm:$0xff] }
 0x1e8   :  { %549 = vst [vmem:[#allocation2 + $0x488] sm:$0xff] %v292_v50  ;;  %550 = vst [vmem:[#allocation2 + $0x490] sm:$0xff] %v293_v51  ;;  %v356_v50 = vld [vmem:[#allocation5 + $0x580] sm:$0xff]  ;;  %v357_v51 = vld [vmem:[#allocation5 + $0x588] sm:$0xff] }
 0x1e9   :  { %551 = vst [vmem:[#allocation2 + $0x498] sm:$0xff] %v294_v52  ;;  %552 = vst [vmem:[#allocation2 + $0x4a0] sm:$0xff] %v295_v53  ;;  %v358_v52 = vld [vmem:[#allocation5 + $0x590] sm:$0xff]  ;;  %v359_v53 = vld [vmem:[#allocation5 + $0x598] sm:$0xff] }
 0x1ea   :  { %553 = vst [vmem:[#allocation2 + $0x4a8] sm:$0xff] %v296_v54  ;;  %554 = vst [vmem:[#allocation2 + $0x4b0] sm:$0xff] %v297_v55  ;;  %v360_v54 = vld [vmem:[#allocation5 + $0x5a0] sm:$0xff]  ;;  %v361_v55 = vld [vmem:[#allocation5 + $0x5a8] sm:$0xff] }
 0x1eb   :  { %555 = vst [vmem:[#allocation2 + $0x4b8] sm:$0xff] %v298_v56  ;;  %556 = vst [vmem:[#allocation2 + $0x4c0] sm:$0xff] %v299_v57  ;;  %v362_v56 = vld [vmem:[#allocation5 + $0x5b0] sm:$0xff]  ;;  %v363_v57 = vld [vmem:[#allocation5 + $0x5b8] sm:$0xff] }
 0x1ec   :  { %557 = vst [vmem:[#allocation2 + $0x4c8] sm:$0xff] %v300_v58  ;;  %558 = vst [vmem:[#allocation2 + $0x4d0] sm:$0xff] %v301_v59  ;;  %v364_v58 = vld [vmem:[#allocation5 + $0x5c0] sm:$0xff]  ;;  %v365_v59 = vld [vmem:[#allocation5 + $0x5c8] sm:$0xff] }
 0x1ed   :  { %559 = vst [vmem:[#allocation2 + $0x4d8] sm:$0xff] %v302_v60  ;;  %560 = vst [vmem:[#allocation2 + $0x4e0] sm:$0xff] %v303_v61  ;;  %v366_v60 = vld [vmem:[#allocation5 + $0x5d0] sm:$0xff]  ;;  %v367_v61 = vld [vmem:[#allocation5 + $0x5d8] sm:$0xff] }
 0x1ee   :  { %561 = vst [vmem:[#allocation2 + $0x4e8] sm:$0xff] %v304_v62  ;;  %562 = vst [vmem:[#allocation2 + $0x4f0] sm:$0xff] %v305_v63  ;;  %v368_v62 = vld [vmem:[#allocation5 + $0x5e0] sm:$0xff]  ;;  %v369_v63 = vld [vmem:[#allocation5 + $0x5e8] sm:$0xff] }
 0x1ef   :  { %563 = vst [vmem:[#allocation2 + $0x4f8] sm:$0xff] %v306_v0  ;;  %564 = vst [vmem:[#allocation2 + $0x500] sm:$0xff] %v307_v1  ;;  %v370_v0 = vld [vmem:[#allocation5 + $0x5f0] sm:$0xff]  ;;  %v371_v1 = vld [vmem:[#allocation5 + $0x5f8] sm:$0xff] }
 0x1f0   :  { %565 = vst [vmem:[#allocation2 + $0x518] sm:$0xff] %v308_v2  ;;  %566 = vst [vmem:[#allocation2 + $0x520] sm:$0xff] %v309_v3  ;;  %v372_v2 = vld [vmem:[#allocation5 + $0x600] sm:$0xff]  ;;  %v373_v3 = vld [vmem:[#allocation5 + $0x608] sm:$0xff] }
 0x1f1   :  { %567 = vst [vmem:[#allocation2 + $0x528] sm:$0xff] %v310_v4  ;;  %568 = vst [vmem:[#allocation2 + $0x530] sm:$0xff] %v311_v5  ;;  %v374_v4 = vld [vmem:[#allocation5 + $0x610] sm:$0xff]  ;;  %v375_v5 = vld [vmem:[#allocation5 + $0x618] sm:$0xff] }
 0x1f2   :  { %569 = vst [vmem:[#allocation2 + $0x538] sm:$0xff] %v312_v6  ;;  %570 = vst [vmem:[#allocation2 + $0x540] sm:$0xff] %v313_v7  ;;  %v376_v6 = vld [vmem:[#allocation5 + $0x620] sm:$0xff]  ;;  %v377_v7 = vld [vmem:[#allocation5 + $0x628] sm:$0xff] }
 0x1f3   :  { %571 = vst [vmem:[#allocation2 + $0x548] sm:$0xff] %v314_v8  ;;  %572 = vst [vmem:[#allocation2 + $0x550] sm:$0xff] %v315_v9  ;;  %v378_v8 = vld [vmem:[#allocation5 + $0x630] sm:$0xff]  ;;  %v379_v9 = vld [vmem:[#allocation5 + $0x638] sm:$0xff] }
 0x1f4   :  { %573 = vst [vmem:[#allocation2 + $0x558] sm:$0xff] %v316_v10  ;;  %574 = vst [vmem:[#allocation2 + $0x560] sm:$0xff] %v317_v11  ;;  %v380_v10 = vld [vmem:[#allocation5 + $0x640] sm:$0xff]  ;;  %v381_v11 = vld [vmem:[#allocation5 + $0x648] sm:$0xff] }
 0x1f5   :  { %575 = vst [vmem:[#allocation2 + $0x568] sm:$0xff] %v318_v12  ;;  %576 = vst [vmem:[#allocation2 + $0x570] sm:$0xff] %v319_v13  ;;  %v382_v12 = vld [vmem:[#allocation5 + $0x650] sm:$0xff]  ;;  %v383_v13 = vld [vmem:[#allocation5 + $0x658] sm:$0xff] }
 0x1f6   :  { %577 = vst [vmem:[#allocation2 + $0x578] sm:$0xff] %v320_v14  ;;  %578 = vst [vmem:[#allocation2 + $0x580] sm:$0xff] %v321_v15  ;;  %v384_v14 = vld [vmem:[#allocation5 + $0x660] sm:$0xff]  ;;  %v385_v15 = vld [vmem:[#allocation5 + $0x668] sm:$0xff] }
 0x1f7   :  { %579 = vst [vmem:[#allocation2 + $0x588] sm:$0xff] %v322_v16  ;;  %580 = vst [vmem:[#allocation2 + $0x590] sm:$0xff] %v323_v17  ;;  %v386_v16 = vld [vmem:[#allocation5 + $0x670] sm:$0xff]  ;;  %v387_v17 = vld [vmem:[#allocation5 + $0x678] sm:$0xff] }
 0x1f8   :  { %581 = vst [vmem:[#allocation2 + $0x5a8] sm:$0xff] %v324_v18  ;;  %582 = vst [vmem:[#allocation2 + $0x5b0] sm:$0xff] %v325_v19  ;;  %v388_v18 = vld [vmem:[#allocation5 + $0x680] sm:$0xff]  ;;  %v389_v19 = vld [vmem:[#allocation5 + $0x688] sm:$0xff] }
 0x1f9   :  { %583 = vst [vmem:[#allocation2 + $0x5b8] sm:$0xff] %v326_v20  ;;  %584 = vst [vmem:[#allocation2 + $0x5c0] sm:$0xff] %v327_v21  ;;  %v390_v20 = vld [vmem:[#allocation5 + $0x690] sm:$0xff]  ;;  %v391_v21 = vld [vmem:[#allocation5 + $0x698] sm:$0xff] }
 0x1fa   :  { %585 = vst [vmem:[#allocation2 + $0x5c8] sm:$0xff] %v328_v22  ;;  %586 = vst [vmem:[#allocation2 + $0x5d0] sm:$0xff] %v329_v23  ;;  %v392_v22 = vld [vmem:[#allocation5 + $0x6a0] sm:$0xff]  ;;  %v393_v23 = vld [vmem:[#allocation5 + $0x6a8] sm:$0xff] }
 0x1fb   :  { %587 = vst [vmem:[#allocation2 + $0x5d8] sm:$0xff] %v330_v24  ;;  %588 = vst [vmem:[#allocation2 + $0x5e0] sm:$0xff] %v331_v25  ;;  %v394_v24 = vld [vmem:[#allocation5 + $0x6b0] sm:$0xff]  ;;  %v395_v25 = vld [vmem:[#allocation5 + $0x6b8] sm:$0xff] }
 0x1fc   :  { %589 = vst [vmem:[#allocation2 + $0x5e8] sm:$0xff] %v332_v26  ;;  %590 = vst [vmem:[#allocation2 + $0x5f0] sm:$0xff] %v333_v27  ;;  %v396_v26 = vld [vmem:[#allocation5 + $0x6c0] sm:$0xff]  ;;  %v397_v27 = vld [vmem:[#allocation5 + $0x6c8] sm:$0xff] }
 0x1fd   :  { %591 = vst [vmem:[#allocation2 + $0x5f8] sm:$0xff] %v334_v28  ;;  %592 = vst [vmem:[#allocation2 + $0x600] sm:$0xff] %v335_v29  ;;  %v398_v28 = vld [vmem:[#allocation5 + $0x6d0] sm:$0xff]  ;;  %v399_v29 = vld [vmem:[#allocation5 + $0x6d8] sm:$0xff] }
 0x1fe   :  { %593 = vst [vmem:[#allocation2 + $0x608] sm:$0xff] %v336_v30  ;;  %594 = vst [vmem:[#allocation2 + $0x610] sm:$0xff] %v337_v31  ;;  %v400_v30 = vld [vmem:[#allocation5 + $0x6e0] sm:$0xff]  ;;  %v401_v31 = vld [vmem:[#allocation5 + $0x6e8] sm:$0xff] }
 0x1ff   :  { %595 = vst [vmem:[#allocation2 + $0x618] sm:$0xff] %v338_v32  ;;  %596 = vst [vmem:[#allocation2 + $0x620] sm:$0xff] %v339_v33  ;;  %v402_v32 = vld [vmem:[#allocation5 + $0x6f0] sm:$0xff]  ;;  %v403_v33 = vld [vmem:[#allocation5 + $0x6f8] sm:$0xff] }
 0x200   :  { %597 = vst [vmem:[#allocation2 + $0x638] sm:$0xff] %v340_v34  ;;  %598 = vst [vmem:[#allocation2 + $0x640] sm:$0xff] %v341_v35  ;;  %v404_v34 = vld [vmem:[#allocation5 + $0x700] sm:$0xff]  ;;  %v405_v35 = vld [vmem:[#allocation5 + $0x708] sm:$0xff] }
 0x201   :  { %599 = vst [vmem:[#allocation2 + $0x648] sm:$0xff] %v342_v36  ;;  %600 = vst [vmem:[#allocation2 + $0x650] sm:$0xff] %v343_v37  ;;  %v406_v36 = vld [vmem:[#allocation5 + $0x710] sm:$0xff]  ;;  %v407_v37 = vld [vmem:[#allocation5 + $0x718] sm:$0xff] }
 0x202   :  { %601 = vst [vmem:[#allocation2 + $0x658] sm:$0xff] %v344_v38  ;;  %602 = vst [vmem:[#allocation2 + $0x660] sm:$0xff] %v345_v39  ;;  %v408_v38 = vld [vmem:[#allocation5 + $0x720] sm:$0xff]  ;;  %v409_v39 = vld [vmem:[#allocation5 + $0x728] sm:$0xff] }
 0x203   :  { %603 = vst [vmem:[#allocation2 + $0x668] sm:$0xff] %v346_v40  ;;  %604 = vst [vmem:[#allocation2 + $0x670] sm:$0xff] %v347_v41  ;;  %v410_v40 = vld [vmem:[#allocation5 + $0x730] sm:$0xff]  ;;  %v411_v41 = vld [vmem:[#allocation5 + $0x738] sm:$0xff] }
 0x204   :  { %605 = vst [vmem:[#allocation2 + $0x678] sm:$0xff] %v348_v42  ;;  %606 = vst [vmem:[#allocation2 + $0x680] sm:$0xff] %v349_v43  ;;  %v412_v42 = vld [vmem:[#allocation5 + $0x740] sm:$0xff]  ;;  %v413_v43 = vld [vmem:[#allocation5 + $0x748] sm:$0xff] }
 0x205   :  { %607 = vst [vmem:[#allocation2 + $0x688] sm:$0xff] %v350_v44  ;;  %608 = vst [vmem:[#allocation2 + $0x690] sm:$0xff] %v351_v45  ;;  %v414_v44 = vld [vmem:[#allocation5 + $0x750] sm:$0xff]  ;;  %v415_v45 = vld [vmem:[#allocation5 + $0x758] sm:$0xff] }
 0x206   :  { %609 = vst [vmem:[#allocation2 + $0x698] sm:$0xff] %v352_v46  ;;  %610 = vst [vmem:[#allocation2 + $0x6a0] sm:$0xff] %v353_v47  ;;  %v416_v46 = vld [vmem:[#allocation5 + $0x760] sm:$0xff]  ;;  %v417_v47 = vld [vmem:[#allocation5 + $0x768] sm:$0xff] }
 0x207   :  { %611 = vst [vmem:[#allocation2 + $0x6a8] sm:$0xff] %v354_v48  ;;  %612 = vst [vmem:[#allocation2 + $0x6b0] sm:$0xff] %v355_v49  ;;  %v418_v48 = vld [vmem:[#allocation5 + $0x770] sm:$0xff]  ;;  %v419_v49 = vld [vmem:[#allocation5 + $0x778] sm:$0xff] }
 0x208   :  { %613 = vst [vmem:[#allocation2 + $0x6c8] sm:$0xff] %v356_v50  ;;  %614 = vst [vmem:[#allocation2 + $0x6d0] sm:$0xff] %v357_v51  ;;  %v420_v50 = vld [vmem:[#allocation5 + $0x780] sm:$0xff]  ;;  %v421_v51 = vld [vmem:[#allocation5 + $0x788] sm:$0xff] }
 0x209   :  { %615 = vst [vmem:[#allocation2 + $0x6d8] sm:$0xff] %v358_v52  ;;  %616 = vst [vmem:[#allocation2 + $0x6e0] sm:$0xff] %v359_v53  ;;  %v422_v52 = vld [vmem:[#allocation5 + $0x790] sm:$0xff]  ;;  %v423_v53 = vld [vmem:[#allocation5 + $0x798] sm:$0xff] }
 0x20a   :  { %617 = vst [vmem:[#allocation2 + $0x6e8] sm:$0xff] %v360_v54  ;;  %618 = vst [vmem:[#allocation2 + $0x6f0] sm:$0xff] %v361_v55  ;;  %v424_v54 = vld [vmem:[#allocation5 + $0x7a0] sm:$0xff]  ;;  %v425_v55 = vld [vmem:[#allocation5 + $0x7a8] sm:$0xff] }
 0x20b   :  { %619 = vst [vmem:[#allocation2 + $0x6f8] sm:$0xff] %v362_v56  ;;  %620 = vst [vmem:[#allocation2 + $0x700] sm:$0xff] %v363_v57  ;;  %v426_v56 = vld [vmem:[#allocation5 + $0x7b0] sm:$0xff]  ;;  %v427_v57 = vld [vmem:[#allocation5 + $0x7b8] sm:$0xff] }
 0x20c   :  { %621 = vst [vmem:[#allocation2 + $0x708] sm:$0xff] %v364_v58  ;;  %622 = vst [vmem:[#allocation2 + $0x710] sm:$0xff] %v365_v59  ;;  %v428_v58 = vld [vmem:[#allocation5 + $0x7c0] sm:$0xff]  ;;  %v429_v59 = vld [vmem:[#allocation5 + $0x7c8] sm:$0xff] }
 0x20d   :  { %623 = vst [vmem:[#allocation2 + $0x718] sm:$0xff] %v366_v60  ;;  %624 = vst [vmem:[#allocation2 + $0x720] sm:$0xff] %v367_v61  ;;  %v430_v60 = vld [vmem:[#allocation5 + $0x7d0] sm:$0xff]  ;;  %v431_v61 = vld [vmem:[#allocation5 + $0x7d8] sm:$0xff] }
 0x20e   :  { %625 = vst [vmem:[#allocation2 + $0x728] sm:$0xff] %v368_v62  ;;  %626 = vst [vmem:[#allocation2 + $0x730] sm:$0xff] %v369_v63  ;;  %v432_v62 = vld [vmem:[#allocation5 + $0x7e0] sm:$0xff]  ;;  %v433_v63 = vld [vmem:[#allocation5 + $0x7e8] sm:$0xff] }
 0x20f   :  { %627 = vst [vmem:[#allocation2 + $0x738] sm:$0xff] %v370_v0  ;;  %628 = vst [vmem:[#allocation2 + $0x740] sm:$0xff] %v371_v1  ;;  %v434_v0 = vld [vmem:[#allocation5 + $0x7f0] sm:$0xff]  ;;  %v435_v1 = vld [vmem:[#allocation5 + $0x7f8] sm:$0xff] }
 0x210   :  { %629 = vst [vmem:[#allocation2 + $0x758] sm:$0xff] %v372_v2  ;;  %630 = vst [vmem:[#allocation2 + $0x760] sm:$0xff] %v373_v3 }
 0x211   :  { %631 = vst [vmem:[#allocation2 + $0x768] sm:$0xff] %v374_v4  ;;  %632 = vst [vmem:[#allocation2 + $0x770] sm:$0xff] %v375_v5 }
 0x212   :  { %633 = vst [vmem:[#allocation2 + $0x778] sm:$0xff] %v376_v6  ;;  %634 = vst [vmem:[#allocation2 + $0x780] sm:$0xff] %v377_v7 }
 0x213   :  { %635 = vst [vmem:[#allocation2 + $0x788] sm:$0xff] %v378_v8  ;;  %636 = vst [vmem:[#allocation2 + $0x790] sm:$0xff] %v379_v9 }
 0x214   :  { %637 = vst [vmem:[#allocation2 + $0x798] sm:$0xff] %v380_v10  ;;  %638 = vst [vmem:[#allocation2 + $0x7a0] sm:$0xff] %v381_v11 }
 0x215   :  { %639 = vst [vmem:[#allocation2 + $0x7a8] sm:$0xff] %v382_v12  ;;  %640 = vst [vmem:[#allocation2 + $0x7b0] sm:$0xff] %v383_v13 }
 0x216   :  { %641 = vst [vmem:[#allocation2 + $0x7b8] sm:$0xff] %v384_v14  ;;  %642 = vst [vmem:[#allocation2 + $0x7c0] sm:$0xff] %v385_v15 }
 0x217   :  { %643 = vst [vmem:[#allocation2 + $0x7c8] sm:$0xff] %v386_v16  ;;  %644 = vst [vmem:[#allocation2 + $0x7d0] sm:$0xff] %v387_v17 }
 0x218   :  { %645 = vst [vmem:[#allocation2 + $0x7e8] sm:$0xff] %v388_v18  ;;  %646 = vst [vmem:[#allocation2 + $0x7f0] sm:$0xff] %v389_v19 }
 0x219   :  { %647 = vst [vmem:[#allocation2 + $0x7f8] sm:$0xff] %v390_v20  ;;  %648 = vst [vmem:[#allocation2 + $0x800] sm:$0xff] %v391_v21 }
 0x21a   :  { %649 = vst [vmem:[#allocation2 + $0x808] sm:$0xff] %v392_v22  ;;  %650 = vst [vmem:[#allocation2 + $0x810] sm:$0xff] %v393_v23 }
 0x21b   :  { %651 = vst [vmem:[#allocation2 + $0x818] sm:$0xff] %v394_v24  ;;  %652 = vst [vmem:[#allocation2 + $0x820] sm:$0xff] %v395_v25 }
 0x21c   :  { %653 = vst [vmem:[#allocation2 + $0x828] sm:$0xff] %v396_v26  ;;  %654 = vst [vmem:[#allocation2 + $0x830] sm:$0xff] %v397_v27 }
 0x21d   :  { %655 = vst [vmem:[#allocation2 + $0x838] sm:$0xff] %v398_v28  ;;  %656 = vst [vmem:[#allocation2 + $0x840] sm:$0xff] %v399_v29 }
 0x21e   :  { %657 = vst [vmem:[#allocation2 + $0x848] sm:$0xff] %v400_v30  ;;  %658 = vst [vmem:[#allocation2 + $0x850] sm:$0xff] %v401_v31 }
 0x21f   :  { %659 = vst [vmem:[#allocation2 + $0x858] sm:$0xff] %v402_v32  ;;  %660 = vst [vmem:[#allocation2 + $0x860] sm:$0xff] %v403_v33 }
 0x220   :  { %661 = vst [vmem:[#allocation2 + $0x878] sm:$0xff] %v404_v34  ;;  %662 = vst [vmem:[#allocation2 + $0x880] sm:$0xff] %v405_v35 }
 0x221   :  { %663 = vst [vmem:[#allocation2 + $0x888] sm:$0xff] %v406_v36  ;;  %664 = vst [vmem:[#allocation2 + $0x890] sm:$0xff] %v407_v37 }
 0x222   :  { %665 = vst [vmem:[#allocation2 + $0x898] sm:$0xff] %v408_v38  ;;  %666 = vst [vmem:[#allocation2 + $0x8a0] sm:$0xff] %v409_v39 }
 0x223   :  { %667 = vst [vmem:[#allocation2 + $0x8a8] sm:$0xff] %v410_v40  ;;  %668 = vst [vmem:[#allocation2 + $0x8b0] sm:$0xff] %v411_v41 }
 0x224   :  { %669 = vst [vmem:[#allocation2 + $0x8b8] sm:$0xff] %v412_v42  ;;  %670 = vst [vmem:[#allocation2 + $0x8c0] sm:$0xff] %v413_v43 }
 0x225   :  { %671 = vst [vmem:[#allocation2 + $0x8c8] sm:$0xff] %v414_v44  ;;  %672 = vst [vmem:[#allocation2 + $0x8d0] sm:$0xff] %v415_v45 }
 0x226   :  { %673 = vst [vmem:[#allocation2 + $0x8d8] sm:$0xff] %v416_v46  ;;  %674 = vst [vmem:[#allocation2 + $0x8e0] sm:$0xff] %v417_v47 }
 0x227   :  { %675 = vst [vmem:[#allocation2 + $0x8e8] sm:$0xff] %v418_v48  ;;  %676 = vst [vmem:[#allocation2 + $0x8f0] sm:$0xff] %v419_v49 }
 0x228   :  { %677 = vst [vmem:[#allocation2 + $0x908] sm:$0xff] %v420_v50  ;;  %678 = vst [vmem:[#allocation2 + $0x910] sm:$0xff] %v421_v51 }
 0x229   :  { %679 = vst [vmem:[#allocation2 + $0x918] sm:$0xff] %v422_v52  ;;  %680 = vst [vmem:[#allocation2 + $0x920] sm:$0xff] %v423_v53 }
 0x22a   :  { %681 = vst [vmem:[#allocation2 + $0x928] sm:$0xff] %v424_v54  ;;  %682 = vst [vmem:[#allocation2 + $0x930] sm:$0xff] %v425_v55 }
 0x22b   :  { %683 = vst [vmem:[#allocation2 + $0x938] sm:$0xff] %v426_v56  ;;  %684 = vst [vmem:[#allocation2 + $0x940] sm:$0xff] %v427_v57 }
 0x22c   :  { %685 = vst [vmem:[#allocation2 + $0x948] sm:$0xff] %v428_v58  ;;  %686 = vst [vmem:[#allocation2 + $0x950] sm:$0xff] %v429_v59 }
 0x22d   :  { %687 = vst [vmem:[#allocation2 + $0x958] sm:$0xff] %v430_v60  ;;  %688 = vst [vmem:[#allocation2 + $0x960] sm:$0xff] %v431_v61 }
 0x22e   :  { %689 = vst [vmem:[#allocation2 + $0x968] sm:$0xff] %v432_v62  ;;  %690 = vst [vmem:[#allocation2 + $0x970] sm:$0xff] %v433_v63 }
 0x22f   :  { %691 = vst [vmem:[#allocation2 + $0x978] sm:$0xff] %v434_v0  ;;  %692 = vst [vmem:[#allocation2 + $0x980] sm:$0xff] %v435_v1 }
 0x230 LB: > { %s7902_s6 = smov 0   ;;  %s6905_s5 = sphi %s7897_s5, %s1341_s5  }
 0x231 LB: >> { %s5509_s29 = sshll.u32 %s6909_s6, 1  ;;  %s7912_s8 = smov 0   ;;  %s6909_s6 = sphi %s7902_s6, %s1347_s6  }
 0x232   : >> { %s7910_s30 = sadd.s32 1, %s5509_s29 }
 0x233 LB: >>> { %s5513_s10 = smul.u32 288, %s6905_s5  ;;  %s6159_s12 = sshll.u32 %s6913_s8, 6  ;;  %s6913_s8 = sphi %s7912_s8, %s1355_s8  }
 0x234   : >>> { %s7919_s11 = smul.u32 18, %s6909_s6 }
 0x235   : >>> { %s7923_s13 = smul.u32 9, %s7910_s30  ;;  %s1360_s14 = sadd.s32 %s6159_s12, %s5513_s10 }
 0x236   : >>> { %s1371_s15 = sld [smem:[#allocation10 + %s7919_s11]]  ;;  %s1420_s17 = sadd.s32 1, %s7919_s11 }
 0x237   : >>> { %s7927_s16 = sld [smem:[#allocation10 + %s7923_s13]]  ;;  %s1439_s18 = sadd.s32 1, %s7923_s13 }
 0x238   : >>> { %s7931_s19 = scalar_lea.vmem [#allocation2], %s1360_s14  ;;  %s1421_s0 = sld [smem:[#allocation10 + %s1420_s17]] }
 0x239   : >>> { %v1362_v2 = vld [vmem:[%s7931_s19] sm:$0xff]  ;;  %v1363_v3 = vld [vmem:[%s7931_s19 + $0x8] sm:$0xff]  ;;  %s1470_s20 = sadd.s32 2, %s7919_s11  ;;  %v7937_v4 = vld [vmem:[%s7931_s19 + $0x10] sm:$0xff]  ;;  %s1489_s21 = sadd.s32 2, %s7923_s13 }
 0x23a   : >>> { %v7940_v5 = vld [vmem:[%s7931_s19 + $0x18] sm:$0xff]  ;;  %v7943_v6 = vld [vmem:[%s7931_s19 + $0x20] sm:$0xff]  ;;  %v7947_v7 = vld [vmem:[%s7931_s19 + $0x28] sm:$0xff]  ;;  %s7955_s1 = sld [smem:[#allocation10 + %s1439_s18]]  ;;  %s1520_s22 = sadd.s32 3, %s7919_s11 }
 0x23b   : >>> { %v7950_v8 = vld [vmem:[%s7931_s19 + $0x30] sm:$0xff]  ;;  %v7953_v9 = vld [vmem:[%s7931_s19 + $0x38] sm:$0xff]  ;;  %s7960_s23 = sld [smem:[#allocation10 + %s1470_s20]]  ;;  %v8006_v29 = vld [vmem:[%s7931_s19 + $0x40] sm:$0xff]  ;;  %s1539_s3 = sadd.s32 3, %s7923_s13 }
 0x23c   : >>> { %v7958_v10 = vstv %s1371_s15  ;;  %v7963_v11 = vld [vmem:[%s7931_s19 + $0x90] sm:$0xff]  ;;  %v7966_v12 = vld [vmem:[%s7931_s19 + $0x98] sm:$0xff]  ;;  %s7974_s24 = sld [smem:[#allocation10 + %s1489_s21]]  ;;  %s1568_s26 = sadd.s32 4, %s7919_s11 }
 0x23d   : >>> { %v1373_v13 = vmul.f32 %v7958_v10, %v1362_v2  ;;  %v1374_v14 = vmul.f32 %v7958_v10, %v1363_v3  ;;  %v1375_v15 = vmul.f32 %v7958_v10, %v7937_v4  ;;  %v1376_v16 = vmul.f32 %v7958_v10, %v7940_v5  ;;  %s7984_s25 = sld [smem:[#allocation10 + %s1520_s22]]  ;;  %s1587_s27 = sadd.s32 4, %s7923_s13 }
 0x23e   : >>> { %v1377_v17 = vmul.f32 %v7958_v10, %v7943_v6  ;;  %v1378_v18 = vmul.f32 %v7958_v10, %v7947_v7  ;;  %v1379_v19 = vmul.f32 %v7958_v10, %v7950_v8  ;;  %v1380_v20 = vmul.f32 %v7958_v10, %v7953_v9  ;;  %s8077_s4 = sld [smem:[#allocation10 + %s1539_s3]]  ;;  %s1616_s28 = sadd.s32 5, %s7919_s11 }
 0x23f   : >>> { %v7987_v21 = vstv %s7927_s16  ;;  %v7989_v22 = vstv %s1421_s0  ;;  %v7993_v23 = vmul.f32 %v7963_v11, %v7958_v10  ;;  %v7997_v24 = vmul.f32 %v7966_v12, %v7958_v10  ;;  %s8080_s10 = sld [smem:[#allocation10 + %s1568_s26]]  ;;  %s1635_s15 = sadd.s32 5, %s7923_s13 }
 0x240   : >>> { %v1392_v25 = vmul.f32 %v7987_v21, %v1362_v2  ;;  %v1393_v26 = vmul.f32 %v7987_v21, %v1363_v3  ;;  %v1394_v27 = vmul.f32 %v7987_v21, %v7937_v4  ;;  %v1395_v28 = vmul.f32 %v7987_v21, %v7940_v5  ;;  %v5533_v2 = vld [vmem:[%s7931_s19 + $0x48] sm:$0xff]  ;;  %s8082_s12 = sld [smem:[#allocation10 + %s1587_s27]]  ;;  %s1666_s16 = sadd.s32 6, %s7919_s11 }
 0x241   : >>> { %v1396_v30 = vmul.f32 %v7987_v21, %v7943_v6  ;;  %v1397_v31 = vmul.f32 %v7987_v21, %v7947_v7  ;;  %v1398_v32 = vmul.f32 %v7987_v21, %v7950_v8  ;;  %v1399_v33 = vmul.f32 %v7987_v21, %v7953_v9  ;;  %s8092_s14 = sld [smem:[#allocation10 + %s1616_s28]]  ;;  %s1685_s17 = sadd.s32 6, %s7923_s13 }
 0x242   : >>> { %v1423_v34 = vmul.f32 %v7989_v22, %v1363_v3  ;;  %v1424_v35 = vmul.f32 %v7989_v22, %v7937_v4  ;;  %v1425_v36 = vmul.f32 %v7989_v22, %v7940_v5  ;;  %v1426_v37 = vmul.f32 %v7989_v22, %v7943_v6  ;;  %s8185_s18 = sld [smem:[#allocation10 + %s1635_s15]]  ;;  %s1714_s0 = sadd.s32 7, %s7919_s11 }
 0x243   : >>> { %v1427_v38 = vmul.f32 %v7989_v22, %v7947_v7  ;;  %v1428_v39 = vmul.f32 %v7989_v22, %v7950_v8  ;;  %v1429_v40 = vmul.f32 %v7989_v22, %v7953_v9  ;;  %v1430_v41 = vmul.f32 %v8006_v29, %v7989_v22  ;;  %s8188_s20 = sld [smem:[#allocation10 + %s1666_s16]]  ;;  %s1733_s22 = sadd.s32 7, %s7923_s13 }
 0x244   : >>> { %v1431_v42 = vadd.f32 %v1423_v34, %v1373_v13  ;;  %v1432_v43 = vadd.f32 %v1424_v35, %v1374_v14  ;;  %v1433_v44 = vadd.f32 %v1425_v36, %v1375_v15  ;;  %v1434_v45 = vadd.f32 %v1426_v37, %v1376_v16  ;;  %s8190_s21 = sld [smem:[#allocation10 + %s1685_s17]]  ;;  %s5020_s3 = smul.u32 96, %s6905_s5 }
 0x245   : >>> { %v1435_v46 = vadd.f32 %v1427_v38, %v1377_v17  ;;  %v1436_v47 = vadd.f32 %v1428_v39, %v1378_v18  ;;  %v1437_v48 = vadd.f32 %v1429_v40, %v1379_v19  ;;  %v1438_v49 = vadd.f32 %v1430_v41, %v1380_v20  ;;  %s8759_s26 = sld [smem:[#allocation11 + %s7910_s30]]  ;;  %s6168_s27 = sshll.u32 %s6913_s8, 5 }
 0x246   : >>> { %v8032_v50 = vstv %s7955_s1  ;;  %v8035_v51 = vstv %s7960_s23  ;;  %v8038_v52 = vstv %s7974_s24  ;;  %v8041_v53 = vstv %s7984_s25  ;;  %s8200_s1 = sld [smem:[#allocation10 + %s1714_s0]]  ;;  %s1762_s23 = sadd.s32 8, %s7919_s11 }
 0x247   : >>> { %10804 = vst [vmem:[#allocation28_spill] sm:$0xff] %v8038_v52  ;;  %10805 = vst [vmem:[#allocation29_spill] sm:$0xff] %v8041_v53  ;;  %v1442_v54 = vmul.f32 %v8032_v50, %v1363_v3  ;;  %v1443_v55 = vmul.f32 %v8032_v50, %v7937_v4  ;;  %v1444_v56 = vmul.f32 %v8032_v50, %v7940_v5  ;;  %s1781_s24 = sadd.s32 8, %s7923_s13  ;;  %s8300_s25 = sld [smem:[#allocation10 + %s1733_s22]] }
 0x248   : >>> { %v1445_v57 = vmul.f32 %v8032_v50, %v7943_v6  ;;  %v1446_v58 = vmul.f32 %v8032_v50, %v7947_v7  ;;  %v1447_v59 = vmul.f32 %v8032_v50, %v7950_v8  ;;  %v1448_v60 = vmul.f32 %v8032_v50, %v7953_v9  ;;  %s8302_s11 = sld [smem:[#allocation10 + %s1762_s23]]  ;;  %s5021_s28 = sadd.s32 %s6168_s27, %s5020_s3 }
 0x249   : >>> { %v1449_v61 = vmul.f32 %v8006_v29, %v8032_v50  ;;  %v1450_v62 = vadd.f32 %v1442_v54, %v1392_v25  ;;  %v1451_v63 = vadd.f32 %v1443_v55, %v1393_v26  ;;  %v1452_v0 = vadd.f32 %v1444_v56, %v1394_v27  ;;  %v8108_v54 = vld [vmem:[%s7931_s19 + $0xb0] sm:$0xff]  ;;  %v8114_v55 = vld [vmem:[%s7931_s19 + $0xc0] sm:$0xff]  ;;  %s8312_s13 = sld [smem:[#allocation10 + %s1781_s24]]  ;;  %s1355_s8 = sadd.s32 1, %s6913_s8  }
 0x24a   : >>> { %v1453_v1 = vadd.f32 %v1445_v57, %v1395_v28  ;;  %v1454_v3 = vadd.f32 %v1446_v58, %v1396_v30  ;;  %v1455_v13 = vadd.f32 %v1447_v59, %v1397_v31  ;;  %v1456_v14 = vadd.f32 %v1448_v60, %v1398_v32  ;;  %p1352_p11 = scmp.ge.s32.totalorder %s1355_s8, 2  }
 0x24b   : >>> { %v1457_v15 = vadd.f32 %v1449_v61, %v1399_v33  ;;  %v1473_v16 = vmul.f32 %v8035_v51, %v7937_v4  ;;  %v1474_v17 = vmul.f32 %v8035_v51, %v7940_v5  ;;  %v1475_v18 = vmul.f32 %v8035_v51, %v7943_v6 }
 0x24c   : >>> { %v1476_v19 = vmul.f32 %v8035_v51, %v7947_v7  ;;  %v1477_v20 = vmul.f32 %v8035_v51, %v7950_v8  ;;  %v1478_v25 = vmul.f32 %v8035_v51, %v7953_v9  ;;  %v1479_v26 = vmul.f32 %v8006_v29, %v8035_v51 }
 0x24d   : >>> { %v1480_v27 = vmul.f32 %v5533_v2, %v8035_v51  ;;  %v1481_v28 = vadd.f32 %v1473_v16, %v1431_v42  ;;  %v1482_v30 = vadd.f32 %v1474_v17, %v1432_v43  ;;  %v1483_v31 = vadd.f32 %v1475_v18, %v1433_v44 }
 0x24e   : >>> { %v1484_v32 = vadd.f32 %v1476_v19, %v1434_v45  ;;  %v1485_v33 = vadd.f32 %v1477_v20, %v1435_v46  ;;  %v1486_v34 = vadd.f32 %v1478_v25, %v1436_v47  ;;  %v1487_v35 = vadd.f32 %v1479_v26, %v1437_v48 }
 0x24f   : >>> { %v1488_v36 = vadd.f32 %v1480_v27, %v1438_v49  ;;  %v1492_v37 = vmul.f32 %v8038_v52, %v7937_v4  ;;  %v1493_v38 = vmul.f32 %v8038_v52, %v7940_v5  ;;  %v1494_v39 = vmul.f32 %v8038_v52, %v7943_v6  ;;  %v8102_v49 = vld [vmem:[%s7931_s19 + $0xa0] sm:$0xff] }
 0x250   : >>> { %v1495_v40 = vmul.f32 %v8038_v52, %v7947_v7  ;;  %v1496_v41 = vmul.f32 %v8038_v52, %v7950_v8  ;;  %v1497_v4 = vmul.f32 %v8038_v52, %v7953_v9  ;;  %v1498_v5 = vmul.f32 %v8006_v29, %v8038_v52  ;;  %v8105_v8 = vld [vmem:[%s7931_s19 + $0xa8] sm:$0xff]  ;;  %v8111_v9 = vld [vmem:[%s7931_s19 + $0xb8] sm:$0xff] }
 0x251   : >>> { %v1499_v6 = vmul.f32 %v5533_v2, %v8038_v52  ;;  %v1500_v42 = vadd.f32 %v1492_v37, %v1450_v62  ;;  %v1501_v43 = vadd.f32 %v1493_v38, %v1451_v63  ;;  %v1502_v7 = vadd.f32 %v1494_v39, %v1452_v0  ;;  %v8117_v29 = vld [vmem:[%s7931_s19 + $0xc8] sm:$0xff] }
 0x252   : >>> { %v1503_v44 = vadd.f32 %v1495_v40, %v1453_v1  ;;  %v1504_v45 = vadd.f32 %v1496_v41, %v1454_v3  ;;  %v1505_v46 = vadd.f32 %v1497_v4, %v1455_v13  ;;  %v1506_v47 = vadd.f32 %v1498_v5, %v1456_v14  ;;  %v8166_v4 = vld [vmem:[%s7931_s19 + $0xd0] sm:$0xff] }
 0x253   : >>> { %v1507_v48 = vadd.f32 %v1499_v6, %v1457_v15  ;;  %v1523_v56 = vmul.f32 %v7963_v11, %v8041_v53  ;;  %v1524_v57 = vmul.f32 %v7966_v12, %v8041_v53  ;;  %v1525_v58 = vmul.f32 %v8102_v49, %v8041_v53 }
 0x254   : >>> { %v1526_v59 = vmul.f32 %v8105_v8, %v8041_v53  ;;  %v1527_v60 = vmul.f32 %v8108_v54, %v8041_v53  ;;  %v1528_v61 = vmul.f32 %v8111_v9, %v8041_v53  ;;  %v1529_v62 = vmul.f32 %v8114_v55, %v8041_v53 }
 0x255   : >>> { %v1530_v63 = vmul.f32 %v8117_v29, %v8041_v53  ;;  %v1531_v0 = vadd.f32 %v1523_v56, %v1481_v28  ;;  %v1532_v1 = vadd.f32 %v1524_v57, %v1482_v30  ;;  %v1533_v2 = vadd.f32 %v1525_v58, %v1483_v31 }
 0x256   : >>> { %v1534_v3 = vadd.f32 %v1526_v59, %v1484_v32  ;;  %v1535_v13 = vadd.f32 %v1527_v60, %v1485_v33  ;;  %v1536_v14 = vadd.f32 %v1528_v61, %v1486_v34  ;;  %v1537_v15 = vadd.f32 %v1529_v62, %v1487_v35 }
 0x257   : >>> { %v1538_v16 = vadd.f32 %v1530_v63, %v1488_v36  ;;  %v8136_v17 = vstv %s8077_s4  ;;  %v8139_v18 = vstv %s8080_s10  ;;  %v8142_v19 = vstv %s8082_s12  ;;  %s5022_s4 = smul.u32 2304, %s6909_s6  ;;  %s1347_s6 = sadd.s32 (%p1352_p11), 1, %s6909_s6  }
 0x258   : >>> { %10806 = vst [vmem:[#allocation30_spill] sm:$0xff] %v8136_v17  ;;  %10807 = vst [vmem:[#allocation31_spill] sm:$0xff] %v8139_v18  ;;  %v8145_v20 = vstv %s8092_s14  ;;  %v1542_v25 = vmul.f32 %v7963_v11, %v8136_v17  ;;  %v1543_v26 = vmul.f32 %v7966_v12, %v8136_v17  ;;  %v1544_v27 = vmul.f32 %v8102_v49, %v8136_v17  ;;  %p1344_p12 = scmp.ge.s32.totalorder (%p1352_p11), %s1347_s6, 4  }
 0x259   : >>> { %10808 = vst [vmem:[#allocation32_spill] sm:$0xff] %v8142_v19  ;;  %10809 = vst [vmem:[#allocation33_spill] sm:$0xff] %v8145_v20  ;;  %v1545_v28 = vmul.f32 %v8105_v8, %v8136_v17  ;;  %v1546_v30 = vmul.f32 %v8108_v54, %v8136_v17  ;;  %v1547_v31 = vmul.f32 %v8111_v9, %v8136_v17  ;;  %s5023_s10 = sadd.s32 %s5022_s4, %s5021_s28 }
 0x25a   : >>> { %v1548_v32 = vmul.f32 %v8114_v55, %v8136_v17  ;;  %v1549_v33 = vmul.f32 %v8117_v29, %v8136_v17  ;;  %v1550_v34 = vadd.f32 %v1542_v25, %v1500_v42  ;;  %v1551_v35 = vadd.f32 %v1543_v26, %v1501_v43  ;;  %s5024_s12 = scalar_lea.vmem [#allocation3], %s5023_s10 }
 0x25b   : >>> { %v1552_v36 = vadd.f32 %v1544_v27, %v1502_v7  ;;  %v1553_v37 = vadd.f32 %v1545_v28, %v1503_v44  ;;  %v1554_v38 = vadd.f32 %v1546_v30, %v1504_v45  ;;  %v1555_v39 = vadd.f32 %v1547_v31, %v1505_v46 }
 0x25c   : >>> { %v1556_v40 = vadd.f32 %v1548_v32, %v1506_v47  ;;  %v1557_v41 = vadd.f32 %v1549_v33, %v1507_v48  ;;  %v1571_v5 = vmul.f32 %v7966_v12, %v8139_v18  ;;  %v1572_v6 = vmul.f32 %v8102_v49, %v8139_v18  ;;  %v8211_v32 = vld [vmem:[%s7931_s19 + $0xd8] sm:$0xff] }
 0x25d   : >>> { %v1573_v42 = vmul.f32 %v8105_v8, %v8139_v18  ;;  %v1574_v43 = vmul.f32 %v8108_v54, %v8139_v18  ;;  %v1575_v7 = vmul.f32 %v8111_v9, %v8139_v18  ;;  %v1576_v44 = vmul.f32 %v8114_v55, %v8139_v18 }
 0x25e   : >>> { %v1577_v45 = vmul.f32 %v8117_v29, %v8139_v18  ;;  %v1578_v46 = vmul.f32 %v8166_v4, %v8139_v18  ;;  %v1579_v47 = vadd.f32 %v1571_v5, %v1531_v0  ;;  %v1580_v48 = vadd.f32 %v1572_v6, %v1532_v1 }
 0x25f   : >>> { %v1581_v56 = vadd.f32 %v1573_v42, %v1533_v2  ;;  %v1582_v57 = vadd.f32 %v1574_v43, %v1534_v3  ;;  %v1583_v58 = vadd.f32 %v1575_v7, %v1535_v13  ;;  %v1584_v59 = vadd.f32 %v1576_v44, %v1536_v14 }
 0x260   : >>> { %v1585_v60 = vadd.f32 %v1577_v45, %v1537_v15  ;;  %v1586_v61 = vadd.f32 %v1578_v46, %v1538_v16  ;;  %v1590_v62 = vmul.f32 %v7966_v12, %v8142_v19  ;;  %v1591_v63 = vmul.f32 %v8102_v49, %v8142_v19 }
 0x261   : >>> { %v1592_v0 = vmul.f32 %v8105_v8, %v8142_v19  ;;  %v1593_v1 = vmul.f32 %v8108_v54, %v8142_v19  ;;  %v1594_v2 = vmul.f32 %v8111_v9, %v8142_v19  ;;  %v1595_v3 = vmul.f32 %v8114_v55, %v8142_v19 }
 0x262   : >>> { %v1596_v13 = vmul.f32 %v8117_v29, %v8142_v19  ;;  %v1597_v14 = vmul.f32 %v8166_v4, %v8142_v19  ;;  %v1598_v15 = vadd.f32 %v1590_v62, %v1550_v34  ;;  %v1599_v16 = vadd.f32 %v1591_v63, %v1551_v35 }
 0x263   : >>> { %v1600_v25 = vadd.f32 %v1592_v0, %v1552_v36  ;;  %v1601_v26 = vadd.f32 %v1593_v1, %v1553_v37  ;;  %v1602_v27 = vadd.f32 %v1594_v2, %v1554_v38  ;;  %v1603_v28 = vadd.f32 %v1595_v3, %v1555_v39 }
 0x264   : >>> { %v1604_v30 = vadd.f32 %v1596_v13, %v1556_v40  ;;  %v1605_v31 = vadd.f32 %v1597_v14, %v1557_v41  ;;  %v1619_v33 = vmul.f32 %v8102_v49, %v8145_v20  ;;  %v1620_v5 = vmul.f32 %v8105_v8, %v8145_v20  ;;  %v8258_v14 = vld [vmem:[%s7931_s19 + $0x120] sm:$0xff] }
 0x265   : >>> { %v1621_v34 = vmul.f32 %v8108_v54, %v8145_v20  ;;  %v1622_v35 = vmul.f32 %v8111_v9, %v8145_v20  ;;  %v1623_v36 = vmul.f32 %v8114_v55, %v8145_v20  ;;  %v1624_v37 = vmul.f32 %v8117_v29, %v8145_v20  ;;  %10814 = vst [vmem:[#allocation38_spill] sm:$0xff] %v8258_v14 }
 0x266   : >>> { %v1625_v38 = vmul.f32 %v8166_v4, %v8145_v20  ;;  %v1626_v39 = vmul.f32 %v8211_v32, %v8145_v20  ;;  %v1627_v40 = vadd.f32 %v1619_v33, %v1579_v47  ;;  %v1628_v41 = vadd.f32 %v1620_v5, %v1580_v48  ;;  %v8261_v33 = vld [vmem:[%s7931_s19 + $0x128] sm:$0xff] }
 0x267   : >>> { %v1629_v6 = vadd.f32 %v1621_v34, %v1581_v56  ;;  %v1630_v42 = vadd.f32 %v1622_v35, %v1582_v57  ;;  %v1631_v43 = vadd.f32 %v1623_v36, %v1583_v58  ;;  %v1632_v7 = vadd.f32 %v1624_v37, %v1584_v59  ;;  %10815 = vst [vmem:[#allocation39_spill] sm:$0xff] %v8261_v33  ;;  %v8264_v37 = vld [vmem:[%s7931_s19 + $0x130] sm:$0xff] }
 0x268   : >>> { %v1633_v44 = vadd.f32 %v1625_v38, %v1585_v60  ;;  %v1634_v45 = vadd.f32 %v1626_v39, %v1586_v61  ;;  %v8230_v46 = vstv %s8185_s18  ;;  %v8233_v62 = vstv %s8188_s20  ;;  %v8267_v38 = vld [vmem:[%s7931_s19 + $0x138] sm:$0xff]  ;;  %v8270_v39 = vld [vmem:[%s7931_s19 + $0x140] sm:$0xff] }
 0x269   : >>> { %10810 = vst [vmem:[#allocation34_spill] sm:$0xff] %v8230_v46  ;;  %10811 = vst [vmem:[#allocation35_spill] sm:$0xff] %v8233_v62  ;;  %v8236_v63 = vstv %s8190_s21  ;;  %v8239_v0 = vstv %s8200_s1  ;;  %v1638_v47 = vmul.f32 %v8102_v49, %v8230_v46  ;;  %v1639_v48 = vmul.f32 %v8105_v8, %v8230_v46 }
 0x26a   : >>> { %10812 = vst [vmem:[#allocation36_spill] sm:$0xff] %v8236_v63  ;;  %10813 = vst [vmem:[#allocation37_spill] sm:$0xff] %v8239_v0  ;;  %v1640_v56 = vmul.f32 %v8108_v54, %v8230_v46  ;;  %v1641_v57 = vmul.f32 %v8111_v9, %v8230_v46  ;;  %v1642_v58 = vmul.f32 %v8114_v55, %v8230_v46 }
 0x26b   : >>> { %v1643_v59 = vmul.f32 %v8117_v29, %v8230_v46  ;;  %v1644_v60 = vmul.f32 %v8166_v4, %v8230_v46  ;;  %v1645_v61 = vmul.f32 %v8211_v32, %v8230_v46  ;;  %v1646_v1 = vadd.f32 %v1638_v47, %v1598_v15  ;;  %v8274_v15 = vld [vmem:[%s7931_s19 + $0x148] sm:$0xff] }
 0x26c   : >>> { %v1647_v2 = vadd.f32 %v1639_v48, %v1599_v16  ;;  %v1648_v3 = vadd.f32 %v1640_v56, %v1600_v25  ;;  %v1649_v13 = vadd.f32 %v1641_v57, %v1601_v26  ;;  %v1650_v5 = vadd.f32 %v1642_v58, %v1602_v27  ;;  %v8277_v16 = vld [vmem:[%s7931_s19 + $0x150] sm:$0xff]  ;;  %v8280_v25 = vld [vmem:[%s7931_s19 + $0x158] sm:$0xff] }
 0x26d   : >>> { %v1651_v34 = vadd.f32 %v1643_v59, %v1603_v28  ;;  %v1652_v35 = vadd.f32 %v1644_v60, %v1604_v30  ;;  %v1653_v36 = vadd.f32 %v1645_v61, %v1605_v31  ;;  %v1669_v26 = vmul.f32 %v8258_v14, %v8233_v62 }
 0x26e   : >>> { %v1670_v27 = vmul.f32 %v8261_v33, %v8233_v62  ;;  %v1671_v28 = vmul.f32 %v8264_v37, %v8233_v62  ;;  %v1672_v30 = vmul.f32 %v8267_v38, %v8233_v62  ;;  %v1673_v31 = vmul.f32 %v8270_v39, %v8233_v62 }
 0x26f   : >>> { %v1674_v47 = vmul.f32 %v8274_v15, %v8233_v62  ;;  %v1675_v48 = vmul.f32 %v8277_v16, %v8233_v62  ;;  %v1676_v56 = vmul.f32 %v8280_v25, %v8233_v62  ;;  %v1677_v57 = vadd.f32 %v1669_v26, %v1627_v40 }
 0x270   : >>> { %v1678_v58 = vadd.f32 %v1670_v27, %v1628_v41  ;;  %v1679_v59 = vadd.f32 %v1671_v28, %v1629_v6  ;;  %v1680_v60 = vadd.f32 %v1672_v30, %v1630_v42  ;;  %v1681_v61 = vadd.f32 %v1673_v31, %v1631_v43 }
 0x271   : >>> { %v1682_v46 = vadd.f32 %v1674_v47, %v1632_v7  ;;  %v1683_v20 = vadd.f32 %v1675_v48, %v1633_v44  ;;  %v1684_v19 = vadd.f32 %v1676_v56, %v1634_v45  ;;  %v1688_v18 = vmul.f32 %v8258_v14, %v8236_v63  ;;  %v8323_v48 = vld [vmem:[%s7931_s19 + $0x160] sm:$0xff] }
 0x272   : >>> { %v1689_v17 = vmul.f32 %v8261_v33, %v8236_v63  ;;  %v1690_v40 = vmul.f32 %v8264_v37, %v8236_v63  ;;  %v1691_v41 = vmul.f32 %v8267_v38, %v8236_v63  ;;  %v1692_v6 = vmul.f32 %v8270_v39, %v8236_v63 }
 0x273   : >>> { %v1693_v42 = vmul.f32 %v8274_v15, %v8236_v63  ;;  %v1694_v43 = vmul.f32 %v8277_v16, %v8236_v63  ;;  %v1695_v7 = vmul.f32 %v8280_v25, %v8236_v63  ;;  %v1696_v44 = vadd.f32 %v1688_v18, %v1646_v1 }
 0x274   : >>> { %v1697_v45 = vadd.f32 %v1689_v17, %v1647_v2  ;;  %v1698_v26 = vadd.f32 %v1690_v40, %v1648_v3  ;;  %v1699_v27 = vadd.f32 %v1691_v41, %v1649_v13  ;;  %v1700_v28 = vadd.f32 %v1692_v6, %v1650_v5 }
 0x275   : >>> { %v1701_v30 = vadd.f32 %v1693_v42, %v1651_v34  ;;  %v1702_v31 = vadd.f32 %v1694_v43, %v1652_v35  ;;  %v1703_v47 = vadd.f32 %v1695_v7, %v1653_v36  ;;  %v1717_v56 = vmul.f32 %v8261_v33, %v8239_v0 }
 0x276   : >>> { %v1718_v62 = vmul.f32 %v8264_v37, %v8239_v0  ;;  %v1719_v18 = vmul.f32 %v8267_v38, %v8239_v0  ;;  %v1720_v17 = vmul.f32 %v8270_v39, %v8239_v0  ;;  %v1721_v1 = vmul.f32 %v8274_v15, %v8239_v0 }
 0x277   : >>> { %v1722_v2 = vmul.f32 %v8277_v16, %v8239_v0  ;;  %v1723_v3 = vmul.f32 %v8280_v25, %v8239_v0  ;;  %v1724_v13 = vmul.f32 %v8323_v48, %v8239_v0  ;;  %v1725_v5 = vadd.f32 %v1717_v56, %v1677_v57  ;;  %v8371_v0 = vld [vmem:[%s7931_s19 + $0x168] sm:$0xff] }
 0x278   : >>> { %v1726_v34 = vadd.f32 %v1718_v62, %v1678_v58  ;;  %v1727_v35 = vadd.f32 %v1719_v18, %v1679_v59  ;;  %v1728_v36 = vadd.f32 %v1720_v17, %v1680_v60  ;;  %v1729_v40 = vadd.f32 %v1721_v1, %v1681_v61 }
 0x279   : >>> { %v1730_v41 = vadd.f32 %v1722_v2, %v1682_v46  ;;  %v1731_v6 = vadd.f32 %v1723_v3, %v1683_v20  ;;  %v1732_v42 = vadd.f32 %v1724_v13, %v1684_v19  ;;  %v8342_v43 = vstv %s8300_s25 }
 0x27a   : >>> { %v8345_v7 = vstv %s8302_s11  ;;  %v8348_v63 = vstv %s8312_s13  ;;  %v8352_v14 = vmul.f32 %v8102_v49, %v7958_v10  ;;  %v1736_v57 = vmul.f32 %v8261_v33, %v8342_v43 }
 0x27b   : >>> { %v1737_v62 = vmul.f32 %v8264_v37, %v8342_v43  ;;  %v1738_v19 = vmul.f32 %v8267_v38, %v8342_v43  ;;  %v1739_v20 = vmul.f32 %v8270_v39, %v8342_v43  ;;  %v1740_v46 = vmul.f32 %v8274_v15, %v8342_v43 }
 0x27c   : >>> { %v1741_v58 = vmul.f32 %v8277_v16, %v8342_v43  ;;  %v1742_v59 = vmul.f32 %v8280_v25, %v8342_v43  ;;  %v1743_v60 = vmul.f32 %v8323_v48, %v8342_v43  ;;  %v1744_v61 = vadd.f32 %v1736_v57, %v1696_v44 }
 0x27d   : >>> { %v1745_v56 = vadd.f32 %v1737_v62, %v1697_v45  ;;  %v1746_v18 = vadd.f32 %v1738_v19, %v1698_v26  ;;  %v1747_v17 = vadd.f32 %v1739_v20, %v1699_v27  ;;  %v1748_v1 = vadd.f32 %v1740_v46, %v1700_v28 }
 0x27e   : >>> { %v1749_v2 = vadd.f32 %v1741_v58, %v1701_v30  ;;  %v1750_v3 = vadd.f32 %v1742_v59, %v1702_v31  ;;  %v1751_v13 = vadd.f32 %v1743_v60, %v1703_v47  ;;  %v1765_v33 = vmul.f32 %v8264_v37, %v8345_v7 }
 0x27f   : >>> { %v1766_v53 = vmul.f32 %v8267_v38, %v8345_v7  ;;  %v1767_v52 = vmul.f32 %v8270_v39, %v8345_v7  ;;  %v1768_v44 = vmul.f32 %v8274_v15, %v8345_v7  ;;  %v1769_v45 = vmul.f32 %v8277_v16, %v8345_v7 }
 0x280   : >>> { %v1770_v26 = vmul.f32 %v8280_v25, %v8345_v7  ;;  %v1771_v27 = vmul.f32 %v8323_v48, %v8345_v7  ;;  %v1772_v28 = vmul.f32 %v8371_v0, %v8345_v7  ;;  %v8389_v30 = vadd.f32 %v1765_v33, %v1725_v5 }
 0x281   : >>> { %v8391_v31 = vadd.f32 %v1766_v53, %v1726_v34  ;;  %v8393_v47 = vadd.f32 %v1767_v52, %v1727_v35  ;;  %v8395_v57 = vadd.f32 %v1768_v44, %v1728_v36  ;;  %v8397_v62 = vadd.f32 %v1769_v45, %v1729_v40 }
 0x282   : >>> { %v8399_v19 = vadd.f32 %v1770_v26, %v1730_v41  ;;  %v8401_v20 = vadd.f32 %v1771_v27, %v1731_v6  ;;  %v8403_v46 = vadd.f32 %v1772_v28, %v1732_v42  ;;  %v1784_v58 = vmul.f32 %v8264_v37, %v8348_v63 }
 0x283   : >>> { %v1785_v33 = vmul.f32 %v8267_v38, %v8348_v63  ;;  %v1786_v52 = vmul.f32 %v8270_v39, %v8348_v63  ;;  %v1787_v53 = vmul.f32 %v8274_v15, %v8348_v63  ;;  %v1788_v5 = vmul.f32 %v8277_v16, %v8348_v63 }
 0x284   : >>> { %10816 = vst [vmem:[#allocation40_spill] sm:$0xff] %v8403_v46  ;;  %v1789_v34 = vmul.f32 %v8280_v25, %v8348_v63  ;;  %v1790_v35 = vmul.f32 %v8323_v48, %v8348_v63  ;;  %v1791_v36 = vmul.f32 %v8371_v0, %v8348_v63  ;;  %v8421_v40 = vadd.f32 %v1784_v58, %v1744_v61 }
 0x285   : >>> { %v8423_v41 = vadd.f32 %v1785_v33, %v1745_v56  ;;  %v8425_v6 = vadd.f32 %v1786_v52, %v1746_v18  ;;  %v8427_v42 = vadd.f32 %v1787_v53, %v1747_v17  ;;  %v8429_v59 = vadd.f32 %v1788_v5, %v1748_v1 }
 0x286   : >>> { %10817 = vst [vmem:[#allocation41_spill] sm:$0xff] %v8421_v40  ;;  %v8431_v60 = vadd.f32 %v1789_v34, %v1749_v2  ;;  %v8433_v44 = vadd.f32 %v1790_v35, %v1750_v3  ;;  %v8435_v45 = vadd.f32 %v1791_v36, %v1751_v13  ;;  %v1811_v13 = vmul.f32 %v8105_v8, %v7958_v10 }
 0x287   : >>> { %10818 = vst [vmem:[#allocation42_spill] sm:$0xff] %v8423_v41  ;;  %10819 = vst [vmem:[#allocation43_spill] sm:$0xff] %v8425_v6  ;;  %v1812_v27 = vmul.f32 %v8108_v54, %v7958_v10  ;;  %v1813_v28 = vmul.f32 %v8111_v9, %v7958_v10  ;;  %v1814_v58 = vmul.f32 %v8114_v55, %v7958_v10 }
 0x288   : >>> { %10820 = vst [vmem:[#allocation44_spill] sm:$0xff] %v8427_v42  ;;  %10821 = vst [vmem:[#allocation45_spill] sm:$0xff] %v8429_v59  ;;  %v1815_v33 = vmul.f32 %v8117_v29, %v7958_v10  ;;  %v1824_v52 = vmul.f32 %v7963_v11, %v7987_v21  ;;  %v1825_v53 = vmul.f32 %v7966_v12, %v7987_v21 }
 0x289   : >>> { %10822 = vst [vmem:[#allocation46_spill] sm:$0xff] %v8431_v60  ;;  %10823 = vst [vmem:[#allocation47_spill] sm:$0xff] %v8433_v44  ;;  %v1826_v5 = vmul.f32 %v8102_v49, %v7987_v21  ;;  %v1827_v34 = vmul.f32 %v8105_v8, %v7987_v21  ;;  %v1828_v35 = vmul.f32 %v8108_v54, %v7987_v21 }
 0x28a   : >>> { %10824 = vst [vmem:[#allocation48_spill] sm:$0xff] %v8435_v45  ;;  %v1829_v36 = vmul.f32 %v8111_v9, %v7987_v21  ;;  %v1830_v10 = vmul.f32 %v8114_v55, %v7987_v21  ;;  %v1831_v11 = vmul.f32 %v8117_v29, %v7987_v21  ;;  %v1840_v3 = vmul.f32 %v7966_v12, %v7989_v22 }
 0x28b   : >>> { %v1841_v2 = vmul.f32 %v8102_v49, %v7989_v22  ;;  %v1842_v1 = vmul.f32 %v8105_v8, %v7989_v22  ;;  %v1843_v17 = vmul.f32 %v8108_v54, %v7989_v22  ;;  %v1844_v18 = vmul.f32 %v8111_v9, %v7989_v22 }
 0x28c   : >>> { %v1845_v56 = vmul.f32 %v8114_v55, %v7989_v22  ;;  %v1846_v21 = vmul.f32 %v8117_v29, %v7989_v22  ;;  %v1847_v61 = vmul.f32 %v8166_v4, %v7989_v22  ;;  %v1848_v26 = vadd.f32 %v1840_v3, %v7993_v23 }
 0x28d   : >>> { %v1849_v45 = vadd.f32 %v1841_v2, %v7997_v24  ;;  %v1850_v44 = vadd.f32 %v1842_v1, %v8352_v14  ;;  %v1851_v60 = vadd.f32 %v1843_v17, %v1811_v13  ;;  %v1852_v59 = vadd.f32 %v1844_v18, %v1812_v27 }
 0x28e   : >>> { %v1853_v42 = vadd.f32 %v1845_v56, %v1813_v28  ;;  %v1854_v6 = vadd.f32 %v1846_v21, %v1814_v58  ;;  %v1855_v41 = vadd.f32 %v1847_v61, %v1815_v33  ;;  %v1856_v40 = vmul.f32 %v7966_v12, %v8032_v50 }
 0x28f   : >>> { %v1857_v46 = vmul.f32 %v8102_v49, %v8032_v50  ;;  %v1858_v22 = vmul.f32 %v8105_v8, %v8032_v50  ;;  %v1859_v23 = vmul.f32 %v8108_v54, %v8032_v50  ;;  %v1860_v24 = vmul.f32 %v8111_v9, %v8032_v50 }
 0x290   : >>> { %v1861_v14 = vmul.f32 %v8114_v55, %v8032_v50  ;;  %v1862_v61 = vmul.f32 %v8117_v29, %v8032_v50  ;;  %v1863_v12 = vmul.f32 %v8166_v4, %v8032_v50  ;;  %v1864_v56 = vadd.f32 %v1856_v40, %v1824_v52 }
 0x291   : >>> { %v1865_v18 = vadd.f32 %v1857_v46, %v1825_v53  ;;  %v1866_v17 = vadd.f32 %v1858_v22, %v1826_v5  ;;  %v1867_v1 = vadd.f32 %v1859_v23, %v1827_v34  ;;  %v1868_v2 = vadd.f32 %v1860_v24, %v1828_v35  ;;  %v10825_v23 = vld [vmem:[#allocation28_spill] sm:$0xff] }
 0x292   : >>> { %v1869_v3 = vadd.f32 %v1861_v14, %v1829_v36  ;;  %v1870_v13 = vadd.f32 %v1862_v61, %v1830_v10  ;;  %v1871_v27 = vadd.f32 %v1863_v12, %v1831_v11  ;;  %v1872_v28 = vmul.f32 %v8102_v49, %v8035_v51  ;;  %v10826_v12 = vld [vmem:[#allocation29_spill] sm:$0xff] }
 0x293   : >>> { %v1873_v58 = vmul.f32 %v8105_v8, %v8035_v51  ;;  %v1874_v33 = vmul.f32 %v8108_v54, %v8035_v51  ;;  %v1875_v50 = vmul.f32 %v8111_v9, %v8035_v51  ;;  %v1876_v46 = vmul.f32 %v8114_v55, %v8035_v51 }
 0x294   : >>> { %v1877_v40 = vmul.f32 %v8117_v29, %v8035_v51  ;;  %v1878_v52 = vmul.f32 %v8166_v4, %v8035_v51  ;;  %v1879_v53 = vmul.f32 %v8211_v32, %v8035_v51  ;;  %v1880_v5 = vadd.f32 %v1872_v28, %v1848_v26  ;;  %v10827_v28 = vld [vmem:[#allocation38_spill] sm:$0xff] }
 0x295   : >>> { %v1881_v34 = vadd.f32 %v1873_v58, %v1849_v45  ;;  %v1882_v35 = vadd.f32 %v1874_v33, %v1850_v44  ;;  %v1883_v36 = vadd.f32 %v1875_v50, %v1851_v60  ;;  %v1884_v10 = vadd.f32 %v1876_v46, %v1852_v59  ;;  %v10828_v58 = vld [vmem:[#allocation39_spill] sm:$0xff] }
 0x296   : >>> { %v1885_v11 = vadd.f32 %v1877_v40, %v1853_v42  ;;  %v1886_v21 = vadd.f32 %v1878_v52, %v1854_v6  ;;  %v1887_v22 = vadd.f32 %v1879_v53, %v1855_v41  ;;  %v1888_v24 = vmul.f32 %v8102_v49, %v10825_v23  ;;  %v10829_v52 = vld [vmem:[#allocation30_spill] sm:$0xff] }
 0x297   : >>> { %v1889_v14 = vmul.f32 %v8105_v8, %v10825_v23  ;;  %v1890_v61 = vmul.f32 %v8108_v54, %v10825_v23  ;;  %v1891_v51 = vmul.f32 %v8111_v9, %v10825_v23  ;;  %v1892_v44 = vmul.f32 %v8114_v55, %v10825_v23 }
 0x298   : >>> { %v1893_v42 = vmul.f32 %v8117_v29, %v10825_v23  ;;  %v1894_v41 = vmul.f32 %v8166_v4, %v10825_v23  ;;  %v1895_v49 = vmul.f32 %v8211_v32, %v10825_v23  ;;  %v1896_v6 = vadd.f32 %v1888_v24, %v1864_v56 }
 0x299   : >>> { %v1897_v8 = vadd.f32 %v1889_v14, %v1865_v18  ;;  %v1898_v59 = vadd.f32 %v1890_v61, %v1866_v17  ;;  %v1899_v60 = vadd.f32 %v1891_v51, %v1867_v1  ;;  %v1900_v54 = vadd.f32 %v1892_v44, %v1868_v2 }
 0x29a   : >>> { %v1901_v45 = vadd.f32 %v1893_v42, %v1869_v3  ;;  %v1902_v26 = vadd.f32 %v1894_v41, %v1870_v13  ;;  %v1903_v9 = vadd.f32 %v1895_v49, %v1871_v27  ;;  %v1904_v55 = vmul.f32 %v10827_v28, %v10826_v12  ;;  %v10830_v41 = vld [vmem:[#allocation31_spill] sm:$0xff] }
 0x29b   : >>> { %v1905_v29 = vmul.f32 %v10828_v58, %v10826_v12  ;;  %v1906_v4 = vmul.f32 %v8264_v37, %v10826_v12  ;;  %v1907_v32 = vmul.f32 %v8267_v38, %v10826_v12  ;;  %v1908_v56 = vmul.f32 %v8270_v39, %v10826_v12 }
 0x29c   : >>> { %v1909_v18 = vmul.f32 %v8274_v15, %v10826_v12  ;;  %v1910_v17 = vmul.f32 %v8277_v16, %v10826_v12  ;;  %v1911_v1 = vmul.f32 %v8280_v25, %v10826_v12  ;;  %v1912_v2 = vadd.f32 %v1904_v55, %v1880_v5 }
 0x29d   : >>> { %v1913_v3 = vadd.f32 %v1905_v29, %v1881_v34  ;;  %v1914_v13 = vadd.f32 %v1906_v4, %v1882_v35  ;;  %v1915_v27 = vadd.f32 %v1907_v32, %v1883_v36  ;;  %v1916_v33 = vadd.f32 %v1908_v56, %v1884_v10 }
 0x29e   : >>> { %v1917_v50 = vadd.f32 %v1909_v18, %v1885_v11  ;;  %v1918_v46 = vadd.f32 %v1910_v17, %v1886_v21  ;;  %v1919_v40 = vadd.f32 %v1911_v1, %v1887_v22  ;;  %v1920_v53 = vmul.f32 %v10827_v28, %v10829_v52  ;;  %v10831_v18 = vld [vmem:[#allocation32_spill] sm:$0xff] }
 0x29f   : >>> { %v1921_v23 = vmul.f32 %v10828_v58, %v10829_v52  ;;  %v1922_v24 = vmul.f32 %v8264_v37, %v10829_v52  ;;  %v1923_v14 = vmul.f32 %v8267_v38, %v10829_v52  ;;  %v1924_v5 = vmul.f32 %v8270_v39, %v10829_v52 }
 0x2a0   : >>> { %v1925_v34 = vmul.f32 %v8274_v15, %v10829_v52  ;;  %v1926_v35 = vmul.f32 %v8277_v16, %v10829_v52  ;;  %v1927_v36 = vmul.f32 %v8280_v25, %v10829_v52  ;;  %v1928_v10 = vadd.f32 %v1920_v53, %v1896_v6 }
 0x2a1   : >>> { %v1929_v11 = vadd.f32 %v1921_v23, %v1897_v8  ;;  %v1930_v21 = vadd.f32 %v1922_v24, %v1898_v59  ;;  %v1931_v22 = vadd.f32 %v1923_v14, %v1899_v60  ;;  %v1932_v61 = vadd.f32 %v1924_v5, %v1900_v54  ;;  %v10832_v5 = vld [vmem:[#allocation33_spill] sm:$0xff] }
 0x2a2   : >>> { %v1933_v51 = vadd.f32 %v1925_v34, %v1901_v45  ;;  %v1934_v44 = vadd.f32 %v1926_v35, %v1902_v26  ;;  %v1935_v42 = vadd.f32 %v1927_v36, %v1903_v9  ;;  %v1936_v49 = vmul.f32 %v10828_v58, %v10830_v41 }
 0x2a3   : >>> { %v1937_v12 = vmul.f32 %v8264_v37, %v10830_v41  ;;  %v1938_v28 = vmul.f32 %v8267_v38, %v10830_v41  ;;  %v1939_v55 = vmul.f32 %v8270_v39, %v10830_v41  ;;  %v1940_v6 = vmul.f32 %v8274_v15, %v10830_v41 }
 0x2a4   : >>> { %v1941_v8 = vmul.f32 %v8277_v16, %v10830_v41  ;;  %v1942_v59 = vmul.f32 %v8280_v25, %v10830_v41  ;;  %v1943_v60 = vmul.f32 %v8323_v48, %v10830_v41  ;;  %v1944_v54 = vadd.f32 %v1936_v49, %v1912_v2 }
 0x2a5   : >>> { %v1945_v45 = vadd.f32 %v1937_v12, %v1913_v3  ;;  %v1946_v26 = vadd.f32 %v1938_v28, %v1914_v13  ;;  %v1947_v9 = vadd.f32 %v1939_v55, %v1915_v27  ;;  %v1948_v29 = vadd.f32 %v1940_v6, %v1916_v33  ;;  %v10833_v6 = vld [vmem:[#allocation34_spill] sm:$0xff] }
 0x2a6   : >>> { %v1949_v4 = vadd.f32 %v1941_v8, %v1917_v50  ;;  %v1950_v32 = vadd.f32 %v1942_v59, %v1918_v46  ;;  %v1951_v56 = vadd.f32 %v1943_v60, %v1919_v40  ;;  %v1952_v17 = vmul.f32 %v10828_v58, %v10831_v18 }
 0x2a7   : >>> { %v1953_v1 = vmul.f32 %v8264_v37, %v10831_v18  ;;  %v1954_v52 = vmul.f32 %v8267_v38, %v10831_v18  ;;  %v1955_v53 = vmul.f32 %v8270_v39, %v10831_v18  ;;  %v1956_v2 = vmul.f32 %v8274_v15, %v10831_v18 }
 0x2a8   : >>> { %v1957_v3 = vmul.f32 %v8277_v16, %v10831_v18  ;;  %v1958_v13 = vmul.f32 %v8280_v25, %v10831_v18  ;;  %v1959_v58 = vmul.f32 %v8323_v48, %v10831_v18  ;;  %v1960_v27 = vadd.f32 %v1952_v17, %v1928_v10  ;;  %v8656_v18 = vld [vmem:[%s7931_s19 + $0x1d8] sm:$0xff] }
 0x2a9   : >>> { %v1961_v33 = vadd.f32 %v1953_v1, %v1929_v11  ;;  %v1962_v50 = vadd.f32 %v1954_v52, %v1930_v21  ;;  %v1963_v46 = vadd.f32 %v1955_v53, %v1931_v22  ;;  %v1964_v40 = vadd.f32 %v1956_v2, %v1932_v61  ;;  %v8662_v53 = vld [vmem:[%s7931_s19 + $0x1e8] sm:$0xff] }
 0x2aa   : >>> { %v1965_v23 = vadd.f32 %v1957_v3, %v1933_v51  ;;  %v1966_v24 = vadd.f32 %v1958_v13, %v1934_v44  ;;  %v1967_v14 = vadd.f32 %v1959_v58, %v1935_v42  ;;  %v1968_v34 = vmul.f32 %v8264_v37, %v10832_v5  ;;  %v10834_v3 = vld [vmem:[#allocation35_spill] sm:$0xff] }
 0x2ab   : >>> { %v1969_v35 = vmul.f32 %v8267_v38, %v10832_v5  ;;  %v1970_v36 = vmul.f32 %v8270_v39, %v10832_v5  ;;  %v1971_v41 = vmul.f32 %v8274_v15, %v10832_v5  ;;  %v1972_v10 = vmul.f32 %v8277_v16, %v10832_v5 }
 0x2ac   : >>> { %v1973_v11 = vmul.f32 %v8280_v25, %v10832_v5  ;;  %v1974_v21 = vmul.f32 %v8323_v48, %v10832_v5  ;;  %v1975_v22 = vmul.f32 %v8371_v0, %v10832_v5  ;;  %v1976_v61 = vadd.f32 %v1968_v34, %v1944_v54  ;;  %v5607_v54 = vld [vmem:[%s7931_s19 + $0x1b0] sm:$0xff] }
 0x2ad   : >>> { %v1977_v51 = vadd.f32 %v1969_v35, %v1945_v45  ;;  %v1978_v44 = vadd.f32 %v1970_v36, %v1946_v26  ;;  %v1979_v42 = vadd.f32 %v1971_v41, %v1947_v9  ;;  %v1980_v49 = vadd.f32 %v1972_v10, %v1948_v29  ;;  %v8642_v29 = vld [vmem:[%s7931_s19 + $0x1b8] sm:$0xff]  ;;  %v10835_v10 = vld [vmem:[#allocation36_spill] sm:$0xff] }
 0x2ae   : >>> { %v1981_v12 = vadd.f32 %v1973_v11, %v1949_v4  ;;  %v1982_v28 = vadd.f32 %v1974_v21, %v1950_v32  ;;  %v1983_v55 = vadd.f32 %v1975_v22, %v1951_v56  ;;  %v1984_v8 = vmul.f32 %v8264_v37, %v10833_v6  ;;  %v8648_v4 = vld [vmem:[%s7931_s19 + $0x1c8] sm:$0xff] }
 0x2af   : >>> { %v1985_v59 = vmul.f32 %v8267_v38, %v10833_v6  ;;  %v1986_v60 = vmul.f32 %v8270_v39, %v10833_v6  ;;  %v1987_v45 = vmul.f32 %v8274_v15, %v10833_v6  ;;  %v1988_v26 = vmul.f32 %v8277_v16, %v10833_v6  ;;  %v8645_v38 = vld [vmem:[%s7931_s19 + $0x1c0] sm:$0xff]  ;;  %v8653_v16 = vld [vmem:[%s7931_s19 + $0x1d0] sm:$0xff] }
 0x2b0   : >>> { %v1989_v9 = vmul.f32 %v8280_v25, %v10833_v6  ;;  %v1990_v37 = vmul.f32 %v8323_v48, %v10833_v6  ;;  %v1991_v39 = vmul.f32 %v8371_v0, %v10833_v6  ;;  %v1992_v15 = vadd.f32 %v1984_v8, %v1960_v27  ;;  %v8659_v25 = vld [vmem:[%s7931_s19 + $0x1e0] sm:$0xff] }
 0x2b1   : >>> { %v1993_v32 = vadd.f32 %v1985_v59, %v1961_v33  ;;  %v1994_v56 = vadd.f32 %v1986_v60, %v1962_v50  ;;  %v1995_v17 = vadd.f32 %v1987_v45, %v1963_v46  ;;  %v1996_v48 = vadd.f32 %v1988_v26, %v1964_v40  ;;  %v10836_v26 = vld [vmem:[#allocation37_spill] sm:$0xff] }
 0x2b2   : >>> { %v1997_v1 = vadd.f32 %v1989_v9, %v1965_v23  ;;  %v1998_v52 = vadd.f32 %v1990_v37, %v1966_v24  ;;  %v1999_v2 = vadd.f32 %v1991_v39, %v1967_v14  ;;  %v2012_v13 = vmul.f32 %v5607_v54, %v10834_v3 }
 0x2b3   : >>> { %v2013_v0 = vmul.f32 %v8642_v29, %v10834_v3  ;;  %v2014_v58 = vmul.f32 %v8645_v38, %v10834_v3  ;;  %v2015_v27 = vmul.f32 %v8648_v4, %v10834_v3  ;;  %v2016_v33 = vmul.f32 %v8653_v16, %v10834_v3 }
 0x2b4   : >>> { %v2017_v50 = vmul.f32 %v8656_v18, %v10834_v3  ;;  %v2018_v46 = vmul.f32 %v8659_v25, %v10834_v3  ;;  %v2019_v40 = vmul.f32 %v8662_v53, %v10834_v3  ;;  %v2020_v23 = vadd.f32 %v2012_v13, %v1976_v61 }
 0x2b5   : >>> { %v2021_v24 = vadd.f32 %v2013_v0, %v1977_v51  ;;  %v2022_v14 = vadd.f32 %v2014_v58, %v1978_v44  ;;  %v2023_v5 = vadd.f32 %v2015_v27, %v1979_v42  ;;  %v2024_v34 = vadd.f32 %v2016_v33, %v1980_v49 }
 0x2b6   : >>> { %v2025_v35 = vadd.f32 %v2017_v50, %v1981_v12  ;;  %v2026_v36 = vadd.f32 %v2018_v46, %v1982_v28  ;;  %v2027_v41 = vadd.f32 %v2019_v40, %v1983_v55  ;;  %v2028_v11 = vmul.f32 %v5607_v54, %v10835_v10  ;;  %v5626_v54 = vld [vmem:[%s7931_s19 + $0x1f0] sm:$0xff] }
 0x2b7   : >>> { %v2029_v21 = vmul.f32 %v8642_v29, %v10835_v10  ;;  %v2030_v22 = vmul.f32 %v8645_v38, %v10835_v10  ;;  %v2031_v6 = vmul.f32 %v8648_v4, %v10835_v10  ;;  %v2032_v61 = vmul.f32 %v8653_v16, %v10835_v10 }
 0x2b8   : >>> { %v2033_v51 = vmul.f32 %v8656_v18, %v10835_v10  ;;  %v2034_v44 = vmul.f32 %v8659_v25, %v10835_v10  ;;  %v2035_v42 = vmul.f32 %v8662_v53, %v10835_v10  ;;  %v2036_v49 = vadd.f32 %v2028_v11, %v1992_v15 }
 0x2b9   : >>> { %v2037_v12 = vadd.f32 %v2029_v21, %v1993_v32  ;;  %v2038_v28 = vadd.f32 %v2030_v22, %v1994_v56  ;;  %v2039_v55 = vadd.f32 %v2031_v6, %v1995_v17  ;;  %v2040_v8 = vadd.f32 %v2032_v61, %v1996_v48  ;;  %v5638_v21 = vld [vmem:[%s7931_s19 + $0x1f8] sm:$0xff]  ;;  %s8742_s19 = sld [smem:[#allocation11 + %s5509_s29]] }
 0x2ba   : >>> { %v2041_v59 = vadd.f32 %v2033_v51, %v1997_v1  ;;  %v2042_v60 = vadd.f32 %v2034_v44, %v1998_v52  ;;  %v2043_v45 = vadd.f32 %v2035_v42, %v1999_v2  ;;  %v2054_v9 = vmul.f32 %v8642_v29, %v10836_v26 }
 0x2bb   : >>> { %v2055_v37 = vmul.f32 %v8645_v38, %v10836_v26  ;;  %v2056_v39 = vmul.f32 %v8648_v4, %v10836_v26  ;;  %v2057_v15 = vmul.f32 %v8653_v16, %v10836_v26  ;;  %v2058_v32 = vmul.f32 %v8656_v18, %v10836_v26 }
 0x2bc   : >>> { %v2059_v56 = vmul.f32 %v8659_v25, %v10836_v26  ;;  %v2060_v17 = vmul.f32 %v8662_v53, %v10836_v26  ;;  %v2061_v48 = vmul.f32 %v5626_v54, %v10836_v26  ;;  %v2062_v1 = vadd.f32 %v2054_v9, %v2020_v23 }
 0x2bd   : >>> { %v2063_v52 = vadd.f32 %v2055_v37, %v2021_v24  ;;  %v2064_v2 = vadd.f32 %v2056_v39, %v2022_v14  ;;  %v2065_v3 = vadd.f32 %v2057_v15, %v2023_v5  ;;  %v2066_v13 = vadd.f32 %v2058_v32, %v2024_v34 }
 0x2be   : >>> { %v2067_v0 = vadd.f32 %v2059_v56, %v2025_v35  ;;  %v2068_v58 = vadd.f32 %v2060_v17, %v2026_v36  ;;  %v2069_v27 = vadd.f32 %v2061_v48, %v2027_v41  ;;  %v2070_v33 = vmul.f32 %v8642_v29, %v8342_v43 }
 0x2bf   : >>> { %v2071_v50 = vmul.f32 %v8645_v38, %v8342_v43  ;;  %v2072_v46 = vmul.f32 %v8648_v4, %v8342_v43  ;;  %v2073_v40 = vmul.f32 %v8653_v16, %v8342_v43  ;;  %v2074_v23 = vmul.f32 %v8656_v18, %v8342_v43 }
 0x2c0   : >>> { %v2075_v24 = vmul.f32 %v8659_v25, %v8342_v43  ;;  %v2076_v14 = vmul.f32 %v8662_v53, %v8342_v43  ;;  %v2077_v29 = vmul.f32 %v5626_v54, %v8342_v43  ;;  %v2078_v5 = vadd.f32 %v2070_v33, %v2036_v49 }
 0x2c1   : >>> { %v2079_v34 = vadd.f32 %v2071_v50, %v2037_v12  ;;  %v2080_v35 = vadd.f32 %v2072_v46, %v2038_v28  ;;  %v2081_v36 = vadd.f32 %v2073_v40, %v2039_v55  ;;  %v2082_v41 = vadd.f32 %v2074_v23, %v2040_v8 }
 0x2c2   : >>> { %v2083_v10 = vadd.f32 %v2075_v24, %v2041_v59  ;;  %v2084_v11 = vadd.f32 %v2076_v14, %v2042_v60  ;;  %v2085_v22 = vadd.f32 %v2077_v29, %v2043_v45  ;;  %v2096_v6 = vmul.f32 %v8645_v38, %v8345_v7  ;;  %v10840_v14 = vld [vmem:[#allocation40_spill] sm:$0xff] }
 0x2c3   : >>> { %v2097_v61 = vmul.f32 %v8648_v4, %v8345_v7  ;;  %v2098_v51 = vmul.f32 %v8653_v16, %v8345_v7  ;;  %v2099_v43 = vmul.f32 %v8656_v18, %v8345_v7  ;;  %v2100_v44 = vmul.f32 %v8659_v25, %v8345_v7 }
 0x2c4   : >>> { %v2101_v42 = vmul.f32 %v8662_v53, %v8345_v7  ;;  %v2102_v49 = vmul.f32 %v5626_v54, %v8345_v7  ;;  %v2103_v12 = vmul.f32 %v5638_v21, %v8345_v7  ;;  %v2104_v28 = vadd.f32 %v2096_v6, %v2062_v1  ;;  %v10848_v6 = vld [vmem:[#allocation45_spill] sm:$0xff] }
 0x2c5   : >>> { %v2105_v55 = vadd.f32 %v2097_v61, %v2063_v52  ;;  %v2106_v8 = vadd.f32 %v2098_v51, %v2064_v2  ;;  %v2107_v59 = vadd.f32 %v2099_v43, %v2065_v3  ;;  %v2108_v60 = vadd.f32 %v2100_v44, %v2066_v13  ;;  %v10852_v43 = vld [vmem:[#allocation48_spill] sm:$0xff] }
 0x2c6   : >>> { %v2109_v45 = vadd.f32 %v2101_v42, %v2067_v0  ;;  %v2110_v26 = vadd.f32 %v2102_v49, %v2068_v58  ;;  %v2111_v9 = vadd.f32 %v2103_v12, %v2069_v27  ;;  %v2112_v37 = vmul.f32 %v8645_v38, %v8348_v63 }
 0x2c7   : >>> { %v2113_v39 = vmul.f32 %v8648_v4, %v8348_v63  ;;  %v2114_v7 = vmul.f32 %v8653_v16, %v8348_v63  ;;  %v2115_v15 = vmul.f32 %v8656_v18, %v8348_v63  ;;  %v2116_v32 = vmul.f32 %v8659_v25, %v8348_v63 }
 0x2c8   : >>> { %v2117_v56 = vmul.f32 %v8662_v53, %v8348_v63  ;;  %v2118_v17 = vmul.f32 %v5626_v54, %v8348_v63  ;;  %v2119_v38 = vmul.f32 %v5638_v21, %v8348_v63  ;;  %v2120_v4 = vadd.f32 %v2112_v37, %v2078_v5 }
 0x2c9   : >>> { %v2121_v16 = vadd.f32 %v2113_v39, %v2079_v34  ;;  %v2122_v48 = vadd.f32 %v2114_v7, %v2080_v35  ;;  %v2123_v1 = vadd.f32 %v2115_v15, %v2081_v36  ;;  %v2124_v52 = vadd.f32 %v2116_v32, %v2082_v41  ;;  %v10842_v35 = vld [vmem:[#allocation41_spill] sm:$0xff]  ;;  %v10843_v36 = vld [vmem:[#allocation42_spill] sm:$0xff] }
 0x2ca   : >>> { %v2125_v2 = vadd.f32 %v2117_v56, %v2083_v10  ;;  %v2126_v18 = vadd.f32 %v2118_v17, %v2084_v11  ;;  %v2127_v25 = vadd.f32 %v2119_v38, %v2085_v22  ;;  %v2128_v3 = vmax.f32 %v2104_v28, %v2105_v55  ;;  %v10845_v11 = vld [vmem:[#allocation43_spill] sm:$0xff] }
 0x2cb   : >>> { %v2129_v13 = vmax.f32 %v2106_v8, %v2107_v59  ;;  %v2130_v53 = vmax.f32 %v2108_v60, %v2109_v45  ;;  %v2131_v54 = vmax.f32 %v2110_v26, %v2111_v9  ;;  %v2132_v0 = vmax.f32 %v2120_v4, %v2121_v16 }
 0x2cc   : >>> { %v2133_v58 = vmax.f32 %v2122_v48, %v2123_v1  ;;  %v2134_v27 = vmax.f32 %v2124_v52, %v2125_v2  ;;  %v2135_v63 = vmax.f32 %v2126_v18, %v2127_v25  ;;  %v10837_v33 = vmax.f32 %v8389_v30, %v8391_v31  ;;  %v10846_v30 = vld [vmem:[#allocation44_spill] sm:$0xff] }
 0x2cd   : >>> { %v10838_v46 = vmax.f32 %v8393_v47, %v8395_v57  ;;  %v10839_v23 = vmax.f32 %v8397_v62, %v8399_v19  ;;  %v10841_v29 = vmax.f32 %v8401_v20, %v10840_v14  ;;  %v2141_v34 = vstv %s8742_s19  ;;  %v10849_v62 = vld [vmem:[#allocation46_spill] sm:$0xff]  ;;  %v10851_v20 = vld [vmem:[#allocation47_spill] sm:$0xff] }
 0x2ce   : >>> { %v2136_v50 = vmax.f32 %v10837_v33, %v2128_v3  ;;  %v10844_v41 = vmax.f32 %v10842_v35, %v10843_v36  ;;  %v10847_v31 = vmax.f32 %v10845_v11, %v10846_v30  ;;  %v10850_v19 = vmax.f32 %v10848_v6, %v10849_v62 }
 0x2cf   : >>> { %v2137_v40 = vmax.f32 %v10838_v46, %v2129_v13  ;;  %v2138_v24 = vmax.f32 %v10839_v23, %v2130_v53  ;;  %v2139_v5 = vmax.f32 %v10841_v29, %v2131_v54  ;;  %v10853_v44 = vmax.f32 %v10851_v20, %v10852_v43 }
 0x2d0   : >>> { %v2158_v10 = vmax.f32 %v10844_v41, %v2132_v0  ;;  %v2159_v21 = vmax.f32 %v10847_v31, %v2133_v58  ;;  %v2142_v47 = vadd.f32 %v2141_v34, %v2136_v50  ;;  %v2160_v61 = vmax.f32 %v10850_v19, %v2134_v27 }
 0x2d1   : >>> { %v2143_v57 = vadd.f32 %v2141_v34, %v2137_v40  ;;  %v2144_v22 = vadd.f32 %v2141_v34, %v2138_v24  ;;  %v2145_v51 = vadd.f32 %v2141_v34, %v2139_v5  ;;  %v2161_v42 = vmax.f32 %v10853_v44, %v2135_v63 }
 0x2d2   : >>> { %v2163_v49 = vstv %s8759_s26  ;;  %vm2146_vm0 = vcmp.gt.f32.partialorder %v2142_v47, 0.0  ;;  %v2150_v12 = vmul.f32 0.01, %v2142_v47 }
 0x2d3   : >>> { %vm2147_vm1 = vcmp.gt.f32.partialorder %v2143_v57, 0.0  ;;  %vm2148_vm2 = vcmp.gt.f32.partialorder %v2144_v22, 0.0  ;;  %vm2149_vm3 = vcmp.gt.f32.partialorder %v2145_v51, 0.0  ;;  %v2151_v28 = vmul.f32 0.01, %v2143_v57 }
 0x2d4   : >>> { %v2152_v55 = vmul.f32 0.01, %v2144_v22  ;;  %v2164_v8 = vadd.f32 %v2163_v49, %v2158_v10  ;;  %v2153_v59 = vmul.f32 0.01, %v2145_v51  ;;  %v2154_v60 = vsel %vm2146_vm0, %v2142_v47, %v2150_v12 }
 0x2d5   : >>> { %v2165_v45 = vadd.f32 %v2163_v49, %v2159_v21  ;;  %v2166_v26 = vadd.f32 %v2163_v49, %v2160_v61  ;;  %v2155_v9 = vsel %vm2147_vm1, %v2143_v57, %v2151_v28  ;;  %v2167_v39 = vadd.f32 %v2163_v49, %v2161_v42  ;;  %5641 = vst [vmem:[%s5024_s12 + $0xd0] sm:$0xff] %v2154_v60 }
 0x2d6   : >>> { %v2156_v37 = vsel %vm2148_vm2, %v2144_v22, %v2152_v55  ;;  %vm2168_vm4 = vcmp.gt.f32.partialorder %v2164_v8, 0.0  ;;  %v2157_v7 = vsel %vm2149_vm3, %v2145_v51, %v2153_v59  ;;  %v2172_v15 = vmul.f32 0.01, %v2164_v8  ;;  %5642 = vst [vmem:[%s5024_s12 + $0xd8] sm:$0xff] %v2155_v9 }
 0x2d7   : >>> { %vm2169_vm5 = vcmp.gt.f32.partialorder %v2165_v45, 0.0  ;;  %vm2170_vm6 = vcmp.gt.f32.partialorder %v2166_v26, 0.0  ;;  %5643 = vst [vmem:[%s5024_s12 + $0xe0] sm:$0xff] %v2156_v37  ;;  %vm2171_vm7 = vcmp.gt.f32.partialorder %v2167_v39, 0.0  ;;  %v2173_v32 = vmul.f32 0.01, %v2165_v45 }
 0x2d8   : >>> { %v2174_v56 = vmul.f32 0.01, %v2166_v26  ;;  %5644 = vst [vmem:[%s5024_s12 + $0xe8] sm:$0xff] %v2157_v7  ;;  %v2175_v17 = vmul.f32 0.01, %v2167_v39  ;;  %v2176_v38 = vsel %vm2168_vm4, %v2164_v8, %v2172_v15  ;;  %1354 = sbr.rel (!%p1352_p11) target bundleno = 563 (0x233), region = 215 }
 0x2d9   : >>> { %v2177_v4 = vsel %vm2169_vm5, %v2165_v45, %v2173_v32  ;;  %5649 = vst [vmem:[%s5024_s12 + $0x550] sm:$0xff] %v2176_v38 }
 0x2da   : >>> { %v2178_v16 = vsel %vm2170_vm6, %v2166_v26, %v2174_v56  ;;  %v2179_v48 = vsel %vm2171_vm7, %v2167_v39, %v2175_v17  ;;  %5650 = vst [vmem:[%s5024_s12 + $0x558] sm:$0xff] %v2177_v4 }
 0x2db   : >>> { %5651 = vst [vmem:[%s5024_s12 + $0x560] sm:$0xff] %v2178_v16  ;;  %5652 = vst [vmem:[%s5024_s12 + $0x568] sm:$0xff] %v2179_v48 }
 0x2dd   : > { %1346 = sbr.rel (!%p1344_p12) target bundleno = 561 (0x231), region = 226  ;;  %s1341_s5 = sadd.s32 (%p1344_p12), 1, %s6905_s5  }
 0x2de   : > { %p1338_p13 = scmp.ge.s32.totalorder (%p1344_p12), %s1341_s5, 8  }
 0x2e2   :  { %1340 = sbr.rel (!%p1338_p13) target bundleno = 560 (0x230), region = 237  ;;  %s8799_s14 = smov (%p1338_p13), 0  }
 0x2e7 LB: > { %s8804_s8 = smov 0   ;;  %s6917_s14 = sphi %s8799_s14, %s2205_s14  }
 0x2e8 LB: >> { %s5653_s6 = sshll.u32 %s6921_s8, 1  ;;  %v8814_v1 = vmov 0.0   ;;  %v8816_v52 = vmov 0.0   ;;  %v8818_v2 = vmov 0.0   ;;  %v8820_v18 = vmov 0.0   ;;  %s8846_s29 = smov 0   ;;  %s6921_s8 = sphi %s8804_s8, %s2211_s8  }
 0x2e9   : >> { %s8812_s5 = sadd.s32 1, %s5653_s6  ;;  %v8822_v25 = vmov 0.0   ;;  %v8824_v3 = vmov 0.0   ;;  %v8826_v13 = vmov 0.0   ;;  %v8828_v53 = vmov 0.0  }
 0x2ea   : >> { %v8830_v54 = vmov 0.0   ;;  %v8832_v0 = vmov 0.0   ;;  %v8834_v58 = vmov 0.0   ;;  %v8836_v27 = vmov 0.0  }
 0x2eb   : >> { %v8838_v63 = vmov 0.0   ;;  %v8840_v33 = vmov 0.0   ;;  %v8842_v50 = vmov 0.0   ;;  %v8844_v46 = vmov 0.0  }
 0x2ec LB: >>> { %s2237_s30 = smul.u32 400, %s6921_s8  ;;  %s6989_s29 = sphi %s8846_s29, %s2220_s29   ;;  %v6985_v46 = vphi %v8844_v46, %v10889_v46   ;;  %v6981_v50 = vphi %v8842_v50, %v10888_v50   ;;  %v6977_v33 = vphi %v8840_v33, %v10887_v33   ;;  %v6973_v63 = vphi %v8838_v63, %v10886_v63   ;;  %v6969_v27 = vphi %v8836_v27, %v10885_v27   ;;  %v6965_v58 = vphi %v8834_v58, %v10884_v58   ;;  %v6961_v0 = vphi %v8832_v0, %v10883_v0   ;;  %v6957_v54 = vphi %v8830_v54, %v10882_v54   ;;  %v6953_v53 = vphi %v8828_v53, %v10881_v53   ;;  %v6949_v13 = vphi %v8826_v13, %v10880_v13   ;;  %v6945_v3 = vphi %v8824_v3, %v10879_v3   ;;  %v6941_v25 = vphi %v8822_v25, %v10878_v25   ;;  %v6937_v18 = vphi %v8820_v18, %v10877_v18   ;;  %v6933_v2 = vphi %v8818_v2, %v10876_v2   ;;  %v6929_v52 = vphi %v8816_v52, %v10875_v52   ;;  %v6925_v1 = vphi %v8814_v1, %v10874_v1  }
 0x2ed   : >>> { %s2240_s15 = smul.u32 200, %s8812_s5 }
 0x2ee   : >>> { %s2238_s16 = smul.u32 25, %s6989_s29 }
 0x2ef   : >>> { %s5655_s17 = smul.u32 192, %s6917_s14 }
 0x2f0   : >>> { %s8889_s18 = sadd.s32 %s2238_s16, %s2237_s30  ;;  %s8893_s0 = sadd.s32 %s2240_s15, %s2238_s16 }
 0x2f1   : >>> { %s2243_s20 = smul.u32 1152, %s6989_s29  ;;  %s2254_s21 = sld [smem:[#allocation13 + %s8889_s18]] }
 0x2f2   : >>> { %s8898_s1 = sld [smem:[#allocation13 + %s8893_s0]]  ;;  %s2301_s22 = sadd.s32 1, %s8889_s18 }
 0x2f3   : >>> { %s2244_s23 = sadd.s32 %s5655_s17, %s2243_s20  ;;  %s8903_s24 = sld [smem:[#allocation13 + %s2301_s22]] }
 0x2f4   : >>> { %s2320_s25 = sadd.s32 1, %s8893_s0  ;;  %s8906_s11 = scalar_lea.vmem [#allocation3], %s2244_s23 }
 0x2f5   : >>> { %v2246_v40 = vld [vmem:[%s8906_s11] sm:$0xff]  ;;  %v8910_v23 = vld [vmem:[%s8906_s11 + $0x8] sm:$0xff]  ;;  %v8913_v24 = vld [vmem:[%s8906_s11 + $0x10] sm:$0xff]  ;;  %s8915_s13 = sld [smem:[#allocation13 + %s2320_s25]]  ;;  %s2350_s19 = sadd.s32 2, %s8889_s18 }
 0x2f6   : >>> { %v8919_v14 = vld [vmem:[%s8906_s11 + $0x18] sm:$0xff]  ;;  %v8922_v29 = vld [vmem:[%s8906_s11 + $0x20] sm:$0xff]  ;;  %v8925_v5 = vld [vmem:[%s8906_s11 + $0x28] sm:$0xff]  ;;  %s2351_s3 = sld [smem:[#allocation13 + %s2350_s19]]  ;;  %s2369_s26 = sadd.s32 2, %s8893_s0 }
 0x2f7   : >>> { %v8928_v34 = vld [vmem:[%s8906_s11 + $0x30] sm:$0xff]  ;;  %v8931_v35 = vld [vmem:[%s8906_s11 + $0x38] sm:$0xff]  ;;  %v2255_v36 = vstv %s2254_s21  ;;  %v8952_v39 = vld [vmem:[%s8906_s11 + $0x40] sm:$0xff]  ;;  %s2399_s27 = sadd.s32 3, %s8889_s18  ;;  %s2418_s4 = sadd.s32 3, %s8893_s0 }
 0x2f8   : >>> { %v2256_v41 = vmul.f32 %v2255_v36, %v2246_v40  ;;  %v2257_v10 = vmul.f32 %v2255_v36, %v8910_v23  ;;  %v2258_v11 = vmul.f32 %v2255_v36, %v8913_v24  ;;  %v2259_v30 = vmul.f32 %v2255_v36, %v8919_v14  ;;  %s8972_s28 = sld [smem:[#allocation13 + %s2369_s26]]  ;;  %s2448_s10 = sadd.s32 4, %s8889_s18 }
 0x2f9   : >>> { %v2260_v31 = vmul.f32 %v2255_v36, %v8922_v29  ;;  %v2261_v21 = vmul.f32 %v2255_v36, %v8925_v5  ;;  %v2262_v47 = vmul.f32 %v2255_v36, %v8928_v34  ;;  %v2263_v57 = vmul.f32 %v2255_v36, %v8931_v35  ;;  %s8979_s12 = sld [smem:[#allocation13 + %s2399_s27]]  ;;  %s2467_s21 = sadd.s32 4, %s8893_s0 }
 0x2fa   : >>> { %v2264_v22 = vadd.f32 %v6985_v46, %v2256_v41  ;;  %v2265_v6 = vadd.f32 %v6981_v50, %v2257_v10  ;;  %v2266_v62 = vadd.f32 %v6977_v33, %v2258_v11  ;;  %v2267_v19 = vadd.f32 %v6973_v63, %v2259_v30  ;;  %s8982_s16 = sld [smem:[#allocation13 + %s2418_s4]]  ;;  %s2517_s22 = sadd.s32 5, %s8893_s0 }
 0x2fb   : >>> { %v2268_v61 = vadd.f32 %v6969_v27, %v2260_v31  ;;  %v2269_v51 = vadd.f32 %v6965_v58, %v2261_v21  ;;  %v2270_v20 = vadd.f32 %v6961_v0, %v2262_v47  ;;  %v2271_v43 = vadd.f32 %v6957_v54, %v2263_v57  ;;  %v8988_v31 = vld [vmem:[%s8906_s11 + $0x48] sm:$0xff]  ;;  %s8990_s20 = sld [smem:[#allocation13 + %s2448_s10]]  ;;  %s2596_s26 = sadd.s32 7, %s8889_s18 }
 0x2fc   : >>> { %v2273_v44 = vstv %s8898_s1  ;;  %v2303_v8 = vstv %s8903_s24  ;;  %v2322_v59 = vstv %s8915_s13  ;;  %v2352_v60 = vstv %s2351_s3  ;;  %s2498_s1 = sadd.s32 5, %s8889_s18  ;;  %s9026_s23 = sld [smem:[#allocation13 + %s2467_s21]] }
 0x2fd   : >>> { %v2274_v42 = vmul.f32 %v2273_v44, %v2246_v40  ;;  %v2275_v49 = vmul.f32 %v2273_v44, %v8910_v23  ;;  %v2276_v12 = vmul.f32 %v2273_v44, %v8913_v24  ;;  %v2277_v28 = vmul.f32 %v2273_v44, %v8919_v14  ;;  %s2547_s24 = sadd.s32 6, %s8889_s18  ;;  %s9033_s25 = sld [smem:[#allocation13 + %s2498_s1]] }
 0x2fe   : >>> { %v2278_v55 = vmul.f32 %v2273_v44, %v8922_v29  ;;  %v2279_v45 = vmul.f32 %v2273_v44, %v8925_v5  ;;  %v2280_v26 = vmul.f32 %v2273_v44, %v8928_v34  ;;  %v2281_v9 = vmul.f32 %v2273_v44, %v8931_v35  ;;  %s9036_s13 = sld [smem:[#allocation13 + %s2517_s22]]  ;;  %s2566_s3 = sadd.s32 6, %s8893_s0 }
 0x2ff   : >>> { %v2282_v37 = vadd.f32 %v6953_v53, %v2274_v42  ;;  %v2283_v7 = vadd.f32 %v6949_v13, %v2275_v49  ;;  %v2284_v15 = vadd.f32 %v6945_v3, %v2276_v12  ;;  %v2285_v32 = vadd.f32 %v6941_v25, %v2277_v28  ;;  %s9042_s19 = sld [smem:[#allocation13 + %s2547_s24]]  ;;  %s2615_s27 = sadd.s32 7, %s8893_s0 }
 0x300   : >>> { %v2286_v56 = vadd.f32 %v6937_v18, %v2278_v55  ;;  %v2304_v17 = vmul.f32 %v2303_v8, %v8910_v23  ;;  %v2305_v38 = vmul.f32 %v2303_v8, %v8913_v24  ;;  %v2306_v4 = vmul.f32 %v2303_v8, %v8919_v14  ;;  %s9094_s4 = sld [smem:[#allocation13 + %s2566_s3]]  ;;  %s2694_s21 = sadd.s32 9, %s8889_s18 }
 0x301   : >>> { %v2307_v16 = vmul.f32 %v2303_v8, %v8922_v29  ;;  %v2308_v48 = vmul.f32 %v2303_v8, %v8925_v5  ;;  %v2309_v13 = vmul.f32 %v2303_v8, %v8928_v34  ;;  %v2310_v3 = vmul.f32 %v2303_v8, %v8931_v35  ;;  %s9100_s10 = sld [smem:[#allocation13 + %s2596_s26]]  ;;  %s2713_s1 = sadd.s32 9, %s8893_s0 }
 0x302   : >>> { %v2311_v25 = vmul.f32 %v8952_v39, %v2303_v8  ;;  %v2287_v18 = vadd.f32 %v6933_v2, %v2279_v45  ;;  %v2288_v53 = vadd.f32 %v6929_v52, %v2280_v26  ;;  %v2289_v54 = vadd.f32 %v6925_v1, %v2281_v9  ;;  %s9154_s24 = sld [smem:[#allocation13 + %s2694_s21]]  ;;  %s2793_s3 = sadd.s32 11, %s8889_s18 }
 0x303   : >>> { %v2312_v0 = vadd.f32 %v2304_v17, %v2264_v22  ;;  %v2313_v58 = vadd.f32 %v2305_v38, %v2265_v6  ;;  %v2314_v27 = vadd.f32 %v2306_v4, %v2266_v62  ;;  %v2315_v63 = vadd.f32 %v2307_v16, %v2267_v19  ;;  %s2812_s26 = sadd.s32 11, %s8893_s0  ;;  %s2910_s21 = sadd.s32 13, %s8893_s0 }
 0x304   : >>> { %v2316_v33 = vadd.f32 %v2308_v48, %v2268_v61  ;;  %v2323_v50 = vmul.f32 %v2322_v59, %v8910_v23  ;;  %v2324_v46 = vmul.f32 %v2322_v59, %v8913_v24  ;;  %v2325_v2 = vmul.f32 %v2322_v59, %v8919_v14  ;;  %s2220_s29 = sadd.s32 1, %s6989_s29  }
 0x305   : >>> { %v2326_v52 = vmul.f32 %v2322_v59, %v8922_v29  ;;  %v2317_v1 = vadd.f32 %v2309_v13, %v2269_v51  ;;  %v2318_v40 = vadd.f32 %v2310_v3, %v2270_v20  ;;  %v2319_v36 = vadd.f32 %v2311_v25, %v2271_v43  ;;  %v9013_v25 = vld [vmem:[%s8906_s11 + $0x50] sm:$0xff]  ;;  %p9695_p0 = scmp.ge.s32.totalorder %s2220_s29, 8  }
 0x306   : >>> { %v2327_v41 = vmul.f32 %v2322_v59, %v8925_v5  ;;  %v2328_v10 = vmul.f32 %v2322_v59, %v8928_v34  ;;  %v2329_v11 = vmul.f32 %v2322_v59, %v8931_v35  ;;  %v2330_v23 = vmul.f32 %v8952_v39, %v2322_v59  ;;  %s9799_s29 = smov (%p9695_p0), 0  }
 0x307   : >>> { %v2331_v30 = vadd.f32 %v2323_v50, %v2282_v37  ;;  %v2332_v21 = vadd.f32 %v2324_v46, %v2283_v7  ;;  %v2333_v47 = vadd.f32 %v2325_v2, %v2284_v15  ;;  %v2334_v57 = vadd.f32 %v2326_v52, %v2285_v32 }
 0x308   : >>> { %v2335_v22 = vadd.f32 %v2327_v41, %v2286_v56  ;;  %v2353_v6 = vmul.f32 %v2352_v60, %v8913_v24  ;;  %v2354_v62 = vmul.f32 %v2352_v60, %v8919_v14  ;;  %v2355_v19 = vmul.f32 %v2352_v60, %v8922_v29 }
 0x309   : >>> { %v2356_v61 = vmul.f32 %v2352_v60, %v8925_v5  ;;  %v2357_v51 = vmul.f32 %v2352_v60, %v8928_v34  ;;  %v2358_v20 = vmul.f32 %v2352_v60, %v8931_v35  ;;  %v2359_v43 = vmul.f32 %v8952_v39, %v2352_v60 }
 0x30a   : >>> { %v2360_v44 = vmul.f32 %v8988_v31, %v2352_v60  ;;  %v2336_v42 = vadd.f32 %v2328_v10, %v2287_v18  ;;  %v2337_v49 = vadd.f32 %v2329_v11, %v2288_v53  ;;  %v2338_v12 = vadd.f32 %v2330_v23, %v2289_v54 }
 0x30b   : >>> { %v2361_v28 = vadd.f32 %v2353_v6, %v2312_v0  ;;  %v2362_v55 = vadd.f32 %v2354_v62, %v2313_v58  ;;  %v2363_v8 = vadd.f32 %v2355_v19, %v2314_v27  ;;  %v2364_v59 = vadd.f32 %v2356_v61, %v2315_v63 }
 0x30c   : >>> { %v2365_v45 = vadd.f32 %v2357_v51, %v2316_v33  ;;  %v2366_v26 = vadd.f32 %v2358_v20, %v2317_v1  ;;  %v2367_v9 = vadd.f32 %v2359_v43, %v2318_v40  ;;  %v2368_v37 = vadd.f32 %v2360_v44, %v2319_v36  ;;  %v5687_v44 = vld [vmem:[%s8906_s11 + $0x58] sm:$0xff] }
 0x30d   : >>> { %v2371_v7 = vstv %s8972_s28  ;;  %v2401_v38 = vstv %s8979_s12  ;;  %v2420_v4 = vstv %s8982_s16  ;;  %v2450_v16 = vstv %s8990_s20  ;;  %s2645_s28 = sadd.s32 8, %s8889_s18  ;;  %s9103_s12 = sld [smem:[#allocation13 + %s2615_s27]] }
 0x30e   : >>> { %v2372_v15 = vmul.f32 %v2371_v7, %v8913_v24  ;;  %v2373_v60 = vmul.f32 %v2371_v7, %v8919_v14  ;;  %v2374_v32 = vmul.f32 %v2371_v7, %v8922_v29  ;;  %v2375_v56 = vmul.f32 %v2371_v7, %v8925_v5  ;;  %s9111_s16 = sld [smem:[#allocation13 + %s2645_s28]]  ;;  %s2664_s20 = sadd.s32 8, %s8893_s0 }
 0x30f   : >>> { %v2376_v17 = vmul.f32 %v2371_v7, %v8928_v34  ;;  %v2377_v48 = vmul.f32 %v2371_v7, %v8931_v35  ;;  %v2378_v13 = vmul.f32 %v8952_v39, %v2371_v7  ;;  %v2379_v3 = vmul.f32 %v8988_v31, %v2371_v7  ;;  %s9147_s22 = sld [smem:[#allocation13 + %s2664_s20]]  ;;  %s2891_s20 = sadd.s32 13, %s8889_s18 }
 0x310   : >>> { %v2380_v24 = vadd.f32 %v2372_v15, %v2331_v30  ;;  %v2381_v18 = vadd.f32 %v2373_v60, %v2332_v21  ;;  %v2382_v53 = vadd.f32 %v2374_v32, %v2333_v47  ;;  %v2383_v54 = vadd.f32 %v2375_v56, %v2334_v57  ;;  %s9211_s28 = sld [smem:[#allocation13 + %s2793_s3]]  ;;  %s3009_s3 = sadd.s32 15, %s8893_s0 }
 0x311   : >>> { %v2384_v0 = vadd.f32 %v2376_v17, %v2335_v22  ;;  %v2402_v58 = vmul.f32 %v2401_v38, %v8919_v14  ;;  %v2403_v27 = vmul.f32 %v2401_v38, %v8922_v29  ;;  %v2404_v63 = vmul.f32 %v2401_v38, %v8925_v5 }
 0x312   : >>> { %v2405_v33 = vmul.f32 %v2401_v38, %v8928_v34  ;;  %v2406_v50 = vmul.f32 %v2401_v38, %v8931_v35  ;;  %v2407_v46 = vmul.f32 %v8952_v39, %v2401_v38  ;;  %v2408_v2 = vmul.f32 %v8988_v31, %v2401_v38 }
 0x313   : >>> { %v2409_v52 = vmul.f32 %v9013_v25, %v2401_v38  ;;  %v2385_v1 = vadd.f32 %v2377_v48, %v2336_v42  ;;  %v2386_v40 = vadd.f32 %v2378_v13, %v2337_v49  ;;  %v2387_v36 = vadd.f32 %v2379_v3, %v2338_v12 }
 0x314   : >>> { %v2410_v41 = vadd.f32 %v2402_v58, %v2361_v28  ;;  %v2411_v10 = vadd.f32 %v2403_v27, %v2362_v55  ;;  %v2412_v11 = vadd.f32 %v2404_v63, %v2363_v8  ;;  %v2413_v23 = vadd.f32 %v2405_v33, %v2364_v59  ;;  %v9058_v27 = vld [vmem:[%s8906_s11 + $0x68] sm:$0xff]  ;;  %v9061_v63 = vld [vmem:[%s8906_s11 + $0x70] sm:$0xff]  ;;  %v9064_v33 = vld [vmem:[%s8906_s11 + $0x78] sm:$0xff] }
 0x315   : >>> { %v2414_v30 = vadd.f32 %v2406_v50, %v2365_v45  ;;  %v2421_v21 = vmul.f32 %v2420_v4, %v8919_v14  ;;  %v2422_v47 = vmul.f32 %v2420_v4, %v8922_v29  ;;  %v2423_v57 = vmul.f32 %v2420_v4, %v8925_v5 }
 0x316   : >>> { %v2424_v22 = vmul.f32 %v2420_v4, %v8928_v34  ;;  %v2415_v6 = vadd.f32 %v2407_v46, %v2366_v26  ;;  %v2416_v62 = vadd.f32 %v2408_v2, %v2367_v9  ;;  %v2417_v19 = vadd.f32 %v2409_v52, %v2368_v37  ;;  %v9068_v46 = vld [vmem:[%s8906_s11 + $0x80] sm:$0xff] }
 0x317   : >>> { %v2425_v61 = vmul.f32 %v2420_v4, %v8931_v35  ;;  %v2426_v51 = vmul.f32 %v8952_v39, %v2420_v4  ;;  %v2427_v20 = vmul.f32 %v8988_v31, %v2420_v4  ;;  %v2428_v14 = vmul.f32 %v9013_v25, %v2420_v4 }
 0x318   : >>> { %v2429_v43 = vadd.f32 %v2421_v21, %v2380_v24  ;;  %v2430_v42 = vadd.f32 %v2422_v47, %v2381_v18  ;;  %v2431_v49 = vadd.f32 %v2423_v57, %v2382_v53  ;;  %v2432_v12 = vadd.f32 %v2424_v22, %v2383_v54 }
 0x319   : >>> { %v2433_v28 = vadd.f32 %v2425_v61, %v2384_v0  ;;  %v2451_v55 = vmul.f32 %v2450_v16, %v8922_v29  ;;  %v2452_v8 = vmul.f32 %v2450_v16, %v8925_v5  ;;  %v2453_v59 = vmul.f32 %v2450_v16, %v8928_v34 }
 0x31a   : >>> { %v2454_v45 = vmul.f32 %v2450_v16, %v8931_v35  ;;  %v2455_v26 = vmul.f32 %v8952_v39, %v2450_v16  ;;  %v2456_v9 = vmul.f32 %v8988_v31, %v2450_v16  ;;  %v2457_v37 = vmul.f32 %v9013_v25, %v2450_v16 }
 0x31b   : >>> { %v2458_v7 = vmul.f32 %v5687_v44, %v2450_v16  ;;  %v2434_v15 = vadd.f32 %v2426_v51, %v2385_v1  ;;  %v2435_v60 = vadd.f32 %v2427_v20, %v2386_v40  ;;  %v2436_v32 = vadd.f32 %v2428_v14, %v2387_v36  ;;  %v5690_v16 = vld [vmem:[%s8906_s11 + $0x60] sm:$0xff]  ;;  %v9076_v40 = vld [vmem:[%s8906_s11 + $0x88] sm:$0xff]  ;;  %v9079_v36 = vld [vmem:[%s8906_s11 + $0x90] sm:$0xff] }
 0x31c   : >>> { %v2459_v56 = vadd.f32 %v2451_v55, %v2410_v41  ;;  %v2460_v17 = vadd.f32 %v2452_v8, %v2411_v10  ;;  %v2461_v38 = vadd.f32 %v2453_v59, %v2412_v11  ;;  %v2462_v4 = vadd.f32 %v2454_v45, %v2413_v23  ;;  %v9082_v41 = vld [vmem:[%s8906_s11 + $0x98] sm:$0xff] }
 0x31d   : >>> { %v2463_v48 = vadd.f32 %v2455_v26, %v2414_v30  ;;  %v2464_v13 = vadd.f32 %v2456_v9, %v2415_v6  ;;  %v2465_v3 = vadd.f32 %v2457_v37, %v2416_v62  ;;  %v2466_v24 = vadd.f32 %v2458_v7, %v2417_v19 }
 0x31e   : >>> { %v2469_v18 = vstv %s9026_s23  ;;  %v2519_v2 = vstv %s9036_s13  ;;  %v2549_v52 = vstv %s9042_s19  ;;  %s2744_s23 = sadd.s32 10, %s8889_s18  ;;  %s2763_s19 = sadd.s32 10, %s8893_s0 }
 0x31f   : >>> { %v2470_v53 = vmul.f32 %v2469_v18, %v8922_v29  ;;  %v2471_v54 = vmul.f32 %v2469_v18, %v8925_v5  ;;  %v2472_v0 = vmul.f32 %v2469_v18, %v8928_v34  ;;  %v2473_v58 = vmul.f32 %v2469_v18, %v8931_v35  ;;  %s9165_s13 = sld [smem:[#allocation13 + %s2744_s23]] }
 0x320   : >>> { %v2474_v50 = vmul.f32 %v8952_v39, %v2469_v18  ;;  %v2500_v29 = vstv %s9033_s25  ;;  %v2475_v5 = vmul.f32 %v8988_v31, %v2469_v18  ;;  %v2476_v34 = vmul.f32 %v9013_v25, %v2469_v18  ;;  %s9157_s25 = sld [smem:[#allocation13 + %s2713_s1]] }
 0x321   : >>> { %v2477_v1 = vmul.f32 %v5687_v44, %v2469_v18  ;;  %v2478_v35 = vadd.f32 %v2470_v53, %v2429_v43  ;;  %v2479_v39 = vadd.f32 %v2471_v54, %v2430_v42  ;;  %v2480_v10 = vadd.f32 %v2472_v0, %v2431_v49  ;;  %s9200_s27 = sld [smem:[#allocation13 + %s2763_s19]]  ;;  %s2990_s19 = sadd.s32 15, %s8889_s18 }
 0x322   : >>> { %v2481_v11 = vadd.f32 %v2473_v58, %v2432_v12  ;;  %v2482_v23 = vadd.f32 %v2474_v50, %v2433_v28  ;;  %v2501_v30 = vmul.f32 %v5690_v16, %v2500_v29  ;;  %v2502_v21 = vmul.f32 %v9058_v27, %v2500_v29  ;;  %s9285_s23 = sld [smem:[#allocation13 + %s2891_s20]]  ;;  %s3107_s20 = sadd.s32 17, %s8893_s0 }
 0x323   : >>> { %v2503_v31 = vmul.f32 %v9061_v63, %v2500_v29  ;;  %v2504_v25 = vmul.f32 %v9064_v33, %v2500_v29  ;;  %v2505_v47 = vmul.f32 %v9068_v46, %v2500_v29  ;;  %v2506_v57 = vmul.f32 %v9076_v40, %v2500_v29 }
 0x324   : >>> { %v2507_v22 = vmul.f32 %v9079_v36, %v2500_v29  ;;  %v2508_v6 = vmul.f32 %v9082_v41, %v2500_v29  ;;  %v2483_v62 = vadd.f32 %v2475_v5, %v2434_v15  ;;  %v2484_v19 = vadd.f32 %v2476_v34, %v2435_v60  ;;  %v9109_v15 = vld [vmem:[%s8906_s11 + $0xa0] sm:$0xff] }
 0x325   : >>> { %v2485_v61 = vadd.f32 %v2477_v1, %v2436_v32  ;;  %v2509_v51 = vadd.f32 %v2501_v30, %v2459_v56  ;;  %v2510_v20 = vadd.f32 %v2502_v21, %v2460_v17  ;;  %v2511_v14 = vadd.f32 %v2503_v31, %v2461_v38 }
 0x326   : >>> { %v2512_v43 = vadd.f32 %v2504_v25, %v2462_v4  ;;  %v2513_v44 = vadd.f32 %v2505_v47, %v2463_v48  ;;  %v2520_v42 = vmul.f32 %v5690_v16, %v2519_v2  ;;  %v2521_v49 = vmul.f32 %v9058_v27, %v2519_v2 }
 0x327   : >>> { %v2522_v12 = vmul.f32 %v9061_v63, %v2519_v2  ;;  %v2523_v28 = vmul.f32 %v9064_v33, %v2519_v2  ;;  %v2514_v55 = vadd.f32 %v2506_v57, %v2464_v13  ;;  %v2515_v8 = vadd.f32 %v2507_v22, %v2465_v3 }
 0x328   : >>> { %v2516_v59 = vadd.f32 %v2508_v6, %v2466_v24  ;;  %v2524_v45 = vmul.f32 %v9068_v46, %v2519_v2  ;;  %v2525_v26 = vmul.f32 %v9076_v40, %v2519_v2  ;;  %v2526_v9 = vmul.f32 %v9079_v36, %v2519_v2  ;;  %v9134_v6 = vld [vmem:[%s8906_s11 + $0xa8] sm:$0xff] }
 0x329   : >>> { %v2527_v37 = vmul.f32 %v9082_v41, %v2519_v2  ;;  %v2528_v7 = vadd.f32 %v2520_v42, %v2478_v35  ;;  %v2529_v60 = vadd.f32 %v2521_v49, %v2479_v39  ;;  %v2530_v32 = vadd.f32 %v2522_v12, %v2480_v10 }
 0x32a   : >>> { %v2531_v56 = vadd.f32 %v2523_v28, %v2481_v11  ;;  %v2532_v17 = vadd.f32 %v2524_v45, %v2482_v23  ;;  %v2550_v38 = vmul.f32 %v9058_v27, %v2549_v52  ;;  %v2551_v4 = vmul.f32 %v9061_v63, %v2549_v52 }
 0x32b   : >>> { %v2552_v48 = vmul.f32 %v9064_v33, %v2549_v52  ;;  %v2553_v13 = vmul.f32 %v9068_v46, %v2549_v52  ;;  %v2554_v3 = vmul.f32 %v9076_v40, %v2549_v52  ;;  %v2555_v24 = vmul.f32 %v9079_v36, %v2549_v52 }
 0x32c   : >>> { %v2556_v18 = vmul.f32 %v9082_v41, %v2549_v52  ;;  %v2557_v16 = vmul.f32 %v9109_v15, %v2549_v52  ;;  %v2533_v53 = vadd.f32 %v2525_v26, %v2483_v62  ;;  %v2534_v54 = vadd.f32 %v2526_v9, %v2484_v19 }
 0x32d   : >>> { %v2535_v0 = vadd.f32 %v2527_v37, %v2485_v61  ;;  %v2558_v58 = vadd.f32 %v2550_v38, %v2509_v51  ;;  %v2559_v50 = vadd.f32 %v2551_v4, %v2510_v20  ;;  %v2560_v29 = vadd.f32 %v2552_v48, %v2511_v14 }
 0x32e   : >>> { %v2561_v2 = vadd.f32 %v2553_v13, %v2512_v43  ;;  %v2562_v5 = vadd.f32 %v2554_v3, %v2513_v44  ;;  %v2563_v34 = vadd.f32 %v2555_v24, %v2514_v55  ;;  %v2564_v1 = vadd.f32 %v2556_v18, %v2515_v8 }
 0x32f   : >>> { %v2565_v35 = vadd.f32 %v2557_v16, %v2516_v59  ;;  %v2568_v39 = vstv %s9094_s4  ;;  %v2598_v21 = vstv %s9100_s10  ;;  %v2617_v31 = vstv %s9103_s12  ;;  %v9163_v16 = vld [vmem:[%s8906_s11 + $0xb0] sm:$0xff]  ;;  %s2842_s4 = sadd.s32 12, %s8889_s18  ;;  %s9223_s10 = sld [smem:[#allocation13 + %s2812_s26]] }
 0x330   : >>> { %v2569_v10 = vmul.f32 %v9058_v27, %v2568_v39  ;;  %v2570_v52 = vmul.f32 %v9061_v63, %v2568_v39  ;;  %v2571_v11 = vmul.f32 %v9064_v33, %v2568_v39  ;;  %v2572_v23 = vmul.f32 %v9068_v46, %v2568_v39  ;;  %s9236_s12 = sld [smem:[#allocation13 + %s2842_s4]] }
 0x331   : >>> { %v2573_v30 = vmul.f32 %v9076_v40, %v2568_v39  ;;  %v2647_v25 = vstv %s9111_s16  ;;  %v2574_v47 = vmul.f32 %v9079_v36, %v2568_v39  ;;  %v2575_v57 = vmul.f32 %v9082_v41, %v2568_v39  ;;  %s2861_s16 = sadd.s32 12, %s8893_s0  ;;  %s9339_s4 = sld [smem:[#allocation13 + %s2990_s19]] }
 0x332   : >>> { %v2576_v22 = vmul.f32 %v9109_v15, %v2568_v39  ;;  %v2577_v27 = vadd.f32 %v2569_v10, %v2528_v7  ;;  %v2578_v62 = vadd.f32 %v2570_v52, %v2529_v60  ;;  %v2579_v19 = vadd.f32 %v2571_v11, %v2530_v32  ;;  %s9278_s1 = sld [smem:[#allocation13 + %s2861_s16]]  ;;  %s3088_s16 = sadd.s32 17, %s8889_s18 }
 0x333   : >>> { %v2580_v61 = vadd.f32 %v2572_v23, %v2531_v56  ;;  %v2581_v51 = vadd.f32 %v2573_v30, %v2532_v17  ;;  %v2599_v20 = vmul.f32 %v9061_v63, %v2598_v21  ;;  %v2600_v14 = vmul.f32 %v9064_v33, %v2598_v21  ;;  %s3205_s19 = sadd.s32 19, %s8893_s0 }
 0x334   : >>> { %v2601_v43 = vmul.f32 %v9068_v46, %v2598_v21  ;;  %v2602_v44 = vmul.f32 %v9076_v40, %v2598_v21  ;;  %v2603_v42 = vmul.f32 %v9079_v36, %v2598_v21  ;;  %v2604_v49 = vmul.f32 %v9082_v41, %v2598_v21 }
 0x335   : >>> { %v2605_v12 = vmul.f32 %v9109_v15, %v2598_v21  ;;  %v2606_v28 = vmul.f32 %v9134_v6, %v2598_v21  ;;  %v2582_v55 = vadd.f32 %v2574_v47, %v2533_v53  ;;  %v2583_v8 = vadd.f32 %v2575_v57, %v2534_v54 }
 0x336   : >>> { %v2584_v59 = vadd.f32 %v2576_v22, %v2535_v0  ;;  %v2607_v45 = vadd.f32 %v2599_v20, %v2558_v58  ;;  %v2608_v26 = vadd.f32 %v2600_v14, %v2559_v50  ;;  %v2609_v9 = vadd.f32 %v2601_v43, %v2560_v29 }
 0x337   : >>> { %v2610_v37 = vadd.f32 %v2602_v44, %v2561_v2  ;;  %v2611_v7 = vadd.f32 %v2603_v42, %v2562_v5  ;;  %v2618_v60 = vmul.f32 %v9061_v63, %v2617_v31  ;;  %v2619_v32 = vmul.f32 %v9064_v33, %v2617_v31 }
 0x338   : >>> { %v2620_v56 = vmul.f32 %v9068_v46, %v2617_v31  ;;  %v2621_v17 = vmul.f32 %v9076_v40, %v2617_v31  ;;  %v2612_v38 = vadd.f32 %v2604_v49, %v2563_v34  ;;  %v2613_v4 = vadd.f32 %v2605_v12, %v2564_v1 }
 0x339   : >>> { %v2614_v48 = vadd.f32 %v2606_v28, %v2565_v35  ;;  %v2622_v13 = vmul.f32 %v9079_v36, %v2617_v31  ;;  %v2623_v3 = vmul.f32 %v9082_v41, %v2617_v31  ;;  %v2624_v24 = vmul.f32 %v9109_v15, %v2617_v31  ;;  %v5737_v28 = vld [vmem:[%s8906_s11 + $0xb8] sm:$0xff] }
 0x33a   : >>> { %v2625_v63 = vmul.f32 %v9134_v6, %v2617_v31  ;;  %v2626_v18 = vadd.f32 %v2618_v60, %v2577_v27  ;;  %v2627_v53 = vadd.f32 %v2619_v32, %v2578_v62  ;;  %v2628_v54 = vadd.f32 %v2620_v56, %v2579_v19 }
 0x33b   : >>> { %v2629_v0 = vadd.f32 %v2621_v17, %v2580_v61  ;;  %v2630_v58 = vadd.f32 %v2622_v13, %v2581_v51  ;;  %v2648_v50 = vmul.f32 %v9064_v33, %v2647_v25  ;;  %v2649_v29 = vmul.f32 %v9068_v46, %v2647_v25 }
 0x33c   : >>> { %v2650_v2 = vmul.f32 %v9076_v40, %v2647_v25  ;;  %v2651_v5 = vmul.f32 %v9079_v36, %v2647_v25  ;;  %v2652_v34 = vmul.f32 %v9082_v41, %v2647_v25  ;;  %v2653_v1 = vmul.f32 %v9109_v15, %v2647_v25 }
 0x33d   : >>> { %v2654_v35 = vmul.f32 %v9134_v6, %v2647_v25  ;;  %v2655_v39 = vmul.f32 %v9163_v16, %v2647_v25  ;;  %v2631_v10 = vadd.f32 %v2623_v3, %v2582_v55  ;;  %v2632_v52 = vadd.f32 %v2624_v24, %v2583_v8 }
 0x33e   : >>> { %v2633_v11 = vadd.f32 %v2625_v63, %v2584_v59  ;;  %v2656_v23 = vadd.f32 %v2648_v50, %v2607_v45  ;;  %v2657_v30 = vadd.f32 %v2649_v29, %v2608_v26  ;;  %v2658_v21 = vadd.f32 %v2650_v2, %v2609_v9  ;;  %v5740_v50 = vld [vmem:[%s8906_s11 + $0xc0] sm:$0xff]  ;;  %v9209_v29 = vld [vmem:[%s8906_s11 + $0xc8] sm:$0xff] }
 0x33f   : >>> { %v2659_v31 = vadd.f32 %v2651_v5, %v2610_v37  ;;  %v2660_v47 = vadd.f32 %v2652_v34, %v2611_v7  ;;  %v2661_v57 = vadd.f32 %v2653_v1, %v2612_v38  ;;  %v2662_v22 = vadd.f32 %v2654_v35, %v2613_v4 }
 0x340   : >>> { %v2663_v27 = vadd.f32 %v2655_v39, %v2614_v48  ;;  %v2666_v62 = vstv %s9147_s22  ;;  %v2696_v14 = vstv %s9154_s24  ;;  %v2715_v43 = vstv %s9157_s25  ;;  %s2940_s22 = sadd.s32 14, %s8889_s18  ;;  %s9288_s24 = sld [smem:[#allocation13 + %s2910_s21]] }
 0x341   : >>> { %v2667_v19 = vmul.f32 %v9064_v33, %v2666_v62  ;;  %v2668_v25 = vmul.f32 %v9068_v46, %v2666_v62  ;;  %v2669_v61 = vmul.f32 %v9076_v40, %v2666_v62  ;;  %v2670_v51 = vmul.f32 %v9079_v36, %v2666_v62  ;;  %s9296_s25 = sld [smem:[#allocation13 + %s2940_s22]] }
 0x342   : >>> { %v2671_v20 = vmul.f32 %v9082_v41, %v2666_v62  ;;  %v9184_v44 = vstv %s9165_s13  ;;  %v2672_v42 = vmul.f32 %v9109_v15, %v2666_v62  ;;  %v2673_v49 = vmul.f32 %v9134_v6, %v2666_v62  ;;  %s2959_s13 = sadd.s32 14, %s8893_s0  ;;  %s9406_s22 = sld [smem:[#allocation13 + %s3088_s16]] }
 0x343   : >>> { %v2674_v12 = vmul.f32 %v9163_v16, %v2666_v62  ;;  %v2675_v33 = vadd.f32 %v2667_v19, %v2626_v18  ;;  %v2676_v55 = vadd.f32 %v2668_v25, %v2627_v53  ;;  %v2677_v8 = vadd.f32 %v2669_v61, %v2628_v54  ;;  %s9332_s26 = sld [smem:[#allocation13 + %s2959_s13]]  ;;  %s3186_s13 = sadd.s32 19, %s8889_s18 }
 0x344   : >>> { %v2678_v59 = vadd.f32 %v2670_v51, %v2629_v0  ;;  %v2679_v45 = vadd.f32 %v2671_v20, %v2630_v58  ;;  %v2697_v26 = vmul.f32 %v9068_v46, %v2696_v14  ;;  %v2698_v9 = vmul.f32 %v9076_v40, %v2696_v14  ;;  %s3304_s16 = sadd.s32 21, %s8893_s0 }
 0x345   : >>> { %v2699_v37 = vmul.f32 %v9079_v36, %v2696_v14  ;;  %v2700_v7 = vmul.f32 %v9082_v41, %v2696_v14  ;;  %v2701_v60 = vmul.f32 %v9109_v15, %v2696_v14  ;;  %v2702_v32 = vmul.f32 %v9134_v6, %v2696_v14 }
 0x346   : >>> { %v2703_v56 = vmul.f32 %v9163_v16, %v2696_v14  ;;  %v2704_v17 = vmul.f32 %v5737_v28, %v2696_v14  ;;  %v2680_v38 = vadd.f32 %v2672_v42, %v2631_v10  ;;  %v2681_v4 = vadd.f32 %v2673_v49, %v2632_v52  ;;  %v9228_v52 = vld [vmem:[%s8906_s11 + $0xe8] sm:$0xff] }
 0x347   : >>> { %v2682_v48 = vadd.f32 %v2674_v12, %v2633_v11  ;;  %v2705_v13 = vadd.f32 %v2697_v26, %v2656_v23  ;;  %v2706_v3 = vadd.f32 %v2698_v9, %v2657_v30  ;;  %v2707_v24 = vadd.f32 %v2699_v37, %v2658_v21  ;;  %v9231_v11 = vld [vmem:[%s8906_s11 + $0xf0] sm:$0xff]  ;;  %v9234_v23 = vld [vmem:[%s8906_s11 + $0xf8] sm:$0xff] }
 0x348   : >>> { %v2708_v63 = vadd.f32 %v2700_v7, %v2659_v31  ;;  %v2709_v18 = vadd.f32 %v2701_v60, %v2660_v47  ;;  %v2716_v53 = vmul.f32 %v9068_v46, %v2715_v43  ;;  %v2717_v54 = vmul.f32 %v9076_v40, %v2715_v43  ;;  %v9215_v46 = vld [vmem:[%s8906_s11 + $0xd0] sm:$0xff]  ;;  %v9218_v40 = vld [vmem:[%s8906_s11 + $0xd8] sm:$0xff] }
 0x349   : >>> { %v2718_v0 = vmul.f32 %v9079_v36, %v2715_v43  ;;  %v2719_v58 = vmul.f32 %v9082_v41, %v2715_v43  ;;  %v2710_v2 = vadd.f32 %v2702_v32, %v2661_v57  ;;  %v2711_v5 = vadd.f32 %v2703_v56, %v2662_v22  ;;  %v9221_v36 = vld [vmem:[%s8906_s11 + $0xe0] sm:$0xff] }
 0x34a   : >>> { %v2712_v34 = vadd.f32 %v2704_v17, %v2663_v27  ;;  %v2720_v1 = vmul.f32 %v9109_v15, %v2715_v43  ;;  %v2721_v41 = vmul.f32 %v9134_v6, %v2715_v43  ;;  %v2722_v35 = vmul.f32 %v9163_v16, %v2715_v43 }
 0x34b   : >>> { %v2723_v39 = vmul.f32 %v5737_v28, %v2715_v43  ;;  %v2724_v10 = vadd.f32 %v2716_v53, %v2675_v33  ;;  %v2725_v15 = vadd.f32 %v2717_v54, %v2676_v55  ;;  %v2726_v30 = vadd.f32 %v2718_v0, %v2677_v8 }
 0x34c   : >>> { %v2727_v21 = vadd.f32 %v2719_v58, %v2678_v59  ;;  %v2728_v31 = vadd.f32 %v2720_v1, %v2679_v45  ;;  %v2747_v47 = vmul.f32 %v5740_v50, %v9184_v44  ;;  %v2748_v6 = vmul.f32 %v9209_v29, %v9184_v44 }
 0x34d   : >>> { %v2749_v16 = vmul.f32 %v9215_v46, %v9184_v44  ;;  %v2750_v57 = vmul.f32 %v9218_v40, %v9184_v44  ;;  %v2751_v22 = vmul.f32 %v9221_v36, %v9184_v44  ;;  %v2752_v27 = vmul.f32 %v9228_v52, %v9184_v44 }
 0x34e   : >>> { %v2753_v62 = vmul.f32 %v9231_v11, %v9184_v44  ;;  %v2754_v19 = vmul.f32 %v9234_v23, %v9184_v44  ;;  %v2729_v25 = vadd.f32 %v2721_v41, %v2680_v38  ;;  %v2730_v61 = vadd.f32 %v2722_v35, %v2681_v4  ;;  %v9265_v38 = vld [vmem:[%s8906_s11 + $0x100] sm:$0xff] }
 0x34f   : >>> { %v2731_v51 = vadd.f32 %v2723_v39, %v2682_v48  ;;  %v2755_v20 = vadd.f32 %v2747_v47, %v2705_v13  ;;  %v2756_v14 = vadd.f32 %v2748_v6, %v2706_v3  ;;  %v2757_v43 = vadd.f32 %v2749_v16, %v2707_v24 }
 0x350   : >>> { %v2758_v42 = vadd.f32 %v2750_v57, %v2708_v63  ;;  %v2759_v49 = vadd.f32 %v2751_v22, %v2709_v18  ;;  %v2760_v12 = vadd.f32 %v2752_v27, %v2710_v2  ;;  %v2761_v33 = vadd.f32 %v2753_v62, %v2711_v5 }
 0x351   : >>> { %v2762_v28 = vadd.f32 %v2754_v19, %v2712_v34  ;;  %v2765_v55 = vstv %s9200_s27  ;;  %v2795_v9 = vstv %s9211_s28  ;;  %v2814_v37 = vstv %s9223_s10  ;;  %v9294_v19 = vld [vmem:[%s8906_s11 + $0x108] sm:$0xff]  ;;  %s3039_s27 = sadd.s32 16, %s8889_s18  ;;  %s9342_s28 = sld [smem:[#allocation13 + %s3009_s3]] }
 0x352   : >>> { %v2766_v8 = vmul.f32 %v5740_v50, %v2765_v55  ;;  %v2767_v59 = vmul.f32 %v9209_v29, %v2765_v55  ;;  %v2768_v44 = vmul.f32 %v9215_v46, %v2765_v55  ;;  %v2769_v45 = vmul.f32 %v9218_v40, %v2765_v55  ;;  %s9348_s10 = sld [smem:[#allocation13 + %s3039_s27]] }
 0x353   : >>> { %v2770_v26 = vmul.f32 %v9221_v36, %v2765_v55  ;;  %v2844_v7 = vstv %s9236_s12  ;;  %v2771_v60 = vmul.f32 %v9228_v52, %v2765_v55  ;;  %v2772_v32 = vmul.f32 %v9231_v11, %v2765_v55  ;;  %s3058_s12 = sadd.s32 16, %s8893_s0  ;;  %s9460_s27 = sld [smem:[#allocation13 + %s3186_s13]] }
 0x354   : >>> { %v2773_v56 = vmul.f32 %v9234_v23, %v2765_v55  ;;  %v2774_v17 = vadd.f32 %v2766_v8, %v2724_v10  ;;  %v2775_v4 = vadd.f32 %v2767_v59, %v2725_v15  ;;  %v2776_v48 = vadd.f32 %v2768_v44, %v2726_v30  ;;  %s9400_s21 = sld [smem:[#allocation13 + %s3058_s12]]  ;;  %s3285_s12 = sadd.s32 21, %s8889_s18 }
 0x355   : >>> { %v2777_v13 = vadd.f32 %v2769_v45, %v2727_v21  ;;  %v2778_v3 = vadd.f32 %v2770_v26, %v2728_v31  ;;  %v2796_v24 = vmul.f32 %v9209_v29, %v2795_v9  ;;  %v2797_v63 = vmul.f32 %v9215_v46, %v2795_v9  ;;  %s3402_s13 = sadd.s32 23, %s8893_s0 }
 0x356   : >>> { %v2798_v18 = vmul.f32 %v9218_v40, %v2795_v9  ;;  %v2799_v53 = vmul.f32 %v9221_v36, %v2795_v9  ;;  %v2800_v54 = vmul.f32 %v9228_v52, %v2795_v9  ;;  %v2801_v0 = vmul.f32 %v9231_v11, %v2795_v9 }
 0x357   : >>> { %v2802_v58 = vmul.f32 %v9234_v23, %v2795_v9  ;;  %v2803_v50 = vmul.f32 %v9265_v38, %v2795_v9  ;;  %v2779_v2 = vadd.f32 %v2771_v60, %v2729_v25  ;;  %v2780_v5 = vadd.f32 %v2772_v32, %v2730_v61 }
 0x358   : >>> { %v2781_v34 = vadd.f32 %v2773_v56, %v2731_v51  ;;  %v2804_v1 = vadd.f32 %v2796_v24, %v2755_v20  ;;  %v2805_v41 = vadd.f32 %v2797_v63, %v2756_v14  ;;  %v2806_v35 = vadd.f32 %v2798_v18, %v2757_v43 }
 0x359   : >>> { %v2807_v39 = vadd.f32 %v2799_v53, %v2758_v42  ;;  %v2808_v10 = vadd.f32 %v2800_v54, %v2759_v49  ;;  %v2815_v15 = vmul.f32 %v9209_v29, %v2814_v37  ;;  %v2816_v30 = vmul.f32 %v9215_v46, %v2814_v37 }
 0x35a   : >>> { %v2817_v21 = vmul.f32 %v9218_v40, %v2814_v37  ;;  %v2818_v31 = vmul.f32 %v9221_v36, %v2814_v37  ;;  %v2809_v47 = vadd.f32 %v2801_v0, %v2760_v12  ;;  %v2810_v6 = vadd.f32 %v2802_v58, %v2761_v33 }
 0x35b   : >>> { %v2811_v16 = vadd.f32 %v2803_v50, %v2762_v28  ;;  %v2819_v57 = vmul.f32 %v9228_v52, %v2814_v37  ;;  %v2820_v22 = vmul.f32 %v9231_v11, %v2814_v37  ;;  %v2821_v27 = vmul.f32 %v9234_v23, %v2814_v37  ;;  %v9319_v50 = vld [vmem:[%s8906_s11 + $0x110] sm:$0xff] }
 0x35c   : >>> { %v2822_v29 = vmul.f32 %v9265_v38, %v2814_v37  ;;  %v2823_v62 = vadd.f32 %v2815_v15, %v2774_v17  ;;  %v2824_v25 = vadd.f32 %v2816_v30, %v2775_v4  ;;  %v2825_v61 = vadd.f32 %v2817_v21, %v2776_v48 }
 0x35d   : >>> { %v2826_v51 = vadd.f32 %v2818_v31, %v2777_v13  ;;  %v2827_v20 = vadd.f32 %v2819_v57, %v2778_v3  ;;  %v2845_v14 = vmul.f32 %v9215_v46, %v2844_v7  ;;  %v2846_v43 = vmul.f32 %v9218_v40, %v2844_v7 }
 0x35e   : >>> { %v2847_v42 = vmul.f32 %v9221_v36, %v2844_v7  ;;  %v2848_v49 = vmul.f32 %v9228_v52, %v2844_v7  ;;  %v2849_v12 = vmul.f32 %v9231_v11, %v2844_v7  ;;  %v2850_v33 = vmul.f32 %v9234_v23, %v2844_v7 }
 0x35f   : >>> { %v2851_v28 = vmul.f32 %v9265_v38, %v2844_v7  ;;  %v2852_v55 = vmul.f32 %v9294_v19, %v2844_v7  ;;  %v2828_v8 = vadd.f32 %v2820_v22, %v2779_v2  ;;  %v2829_v59 = vadd.f32 %v2821_v27, %v2780_v5 }
 0x360   : >>> { %v2830_v44 = vadd.f32 %v2822_v29, %v2781_v34  ;;  %v2853_v45 = vadd.f32 %v2845_v14, %v2804_v1  ;;  %v2854_v26 = vadd.f32 %v2846_v43, %v2805_v41  ;;  %v2855_v9 = vadd.f32 %v2847_v42, %v2806_v35 }
 0x361   : >>> { %v2856_v37 = vadd.f32 %v2848_v49, %v2807_v39  ;;  %v2857_v60 = vadd.f32 %v2849_v12, %v2808_v10  ;;  %v2858_v32 = vadd.f32 %v2850_v33, %v2809_v47  ;;  %v2859_v56 = vadd.f32 %v2851_v28, %v2810_v6 }
 0x362   : >>> { %v2860_v17 = vadd.f32 %v2852_v55, %v2811_v16  ;;  %v2863_v4 = vstv %s9278_s1  ;;  %v2893_v63 = vstv %s9285_s23  ;;  %v2912_v18 = vstv %s9288_s24  ;;  %v5787_v55 = vld [vmem:[%s8906_s11 + $0x118] sm:$0xff]  ;;  %s3137_s1 = sadd.s32 18, %s8889_s18  ;;  %s9409_s23 = sld [smem:[#allocation13 + %s3107_s20]] }
 0x363   : >>> { %v2864_v48 = vmul.f32 %v9215_v46, %v2863_v4  ;;  %v2865_v7 = vmul.f32 %v9218_v40, %v2863_v4  ;;  %v2866_v13 = vmul.f32 %v9221_v36, %v2863_v4  ;;  %v2867_v3 = vmul.f32 %v9228_v52, %v2863_v4  ;;  %s9417_s24 = sld [smem:[#allocation13 + %s3137_s1]] }
 0x364   : >>> { %v2868_v24 = vmul.f32 %v9231_v11, %v2863_v4  ;;  %v2942_v53 = vstv %s9296_s25  ;;  %v2869_v54 = vmul.f32 %v9234_v23, %v2863_v4  ;;  %v2870_v0 = vmul.f32 %v9265_v38, %v2863_v4  ;;  %s3156_s25 = sadd.s32 18, %s8893_s0  ;;  %s9517_s1 = sld [smem:[#allocation13 + %s3285_s12]] }
 0x365   : >>> { %v2871_v58 = vmul.f32 %v9294_v19, %v2863_v4  ;;  %v2872_v46 = vadd.f32 %v2864_v48, %v2823_v62  ;;  %v2873_v2 = vadd.f32 %v2865_v7, %v2824_v25  ;;  %v2874_v5 = vadd.f32 %v2866_v13, %v2825_v61  ;;  %s9453_s3 = sld [smem:[#allocation13 + %s3156_s25]]  ;;  %s3383_s25 = sadd.s32 23, %s8889_s18 }
 0x366   : >>> { %v2875_v34 = vadd.f32 %v2867_v3, %v2826_v51  ;;  %v2876_v1 = vadd.f32 %v2868_v24, %v2827_v20  ;;  %v2894_v41 = vmul.f32 %v9218_v40, %v2893_v63  ;;  %v2895_v35 = vmul.f32 %v9221_v36, %v2893_v63 }
 0x367   : >>> { %v2896_v39 = vmul.f32 %v9228_v52, %v2893_v63  ;;  %v2897_v10 = vmul.f32 %v9231_v11, %v2893_v63  ;;  %v2898_v15 = vmul.f32 %v9234_v23, %v2893_v63  ;;  %v2899_v30 = vmul.f32 %v9265_v38, %v2893_v63 }
 0x368   : >>> { %v2900_v21 = vmul.f32 %v9294_v19, %v2893_v63  ;;  %v2901_v31 = vmul.f32 %v9319_v50, %v2893_v63  ;;  %v2877_v47 = vadd.f32 %v2869_v54, %v2828_v8  ;;  %v2878_v6 = vadd.f32 %v2870_v0, %v2829_v59 }
 0x369   : >>> { %v2879_v16 = vadd.f32 %v2871_v58, %v2830_v44  ;;  %v2902_v57 = vadd.f32 %v2894_v41, %v2853_v45  ;;  %v2903_v22 = vadd.f32 %v2895_v35, %v2854_v26  ;;  %v2904_v27 = vadd.f32 %v2896_v39, %v2855_v9  ;;  %v9364_v35 = vld [vmem:[%s8906_s11 + $0x128] sm:$0xff]  ;;  %v9367_v39 = vld [vmem:[%s8906_s11 + $0x130] sm:$0xff] }
 0x36a   : >>> { %v2905_v29 = vadd.f32 %v2897_v10, %v2856_v37  ;;  %v2906_v62 = vadd.f32 %v2898_v15, %v2857_v60  ;;  %v2913_v25 = vmul.f32 %v9218_v40, %v2912_v18  ;;  %v2914_v61 = vmul.f32 %v9221_v36, %v2912_v18  ;;  %v9370_v10 = vld [vmem:[%s8906_s11 + $0x138] sm:$0xff] }
 0x36b   : >>> { %v2915_v51 = vmul.f32 %v9228_v52, %v2912_v18  ;;  %v2916_v20 = vmul.f32 %v9231_v11, %v2912_v18  ;;  %v2907_v14 = vadd.f32 %v2899_v30, %v2858_v32  ;;  %v2908_v43 = vadd.f32 %v2900_v21, %v2859_v56  ;;  %v9374_v30 = vld [vmem:[%s8906_s11 + $0x140] sm:$0xff] }
 0x36c   : >>> { %v2909_v42 = vadd.f32 %v2901_v31, %v2860_v17  ;;  %v2917_v49 = vmul.f32 %v9234_v23, %v2912_v18  ;;  %v2918_v12 = vmul.f32 %v9265_v38, %v2912_v18  ;;  %v2919_v33 = vmul.f32 %v9294_v19, %v2912_v18 }
 0x36d   : >>> { %v2920_v40 = vmul.f32 %v9319_v50, %v2912_v18  ;;  %v2921_v28 = vadd.f32 %v2913_v25, %v2872_v46  ;;  %v2922_v8 = vadd.f32 %v2914_v61, %v2873_v2  ;;  %v2923_v59 = vadd.f32 %v2915_v51, %v2874_v5 }
 0x36e   : >>> { %v2924_v44 = vadd.f32 %v2916_v20, %v2875_v34  ;;  %v2925_v45 = vadd.f32 %v2917_v49, %v2876_v1  ;;  %v2943_v26 = vmul.f32 %v9221_v36, %v2942_v53  ;;  %v2944_v9 = vmul.f32 %v9228_v52, %v2942_v53 }
 0x36f   : >>> { %v2945_v37 = vmul.f32 %v9231_v11, %v2942_v53  ;;  %v2946_v60 = vmul.f32 %v9234_v23, %v2942_v53  ;;  %v2947_v32 = vmul.f32 %v9265_v38, %v2942_v53  ;;  %v2948_v56 = vmul.f32 %v9294_v19, %v2942_v53 }
 0x370   : >>> { %v2949_v17 = vmul.f32 %v9319_v50, %v2942_v53  ;;  %v2950_v4 = vmul.f32 %v5787_v55, %v2942_v53  ;;  %v2926_v48 = vadd.f32 %v2918_v12, %v2877_v47  ;;  %v2927_v7 = vadd.f32 %v2919_v33, %v2878_v6  ;;  %v5790_v53 = vld [vmem:[%s8906_s11 + $0x120] sm:$0xff]  ;;  %v9382_v6 = vld [vmem:[%s8906_s11 + $0x148] sm:$0xff] }
 0x371   : >>> { %v2928_v13 = vadd.f32 %v2920_v40, %v2879_v16  ;;  %v2951_v3 = vadd.f32 %v2943_v26, %v2902_v57  ;;  %v2952_v24 = vadd.f32 %v2944_v9, %v2903_v22  ;;  %v2953_v63 = vadd.f32 %v2945_v37, %v2904_v27  ;;  %v9385_v16 = vld [vmem:[%s8906_s11 + $0x150] sm:$0xff]  ;;  %v9388_v57 = vld [vmem:[%s8906_s11 + $0x158] sm:$0xff] }
 0x372   : >>> { %v2954_v18 = vadd.f32 %v2946_v60, %v2905_v29  ;;  %v2955_v54 = vadd.f32 %v2947_v32, %v2906_v62  ;;  %v2956_v0 = vadd.f32 %v2948_v56, %v2907_v14  ;;  %v2957_v58 = vadd.f32 %v2949_v17, %v2908_v43 }
 0x373   : >>> { %v2958_v46 = vadd.f32 %v2950_v4, %v2909_v42  ;;  %v2961_v2 = vstv %s9332_s26  ;;  %v3011_v21 = vstv %s9342_s28  ;;  %v3041_v31 = vstv %s9348_s10  ;;  %s3236_s26 = sadd.s32 20, %s8889_s18  ;;  %s3255_s10 = sadd.s32 20, %s8893_s0 }
 0x374   : >>> { %v2962_v5 = vmul.f32 %v9221_v36, %v2961_v2  ;;  %v2963_v34 = vmul.f32 %v9228_v52, %v2961_v2  ;;  %v2964_v1 = vmul.f32 %v9231_v11, %v2961_v2  ;;  %v2965_v41 = vmul.f32 %v9234_v23, %v2961_v2  ;;  %s9471_s28 = sld [smem:[#allocation13 + %s3236_s26]] }
 0x375   : >>> { %v2966_v15 = vmul.f32 %v9265_v38, %v2961_v2  ;;  %v2992_v36 = vstv %s9339_s4  ;;  %v2967_v52 = vmul.f32 %v9294_v19, %v2961_v2  ;;  %v2968_v11 = vmul.f32 %v9319_v50, %v2961_v2  ;;  %s9463_s4 = sld [smem:[#allocation13 + %s3205_s19]] }
 0x376   : >>> { %v2969_v47 = vmul.f32 %v5787_v55, %v2961_v2  ;;  %v2970_v23 = vadd.f32 %v2962_v5, %v2921_v28  ;;  %v2971_v38 = vadd.f32 %v2963_v34, %v2922_v8  ;;  %v2972_v22 = vadd.f32 %v2964_v1, %v2923_v59  ;;  %s9506_s20 = sld [smem:[#allocation13 + %s3255_s10]] }
 0x377   : >>> { %v2973_v27 = vadd.f32 %v2965_v41, %v2924_v44  ;;  %v2974_v29 = vadd.f32 %v2966_v15, %v2925_v45  ;;  %v2993_v62 = vmul.f32 %v5790_v53, %v2992_v36  ;;  %v2994_v25 = vmul.f32 %v9364_v35, %v2992_v36  ;;  %s9591_s26 = sld [smem:[#allocation13 + %s3383_s25]] }
 0x378   : >>> { %v2995_v19 = vmul.f32 %v9367_v39, %v2992_v36  ;;  %v2996_v50 = vmul.f32 %v9370_v10, %v2992_v36  ;;  %v2997_v61 = vmul.f32 %v9374_v30, %v2992_v36  ;;  %v2998_v51 = vmul.f32 %v9382_v6, %v2992_v36 }
 0x379   : >>> { %v2999_v20 = vmul.f32 %v9385_v16, %v2992_v36  ;;  %v3000_v14 = vmul.f32 %v9388_v57, %v2992_v36  ;;  %v2975_v43 = vadd.f32 %v2967_v52, %v2926_v48  ;;  %v2976_v42 = vadd.f32 %v2968_v11, %v2927_v7  ;;  %v9415_v48 = vld [vmem:[%s8906_s11 + $0x160] sm:$0xff] }
 0x37a   : >>> { %v2977_v49 = vadd.f32 %v2969_v47, %v2928_v13  ;;  %v3001_v12 = vadd.f32 %v2993_v62, %v2951_v3  ;;  %v3002_v33 = vadd.f32 %v2994_v25, %v2952_v24  ;;  %v3003_v40 = vadd.f32 %v2995_v19, %v2953_v63 }
 0x37b   : >>> { %v3004_v28 = vadd.f32 %v2996_v50, %v2954_v18  ;;  %v3005_v55 = vadd.f32 %v2997_v61, %v2955_v54  ;;  %v3012_v8 = vmul.f32 %v5790_v53, %v3011_v21  ;;  %v3013_v59 = vmul.f32 %v9364_v35, %v3011_v21 }
 0x37c   : >>> { %v3014_v44 = vmul.f32 %v9367_v39, %v3011_v21  ;;  %v3015_v45 = vmul.f32 %v9370_v10, %v3011_v21  ;;  %v3006_v26 = vadd.f32 %v2998_v51, %v2956_v0  ;;  %v3007_v9 = vadd.f32 %v2999_v20, %v2957_v58 }
 0x37d   : >>> { %v3008_v37 = vadd.f32 %v3000_v14, %v2958_v46  ;;  %v3016_v60 = vmul.f32 %v9374_v30, %v3011_v21  ;;  %v3017_v32 = vmul.f32 %v9382_v6, %v3011_v21  ;;  %v3018_v56 = vmul.f32 %v9385_v16, %v3011_v21  ;;  %v9440_v14 = vld [vmem:[%s8906_s11 + $0x168] sm:$0xff] }
 0x37e   : >>> { %v3019_v17 = vmul.f32 %v9388_v57, %v3011_v21  ;;  %v3020_v4 = vadd.f32 %v3012_v8, %v2970_v23  ;;  %v3021_v7 = vadd.f32 %v3013_v59, %v2971_v38  ;;  %v3022_v13 = vadd.f32 %v3014_v44, %v2972_v22 }
 0x37f   : >>> { %v3023_v3 = vadd.f32 %v3015_v45, %v2973_v27  ;;  %v3024_v24 = vadd.f32 %v3016_v60, %v2974_v29  ;;  %v3042_v63 = vmul.f32 %v9364_v35, %v3041_v31  ;;  %v3043_v18 = vmul.f32 %v9367_v39, %v3041_v31 }
 0x380   : >>> { %v3044_v54 = vmul.f32 %v9370_v10, %v3041_v31  ;;  %v3045_v0 = vmul.f32 %v9374_v30, %v3041_v31  ;;  %v3046_v58 = vmul.f32 %v9382_v6, %v3041_v31  ;;  %v3047_v46 = vmul.f32 %v9385_v16, %v3041_v31 }
 0x381   : >>> { %v3048_v2 = vmul.f32 %v9388_v57, %v3041_v31  ;;  %v3049_v53 = vmul.f32 %v9415_v48, %v3041_v31  ;;  %v3025_v5 = vadd.f32 %v3017_v32, %v2975_v43  ;;  %v3026_v34 = vadd.f32 %v3018_v56, %v2976_v42 }
 0x382   : >>> { %v3027_v1 = vadd.f32 %v3019_v17, %v2977_v49  ;;  %v3050_v41 = vadd.f32 %v3042_v63, %v3001_v12  ;;  %v3051_v15 = vadd.f32 %v3043_v18, %v3002_v33  ;;  %v3052_v36 = vadd.f32 %v3044_v54, %v3003_v40 }
 0x383   : >>> { %v3053_v21 = vadd.f32 %v3045_v0, %v3004_v28  ;;  %v3054_v52 = vadd.f32 %v3046_v58, %v3005_v55  ;;  %v3055_v11 = vadd.f32 %v3047_v46, %v3006_v26  ;;  %v3056_v47 = vadd.f32 %v3048_v2, %v3007_v9 }
 0x384   : >>> { %v3057_v23 = vadd.f32 %v3049_v53, %v3008_v37  ;;  %v3060_v38 = vstv %s9400_s21  ;;  %v3090_v25 = vstv %s9406_s22  ;;  %v3109_v19 = vstv %s9409_s23  ;;  %v9469_v53 = vld [vmem:[%s8906_s11 + $0x170] sm:$0xff]  ;;  %s3334_s21 = sadd.s32 22, %s8889_s18  ;;  %s9529_s22 = sld [smem:[#allocation13 + %s3304_s16]] }
 0x385   : >>> { %v3061_v22 = vmul.f32 %v9364_v35, %v3060_v38  ;;  %v3062_v31 = vmul.f32 %v9367_v39, %v3060_v38  ;;  %v3063_v27 = vmul.f32 %v9370_v10, %v3060_v38  ;;  %v3064_v29 = vmul.f32 %v9374_v30, %v3060_v38  ;;  %s9542_s23 = sld [smem:[#allocation13 + %s3334_s21]] }
 0x386   : >>> { %v3065_v62 = vmul.f32 %v9382_v6, %v3060_v38  ;;  %v3139_v50 = vstv %s9417_s24  ;;  %v3066_v61 = vmul.f32 %v9385_v16, %v3060_v38  ;;  %v3067_v51 = vmul.f32 %v9388_v57, %v3060_v38  ;;  %s3353_s24 = sadd.s32 22, %s8893_s0 }
 0x387   : >>> { %v3068_v20 = vmul.f32 %v9415_v48, %v3060_v38  ;;  %v3069_v35 = vadd.f32 %v3061_v22, %v3020_v4  ;;  %v3070_v43 = vadd.f32 %v3062_v31, %v3021_v7  ;;  %v3071_v42 = vadd.f32 %v3063_v27, %v3022_v13  ;;  %s9584_s19 = sld [smem:[#allocation13 + %s3353_s24]] }
 0x388   : >>> { %v3072_v49 = vadd.f32 %v3064_v29, %v3023_v3  ;;  %v3073_v12 = vadd.f32 %v3065_v62, %v3024_v24  ;;  %v3091_v33 = vmul.f32 %v9367_v39, %v3090_v25  ;;  %v3092_v40 = vmul.f32 %v9370_v10, %v3090_v25 }
 0x389   : >>> { %v3093_v28 = vmul.f32 %v9374_v30, %v3090_v25  ;;  %v3094_v55 = vmul.f32 %v9382_v6, %v3090_v25  ;;  %v3095_v8 = vmul.f32 %v9385_v16, %v3090_v25  ;;  %v3096_v59 = vmul.f32 %v9388_v57, %v3090_v25 }
 0x38a   : >>> { %v3097_v44 = vmul.f32 %v9415_v48, %v3090_v25  ;;  %v3098_v45 = vmul.f32 %v9440_v14, %v3090_v25  ;;  %v3074_v26 = vadd.f32 %v3066_v61, %v3025_v5  ;;  %v3075_v9 = vadd.f32 %v3067_v51, %v3026_v34 }
 0x38b   : >>> { %v3076_v37 = vadd.f32 %v3068_v20, %v3027_v1  ;;  %v3099_v60 = vadd.f32 %v3091_v33, %v3050_v41  ;;  %v3100_v32 = vadd.f32 %v3092_v40, %v3051_v15  ;;  %v3101_v56 = vadd.f32 %v3093_v28, %v3052_v36 }
 0x38c   : >>> { %v3102_v17 = vadd.f32 %v3094_v55, %v3053_v21  ;;  %v3103_v4 = vadd.f32 %v3095_v8, %v3054_v52  ;;  %v3110_v7 = vmul.f32 %v9367_v39, %v3109_v19  ;;  %v3111_v13 = vmul.f32 %v9370_v10, %v3109_v19 }
 0x38d   : >>> { %v3112_v3 = vmul.f32 %v9374_v30, %v3109_v19  ;;  %v3113_v24 = vmul.f32 %v9382_v6, %v3109_v19  ;;  %v3104_v63 = vadd.f32 %v3096_v59, %v3055_v11  ;;  %v3105_v18 = vadd.f32 %v3097_v44, %v3056_v47 }
 0x38e   : >>> { %v3106_v54 = vadd.f32 %v3098_v45, %v3057_v23  ;;  %v3114_v0 = vmul.f32 %v9385_v16, %v3109_v19  ;;  %v3115_v58 = vmul.f32 %v9388_v57, %v3109_v19  ;;  %v3116_v46 = vmul.f32 %v9415_v48, %v3109_v19  ;;  %v5837_v45 = vld [vmem:[%s8906_s11 + $0x178] sm:$0xff] }
 0x38f   : >>> { %v3117_v39 = vmul.f32 %v9440_v14, %v3109_v19  ;;  %v3118_v2 = vadd.f32 %v3110_v7, %v3069_v35  ;;  %v3119_v5 = vadd.f32 %v3111_v13, %v3070_v43  ;;  %v3120_v34 = vadd.f32 %v3112_v3, %v3071_v42 }
 0x390   : >>> { %v3121_v1 = vadd.f32 %v3113_v24, %v3072_v49  ;;  %v3122_v41 = vadd.f32 %v3114_v0, %v3073_v12  ;;  %v3140_v15 = vmul.f32 %v9370_v10, %v3139_v50  ;;  %v3141_v36 = vmul.f32 %v9374_v30, %v3139_v50 }
 0x391   : >>> { %v3142_v21 = vmul.f32 %v9382_v6, %v3139_v50  ;;  %v3143_v52 = vmul.f32 %v9385_v16, %v3139_v50  ;;  %v3144_v11 = vmul.f32 %v9388_v57, %v3139_v50  ;;  %v3145_v47 = vmul.f32 %v9415_v48, %v3139_v50 }
 0x392   : >>> { %v3146_v23 = vmul.f32 %v9440_v14, %v3139_v50  ;;  %v3147_v38 = vmul.f32 %v9469_v53, %v3139_v50  ;;  %v3123_v22 = vadd.f32 %v3115_v58, %v3074_v26  ;;  %v3124_v31 = vadd.f32 %v3116_v46, %v3075_v9 }
 0x393   : >>> { %v3125_v27 = vadd.f32 %v3117_v39, %v3076_v37  ;;  %v3148_v29 = vadd.f32 %v3140_v15, %v3099_v60  ;;  %v3149_v62 = vadd.f32 %v3141_v36, %v3100_v32  ;;  %v3150_v25 = vadd.f32 %v3142_v21, %v3101_v56  ;;  %v5840_v15 = vld [vmem:[%s8906_s11 + $0x180] sm:$0xff]  ;;  %v9515_v36 = vld [vmem:[%s8906_s11 + $0x188] sm:$0xff] }
 0x394   : >>> { %v3151_v19 = vadd.f32 %v3143_v52, %v3102_v17  ;;  %v3152_v61 = vadd.f32 %v3144_v11, %v3103_v4  ;;  %v3153_v51 = vadd.f32 %v3145_v47, %v3104_v63  ;;  %v3154_v20 = vadd.f32 %v3146_v23, %v3105_v18 }
 0x395   : >>> { %v3155_v35 = vadd.f32 %v3147_v38, %v3106_v54  ;;  %v3158_v43 = vstv %s9453_s3  ;;  %v3188_v40 = vstv %s9460_s27  ;;  %v3207_v28 = vstv %s9463_s4  ;;  %s3432_s3 = sadd.s32 24, %s8889_s18  ;;  %s9594_s27 = sld [smem:[#allocation13 + %s3402_s13]] }
 0x396   : >>> { %v3159_v42 = vmul.f32 %v9370_v10, %v3158_v43  ;;  %v3160_v50 = vmul.f32 %v9374_v30, %v3158_v43  ;;  %v3161_v49 = vmul.f32 %v9382_v6, %v3158_v43  ;;  %v3162_v12 = vmul.f32 %v9385_v16, %v3158_v43  ;;  %s9602_s18 = sld [smem:[#allocation13 + %s3432_s3]]  ;;  %s3451_s4 = sadd.s32 24, %s8893_s0 }
 0x397   : >>> { %v3163_v33 = vmul.f32 %v9388_v57, %v3158_v43  ;;  %v9490_v55 = vstv %s9471_s28  ;;  %v3164_v8 = vmul.f32 %v9415_v48, %v3158_v43  ;;  %v3165_v59 = vmul.f32 %v9440_v14, %v3158_v43  ;;  %s9640_s28 = sld [smem:[#allocation13 + %s3451_s4]] }
 0x398   : >>> { %v3166_v44 = vmul.f32 %v9469_v53, %v3158_v43  ;;  %v3167_v10 = vadd.f32 %v3159_v42, %v3118_v2  ;;  %v3168_v26 = vadd.f32 %v3160_v50, %v3119_v5  ;;  %v3169_v9 = vadd.f32 %v3161_v49, %v3120_v34 }
 0x399   : >>> { %v3170_v37 = vadd.f32 %v3162_v12, %v3121_v1  ;;  %v3171_v60 = vadd.f32 %v3163_v33, %v3122_v41  ;;  %v3189_v32 = vmul.f32 %v9374_v30, %v3188_v40  ;;  %v3190_v56 = vmul.f32 %v9382_v6, %v3188_v40 }
 0x39a   : >>> { %v3191_v17 = vmul.f32 %v9385_v16, %v3188_v40  ;;  %v3192_v4 = vmul.f32 %v9388_v57, %v3188_v40  ;;  %v3193_v7 = vmul.f32 %v9415_v48, %v3188_v40  ;;  %v3194_v13 = vmul.f32 %v9440_v14, %v3188_v40 }
 0x39b   : >>> { %v3195_v3 = vmul.f32 %v9469_v53, %v3188_v40  ;;  %v3196_v24 = vmul.f32 %v5837_v45, %v3188_v40  ;;  %v3172_v63 = vadd.f32 %v3164_v8, %v3123_v22  ;;  %v3173_v18 = vadd.f32 %v3165_v59, %v3124_v31  ;;  %v9534_v31 = vld [vmem:[%s8906_s11 + $0x1a8] sm:$0xff] }
 0x39c   : >>> { %v3174_v54 = vadd.f32 %v3166_v44, %v3125_v27  ;;  %v3197_v0 = vadd.f32 %v3189_v32, %v3148_v29  ;;  %v3198_v58 = vadd.f32 %v3190_v56, %v3149_v62  ;;  %v3199_v46 = vadd.f32 %v3191_v17, %v3150_v25  ;;  %v9537_v27 = vld [vmem:[%s8906_s11 + $0x1b0] sm:$0xff]  ;;  %v9540_v29 = vld [vmem:[%s8906_s11 + $0x1b8] sm:$0xff] }
 0x39d   : >>> { %v3200_v39 = vadd.f32 %v3192_v4, %v3151_v19  ;;  %v3201_v2 = vadd.f32 %v3193_v7, %v3152_v61  ;;  %v3208_v5 = vmul.f32 %v9374_v30, %v3207_v28  ;;  %v3209_v34 = vmul.f32 %v9382_v6, %v3207_v28  ;;  %v9521_v30 = vld [vmem:[%s8906_s11 + $0x190] sm:$0xff]  ;;  %v9524_v6 = vld [vmem:[%s8906_s11 + $0x198] sm:$0xff] }
 0x39e   : >>> { %v3210_v1 = vmul.f32 %v9385_v16, %v3207_v28  ;;  %v3211_v41 = vmul.f32 %v9388_v57, %v3207_v28  ;;  %v3202_v21 = vadd.f32 %v3194_v13, %v3153_v51  ;;  %v3203_v52 = vadd.f32 %v3195_v3, %v3154_v20  ;;  %v9527_v16 = vld [vmem:[%s8906_s11 + $0x1a0] sm:$0xff] }
 0x39f   : >>> { %v3204_v11 = vadd.f32 %v3196_v24, %v3155_v35  ;;  %v3212_v47 = vmul.f32 %v9415_v48, %v3207_v28  ;;  %v3213_v57 = vmul.f32 %v9440_v14, %v3207_v28  ;;  %v3214_v23 = vmul.f32 %v9469_v53, %v3207_v28 }
 0x3a0   : >>> { %v3215_v38 = vmul.f32 %v5837_v45, %v3207_v28  ;;  %v3216_v22 = vadd.f32 %v3208_v5, %v3167_v10  ;;  %v3217_v48 = vadd.f32 %v3209_v34, %v3168_v26  ;;  %v3218_v62 = vadd.f32 %v3210_v1, %v3169_v9 }
 0x3a1   : >>> { %v3219_v25 = vadd.f32 %v3211_v41, %v3170_v37  ;;  %v3220_v19 = vadd.f32 %v3212_v47, %v3171_v60  ;;  %v3239_v61 = vmul.f32 %v5840_v15, %v9490_v55  ;;  %v3240_v14 = vmul.f32 %v9515_v36, %v9490_v55 }
 0x3a2   : >>> { %v3241_v53 = vmul.f32 %v9521_v30, %v9490_v55  ;;  %v3242_v51 = vmul.f32 %v9524_v6, %v9490_v55  ;;  %v3243_v20 = vmul.f32 %v9527_v16, %v9490_v55  ;;  %v3244_v35 = vmul.f32 %v9534_v31, %v9490_v55 }
 0x3a3   : >>> { %v3245_v43 = vmul.f32 %v9537_v27, %v9490_v55  ;;  %v3246_v42 = vmul.f32 %v9540_v29, %v9490_v55  ;;  %v3221_v50 = vadd.f32 %v3213_v57, %v3172_v63  ;;  %v3222_v49 = vadd.f32 %v3214_v23, %v3173_v18  ;;  %v9571_v63 = vld [vmem:[%s8906_s11 + $0x1c0] sm:$0xff] }
 0x3a4   : >>> { %v3223_v12 = vadd.f32 %v3215_v38, %v3174_v54  ;;  %v3247_v33 = vadd.f32 %v3239_v61, %v3197_v0  ;;  %v3248_v40 = vadd.f32 %v3240_v14, %v3198_v58  ;;  %v3249_v28 = vadd.f32 %v3241_v53, %v3199_v46 }
 0x3a5   : >>> { %v3250_v8 = vadd.f32 %v3242_v51, %v3200_v39  ;;  %v3251_v59 = vadd.f32 %v3243_v20, %v3201_v2  ;;  %v3252_v44 = vadd.f32 %v3244_v35, %v3202_v21  ;;  %v3253_v10 = vadd.f32 %v3245_v43, %v3203_v52 }
 0x3a6   : >>> { %v3254_v45 = vadd.f32 %v3246_v42, %v3204_v11  ;;  %v3257_v26 = vstv %s9506_s20  ;;  %v3287_v56 = vstv %s9517_s1  ;;  %v3306_v17 = vstv %s9529_s22  ;;  %v9600_v42 = vld [vmem:[%s8906_s11 + $0x1c8] sm:$0xff] }
 0x3a7   : >>> { %v3258_v9 = vmul.f32 %v5840_v15, %v3257_v26  ;;  %v3259_v37 = vmul.f32 %v9515_v36, %v3257_v26  ;;  %v3260_v55 = vmul.f32 %v9521_v30, %v3257_v26  ;;  %v3261_v60 = vmul.f32 %v9524_v6, %v3257_v26 }
 0x3a8   : >>> { %v3262_v32 = vmul.f32 %v9527_v16, %v3257_v26  ;;  %v3336_v4 = vstv %s9542_s23  ;;  %v3263_v7 = vmul.f32 %v9534_v31, %v3257_v26  ;;  %v3264_v13 = vmul.f32 %v9537_v27, %v3257_v26 }
 0x3a9   : >>> { %v3265_v3 = vmul.f32 %v9540_v29, %v3257_v26  ;;  %v3266_v24 = vadd.f32 %v3258_v9, %v3216_v22  ;;  %v3267_v18 = vadd.f32 %v3259_v37, %v3217_v48  ;;  %v3268_v54 = vadd.f32 %v3260_v55, %v3218_v62 }
 0x3aa   : >>> { %v3269_v0 = vadd.f32 %v3261_v60, %v3219_v25  ;;  %v3270_v58 = vadd.f32 %v3262_v32, %v3220_v19  ;;  %v3288_v46 = vmul.f32 %v9515_v36, %v3287_v56  ;;  %v3289_v39 = vmul.f32 %v9521_v30, %v3287_v56 }
 0x3ab   : >>> { %v3290_v2 = vmul.f32 %v9524_v6, %v3287_v56  ;;  %v3291_v5 = vmul.f32 %v9527_v16, %v3287_v56  ;;  %v3292_v34 = vmul.f32 %v9534_v31, %v3287_v56  ;;  %v3293_v1 = vmul.f32 %v9537_v27, %v3287_v56 }
 0x3ac   : >>> { %v3294_v41 = vmul.f32 %v9540_v29, %v3287_v56  ;;  %v3295_v15 = vmul.f32 %v9571_v63, %v3287_v56  ;;  %v3271_v21 = vadd.f32 %v3263_v7, %v3221_v50  ;;  %v3272_v52 = vadd.f32 %v3264_v13, %v3222_v49 }
 0x3ad   : >>> { %v3273_v11 = vadd.f32 %v3265_v3, %v3223_v12  ;;  %v3296_v47 = vadd.f32 %v3288_v46, %v3247_v33  ;;  %v3297_v57 = vadd.f32 %v3289_v39, %v3248_v40  ;;  %v3298_v23 = vadd.f32 %v3290_v2, %v3249_v28 }
 0x3ae   : >>> { %v3299_v38 = vadd.f32 %v3291_v5, %v3250_v8  ;;  %v3300_v22 = vadd.f32 %v3292_v34, %v3251_v59  ;;  %v3307_v48 = vmul.f32 %v9515_v36, %v3306_v17  ;;  %v3308_v62 = vmul.f32 %v9521_v30, %v3306_v17 }
 0x3af   : >>> { %v3309_v25 = vmul.f32 %v9524_v6, %v3306_v17  ;;  %v3310_v19 = vmul.f32 %v9527_v16, %v3306_v17  ;;  %v3301_v61 = vadd.f32 %v3293_v1, %v3252_v44  ;;  %v3302_v14 = vadd.f32 %v3294_v41, %v3253_v10 }
 0x3b0   : >>> { %v3303_v53 = vadd.f32 %v3295_v15, %v3254_v45  ;;  %v3311_v51 = vmul.f32 %v9534_v31, %v3306_v17  ;;  %v3312_v20 = vmul.f32 %v9537_v27, %v3306_v17  ;;  %v3313_v35 = vmul.f32 %v9540_v29, %v3306_v17 }
 0x3b1   : >>> { %v3314_v36 = vmul.f32 %v9571_v63, %v3306_v17  ;;  %v3315_v43 = vadd.f32 %v3307_v48, %v3266_v24  ;;  %v3316_v50 = vadd.f32 %v3308_v62, %v3267_v18  ;;  %v3317_v49 = vadd.f32 %v3309_v25, %v3268_v54 }
 0x3b2   : >>> { %v3318_v12 = vadd.f32 %v3310_v19, %v3269_v0  ;;  %v3319_v33 = vadd.f32 %v3311_v51, %v3270_v58  ;;  %v3337_v40 = vmul.f32 %v9521_v30, %v3336_v4  ;;  %v3338_v28 = vmul.f32 %v9524_v6, %v3336_v4 }
 0x3b3   : >>> { %v3339_v8 = vmul.f32 %v9527_v16, %v3336_v4  ;;  %v3340_v59 = vmul.f32 %v9534_v31, %v3336_v4  ;;  %v3341_v44 = vmul.f32 %v9537_v27, %v3336_v4  ;;  %v3342_v10 = vmul.f32 %v9540_v29, %v3336_v4 }
 0x3b4   : >>> { %v3343_v45 = vmul.f32 %v9571_v63, %v3336_v4  ;;  %v3344_v26 = vmul.f32 %v9600_v42, %v3336_v4  ;;  %v3320_v9 = vadd.f32 %v3312_v20, %v3271_v21  ;;  %v3321_v37 = vadd.f32 %v3313_v35, %v3272_v52 }
 0x3b5   : >>> { %v3322_v55 = vadd.f32 %v3314_v36, %v3273_v11  ;;  %v3345_v60 = vadd.f32 %v3337_v40, %v3296_v47  ;;  %v3346_v32 = vadd.f32 %v3338_v28, %v3297_v57  ;;  %v3347_v56 = vadd.f32 %v3339_v8, %v3298_v23 }
 0x3b6   : >>> { %v3348_v17 = vadd.f32 %v3340_v59, %v3299_v38  ;;  %v3349_v7 = vadd.f32 %v3341_v44, %v3300_v22  ;;  %v3350_v13 = vadd.f32 %v3342_v10, %v3301_v61  ;;  %v3351_v3 = vadd.f32 %v3343_v45, %v3302_v14 }
 0x3b7   : >>> { %v3352_v24 = vadd.f32 %v3344_v26, %v3303_v53  ;;  %v3355_v18 = vstv %s9584_s19  ;;  %v3385_v39 = vstv %s9591_s26  ;;  %v3404_v2 = vstv %s9594_s27  ;;  %v5887_v26 = vld [vmem:[%s8906_s11 + $0x1d8] sm:$0xff] }
 0x3b8   : >>> { %v3356_v54 = vmul.f32 %v9521_v30, %v3355_v18  ;;  %v3357_v4 = vmul.f32 %v9524_v6, %v3355_v18  ;;  %v3358_v0 = vmul.f32 %v9527_v16, %v3355_v18  ;;  %v3359_v58 = vmul.f32 %v9534_v31, %v3355_v18  ;;  %v9625_v30 = vld [vmem:[%s8906_s11 + $0x1d0] sm:$0xff] }
 0x3b9   : >>> { %v3360_v46 = vmul.f32 %v9537_v27, %v3355_v18  ;;  %v3434_v5 = vstv %s9602_s18  ;;  %v3361_v34 = vmul.f32 %v9540_v29, %v3355_v18  ;;  %v3362_v1 = vmul.f32 %v9571_v63, %v3355_v18 }
 0x3ba   : >>> { %v3363_v41 = vmul.f32 %v9600_v42, %v3355_v18  ;;  %v3364_v15 = vadd.f32 %v3356_v54, %v3315_v43  ;;  %v3365_v21 = vadd.f32 %v3357_v4, %v3316_v50  ;;  %v3366_v52 = vadd.f32 %v3358_v0, %v3317_v49 }
 0x3bb   : >>> { %v3367_v11 = vadd.f32 %v3359_v58, %v3318_v12  ;;  %v3368_v47 = vadd.f32 %v3360_v46, %v3319_v33  ;;  %v3386_v57 = vmul.f32 %v9524_v6, %v3385_v39  ;;  %v3387_v23 = vmul.f32 %v9527_v16, %v3385_v39 }
 0x3bc   : >>> { %v3388_v38 = vmul.f32 %v9534_v31, %v3385_v39  ;;  %v3389_v22 = vmul.f32 %v9537_v27, %v3385_v39  ;;  %v3390_v48 = vmul.f32 %v9540_v29, %v3385_v39  ;;  %v3391_v62 = vmul.f32 %v9571_v63, %v3385_v39 }
 0x3bd   : >>> { %v3392_v25 = vmul.f32 %v9600_v42, %v3385_v39  ;;  %v3393_v19 = vmul.f32 %v9625_v30, %v3385_v39  ;;  %v3369_v61 = vadd.f32 %v3361_v34, %v3320_v9  ;;  %v3370_v14 = vadd.f32 %v3362_v1, %v3321_v37 }
 0x3be   : >>> { %v3371_v53 = vadd.f32 %v3363_v41, %v3322_v55  ;;  %v3394_v51 = vadd.f32 %v3386_v57, %v3345_v60  ;;  %v3395_v20 = vadd.f32 %v3387_v23, %v3346_v32  ;;  %v3396_v35 = vadd.f32 %v3388_v38, %v3347_v56 }
 0x3bf   : >>> { %v3397_v36 = vadd.f32 %v3389_v22, %v3348_v17  ;;  %v3398_v43 = vadd.f32 %v3390_v48, %v3349_v7  ;;  %v3405_v50 = vmul.f32 %v9524_v6, %v3404_v2  ;;  %v3406_v49 = vmul.f32 %v9527_v16, %v3404_v2 }
 0x3c0   : >>> { %v3407_v12 = vmul.f32 %v9534_v31, %v3404_v2  ;;  %v3408_v33 = vmul.f32 %v9537_v27, %v3404_v2  ;;  %v3399_v40 = vadd.f32 %v3391_v62, %v3350_v13  ;;  %v3400_v28 = vadd.f32 %v3392_v25, %v3351_v3 }
 0x3c1   : >>> { %v3401_v8 = vadd.f32 %v3393_v19, %v3352_v24  ;;  %v3409_v59 = vmul.f32 %v9540_v29, %v3404_v2  ;;  %v3410_v44 = vmul.f32 %v9571_v63, %v3404_v2  ;;  %v3411_v10 = vmul.f32 %v9600_v42, %v3404_v2 }
 0x3c2   : >>> { %v3412_v45 = vmul.f32 %v9625_v30, %v3404_v2  ;;  %v3413_v6 = vadd.f32 %v3405_v50, %v3364_v15  ;;  %v3414_v9 = vadd.f32 %v3406_v49, %v3365_v21  ;;  %v3415_v37 = vadd.f32 %v3407_v12, %v3366_v52 }
 0x3c3   : >>> { %v3416_v55 = vadd.f32 %v3408_v33, %v3367_v11  ;;  %v3417_v60 = vadd.f32 %v3409_v59, %v3368_v47  ;;  %v3435_v32 = vmul.f32 %v9527_v16, %v3434_v5  ;;  %v3436_v56 = vmul.f32 %v9534_v31, %v3434_v5 }
 0x3c4   : >>> { %v3437_v17 = vmul.f32 %v9537_v27, %v3434_v5  ;;  %v3438_v7 = vmul.f32 %v9540_v29, %v3434_v5  ;;  %v3439_v13 = vmul.f32 %v9571_v63, %v3434_v5  ;;  %v3440_v3 = vmul.f32 %v9600_v42, %v3434_v5 }
 0x3c5   : >>> { %v3441_v24 = vmul.f32 %v9625_v30, %v3434_v5  ;;  %v3442_v18 = vmul.f32 %v5887_v26, %v3434_v5  ;;  %v9654_v46 = vadd.f32 %v3435_v32, %v3394_v51   ;;  %v9656_v50 = vadd.f32 %v3436_v56, %v3395_v20  }
 0x3c6   : >>> { %v9658_v33 = vadd.f32 %v3437_v17, %v3396_v35   ;;  %v9660_v54 = vadd.f32 %v3438_v7, %v3397_v36   ;;  %v9662_v0 = vadd.f32 %v3439_v13, %v3398_v43   ;;  %v9664_v58 = vadd.f32 %v3440_v3, %v3399_v40  }
 0x3c7   : >>> { %v10854_v4 = vmov %v9654_v46  ;;  %v10855_v39 = vmov %v9656_v50  ;;  %v3418_v2 = vadd.f32 %v3410_v44, %v3369_v61  ;;  %v3419_v1 = vadd.f32 %v3411_v10, %v3370_v14 }
 0x3c8   : >>> { %v10856_v34 = vmov %v9658_v33  ;;  %v10857_v41 = vmov %v9660_v54  ;;  %v10858_v15 = vmov %v9662_v0  ;;  %v10859_v21 = vmov %v9664_v58 }
 0x3c9   : >>> { %v9666_v0 = vadd.f32 %v3441_v24, %v3400_v28   ;;  %v9668_v54 = vadd.f32 %v3442_v18, %v3401_v8   ;;  %v3420_v52 = vadd.f32 %v3412_v45, %v3371_v53  ;;  %v3453_v5 = vstv %s9640_s28 }
 0x3ca   : >>> { %v3454_v46 = vmul.f32 %v9527_v16, %v3453_v5  ;;  %v3455_v57 = vmul.f32 %v9534_v31, %v3453_v5  ;;  %v3456_v23 = vmul.f32 %v9537_v27, %v3453_v5  ;;  %v3457_v38 = vmul.f32 %v9540_v29, %v3453_v5 }
 0x3cb   : >>> { %v10860_v11 = vmov %v9666_v0  ;;  %v10861_v47 = vmov %v9668_v54  ;;  %v3458_v22 = vmul.f32 %v9571_v63, %v3453_v5  ;;  %v3459_v58 = vmul.f32 %v9600_v42, %v3453_v5 }
 0x3cc   : >>> { %v3460_v48 = vmul.f32 %v9625_v30, %v3453_v5  ;;  %v3461_v62 = vmul.f32 %v5887_v26, %v3453_v5  ;;  %v9678_v53 = vadd.f32 %v3454_v46, %v3413_v6   ;;  %v9680_v13 = vadd.f32 %v3455_v57, %v3414_v9  }
 0x3cd   : >>> { %v9682_v3 = vadd.f32 %v3456_v23, %v3415_v37   ;;  %v9684_v25 = vadd.f32 %v3457_v38, %v3416_v55   ;;  %v9686_v18 = vadd.f32 %v3458_v22, %v3417_v60   ;;  %v9688_v2 = vadd.f32 %v3459_v58, %v3418_v2  }
 0x3ce   : >>> { %v10862_v19 = vmov %v9678_v53  ;;  %v10863_v61 = vmov %v9680_v13  ;;  %v9690_v27 = vadd.f32 %v3460_v48, %v3419_v1   ;;  %v9692_v1 = vadd.f32 %v3461_v62, %v3420_v52  }
 0x3cf   : >>> { %v10864_v14 = vmov %v9682_v3  ;;  %v10865_v16 = vmov %v9684_v25  ;;  %v10866_v31 = vmov %v9686_v18  ;;  %10867 = vst [vmem:[#allocation49_spill] sm:$0xff] %v9688_v2  ;;  %v10868_v51 = vmov %v9688_v2 }
 0x3d0   : >>> { %10869 = vst [vmem:[#allocation50_spill] sm:$0xff] %v9690_v27  ;;  %v10870_v29 = vmov %v9690_v27  ;;  %10871 = vst [vmem:[#allocation51_spill] sm:$0xff] %v9692_v1  ;;  %v10872_v20 = vmov %v9692_v1  ;;  %v10876_v2 = vmov %v10868_v51  ;;  %v10877_v18 = vmov %v10866_v31  ;;  %2219 = sbr.rel (!%p9695_p0) target bundleno = 748 (0x2ec), region = 248 }
 0x3d1   : >>> { %v10874_v1 = vmov %v10872_v20  ;;  %v10875_v52 = vmov %v10870_v29  ;;  %v10878_v25 = vmov %v10865_v16  ;;  %v10879_v3 = vmov %v10864_v14 }
 0x3d2   : >>> { %v10880_v13 = vmov %v10863_v61  ;;  %v10881_v53 = vmov %v10862_v19  ;;  %v10882_v54 = vmov %v10861_v47  ;;  %v10883_v0 = vmov %v10860_v11 }
 0x3d3   : >>> { %v10884_v58 = vmov %v10859_v21  ;;  %v10885_v27 = vmov %v10858_v15  ;;  %v10886_v63 = vmov %v10857_v41  ;;  %v10887_v33 = vmov %v10856_v34 }
 0x3d4   : >>> { %v10888_v50 = vmov %v10855_v39  ;;  %v10889_v46 = vmov %v10854_v4  ;;  %v9767_v53 = vmov (%p9695_p0), 0.0   ;;  %v9771_v12 = vmov (%p9695_p0), 0.0  }
 0x3d5   : >> { %v9769_v50 = vmov 0.0   ;;  %v9773_v33 = vmov 0.0   ;;  %v9775_v40 = vmov 0.0   ;;  %v9777_v28 = vmov 0.0  }
 0x3d6   : >> { %v9779_v8 = vmov 0.0   ;;  %v9781_v59 = vmov 0.0   ;;  %v9783_v44 = vmov 0.0   ;;  %v9785_v10 = vmov 0.0  }
 0x3d7   : >> { %v9787_v45 = vmov 0.0   ;;  %v9789_v6 = vmov 0.0   ;;  %v9791_v26 = vmov 0.0   ;;  %v9793_v9 = vmov 0.0  }
 0x3d8   : >> { %v9795_v37 = vmov 0.0   ;;  %v9797_v55 = vmov 0.0  }
 0x3d9 LB: >>> { %s3502_s11 = smul.u32 25, %s7057_s29  ;;  %s7057_s29 = sphi %s9799_s29, %s3484_s29   ;;  %v7053_v55 = vphi %v9797_v55, %v10906_v55   ;;  %v7049_v37 = vphi %v9795_v37, %v10905_v37   ;;  %v7045_v9 = vphi %v9793_v9, %v10904_v9   ;;  %v7041_v26 = vphi %v9791_v26, %v10903_v26   ;;  %v7037_v6 = vphi %v9789_v6, %v10902_v6   ;;  %v7033_v45 = vphi %v9787_v45, %v10901_v45   ;;  %v7029_v10 = vphi %v9785_v10, %v10900_v10   ;;  %v7025_v44 = vphi %v9783_v44, %v10899_v44   ;;  %v7021_v59 = vphi %v9781_v59, %v10898_v59   ;;  %v7017_v8 = vphi %v9779_v8, %v10897_v8   ;;  %v7013_v28 = vphi %v9777_v28, %v10896_v28   ;;  %v7009_v40 = vphi %v9775_v40, %v10895_v40   ;;  %v7005_v33 = vphi %v9773_v33, %v10894_v33   ;;  %v7001_v12 = vphi %v9771_v12, %v10893_v12   ;;  %v6997_v50 = vphi %v9769_v50, %v10892_v50   ;;  %v6993_v53 = vphi %v9767_v53, %v10891_v53  }
 0x3da   : >>> { %s5181_s10 = smul.u32 1152, %s7057_s29  ;;  %s3484_s29 = sadd.s32 1, %s7057_s29  }
 0x3db   : >>> { %s9838_s12 = sadd.s32 %s3502_s11, %s2237_s30  ;;  %s9842_s16 = sadd.s32 %s3502_s11, %s2240_s15 }
 0x3dc   : >>> { %s5182_s20 = sadd.s32 %s5655_s17, %s5181_s10  ;;  %s3518_s21 = sld [smem:[#allocation13 + %s9838_s12]] }
 0x3dd   : >>> { %s9848_s1 = sld [smem:[#allocation13 + %s9842_s16]]  ;;  %s3565_s22 = sadd.s32 1, %s9838_s12 }
 0x3de   : >>> { %s3584_s23 = sadd.s32 1, %s9842_s16  ;;  %s9852_s24 = scalar_lea.vmem [#allocation3], %s5182_s20 }
 0x3df   : >>> { %v5890_v60 = vld [vmem:[%s9852_s24 + $0x60] sm:$0xff]  ;;  %v9856_v32 = vld [vmem:[%s9852_s24 + $0x68] sm:$0xff]  ;;  %s9858_s25 = sld [smem:[#allocation13 + %s3565_s22]]  ;;  %s3614_s13 = sadd.s32 2, %s9838_s12  ;;  %v9862_v56 = vld [vmem:[%s9852_s24 + $0x70] sm:$0xff] }
 0x3e0   : >>> { %v9865_v17 = vld [vmem:[%s9852_s24 + $0x78] sm:$0xff]  ;;  %v9868_v7 = vld [vmem:[%s9852_s24 + $0x80] sm:$0xff]  ;;  %s3585_s19 = sld [smem:[#allocation13 + %s3584_s23]]  ;;  %v9871_v13 = vld [vmem:[%s9852_s24 + $0x88] sm:$0xff]  ;;  %s3633_s26 = sadd.s32 2, %s9842_s16 }
 0x3e1   : >>> { %v9874_v3 = vld [vmem:[%s9852_s24 + $0x90] sm:$0xff]  ;;  %v9877_v24 = vld [vmem:[%s9852_s24 + $0x98] sm:$0xff]  ;;  %s3615_s3 = sld [smem:[#allocation13 + %s3614_s13]]  ;;  %s3663_s27 = sadd.s32 3, %s9838_s12 }
 0x3e2   : >>> { %v3519_v18 = vstv %s3518_s21  ;;  %s3682_s18 = sadd.s32 3, %s9842_s16  ;;  %s9916_s4 = sld [smem:[#allocation13 + %s3633_s26]] }
 0x3e3   : >>> { %v3520_v54 = vmul.f32 %v5890_v60, %v3519_v18  ;;  %v3521_v0 = vmul.f32 %v9856_v32, %v3519_v18  ;;  %v3522_v2 = vmul.f32 %v9862_v56, %v3519_v18  ;;  %v3523_v1 = vmul.f32 %v9865_v17, %v3519_v18  ;;  %s3712_s28 = sadd.s32 4, %s9838_s12  ;;  %s9923_s0 = sld [smem:[#allocation13 + %s3663_s27]] }
 0x3e4   : >>> { %v3524_v52 = vmul.f32 %v9868_v7, %v3519_v18  ;;  %v3525_v5 = vmul.f32 %v9871_v13, %v3519_v18  ;;  %v3526_v46 = vmul.f32 %v9874_v3, %v3519_v18  ;;  %v3527_v57 = vmul.f32 %v9877_v24, %v3519_v18  ;;  %s9926_s11 = sld [smem:[#allocation13 + %s3682_s18]]  ;;  %s3731_s20 = sadd.s32 4, %s9842_s16 }
 0x3e5   : >>> { %v3528_v23 = vadd.f32 %v7053_v55, %v3520_v54  ;;  %v3529_v38 = vadd.f32 %v7049_v37, %v3521_v0  ;;  %v3530_v22 = vadd.f32 %v7045_v9, %v3522_v2  ;;  %v3531_v58 = vadd.f32 %v7041_v26, %v3523_v1  ;;  %v9896_v26 = vld [vmem:[%s9852_s24 + $0xa0] sm:$0xff]  ;;  %s9934_s10 = sld [smem:[#allocation13 + %s3712_s28]]  ;;  %s3762_s21 = sadd.s32 5, %s9838_s12 }
 0x3e6   : >>> { %v3532_v48 = vadd.f32 %v7037_v6, %v3524_v52  ;;  %v3533_v62 = vadd.f32 %v7033_v45, %v3525_v5  ;;  %v3534_v27 = vadd.f32 %v7029_v10, %v3526_v46  ;;  %v3535_v25 = vadd.f32 %v7025_v44, %v3527_v57  ;;  %s9970_s22 = sld [smem:[#allocation13 + %s3731_s20]]  ;;  %s3811_s23 = sadd.s32 6, %s9838_s12 }
 0x3e7   : >>> { %v3537_v63 = vstv %s9848_s1  ;;  %v3567_v18 = vstv %s9858_s25  ;;  %v3586_v37 = vstv %s3585_s19  ;;  %v3616_v9 = vstv %s3615_s3  ;;  %s3781_s1 = sadd.s32 5, %s9842_s16  ;;  %s9977_s25 = sld [smem:[#allocation13 + %s3762_s21]] }
 0x3e8   : >>> { %v3538_v49 = vmul.f32 %v5890_v60, %v3537_v63  ;;  %v3539_v43 = vmul.f32 %v9856_v32, %v3537_v63  ;;  %v3540_v36 = vmul.f32 %v9862_v56, %v3537_v63  ;;  %v3541_v35 = vmul.f32 %v9865_v17, %v3537_v63  ;;  %s9980_s13 = sld [smem:[#allocation13 + %s3781_s1]]  ;;  %s3830_s3 = sadd.s32 6, %s9842_s16 }
 0x3e9   : >>> { %v3542_v30 = vmul.f32 %v9868_v7, %v3537_v63  ;;  %v3543_v6 = vmul.f32 %v9871_v13, %v3537_v63  ;;  %v3544_v45 = vmul.f32 %v9874_v3, %v3537_v63  ;;  %v3545_v44 = vmul.f32 %v9877_v24, %v3537_v63  ;;  %s9986_s19 = sld [smem:[#allocation13 + %s3811_s23]]  ;;  %s3860_s26 = sadd.s32 7, %s9838_s12 }
 0x3ea   : >>> { %v3546_v10 = vadd.f32 %v7021_v59, %v3538_v49  ;;  %v3547_v55 = vadd.f32 %v7017_v8, %v3539_v43  ;;  %v3548_v60 = vadd.f32 %v7013_v28, %v3540_v36  ;;  %v3549_v54 = vadd.f32 %v7009_v40, %v3541_v35  ;;  %s3879_s27 = sadd.s32 7, %s9842_s16  ;;  %s10038_s18 = sld [smem:[#allocation13 + %s3830_s3]] }
 0x3eb   : >>> { %v3550_v0 = vadd.f32 %v7005_v33, %v3542_v30  ;;  %v3568_v2 = vmul.f32 %v9856_v32, %v3567_v18  ;;  %v3569_v1 = vmul.f32 %v9862_v56, %v3567_v18  ;;  %v3570_v52 = vmul.f32 %v9865_v17, %v3567_v18  ;;  %s10044_s28 = sld [smem:[#allocation13 + %s3860_s26]]  ;;  %s3958_s20 = sadd.s32 9, %s9838_s12 }
 0x3ec   : >>> { %v3571_v63 = vmul.f32 %v9868_v7, %v3567_v18  ;;  %v3572_v49 = vmul.f32 %v9871_v13, %v3567_v18  ;;  %v3573_v43 = vmul.f32 %v9874_v3, %v3567_v18  ;;  %v3574_v36 = vmul.f32 %v9877_v24, %v3567_v18  ;;  %s3977_s21 = sadd.s32 9, %s9842_s16  ;;  %s10098_s23 = sld [smem:[#allocation13 + %s3958_s20]] }
 0x3ed   : >>> { %v3575_v35 = vmul.f32 %v9896_v26, %v3567_v18  ;;  %v3551_v30 = vadd.f32 %v7001_v12, %v3543_v6  ;;  %v3552_v33 = vadd.f32 %v6997_v50, %v3544_v45  ;;  %v3553_v40 = vadd.f32 %v6993_v53, %v3545_v44  ;;  %v9932_v45 = vld [vmem:[%s9852_s24 + $0xa8] sm:$0xff]  ;;  %s4057_s3 = sadd.s32 11, %s9838_s12  ;;  %s4076_s26 = sadd.s32 11, %s9842_s16 }
 0x3ee   : >>> { %v3576_v28 = vadd.f32 %v3568_v2, %v3528_v23  ;;  %v3577_v8 = vadd.f32 %v3569_v1, %v3529_v38  ;;  %v3578_v59 = vadd.f32 %v3570_v52, %v3530_v22  ;;  %v3579_v5 = vadd.f32 %v3571_v63, %v3531_v58  ;;  %s4174_s20 = sadd.s32 13, %s9842_s16  ;;  %p10607_p1 = scmp.ge.s32.totalorder %s3484_s29, 8  }
 0x3ef   : >>> { %v3580_v46 = vadd.f32 %v3572_v49, %v3532_v48  ;;  %v3587_v57 = vmul.f32 %v9856_v32, %v3586_v37  ;;  %v3588_v18 = vmul.f32 %v9862_v56, %v3586_v37  ;;  %v3589_v12 = vmul.f32 %v9865_v17, %v3586_v37 }
 0x3f0   : >>> { %v3590_v50 = vmul.f32 %v9868_v7, %v3586_v37  ;;  %v3581_v53 = vadd.f32 %v3573_v43, %v3533_v62  ;;  %v3582_v23 = vadd.f32 %v3574_v36, %v3534_v27  ;;  %v3583_v38 = vadd.f32 %v3575_v35, %v3535_v25 }
 0x3f1   : >>> { %v3591_v22 = vmul.f32 %v9871_v13, %v3586_v37  ;;  %v3592_v58 = vmul.f32 %v9874_v3, %v3586_v37  ;;  %v3593_v48 = vmul.f32 %v9877_v24, %v3586_v37  ;;  %v3594_v32 = vmul.f32 %v9896_v26, %v3586_v37 }
 0x3f2   : >>> { %v3595_v6 = vadd.f32 %v3587_v57, %v3546_v10  ;;  %v3596_v44 = vadd.f32 %v3588_v18, %v3547_v55  ;;  %v3597_v2 = vadd.f32 %v3589_v12, %v3548_v60  ;;  %v3598_v62 = vadd.f32 %v3590_v50, %v3549_v54 }
 0x3f3   : >>> { %v3599_v27 = vadd.f32 %v3591_v22, %v3550_v0  ;;  %v3617_v25 = vmul.f32 %v9862_v56, %v3616_v9  ;;  %v3618_v1 = vmul.f32 %v9865_v17, %v3616_v9  ;;  %v3619_v52 = vmul.f32 %v9868_v7, %v3616_v9 }
 0x3f4   : >>> { %v3620_v63 = vmul.f32 %v9871_v13, %v3616_v9  ;;  %v3621_v37 = vmul.f32 %v9874_v3, %v3616_v9  ;;  %v3622_v10 = vmul.f32 %v9877_v24, %v3616_v9  ;;  %v3623_v49 = vmul.f32 %v9896_v26, %v3616_v9 }
 0x3f5   : >>> { %v3624_v55 = vmul.f32 %v9932_v45, %v3616_v9  ;;  %v3600_v60 = vadd.f32 %v3592_v58, %v3551_v30  ;;  %v3601_v54 = vadd.f32 %v3593_v48, %v3552_v33  ;;  %v3602_v0 = vadd.f32 %v3594_v32, %v3553_v40 }
 0x3f6   : >>> { %v3625_v43 = vadd.f32 %v3617_v25, %v3576_v28  ;;  %v3626_v36 = vadd.f32 %v3618_v1, %v3577_v8  ;;  %v3627_v35 = vadd.f32 %v3619_v52, %v3578_v59  ;;  %v3628_v57 = vadd.f32 %v3620_v63, %v3579_v5 }
 0x3f7   : >>> { %v3629_v18 = vadd.f32 %v3621_v37, %v3580_v46  ;;  %v3630_v12 = vadd.f32 %v3622_v10, %v3581_v53  ;;  %v3631_v50 = vadd.f32 %v3623_v49, %v3582_v23  ;;  %v3632_v22 = vadd.f32 %v3624_v55, %v3583_v38  ;;  %v9957_v23 = vld [vmem:[%s9852_s24 + $0xb0] sm:$0xff] }
 0x3f8   : >>> { %v3635_v42 = vstv %s9916_s4  ;;  %v3665_v28 = vstv %s9923_s0  ;;  %v3684_v8 = vstv %s9926_s11  ;;  %v3714_v59 = vstv %s9934_s10  ;;  %s3909_s4 = sadd.s32 8, %s9838_s12  ;;  %s10047_s0 = sld [smem:[#allocation13 + %s3879_s27]] }
 0x3f9   : >>> { %v3636_v20 = vmul.f32 %v9862_v56, %v3635_v42  ;;  %v3637_v9 = vmul.f32 %v9865_v17, %v3635_v42  ;;  %v3638_v30 = vmul.f32 %v9868_v7, %v3635_v42  ;;  %v3639_v33 = vmul.f32 %v9871_v13, %v3635_v42  ;;  %s10055_s11 = sld [smem:[#allocation13 + %s3909_s4]]  ;;  %s3928_s10 = sadd.s32 8, %s9842_s16 }
 0x3fa   : >>> { %v3640_v40 = vmul.f32 %v9874_v3, %v3635_v42  ;;  %v3641_v5 = vmul.f32 %v9877_v24, %v3635_v42  ;;  %v3642_v46 = vmul.f32 %v9896_v26, %v3635_v42  ;;  %v3643_v53 = vmul.f32 %v9932_v45, %v3635_v42  ;;  %s10091_s1 = sld [smem:[#allocation13 + %s3928_s10]]  ;;  %s4155_s10 = sadd.s32 13, %s9838_s12 }
 0x3fb   : >>> { %v3644_v56 = vadd.f32 %v3636_v20, %v3595_v6  ;;  %v3645_v38 = vadd.f32 %v3637_v9, %v3596_v44  ;;  %v3646_v58 = vadd.f32 %v3638_v30, %v3597_v2  ;;  %v3647_v48 = vadd.f32 %v3639_v33, %v3598_v62  ;;  %s10155_s4 = sld [smem:[#allocation13 + %s4057_s3]]  ;;  %s4273_s3 = sadd.s32 15, %s9842_s16 }
 0x3fc   : >>> { %v3648_v32 = vadd.f32 %v3640_v40, %v3599_v27  ;;  %v3666_v25 = vmul.f32 %v9865_v17, %v3665_v28  ;;  %v3667_v1 = vmul.f32 %v9868_v7, %v3665_v28  ;;  %v3668_v52 = vmul.f32 %v9871_v13, %v3665_v28 }
 0x3fd   : >>> { %v3669_v63 = vmul.f32 %v9874_v3, %v3665_v28  ;;  %v3670_v42 = vmul.f32 %v9877_v24, %v3665_v28  ;;  %v3671_v20 = vmul.f32 %v9896_v26, %v3665_v28  ;;  %v3672_v6 = vmul.f32 %v9932_v45, %v3665_v28 }
 0x3fe   : >>> { %v3673_v44 = vmul.f32 %v9957_v23, %v3665_v28  ;;  %v3649_v2 = vadd.f32 %v3641_v5, %v3600_v60  ;;  %v3650_v62 = vadd.f32 %v3642_v46, %v3601_v54  ;;  %v3651_v27 = vadd.f32 %v3643_v53, %v3602_v0  ;;  %v5937_v28 = vld [vmem:[%s9852_s24 + $0xb8] sm:$0xff] }
 0x3ff   : >>> { %v3674_v37 = vadd.f32 %v3666_v25, %v3625_v43  ;;  %v3675_v10 = vadd.f32 %v3667_v1, %v3626_v36  ;;  %v3676_v49 = vadd.f32 %v3668_v52, %v3627_v35  ;;  %v3677_v55 = vadd.f32 %v3669_v63, %v3628_v57 }
 0x400   : >>> { %v3678_v9 = vadd.f32 %v3670_v42, %v3629_v18  ;;  %v3685_v30 = vmul.f32 %v9865_v17, %v3684_v8  ;;  %v3686_v33 = vmul.f32 %v9868_v7, %v3684_v8  ;;  %v3687_v40 = vmul.f32 %v9871_v13, %v3684_v8 }
 0x401   : >>> { %v3688_v60 = vmul.f32 %v9874_v3, %v3684_v8  ;;  %v3679_v54 = vadd.f32 %v3671_v20, %v3630_v12  ;;  %v3680_v0 = vadd.f32 %v3672_v6, %v3631_v50  ;;  %v3681_v43 = vadd.f32 %v3673_v44, %v3632_v22 }
 0x402   : >>> { %v3689_v36 = vmul.f32 %v9877_v24, %v3684_v8  ;;  %v3690_v35 = vmul.f32 %v9896_v26, %v3684_v8  ;;  %v3691_v57 = vmul.f32 %v9932_v45, %v3684_v8  ;;  %v3692_v17 = vmul.f32 %v9957_v23, %v3684_v8 }
 0x403   : >>> { %v3693_v18 = vadd.f32 %v3685_v30, %v3644_v56  ;;  %v3694_v5 = vadd.f32 %v3686_v33, %v3645_v38  ;;  %v3695_v46 = vadd.f32 %v3687_v40, %v3646_v58  ;;  %v3696_v53 = vadd.f32 %v3688_v60, %v3647_v48 }
 0x404   : >>> { %v3697_v12 = vadd.f32 %v3689_v36, %v3648_v32  ;;  %v3715_v50 = vmul.f32 %v9868_v7, %v3714_v59  ;;  %v3716_v22 = vmul.f32 %v9871_v13, %v3714_v59  ;;  %v3717_v25 = vmul.f32 %v9874_v3, %v3714_v59 }
 0x405   : >>> { %v3718_v1 = vmul.f32 %v9877_v24, %v3714_v59  ;;  %v3719_v52 = vmul.f32 %v9896_v26, %v3714_v59  ;;  %v3720_v8 = vmul.f32 %v9932_v45, %v3714_v59  ;;  %v3721_v56 = vmul.f32 %v9957_v23, %v3714_v59 }
 0x406   : >>> { %v3722_v38 = vmul.f32 %v5937_v28, %v3714_v59  ;;  %v3698_v58 = vadd.f32 %v3690_v35, %v3649_v2  ;;  %v3699_v48 = vadd.f32 %v3691_v57, %v3650_v62  ;;  %v3700_v32 = vadd.f32 %v3692_v17, %v3651_v27  ;;  %v5940_v59 = vld [vmem:[%s9852_s24 + $0xc0] sm:$0xff]  ;;  %v10020_v35 = vld [vmem:[%s9852_s24 + $0xe8] sm:$0xff]  ;;  %v10023_v57 = vld [vmem:[%s9852_s24 + $0xf0] sm:$0xff] }
 0x407   : >>> { %v3723_v63 = vadd.f32 %v3715_v50, %v3674_v37  ;;  %v3724_v42 = vadd.f32 %v3716_v22, %v3675_v10  ;;  %v3725_v20 = vadd.f32 %v3717_v25, %v3676_v49  ;;  %v3726_v6 = vadd.f32 %v3718_v1, %v3677_v55  ;;  %v10002_v10 = vld [vmem:[%s9852_s24 + $0xc8] sm:$0xff]  ;;  %v10005_v49 = vld [vmem:[%s9852_s24 + $0xd0] sm:$0xff]  ;;  %v10008_v55 = vld [vmem:[%s9852_s24 + $0xd8] sm:$0xff] }
 0x408   : >>> { %v3727_v44 = vadd.f32 %v3719_v52, %v3678_v9  ;;  %v3728_v30 = vadd.f32 %v3720_v8, %v3679_v54  ;;  %v3729_v33 = vadd.f32 %v3721_v56, %v3680_v0  ;;  %v3730_v40 = vadd.f32 %v3722_v38, %v3681_v43  ;;  %v10012_v54 = vld [vmem:[%s9852_s24 + $0xe0] sm:$0xff]  ;;  %v10026_v17 = vld [vmem:[%s9852_s24 + $0xf8] sm:$0xff] }
 0x409   : >>> { %v3733_v60 = vstv %s9970_s22  ;;  %v3783_v0 = vstv %s9980_s13  ;;  %v3813_v43 = vstv %s9986_s19  ;;  %s4008_s22 = sadd.s32 10, %s9838_s12  ;;  %s4027_s19 = sadd.s32 10, %s9842_s16 }
 0x40a   : >>> { %v3734_v2 = vmul.f32 %v9868_v7, %v3733_v60  ;;  %v3735_v62 = vmul.f32 %v9871_v13, %v3733_v60  ;;  %v3736_v27 = vmul.f32 %v9874_v3, %v3733_v60  ;;  %v3737_v37 = vmul.f32 %v9877_v24, %v3733_v60  ;;  %s10109_s13 = sld [smem:[#allocation13 + %s4008_s22]] }
 0x40b   : >>> { %v3738_v9 = vmul.f32 %v9896_v26, %v3733_v60  ;;  %v3764_v7 = vstv %s9977_s25  ;;  %v3739_v13 = vmul.f32 %v9932_v45, %v3733_v60  ;;  %v3740_v3 = vmul.f32 %v9957_v23, %v3733_v60  ;;  %s10101_s25 = sld [smem:[#allocation13 + %s3977_s21]] }
 0x40c   : >>> { %v3741_v36 = vmul.f32 %v5937_v28, %v3733_v60  ;;  %v3742_v24 = vadd.f32 %v3734_v2, %v3693_v18  ;;  %v3743_v26 = vadd.f32 %v3735_v62, %v3694_v5  ;;  %v3744_v50 = vadd.f32 %v3736_v27, %v3695_v46  ;;  %s10144_s27 = sld [smem:[#allocation13 + %s4027_s19]]  ;;  %s4254_s19 = sadd.s32 15, %s9838_s12 }
 0x40d   : >>> { %v3745_v22 = vadd.f32 %v3737_v37, %v3696_v53  ;;  %v3746_v25 = vadd.f32 %v3738_v9, %v3697_v12  ;;  %v3765_v1 = vmul.f32 %v5940_v59, %v3764_v7  ;;  %v3766_v52 = vmul.f32 %v10002_v10, %v3764_v7  ;;  %s10229_s22 = sld [smem:[#allocation13 + %s4155_s10]]  ;;  %s4371_s10 = sadd.s32 17, %s9842_s16 }
 0x40e   : >>> { %v3767_v45 = vmul.f32 %v10005_v49, %v3764_v7  ;;  %v3768_v23 = vmul.f32 %v10008_v55, %v3764_v7  ;;  %v3769_v18 = vmul.f32 %v10012_v54, %v3764_v7  ;;  %v3770_v28 = vmul.f32 %v10020_v35, %v3764_v7 }
 0x40f   : >>> { %v3771_v8 = vmul.f32 %v10023_v57, %v3764_v7  ;;  %v3772_v5 = vmul.f32 %v10026_v17, %v3764_v7  ;;  %v3747_v46 = vadd.f32 %v3739_v13, %v3698_v58  ;;  %v3748_v53 = vadd.f32 %v3740_v3, %v3699_v48 }
 0x410   : >>> { %v3749_v12 = vadd.f32 %v3741_v36, %v3700_v32  ;;  %v3773_v56 = vadd.f32 %v3765_v1, %v3723_v63  ;;  %v3774_v38 = vadd.f32 %v3766_v52, %v3724_v42  ;;  %v3775_v60 = vadd.f32 %v3767_v45, %v3725_v20 }
 0x411   : >>> { %v3776_v2 = vadd.f32 %v3768_v23, %v3726_v6  ;;  %v3777_v62 = vadd.f32 %v3769_v18, %v3727_v44  ;;  %v3784_v27 = vmul.f32 %v5940_v59, %v3783_v0  ;;  %v3785_v37 = vmul.f32 %v10002_v10, %v3783_v0  ;;  %v10053_v59 = vld [vmem:[%s9852_s24 + $0x100] sm:$0xff] }
 0x412   : >>> { %v3786_v9 = vmul.f32 %v10005_v49, %v3783_v0  ;;  %v3787_v7 = vmul.f32 %v10008_v55, %v3783_v0  ;;  %v3778_v58 = vadd.f32 %v3770_v28, %v3728_v30  ;;  %v3779_v48 = vadd.f32 %v3771_v8, %v3729_v33 }
 0x413   : >>> { %v3780_v32 = vadd.f32 %v3772_v5, %v3730_v40  ;;  %v3788_v63 = vmul.f32 %v10012_v54, %v3783_v0  ;;  %v3789_v42 = vmul.f32 %v10020_v35, %v3783_v0  ;;  %v3790_v20 = vmul.f32 %v10023_v57, %v3783_v0 }
 0x414   : >>> { %v3791_v6 = vmul.f32 %v10026_v17, %v3783_v0  ;;  %v3792_v44 = vadd.f32 %v3784_v27, %v3742_v24  ;;  %v3793_v13 = vadd.f32 %v3785_v37, %v3743_v26  ;;  %v3794_v3 = vadd.f32 %v3786_v9, %v3744_v50 }
 0x415   : >>> { %v3795_v30 = vadd.f32 %v3787_v7, %v3745_v22  ;;  %v3796_v33 = vadd.f32 %v3788_v63, %v3746_v25  ;;  %v3814_v40 = vmul.f32 %v10002_v10, %v3813_v43  ;;  %v3815_v36 = vmul.f32 %v10005_v49, %v3813_v43 }
 0x416   : >>> { %v3816_v1 = vmul.f32 %v10008_v55, %v3813_v43  ;;  %v3817_v52 = vmul.f32 %v10012_v54, %v3813_v43  ;;  %v3818_v0 = vmul.f32 %v10020_v35, %v3813_v43  ;;  %v3819_v24 = vmul.f32 %v10023_v57, %v3813_v43 }
 0x417   : >>> { %v3820_v45 = vmul.f32 %v10026_v17, %v3813_v43  ;;  %v3821_v26 = vmul.f32 %v10053_v59, %v3813_v43  ;;  %v3797_v50 = vadd.f32 %v3789_v42, %v3747_v46  ;;  %v3798_v22 = vadd.f32 %v3790_v20, %v3748_v53 }
 0x418   : >>> { %v3799_v25 = vadd.f32 %v3791_v6, %v3749_v12  ;;  %v3822_v23 = vadd.f32 %v3814_v40, %v3773_v56  ;;  %v3823_v18 = vadd.f32 %v3815_v36, %v3774_v38  ;;  %v3824_v28 = vadd.f32 %v3816_v1, %v3775_v60 }
 0x419   : >>> { %v3825_v8 = vadd.f32 %v3817_v52, %v3776_v2  ;;  %v3826_v5 = vadd.f32 %v3818_v0, %v3777_v62  ;;  %v3827_v27 = vadd.f32 %v3819_v24, %v3778_v58  ;;  %v3828_v37 = vadd.f32 %v3820_v45, %v3779_v48  ;;  %v10078_v48 = vld [vmem:[%s9852_s24 + $0x108] sm:$0xff] }
 0x41a   : >>> { %v3829_v9 = vadd.f32 %v3821_v26, %v3780_v32  ;;  %v3832_v7 = vstv %s10038_s18  ;;  %v3862_v56 = vstv %s10044_s28  ;;  %v3881_v38 = vstv %s10047_s0  ;;  %s4106_s18 = sadd.s32 12, %s9838_s12  ;;  %s10167_s28 = sld [smem:[#allocation13 + %s4076_s26]] }
 0x41b   : >>> { %v3833_v63 = vmul.f32 %v10002_v10, %v3832_v7  ;;  %v3834_v43 = vmul.f32 %v10005_v49, %v3832_v7  ;;  %v3835_v46 = vmul.f32 %v10008_v55, %v3832_v7  ;;  %v3836_v53 = vmul.f32 %v10012_v54, %v3832_v7  ;;  %s10180_s0 = sld [smem:[#allocation13 + %s4106_s18]] }
 0x41c   : >>> { %v3837_v12 = vmul.f32 %v10020_v35, %v3832_v7  ;;  %v3911_v60 = vstv %s10055_s11  ;;  %v3838_v2 = vmul.f32 %v10023_v57, %v3832_v7  ;;  %v3839_v62 = vmul.f32 %v10026_v17, %v3832_v7  ;;  %s4125_s11 = sadd.s32 12, %s9842_s16  ;;  %s10283_s18 = sld [smem:[#allocation13 + %s4254_s19]] }
 0x41d   : >>> { %v3840_v58 = vmul.f32 %v10053_v59, %v3832_v7  ;;  %v3841_v10 = vadd.f32 %v3833_v63, %v3792_v44  ;;  %v3842_v32 = vadd.f32 %v3834_v43, %v3793_v13  ;;  %v3843_v42 = vadd.f32 %v3835_v46, %v3794_v3  ;;  %s10222_s21 = sld [smem:[#allocation13 + %s4125_s11]]  ;;  %s4352_s11 = sadd.s32 17, %s9838_s12 }
 0x41e   : >>> { %v3844_v20 = vadd.f32 %v3836_v53, %v3795_v30  ;;  %v3845_v6 = vadd.f32 %v3837_v12, %v3796_v33  ;;  %v3863_v40 = vmul.f32 %v10005_v49, %v3862_v56  ;;  %v3864_v36 = vmul.f32 %v10008_v55, %v3862_v56  ;;  %s4469_s19 = sadd.s32 19, %s9842_s16 }
 0x41f   : >>> { %v3865_v1 = vmul.f32 %v10012_v54, %v3862_v56  ;;  %v3866_v52 = vmul.f32 %v10020_v35, %v3862_v56  ;;  %v3867_v0 = vmul.f32 %v10023_v57, %v3862_v56  ;;  %v3868_v44 = vmul.f32 %v10026_v17, %v3862_v56 }
 0x420   : >>> { %v3869_v13 = vmul.f32 %v10053_v59, %v3862_v56  ;;  %v3870_v3 = vmul.f32 %v10078_v48, %v3862_v56  ;;  %v3846_v30 = vadd.f32 %v3838_v2, %v3797_v50  ;;  %v3847_v33 = vadd.f32 %v3839_v62, %v3798_v22  ;;  %v10107_v56 = vld [vmem:[%s9852_s24 + $0x110] sm:$0xff] }
 0x421   : >>> { %v3848_v24 = vadd.f32 %v3840_v58, %v3799_v25  ;;  %v3871_v45 = vadd.f32 %v3863_v40, %v3822_v23  ;;  %v3872_v26 = vadd.f32 %v3864_v36, %v3823_v18  ;;  %v3873_v7 = vadd.f32 %v3865_v1, %v3824_v28 }
 0x422   : >>> { %v3874_v63 = vadd.f32 %v3866_v52, %v3825_v8  ;;  %v3875_v43 = vadd.f32 %v3867_v0, %v3826_v5  ;;  %v3882_v46 = vmul.f32 %v10005_v49, %v3881_v38  ;;  %v3883_v53 = vmul.f32 %v10008_v55, %v3881_v38 }
 0x423   : >>> { %v3884_v12 = vmul.f32 %v10012_v54, %v3881_v38  ;;  %v3885_v50 = vmul.f32 %v10020_v35, %v3881_v38  ;;  %v3876_v22 = vadd.f32 %v3868_v44, %v3827_v27  ;;  %v3877_v25 = vadd.f32 %v3869_v13, %v3828_v37 }
 0x424   : >>> { %v3878_v23 = vadd.f32 %v3870_v3, %v3829_v9  ;;  %v3886_v18 = vmul.f32 %v10023_v57, %v3881_v38  ;;  %v3887_v28 = vmul.f32 %v10026_v17, %v3881_v38  ;;  %v3888_v8 = vmul.f32 %v10053_v59, %v3881_v38 }
 0x425   : >>> { %v3889_v49 = vmul.f32 %v10078_v48, %v3881_v38  ;;  %v3890_v5 = vadd.f32 %v3882_v46, %v3841_v10  ;;  %v3891_v2 = vadd.f32 %v3883_v53, %v3842_v32  ;;  %v3892_v62 = vadd.f32 %v3884_v12, %v3843_v42 }
 0x426   : >>> { %v3893_v27 = vadd.f32 %v3885_v50, %v3844_v20  ;;  %v3894_v37 = vadd.f32 %v3886_v18, %v3845_v6  ;;  %v3912_v9 = vmul.f32 %v10008_v55, %v3911_v60  ;;  %v3913_v58 = vmul.f32 %v10012_v54, %v3911_v60 }
 0x427   : >>> { %v3914_v40 = vmul.f32 %v10020_v35, %v3911_v60  ;;  %v3915_v36 = vmul.f32 %v10023_v57, %v3911_v60  ;;  %v3916_v38 = vmul.f32 %v10026_v17, %v3911_v60  ;;  %v3917_v10 = vmul.f32 %v10053_v59, %v3911_v60 }
 0x428   : >>> { %v3918_v1 = vmul.f32 %v10078_v48, %v3911_v60  ;;  %v3919_v32 = vmul.f32 %v10107_v56, %v3911_v60  ;;  %v3895_v42 = vadd.f32 %v3887_v28, %v3846_v30  ;;  %v3896_v20 = vadd.f32 %v3888_v8, %v3847_v33 }
 0x429   : >>> { %v3897_v6 = vadd.f32 %v3889_v49, %v3848_v24  ;;  %v3920_v52 = vadd.f32 %v3912_v9, %v3871_v45  ;;  %v3921_v0 = vadd.f32 %v3913_v58, %v3872_v26  ;;  %v3922_v44 = vadd.f32 %v3914_v40, %v3873_v7 }
 0x42a   : >>> { %v3923_v13 = vadd.f32 %v3915_v36, %v3874_v63  ;;  %v3924_v3 = vadd.f32 %v3916_v38, %v3875_v43  ;;  %v3925_v46 = vadd.f32 %v3917_v10, %v3876_v22  ;;  %v3926_v53 = vadd.f32 %v3918_v1, %v3877_v25  ;;  %v5987_v25 = vld [vmem:[%s9852_s24 + $0x118] sm:$0xff] }
 0x42b   : >>> { %v3927_v12 = vadd.f32 %v3919_v32, %v3878_v23  ;;  %v3930_v50 = vstv %s10091_s1  ;;  %v3960_v45 = vstv %s10098_s23  ;;  %v3979_v26 = vstv %s10101_s25  ;;  %s4204_s1 = sadd.s32 14, %s9838_s12  ;;  %s10232_s23 = sld [smem:[#allocation13 + %s4174_s20]] }
 0x42c   : >>> { %v3931_v18 = vmul.f32 %v10008_v55, %v3930_v50  ;;  %v3932_v60 = vmul.f32 %v10012_v54, %v3930_v50  ;;  %v3933_v30 = vmul.f32 %v10020_v35, %v3930_v50  ;;  %v3934_v33 = vmul.f32 %v10023_v57, %v3930_v50  ;;  %s10240_s25 = sld [smem:[#allocation13 + %s4204_s1]] }
 0x42d   : >>> { %v3935_v24 = vmul.f32 %v10026_v17, %v3930_v50  ;;  %v10128_v7 = vstv %s10109_s13  ;;  %v3936_v63 = vmul.f32 %v10053_v59, %v3930_v50  ;;  %v3937_v43 = vmul.f32 %v10078_v48, %v3930_v50  ;;  %s4223_s13 = sadd.s32 14, %s9842_s16  ;;  %s10350_s1 = sld [smem:[#allocation13 + %s4352_s11]] }
 0x42e   : >>> { %v3938_v22 = vmul.f32 %v10107_v56, %v3930_v50  ;;  %v3939_v55 = vadd.f32 %v3931_v18, %v3890_v5  ;;  %v3940_v23 = vadd.f32 %v3932_v60, %v3891_v2  ;;  %v3941_v28 = vadd.f32 %v3933_v30, %v3892_v62  ;;  %s10276_s26 = sld [smem:[#allocation13 + %s4223_s13]]  ;;  %s4450_s13 = sadd.s32 19, %s9838_s12 }
 0x42f   : >>> { %v3942_v8 = vadd.f32 %v3934_v33, %v3893_v27  ;;  %v3943_v49 = vadd.f32 %v3935_v24, %v3894_v37  ;;  %v3961_v9 = vmul.f32 %v10012_v54, %v3960_v45  ;;  %v3962_v58 = vmul.f32 %v10020_v35, %v3960_v45  ;;  %s4568_s11 = sadd.s32 21, %s9842_s16 }
 0x430   : >>> { %v3963_v40 = vmul.f32 %v10023_v57, %v3960_v45  ;;  %v3964_v36 = vmul.f32 %v10026_v17, %v3960_v45  ;;  %v3965_v38 = vmul.f32 %v10053_v59, %v3960_v45  ;;  %v3966_v5 = vmul.f32 %v10078_v48, %v3960_v45 }
 0x431   : >>> { %v3967_v2 = vmul.f32 %v10107_v56, %v3960_v45  ;;  %v3968_v62 = vmul.f32 %v5987_v25, %v3960_v45  ;;  %v3944_v27 = vadd.f32 %v3936_v63, %v3895_v42  ;;  %v3945_v37 = vadd.f32 %v3937_v43, %v3896_v20  ;;  %v10172_v43 = vld [vmem:[%s9852_s24 + $0x148] sm:$0xff] }
 0x432   : >>> { %v3946_v10 = vadd.f32 %v3938_v22, %v3897_v6  ;;  %v3969_v1 = vadd.f32 %v3961_v9, %v3920_v52  ;;  %v3970_v32 = vadd.f32 %v3962_v58, %v3921_v0  ;;  %v3971_v50 = vadd.f32 %v3963_v40, %v3922_v44  ;;  %v5990_v6 = vld [vmem:[%s9852_s24 + $0x120] sm:$0xff]  ;;  %v10153_v52 = vld [vmem:[%s9852_s24 + $0x128] sm:$0xff] }
 0x433   : >>> { %v3972_v18 = vadd.f32 %v3964_v36, %v3923_v13  ;;  %v3973_v60 = vadd.f32 %v3965_v38, %v3924_v3  ;;  %v3980_v30 = vmul.f32 %v10012_v54, %v3979_v26  ;;  %v3981_v33 = vmul.f32 %v10020_v35, %v3979_v26  ;;  %v10159_v54 = vld [vmem:[%s9852_s24 + $0x130] sm:$0xff]  ;;  %v10162_v35 = vld [vmem:[%s9852_s24 + $0x138] sm:$0xff] }
 0x434   : >>> { %v3982_v42 = vmul.f32 %v10023_v57, %v3979_v26  ;;  %v3983_v20 = vmul.f32 %v10026_v17, %v3979_v26  ;;  %v3974_v0 = vadd.f32 %v3966_v5, %v3925_v46  ;;  %v3975_v44 = vadd.f32 %v3967_v2, %v3926_v53  ;;  %v10165_v57 = vld [vmem:[%s9852_s24 + $0x140] sm:$0xff]  ;;  %v10175_v46 = vld [vmem:[%s9852_s24 + $0x150] sm:$0xff]  ;;  %v10178_v53 = vld [vmem:[%s9852_s24 + $0x158] sm:$0xff] }
 0x435   : >>> { %v3976_v13 = vadd.f32 %v3968_v62, %v3927_v12  ;;  %v3984_v3 = vmul.f32 %v10053_v59, %v3979_v26  ;;  %v3985_v17 = vmul.f32 %v10078_v48, %v3979_v26  ;;  %v3986_v24 = vmul.f32 %v10107_v56, %v3979_v26 }
 0x436   : >>> { %v3987_v45 = vmul.f32 %v5987_v25, %v3979_v26  ;;  %v3988_v63 = vadd.f32 %v3980_v30, %v3939_v55  ;;  %v3989_v59 = vadd.f32 %v3981_v33, %v3940_v23  ;;  %v3990_v12 = vadd.f32 %v3982_v42, %v3941_v28 }
 0x437   : >>> { %v3991_v22 = vadd.f32 %v3983_v20, %v3942_v8  ;;  %v3992_v9 = vadd.f32 %v3984_v3, %v3943_v49  ;;  %v4011_v58 = vmul.f32 %v5990_v6, %v10128_v7  ;;  %v4012_v48 = vmul.f32 %v10153_v52, %v10128_v7 }
 0x438   : >>> { %v4013_v56 = vmul.f32 %v10159_v54, %v10128_v7  ;;  %v4014_v26 = vmul.f32 %v10162_v35, %v10128_v7  ;;  %v4015_v55 = vmul.f32 %v10165_v57, %v10128_v7  ;;  %v4016_v25 = vmul.f32 %v10172_v43, %v10128_v7 }
 0x439   : >>> { %v4017_v23 = vmul.f32 %v10175_v46, %v10128_v7  ;;  %v4018_v28 = vmul.f32 %v10178_v53, %v10128_v7  ;;  %v3993_v8 = vadd.f32 %v3985_v17, %v3944_v27  ;;  %v3994_v49 = vadd.f32 %v3986_v24, %v3945_v37 }
 0x43a   : >>> { %v3995_v40 = vadd.f32 %v3987_v45, %v3946_v10  ;;  %v4019_v36 = vadd.f32 %v4011_v58, %v3969_v1  ;;  %v4020_v38 = vadd.f32 %v4012_v48, %v3970_v32  ;;  %v4021_v5 = vadd.f32 %v4013_v56, %v3971_v50 }
 0x43b   : >>> { %v4022_v2 = vadd.f32 %v4014_v26, %v3972_v18  ;;  %v4023_v62 = vadd.f32 %v4015_v55, %v3973_v60  ;;  %v4024_v30 = vadd.f32 %v4016_v25, %v3974_v0  ;;  %v4025_v33 = vadd.f32 %v4017_v23, %v3975_v44  ;;  %v10209_v0 = vld [vmem:[%s9852_s24 + $0x160] sm:$0xff] }
 0x43c   : >>> { %v4026_v42 = vadd.f32 %v4018_v28, %v3976_v13  ;;  %v4029_v20 = vstv %s10144_s27  ;;  %v4059_v10 = vstv %s10155_s4  ;;  %v4078_v1 = vstv %s10167_s28  ;;  %s4303_s27 = sadd.s32 16, %s9838_s12  ;;  %s10286_s4 = sld [smem:[#allocation13 + %s4273_s3]] }
 0x43d   : >>> { %v4030_v3 = vmul.f32 %v5990_v6, %v4029_v20  ;;  %v4031_v29 = vmul.f32 %v10153_v52, %v4029_v20  ;;  %v4032_v7 = vmul.f32 %v10159_v54, %v4029_v20  ;;  %v4033_v27 = vmul.f32 %v10162_v35, %v4029_v20  ;;  %s10292_s28 = sld [smem:[#allocation13 + %s4303_s27]] }
 0x43e   : >>> { %v4034_v37 = vmul.f32 %v10165_v57, %v4029_v20  ;;  %v4108_v32 = vstv %s10180_s0  ;;  %v4035_v50 = vmul.f32 %v10172_v43, %v4029_v20  ;;  %v4036_v18 = vmul.f32 %v10175_v46, %v4029_v20  ;;  %s4322_s0 = sadd.s32 16, %s9842_s16  ;;  %s10404_s27 = sld [smem:[#allocation13 + %s4450_s13]] }
 0x43f   : >>> { %v4037_v60 = vmul.f32 %v10178_v53, %v4029_v20  ;;  %v4038_v6 = vadd.f32 %v4030_v3, %v3988_v63  ;;  %v4039_v44 = vadd.f32 %v4031_v29, %v3989_v59  ;;  %v4040_v13 = vadd.f32 %v4032_v7, %v3990_v12  ;;  %s10344_s20 = sld [smem:[#allocation13 + %s4322_s0]]  ;;  %s4549_s0 = sadd.s32 21, %s9838_s12 }
 0x440   : >>> { %v4041_v17 = vadd.f32 %v4033_v27, %v3991_v22  ;;  %v4042_v24 = vadd.f32 %v4034_v37, %v3992_v9  ;;  %v4060_v45 = vmul.f32 %v10153_v52, %v4059_v10  ;;  %v4061_v58 = vmul.f32 %v10159_v54, %v4059_v10  ;;  %v10238_v37 = vld [vmem:[%s9852_s24 + $0x168] sm:$0xff]  ;;  %s4666_s13 = sadd.s32 23, %s9842_s16 }
 0x441   : >>> { %v4062_v48 = vmul.f32 %v10162_v35, %v4059_v10  ;;  %v4063_v56 = vmul.f32 %v10165_v57, %v4059_v10  ;;  %v4064_v26 = vmul.f32 %v10172_v43, %v4059_v10  ;;  %v4065_v63 = vmul.f32 %v10175_v46, %v4059_v10 }
 0x442   : >>> { %v4066_v29 = vmul.f32 %v10178_v53, %v4059_v10  ;;  %v4067_v59 = vmul.f32 %v10209_v0, %v4059_v10  ;;  %v4043_v12 = vadd.f32 %v4035_v50, %v3993_v8  ;;  %v4044_v22 = vadd.f32 %v4036_v18, %v3994_v49 }
 0x443   : >>> { %v4045_v9 = vadd.f32 %v4037_v60, %v3995_v40  ;;  %v4068_v55 = vadd.f32 %v4060_v45, %v4019_v36  ;;  %v4069_v25 = vadd.f32 %v4061_v58, %v4020_v38  ;;  %v4070_v23 = vadd.f32 %v4062_v48, %v4021_v5 }
 0x444   : >>> { %v4071_v28 = vadd.f32 %v4063_v56, %v4022_v2  ;;  %v4072_v20 = vadd.f32 %v4064_v26, %v4023_v62  ;;  %v4079_v3 = vmul.f32 %v10153_v52, %v4078_v1  ;;  %v4080_v7 = vmul.f32 %v10159_v54, %v4078_v1 }
 0x445   : >>> { %v4081_v27 = vmul.f32 %v10162_v35, %v4078_v1  ;;  %v4082_v8 = vmul.f32 %v10165_v57, %v4078_v1  ;;  %v4073_v49 = vadd.f32 %v4065_v63, %v4024_v30  ;;  %v4074_v40 = vadd.f32 %v4066_v29, %v4025_v33 }
 0x446   : >>> { %v4075_v36 = vadd.f32 %v4067_v59, %v4026_v42  ;;  %v4083_v38 = vmul.f32 %v10172_v43, %v4078_v1  ;;  %v4084_v5 = vmul.f32 %v10175_v46, %v4078_v1  ;;  %v4085_v2 = vmul.f32 %v10178_v53, %v4078_v1 }
 0x447   : >>> { %v4086_v52 = vmul.f32 %v10209_v0, %v4078_v1  ;;  %v4087_v62 = vadd.f32 %v4079_v3, %v4038_v6  ;;  %v4088_v10 = vadd.f32 %v4080_v7, %v4039_v44  ;;  %v4089_v50 = vadd.f32 %v4081_v27, %v4040_v13 }
 0x448   : >>> { %v4090_v30 = vadd.f32 %v4082_v8, %v4041_v17  ;;  %v4091_v33 = vadd.f32 %v4083_v38, %v4042_v24  ;;  %v4109_v42 = vmul.f32 %v10159_v54, %v4108_v32  ;;  %v4110_v18 = vmul.f32 %v10162_v35, %v4108_v32 }
 0x449   : >>> { %v4111_v60 = vmul.f32 %v10165_v57, %v4108_v32  ;;  %v4112_v45 = vmul.f32 %v10172_v43, %v4108_v32  ;;  %v4113_v1 = vmul.f32 %v10175_v46, %v4108_v32  ;;  %v4114_v6 = vmul.f32 %v10178_v53, %v4108_v32 }
 0x44a   : >>> { %v4115_v58 = vmul.f32 %v10209_v0, %v4108_v32  ;;  %v4116_v44 = vmul.f32 %v10238_v37, %v4108_v32  ;;  %v4092_v13 = vadd.f32 %v4084_v5, %v4043_v12  ;;  %v4093_v17 = vadd.f32 %v4085_v2, %v4044_v22 }
 0x44b   : >>> { %v4094_v24 = vadd.f32 %v4086_v52, %v4045_v9  ;;  %v4117_v48 = vadd.f32 %v4109_v42, %v4068_v55  ;;  %v4118_v56 = vadd.f32 %v4110_v18, %v4069_v25  ;;  %v4119_v26 = vadd.f32 %v4111_v60, %v4070_v23 }
 0x44c   : >>> { %v4120_v63 = vadd.f32 %v4112_v45, %v4071_v28  ;;  %v4121_v29 = vadd.f32 %v4113_v1, %v4072_v20  ;;  %v4122_v59 = vadd.f32 %v4114_v6, %v4073_v49  ;;  %v4123_v3 = vadd.f32 %v4115_v58, %v4074_v40  ;;  %v10263_v40 = vld [vmem:[%s9852_s24 + $0x170] sm:$0xff] }
 0x44d   : >>> { %v4124_v7 = vadd.f32 %v4116_v44, %v4075_v36  ;;  %v4127_v27 = vstv %s10222_s21  ;;  %v4157_v55 = vstv %s10229_s22  ;;  %v4176_v25 = vstv %s10232_s23  ;;  %s4401_s21 = sadd.s32 18, %s9838_s12  ;;  %s10353_s22 = sld [smem:[#allocation13 + %s4371_s10]] }
 0x44e   : >>> { %v4128_v8 = vmul.f32 %v10159_v54, %v4127_v27  ;;  %v4129_v32 = vmul.f32 %v10162_v35, %v4127_v27  ;;  %v4130_v12 = vmul.f32 %v10165_v57, %v4127_v27  ;;  %v4131_v22 = vmul.f32 %v10172_v43, %v4127_v27  ;;  %s10361_s23 = sld [smem:[#allocation13 + %s4401_s21]] }
 0x44f   : >>> { %v4132_v9 = vmul.f32 %v10175_v46, %v4127_v27  ;;  %v4206_v23 = vstv %s10240_s25  ;;  %v4133_v28 = vmul.f32 %v10178_v53, %v4127_v27  ;;  %v4134_v20 = vmul.f32 %v10209_v0, %v4127_v27  ;;  %s4420_s25 = sadd.s32 18, %s9842_s16  ;;  %s10461_s21 = sld [smem:[#allocation13 + %s4549_s0]] }
 0x450   : >>> { %v4135_v49 = vmul.f32 %v10238_v37, %v4127_v27  ;;  %v4136_v54 = vadd.f32 %v4128_v8, %v4087_v62  ;;  %v4137_v36 = vadd.f32 %v4129_v32, %v4088_v10  ;;  %v4138_v38 = vadd.f32 %v4130_v12, %v4089_v50  ;;  %s10397_s3 = sld [smem:[#allocation13 + %s4420_s25]]  ;;  %s4647_s25 = sadd.s32 23, %s9838_s12 }
 0x451   : >>> { %v4139_v5 = vadd.f32 %v4131_v22, %v4090_v30  ;;  %v4140_v2 = vadd.f32 %v4132_v9, %v4091_v33  ;;  %v4158_v52 = vmul.f32 %v10162_v35, %v4157_v55  ;;  %v4159_v42 = vmul.f32 %v10165_v57, %v4157_v55  ;;  %v6037_v9 = vld [vmem:[%s9852_s24 + $0x178] sm:$0xff]  ;;  %s6139_s0 = sshll.u32 (%p10607_p1), %s6917_s14, 2 }
 0x452   : >>> { %v4160_v18 = vmul.f32 %v10172_v43, %v4157_v55  ;;  %v4161_v60 = vmul.f32 %v10175_v46, %v4157_v55  ;;  %v4162_v45 = vmul.f32 %v10178_v53, %v4157_v55  ;;  %v4163_v62 = vmul.f32 %v10209_v0, %v4157_v55 }
 0x453   : >>> { %v4164_v10 = vmul.f32 %v10238_v37, %v4157_v55  ;;  %v4165_v50 = vmul.f32 %v10263_v40, %v4157_v55  ;;  %v4141_v30 = vadd.f32 %v4133_v28, %v4092_v13  ;;  %v4142_v33 = vadd.f32 %v4134_v20, %v4093_v17 }
 0x454   : >>> { %v4143_v1 = vadd.f32 %v4135_v49, %v4094_v24  ;;  %v4166_v6 = vadd.f32 %v4158_v52, %v4117_v48  ;;  %v4167_v58 = vadd.f32 %v4159_v42, %v4118_v56  ;;  %v4168_v44 = vadd.f32 %v4160_v18, %v4119_v26 }
 0x455   : >>> { %v4169_v27 = vadd.f32 %v4161_v60, %v4120_v63  ;;  %v4170_v8 = vadd.f32 %v4162_v45, %v4121_v29  ;;  %v4177_v32 = vmul.f32 %v10162_v35, %v4176_v25  ;;  %v4178_v12 = vmul.f32 %v10165_v57, %v4176_v25 }
 0x456   : >>> { %v4179_v22 = vmul.f32 %v10172_v43, %v4176_v25  ;;  %v4180_v13 = vmul.f32 %v10175_v46, %v4176_v25  ;;  %v4171_v17 = vadd.f32 %v4163_v62, %v4122_v59  ;;  %v4172_v24 = vadd.f32 %v4164_v10, %v4123_v3 }
 0x457   : >>> { %v4173_v48 = vadd.f32 %v4165_v50, %v4124_v7  ;;  %v4181_v56 = vmul.f32 %v10178_v53, %v4176_v25  ;;  %v4182_v26 = vmul.f32 %v10209_v0, %v4176_v25  ;;  %v4183_v63 = vmul.f32 %v10238_v37, %v4176_v25 }
 0x458   : >>> { %v4184_v35 = vmul.f32 %v10263_v40, %v4176_v25  ;;  %v4185_v29 = vadd.f32 %v4177_v32, %v4136_v54  ;;  %v4186_v55 = vadd.f32 %v4178_v12, %v4137_v36  ;;  %v4187_v28 = vadd.f32 %v4179_v22, %v4138_v38 }
 0x459   : >>> { %v4188_v20 = vadd.f32 %v4180_v13, %v4139_v5  ;;  %v4189_v59 = vadd.f32 %v4181_v56, %v4140_v2  ;;  %v4207_v3 = vmul.f32 %v10165_v57, %v4206_v23  ;;  %v4208_v7 = vmul.f32 %v10172_v43, %v4206_v23  ;;  %v10318_v13 = vld [vmem:[%s9852_s24 + $0x1a0] sm:$0xff]  ;;  %v10326_v56 = vld [vmem:[%s9852_s24 + $0x1a8] sm:$0xff] }
 0x45a   : >>> { %v4209_v49 = vmul.f32 %v10175_v46, %v4206_v23  ;;  %v4210_v52 = vmul.f32 %v10178_v53, %v4206_v23  ;;  %v4211_v42 = vmul.f32 %v10209_v0, %v4206_v23  ;;  %v4212_v25 = vmul.f32 %v10238_v37, %v4206_v23 }
 0x45b   : >>> { %v4213_v54 = vmul.f32 %v10263_v40, %v4206_v23  ;;  %v4214_v36 = vmul.f32 %v6037_v9, %v4206_v23  ;;  %v4190_v38 = vadd.f32 %v4182_v26, %v4141_v30  ;;  %v4191_v5 = vadd.f32 %v4183_v63, %v4142_v33  ;;  %v6040_v23 = vld [vmem:[%s9852_s24 + $0x180] sm:$0xff]  ;;  %v10329_v26 = vld [vmem:[%s9852_s24 + $0x1b0] sm:$0xff]  ;;  %v10332_v63 = vld [vmem:[%s9852_s24 + $0x1b8] sm:$0xff] }
 0x45c   : >>> { %v4192_v2 = vadd.f32 %v4184_v35, %v4143_v1  ;;  %v4215_v18 = vadd.f32 %v4207_v3, %v4166_v6  ;;  %v4216_v60 = vadd.f32 %v4208_v7, %v4167_v58  ;;  %v4217_v45 = vadd.f32 %v4209_v49, %v4168_v44  ;;  %v10308_v58 = vld [vmem:[%s9852_s24 + $0x188] sm:$0xff]  ;;  %v10311_v44 = vld [vmem:[%s9852_s24 + $0x190] sm:$0xff] }
 0x45d   : >>> { %v4218_v62 = vadd.f32 %v4210_v52, %v4169_v27  ;;  %v4219_v10 = vadd.f32 %v4211_v42, %v4170_v8  ;;  %v4220_v50 = vadd.f32 %v4212_v25, %v4171_v17  ;;  %v4221_v32 = vadd.f32 %v4213_v54, %v4172_v24  ;;  %v10314_v27 = vld [vmem:[%s9852_s24 + $0x198] sm:$0xff] }
 0x45e   : >>> { %v4222_v12 = vadd.f32 %v4214_v36, %v4173_v48  ;;  %v4225_v22 = vstv %s10276_s26  ;;  %v4275_v17 = vstv %s10286_s4  ;;  %v4305_v24 = vstv %s10292_s28  ;;  %s4500_s26 = sadd.s32 20, %s9838_s12  ;;  %s4519_s28 = sadd.s32 20, %s9842_s16 }
 0x45f   : >>> { %v4226_v30 = vmul.f32 %v10165_v57, %v4225_v22  ;;  %v4227_v33 = vmul.f32 %v10172_v43, %v4225_v22  ;;  %v4228_v1 = vmul.f32 %v10175_v46, %v4225_v22  ;;  %v4229_v6 = vmul.f32 %v10178_v53, %v4225_v22  ;;  %s10415_s4 = sld [smem:[#allocation13 + %s4500_s26]] }
 0x460   : >>> { %v4230_v8 = vmul.f32 %v10209_v0, %v4225_v22  ;;  %v4256_v57 = vstv %s10283_s18  ;;  %v4231_v43 = vmul.f32 %v10238_v37, %v4225_v22  ;;  %v4232_v46 = vmul.f32 %v10263_v40, %v4225_v22  ;;  %s10407_s18 = sld [smem:[#allocation13 + %s4469_s19]] }
 0x461   : >>> { %v4233_v48 = vmul.f32 %v6037_v9, %v4225_v22  ;;  %v4234_v53 = vadd.f32 %v4226_v30, %v4185_v29  ;;  %v4235_v0 = vadd.f32 %v4227_v33, %v4186_v55  ;;  %v4236_v35 = vadd.f32 %v4228_v1, %v4187_v28  ;;  %s10450_s10 = sld [smem:[#allocation13 + %s4519_s28]]  ;;  %s6138_s28 = sshll.u32 (%p10607_p1), %s6921_s8, 5 }
 0x462   : >>> { %v4237_v3 = vadd.f32 %v4229_v6, %v4188_v20  ;;  %v4238_v7 = vadd.f32 %v4230_v8, %v4189_v59  ;;  %v4257_v49 = vmul.f32 %v6040_v23, %v4256_v57  ;;  %v4258_v52 = vmul.f32 %v10308_v58, %v4256_v57  ;;  %s10535_s26 = sld [smem:[#allocation13 + %s4647_s25]]  ;;  %s2211_s8 = sadd.s32 (%p10607_p1), 1, %s6921_s8  }
 0x463   : >>> { %v4259_v37 = vmul.f32 %v10311_v44, %v4256_v57  ;;  %v4260_v40 = vmul.f32 %v10314_v27, %v4256_v57  ;;  %v4261_v29 = vmul.f32 %v10318_v13, %v4256_v57  ;;  %v4262_v9 = vmul.f32 %v10326_v56, %v4256_v57  ;;  %p2208_p2 = scmp.ge.s32.totalorder (%p10607_p1), %s2211_s8, 8  }
 0x464   : >>> { %v4263_v42 = vmul.f32 %v10329_v26, %v4256_v57  ;;  %v4264_v55 = vmul.f32 %v10332_v63, %v4256_v57  ;;  %v4239_v28 = vadd.f32 %v4231_v43, %v4190_v38  ;;  %v4240_v20 = vadd.f32 %v4232_v46, %v4191_v5 }
 0x465   : >>> { %v4241_v59 = vadd.f32 %v4233_v48, %v4192_v2  ;;  %v4265_v25 = vadd.f32 %v4257_v49, %v4215_v18  ;;  %v4266_v54 = vadd.f32 %v4258_v52, %v4216_v60  ;;  %v4267_v36 = vadd.f32 %v4259_v37, %v4217_v45 }
 0x466   : >>> { %v4268_v22 = vadd.f32 %v4260_v40, %v4218_v62  ;;  %v4269_v30 = vadd.f32 %v4261_v29, %v4219_v10  ;;  %v4276_v33 = vmul.f32 %v6040_v23, %v4275_v17  ;;  %v4277_v1 = vmul.f32 %v10308_v58, %v4275_v17  ;;  %v10359_v23 = vld [vmem:[%s9852_s24 + $0x1c0] sm:$0xff] }
 0x467   : >>> { %v4278_v6 = vmul.f32 %v10311_v44, %v4275_v17  ;;  %v4279_v8 = vmul.f32 %v10314_v27, %v4275_v17  ;;  %v4270_v38 = vadd.f32 %v4262_v9, %v4220_v50  ;;  %v4271_v5 = vadd.f32 %v4263_v42, %v4221_v32 }
 0x468   : >>> { %v4272_v2 = vadd.f32 %v4264_v55, %v4222_v12  ;;  %v4280_v18 = vmul.f32 %v10318_v13, %v4275_v17  ;;  %v4281_v60 = vmul.f32 %v10326_v56, %v4275_v17  ;;  %v4282_v45 = vmul.f32 %v10329_v26, %v4275_v17 }
 0x469   : >>> { %v4283_v62 = vmul.f32 %v10332_v63, %v4275_v17  ;;  %v4284_v10 = vadd.f32 %v4276_v33, %v4234_v53  ;;  %v4285_v57 = vadd.f32 %v4277_v1, %v4235_v0  ;;  %v4286_v43 = vadd.f32 %v4278_v6, %v4236_v35 }
 0x46a   : >>> { %v4287_v50 = vadd.f32 %v4279_v8, %v4237_v3  ;;  %v4288_v32 = vadd.f32 %v4280_v18, %v4238_v7  ;;  %v4306_v12 = vmul.f32 %v10308_v58, %v4305_v24  ;;  %v4307_v46 = vmul.f32 %v10311_v44, %v4305_v24 }
 0x46b   : >>> { %v4308_v48 = vmul.f32 %v10314_v27, %v4305_v24  ;;  %v4309_v49 = vmul.f32 %v10318_v13, %v4305_v24  ;;  %v4310_v17 = vmul.f32 %v10326_v56, %v4305_v24  ;;  %v4311_v53 = vmul.f32 %v10329_v26, %v4305_v24 }
 0x46c   : >>> { %v4312_v52 = vmul.f32 %v10332_v63, %v4305_v24  ;;  %v4313_v0 = vmul.f32 %v10359_v23, %v4305_v24  ;;  %v4289_v35 = vadd.f32 %v4281_v60, %v4239_v28  ;;  %v4290_v3 = vadd.f32 %v4282_v45, %v4240_v20 }
 0x46d   : >>> { %v4291_v7 = vadd.f32 %v4283_v62, %v4241_v59  ;;  %v4314_v37 = vadd.f32 %v4306_v12, %v4265_v25  ;;  %v4315_v40 = vadd.f32 %v4307_v46, %v4266_v54  ;;  %v4316_v29 = vadd.f32 %v4308_v48, %v4267_v36 }
 0x46e   : >>> { %v4317_v9 = vadd.f32 %v4309_v49, %v4268_v22  ;;  %v4318_v42 = vadd.f32 %v4310_v17, %v4269_v30  ;;  %v4319_v55 = vadd.f32 %v4311_v53, %v4270_v38  ;;  %v4320_v33 = vadd.f32 %v4312_v52, %v4271_v5  ;;  %v10384_v5 = vld [vmem:[%s9852_s24 + $0x1c8] sm:$0xff] }
 0x46f   : >>> { %v4321_v1 = vadd.f32 %v4313_v0, %v4272_v2  ;;  %v4324_v6 = vstv %s10344_s20  ;;  %v4354_v25 = vstv %s10350_s1  ;;  %v4373_v54 = vstv %s10353_s22  ;;  %s4598_s20 = sadd.s32 22, %s9838_s12  ;;  %s10473_s1 = sld [smem:[#allocation13 + %s4568_s11]] }
 0x470   : >>> { %v4325_v8 = vmul.f32 %v10308_v58, %v4324_v6  ;;  %v4326_v24 = vmul.f32 %v10311_v44, %v4324_v6  ;;  %v4327_v28 = vmul.f32 %v10314_v27, %v4324_v6  ;;  %v4328_v20 = vmul.f32 %v10318_v13, %v4324_v6  ;;  %s10486_s22 = sld [smem:[#allocation13 + %s4598_s20]] }
 0x471   : >>> { %v4329_v59 = vmul.f32 %v10326_v56, %v4324_v6  ;;  %v4403_v36 = vstv %s10361_s23  ;;  %v4330_v22 = vmul.f32 %v10329_v26, %v4324_v6  ;;  %v4331_v30 = vmul.f32 %v10332_v63, %v4324_v6  ;;  %s4617_s23 = sadd.s32 22, %s9842_s16  ;;  %s4768_s11 = sld [smem:[#allocation14 + %s8812_s5]] (%p10607_p1) }
 0x472   : >>> { %v4332_v38 = vmul.f32 %v10359_v23, %v4324_v6  ;;  %v4333_v58 = vadd.f32 %v4325_v8, %v4284_v10  ;;  %v4334_v2 = vadd.f32 %v4326_v24, %v4285_v57  ;;  %v4335_v18 = vadd.f32 %v4327_v28, %v4286_v43  ;;  %s10528_s19 = sld [smem:[#allocation13 + %s4617_s23]] }
 0x473   : >>> { %v4336_v60 = vadd.f32 %v4328_v20, %v4287_v50  ;;  %v4337_v45 = vadd.f32 %v4329_v59, %v4288_v32  ;;  %v4355_v62 = vmul.f32 %v10311_v44, %v4354_v25  ;;  %v4356_v12 = vmul.f32 %v10314_v27, %v4354_v25  ;;  %v10413_v59 = vld [vmem:[%s9852_s24 + $0x1d0] sm:$0xff] }
 0x474   : >>> { %v4357_v46 = vmul.f32 %v10318_v13, %v4354_v25  ;;  %v4358_v48 = vmul.f32 %v10326_v56, %v4354_v25  ;;  %v4359_v49 = vmul.f32 %v10329_v26, %v4354_v25  ;;  %v4360_v10 = vmul.f32 %v10332_v63, %v4354_v25 }
 0x475   : >>> { %v4361_v57 = vmul.f32 %v10359_v23, %v4354_v25  ;;  %v4362_v43 = vmul.f32 %v10384_v5, %v4354_v25  ;;  %v4338_v50 = vadd.f32 %v4330_v22, %v4289_v35  ;;  %v4339_v32 = vadd.f32 %v4331_v30, %v4290_v3 }
 0x476   : >>> { %v4340_v17 = vadd.f32 %v4332_v38, %v4291_v7  ;;  %v4363_v53 = vadd.f32 %v4355_v62, %v4314_v37  ;;  %v4364_v52 = vadd.f32 %v4356_v12, %v4315_v40  ;;  %v4365_v0 = vadd.f32 %v4357_v46, %v4316_v29 }
 0x477   : >>> { %v4366_v6 = vadd.f32 %v4358_v48, %v4317_v9  ;;  %v4367_v8 = vadd.f32 %v4359_v49, %v4318_v42  ;;  %v4374_v24 = vmul.f32 %v10311_v44, %v4373_v54  ;;  %v4375_v28 = vmul.f32 %v10314_v27, %v4373_v54 }
 0x478   : >>> { %v4376_v20 = vmul.f32 %v10318_v13, %v4373_v54  ;;  %v4377_v35 = vmul.f32 %v10326_v56, %v4373_v54  ;;  %v4368_v3 = vadd.f32 %v4360_v10, %v4319_v55  ;;  %v4369_v7 = vadd.f32 %v4361_v57, %v4320_v33 }
 0x479   : >>> { %v4370_v37 = vadd.f32 %v4362_v43, %v4321_v1  ;;  %v4378_v40 = vmul.f32 %v10329_v26, %v4373_v54  ;;  %v4379_v29 = vmul.f32 %v10332_v63, %v4373_v54  ;;  %v4380_v9 = vmul.f32 %v10359_v23, %v4373_v54 }
 0x47a   : >>> { %v4381_v44 = vmul.f32 %v10384_v5, %v4373_v54  ;;  %v4382_v42 = vadd.f32 %v4374_v24, %v4333_v58  ;;  %v4383_v25 = vadd.f32 %v4375_v28, %v4334_v2  ;;  %v4384_v22 = vadd.f32 %v4376_v20, %v4335_v18 }
 0x47b   : >>> { %v4385_v55 = vadd.f32 %v4377_v35, %v4336_v60  ;;  %v4386_v33 = vadd.f32 %v4378_v40, %v4337_v45  ;;  %v4404_v1 = vmul.f32 %v10314_v27, %v4403_v36  ;;  %v4405_v30 = vmul.f32 %v10318_v13, %v4403_v36 }
 0x47c   : >>> { %v4406_v38 = vmul.f32 %v10326_v56, %v4403_v36  ;;  %v4407_v62 = vmul.f32 %v10329_v26, %v4403_v36  ;;  %v4408_v54 = vmul.f32 %v10332_v63, %v4403_v36  ;;  %v4409_v58 = vmul.f32 %v10359_v23, %v4403_v36 }
 0x47d   : >>> { %v4410_v12 = vmul.f32 %v10384_v5, %v4403_v36  ;;  %v4411_v2 = vmul.f32 %v10413_v59, %v4403_v36  ;;  %v4387_v18 = vadd.f32 %v4379_v29, %v4338_v50  ;;  %v4388_v60 = vadd.f32 %v4380_v9, %v4339_v32 }
 0x47e   : >>> { %v4389_v45 = vadd.f32 %v4381_v44, %v4340_v17  ;;  %v4412_v46 = vadd.f32 %v4404_v1, %v4363_v53  ;;  %v4413_v48 = vadd.f32 %v4405_v30, %v4364_v52  ;;  %v4414_v49 = vadd.f32 %v4406_v38, %v4365_v0 }
 0x47f   : >>> { %v4415_v10 = vadd.f32 %v4407_v62, %v4366_v6  ;;  %v4416_v57 = vadd.f32 %v4408_v54, %v4367_v8  ;;  %v4417_v43 = vadd.f32 %v4409_v58, %v4368_v3  ;;  %v4418_v24 = vadd.f32 %v4410_v12, %v4369_v7  ;;  %v6087_v7 = vld [vmem:[%s9852_s24 + $0x1d8] sm:$0xff] }
 0x480   : >>> { %v4419_v28 = vadd.f32 %v4411_v2, %v4370_v37  ;;  %v4422_v20 = vstv %s10397_s3  ;;  %v4452_v53 = vstv %s10404_s27  ;;  %v4471_v52 = vstv %s10407_s18  ;;  %s4696_s3 = sadd.s32 24, %s9838_s12  ;;  %s10538_s27 = sld [smem:[#allocation13 + %s4666_s13]] }
 0x481   : >>> { %v4423_v35 = vmul.f32 %v10314_v27, %v4422_v20  ;;  %v4424_v36 = vmul.f32 %v10318_v13, %v4422_v20  ;;  %v4425_v50 = vmul.f32 %v10326_v56, %v4422_v20  ;;  %v4426_v32 = vmul.f32 %v10329_v26, %v4422_v20  ;;  %s10546_s12 = sld [smem:[#allocation13 + %s4696_s3]]  ;;  %s4715_s18 = sadd.s32 24, %s9842_s16 }
 0x482   : >>> { %v4427_v17 = vmul.f32 %v10332_v63, %v4422_v20  ;;  %v10434_v0 = vstv %s10415_s4  ;;  %v4428_v6 = vmul.f32 %v10359_v23, %v4422_v20  ;;  %v4429_v8 = vmul.f32 %v10384_v5, %v4422_v20  ;;  %s10584_s4 = sld [smem:[#allocation13 + %s4715_s18]] }
 0x483   : >>> { %v4430_v3 = vmul.f32 %v10413_v59, %v4422_v20  ;;  %v4431_v27 = vadd.f32 %v4423_v35, %v4382_v42  ;;  %v4432_v37 = vadd.f32 %v4424_v36, %v4383_v25  ;;  %v4433_v40 = vadd.f32 %v4425_v50, %v4384_v22 }
 0x484   : >>> { %v4434_v29 = vadd.f32 %v4426_v32, %v4385_v55  ;;  %v4435_v9 = vadd.f32 %v4427_v17, %v4386_v33  ;;  %v4453_v44 = vmul.f32 %v10318_v13, %v4452_v53  ;;  %v4454_v1 = vmul.f32 %v10326_v56, %v4452_v53 }
 0x485   : >>> { %v4455_v30 = vmul.f32 %v10329_v26, %v4452_v53  ;;  %v4456_v38 = vmul.f32 %v10332_v63, %v4452_v53  ;;  %v4457_v62 = vmul.f32 %v10359_v23, %v4452_v53  ;;  %v4458_v42 = vmul.f32 %v10384_v5, %v4452_v53 }
 0x486   : >>> { %v4459_v25 = vmul.f32 %v10413_v59, %v4452_v53  ;;  %v4460_v22 = vmul.f32 %v6087_v7, %v4452_v53  ;;  %v4436_v55 = vadd.f32 %v4428_v6, %v4387_v18  ;;  %v4437_v33 = vadd.f32 %v4429_v8, %v4388_v60  ;;  %v10478_v6 = vld [vmem:[%s9852_s24 + $0x208] sm:$0xff] }
 0x487   : >>> { %v4438_v54 = vadd.f32 %v4430_v3, %v4389_v45  ;;  %v4461_v58 = vadd.f32 %v4453_v44, %v4412_v46  ;;  %v4462_v12 = vadd.f32 %v4454_v1, %v4413_v48  ;;  %v4463_v2 = vadd.f32 %v4455_v30, %v4414_v49  ;;  %v6090_v45 = vld [vmem:[%s9852_s24 + $0x1e0] sm:$0xff]  ;;  %v10459_v46 = vld [vmem:[%s9852_s24 + $0x1e8] sm:$0xff] }
 0x488   : >>> { %v4464_v20 = vadd.f32 %v4456_v38, %v4415_v10  ;;  %v4465_v35 = vadd.f32 %v4457_v62, %v4416_v57  ;;  %v4472_v36 = vmul.f32 %v10318_v13, %v4471_v52  ;;  %v4473_v50 = vmul.f32 %v10326_v56, %v4471_v52  ;;  %v10465_v13 = vld [vmem:[%s9852_s24 + $0x1f0] sm:$0xff]  ;;  %v10468_v56 = vld [vmem:[%s9852_s24 + $0x1f8] sm:$0xff] }
 0x489   : >>> { %v4474_v18 = vmul.f32 %v10329_v26, %v4471_v52  ;;  %v4475_v60 = vmul.f32 %v10332_v63, %v4471_v52  ;;  %v4466_v48 = vadd.f32 %v4458_v42, %v4417_v43  ;;  %v4467_v49 = vadd.f32 %v4459_v25, %v4418_v24  ;;  %v10471_v26 = vld [vmem:[%s9852_s24 + $0x200] sm:$0xff]  ;;  %v10481_v43 = vld [vmem:[%s9852_s24 + $0x210] sm:$0xff]  ;;  %v10484_v24 = vld [vmem:[%s9852_s24 + $0x218] sm:$0xff] }
 0x48a   : >>> { %v4468_v10 = vadd.f32 %v4460_v22, %v4419_v28  ;;  %v4476_v57 = vmul.f32 %v10359_v23, %v4471_v52  ;;  %v4477_v63 = vmul.f32 %v10384_v5, %v4471_v52  ;;  %v4478_v32 = vmul.f32 %v10413_v59, %v4471_v52 }
 0x48b   : >>> { %v4479_v17 = vmul.f32 %v6087_v7, %v4471_v52  ;;  %v4480_v53 = vadd.f32 %v4472_v36, %v4431_v27  ;;  %v4481_v23 = vadd.f32 %v4473_v50, %v4432_v37  ;;  %v4482_v28 = vadd.f32 %v4474_v18, %v4433_v40 }
 0x48c   : >>> { %v4483_v8 = vadd.f32 %v4475_v60, %v4434_v29  ;;  %v4484_v3 = vadd.f32 %v4476_v57, %v4435_v9  ;;  %v4503_v44 = vmul.f32 %v6090_v45, %v10434_v0  ;;  %v4504_v5 = vmul.f32 %v10459_v46, %v10434_v0 }
 0x48d   : >>> { %v4505_v59 = vmul.f32 %v10465_v13, %v10434_v0  ;;  %v4506_v52 = vmul.f32 %v10468_v56, %v10434_v0  ;;  %v4507_v27 = vmul.f32 %v10471_v26, %v10434_v0  ;;  %v4508_v7 = vmul.f32 %v10478_v6, %v10434_v0 }
 0x48e   : >>> { %v4509_v37 = vmul.f32 %v10481_v43, %v10434_v0  ;;  %v4510_v40 = vmul.f32 %v10484_v24, %v10434_v0  ;;  %v4485_v29 = vadd.f32 %v4477_v63, %v4436_v55  ;;  %v4486_v9 = vadd.f32 %v4478_v32, %v4437_v33 }
 0x48f   : >>> { %v4487_v1 = vadd.f32 %v4479_v17, %v4438_v54  ;;  %v4511_v30 = vadd.f32 %v4503_v44, %v4461_v58  ;;  %v4512_v38 = vadd.f32 %v4504_v5, %v4462_v12  ;;  %v4513_v62 = vadd.f32 %v4505_v59, %v4463_v2 }
 0x490   : >>> { %v4514_v42 = vadd.f32 %v4506_v52, %v4464_v20  ;;  %v4515_v25 = vadd.f32 %v4507_v27, %v4465_v35  ;;  %v4516_v22 = vadd.f32 %v4508_v7, %v4466_v48  ;;  %v4517_v36 = vadd.f32 %v4509_v37, %v4467_v49  ;;  %v10515_v48 = vld [vmem:[%s9852_s24 + $0x220] sm:$0xff] }
 0x491   : >>> { %v4518_v50 = vadd.f32 %v4510_v40, %v4468_v10  ;;  %v4521_v18 = vstv %s10450_s10  ;;  %v4551_v54 = vstv %s10461_s21  ;;  %v4570_v58 = vstv %s10473_s1  ;;  %s10652_s10 = sadd.s32 (%p10607_p1), %s6139_s0, %s6138_s28 }
 0x492   : >>> { %v4522_v60 = vmul.f32 %v6090_v45, %v4521_v18  ;;  %v4523_v57 = vmul.f32 %v10459_v46, %v4521_v18  ;;  %v4524_v0 = vmul.f32 %v10465_v13, %v4521_v18  ;;  %v4525_v55 = vmul.f32 %v10468_v56, %v4521_v18 }
 0x493   : >>> { %v4526_v33 = vmul.f32 %v10471_v26, %v4521_v18  ;;  %v4600_v12 = vstv %s10486_s22  ;;  %v4527_v2 = vmul.f32 %v10478_v6, %v4521_v18  ;;  %v4528_v20 = vmul.f32 %v10481_v43, %v4521_v18 }
 0x494   : >>> { %v4529_v35 = vmul.f32 %v10484_v24, %v4521_v18  ;;  %v4530_v45 = vadd.f32 %v4522_v60, %v4480_v53  ;;  %v4531_v49 = vadd.f32 %v4523_v57, %v4481_v23  ;;  %v4532_v10 = vadd.f32 %v4524_v0, %v4482_v28 }
 0x495   : >>> { %v4533_v63 = vadd.f32 %v4525_v55, %v4483_v8  ;;  %v4534_v32 = vadd.f32 %v4526_v33, %v4484_v3  ;;  %v4552_v17 = vmul.f32 %v10459_v46, %v4551_v54  ;;  %v4553_v44 = vmul.f32 %v10465_v13, %v4551_v54  ;;  %v10544_v33 = vld [vmem:[%s9852_s24 + $0x228] sm:$0xff] }
 0x496   : >>> { %v4554_v5 = vmul.f32 %v10468_v56, %v4551_v54  ;;  %v4555_v59 = vmul.f32 %v10471_v26, %v4551_v54  ;;  %v4556_v52 = vmul.f32 %v10478_v6, %v4551_v54  ;;  %v4557_v53 = vmul.f32 %v10481_v43, %v4551_v54 }
 0x497   : >>> { %v4558_v23 = vmul.f32 %v10484_v24, %v4551_v54  ;;  %v4559_v28 = vmul.f32 %v10515_v48, %v4551_v54  ;;  %v4535_v8 = vadd.f32 %v4527_v2, %v4485_v29  ;;  %v4536_v3 = vadd.f32 %v4528_v20, %v4486_v9 }
 0x498   : >>> { %v4537_v27 = vadd.f32 %v4529_v35, %v4487_v1  ;;  %v4560_v7 = vadd.f32 %v4552_v17, %v4511_v30  ;;  %v4561_v37 = vadd.f32 %v4553_v44, %v4512_v38  ;;  %v4562_v40 = vadd.f32 %v4554_v5, %v4513_v62 }
 0x499   : >>> { %v4563_v18 = vadd.f32 %v4555_v59, %v4514_v42  ;;  %v4564_v60 = vadd.f32 %v4556_v52, %v4515_v25  ;;  %v4571_v57 = vmul.f32 %v10459_v46, %v4570_v58  ;;  %v4572_v0 = vmul.f32 %v10465_v13, %v4570_v58 }
 0x49a   : >>> { %v4573_v55 = vmul.f32 %v10468_v56, %v4570_v58  ;;  %v4574_v29 = vmul.f32 %v10471_v26, %v4570_v58  ;;  %v4565_v9 = vadd.f32 %v4557_v53, %v4516_v22  ;;  %v4566_v1 = vadd.f32 %v4558_v23, %v4517_v36 }
 0x49b   : >>> { %v4567_v30 = vadd.f32 %v4559_v28, %v4518_v50  ;;  %v4575_v38 = vmul.f32 %v10478_v6, %v4570_v58  ;;  %v4576_v62 = vmul.f32 %v10481_v43, %v4570_v58  ;;  %v4577_v42 = vmul.f32 %v10484_v24, %v4570_v58 }
 0x49c   : >>> { %v4578_v46 = vmul.f32 %v10515_v48, %v4570_v58  ;;  %v4579_v25 = vadd.f32 %v4571_v57, %v4530_v45  ;;  %v4580_v54 = vadd.f32 %v4572_v0, %v4531_v49  ;;  %v4581_v2 = vadd.f32 %v4573_v55, %v4532_v10 }
 0x49d   : >>> { %v4582_v22 = vadd.f32 %v4574_v29, %v4533_v63  ;;  %v4583_v36 = vadd.f32 %v4575_v38, %v4534_v32  ;;  %v4601_v50 = vmul.f32 %v10465_v13, %v4600_v12  ;;  %v4602_v20 = vmul.f32 %v10468_v56, %v4600_v12 }
 0x49e   : >>> { %v4603_v35 = vmul.f32 %v10471_v26, %v4600_v12  ;;  %v4604_v17 = vmul.f32 %v10478_v6, %v4600_v12  ;;  %v4605_v58 = vmul.f32 %v10481_v43, %v4600_v12  ;;  %v4606_v45 = vmul.f32 %v10484_v24, %v4600_v12 }
 0x49f   : >>> { %v4607_v44 = vmul.f32 %v10515_v48, %v4600_v12  ;;  %v4608_v49 = vmul.f32 %v10544_v33, %v4600_v12  ;;  %v4584_v10 = vadd.f32 %v4576_v62, %v4535_v8  ;;  %v4585_v63 = vadd.f32 %v4577_v42, %v4536_v3 }
 0x4a0   : >>> { %v4586_v32 = vadd.f32 %v4578_v46, %v4537_v27  ;;  %v4609_v5 = vadd.f32 %v4601_v50, %v4560_v7  ;;  %v4610_v59 = vadd.f32 %v4602_v20, %v4561_v37  ;;  %v4611_v52 = vadd.f32 %v4603_v35, %v4562_v40 }
 0x4a1   : >>> { %v4612_v53 = vadd.f32 %v4604_v17, %v4563_v18  ;;  %v4613_v23 = vadd.f32 %v4605_v58, %v4564_v60  ;;  %v4614_v28 = vadd.f32 %v4606_v45, %v4565_v9  ;;  %v4615_v57 = vadd.f32 %v4607_v44, %v4566_v1 }
 0x4a2   : >>> { %v4616_v0 = vadd.f32 %v4608_v49, %v4567_v30  ;;  %v4619_v55 = vstv %s10528_s19  ;;  %v4649_v7 = vstv %s10535_s26  ;;  %v4668_v37 = vstv %s10538_s27 }
 0x4a3   : >>> { %v4620_v29 = vmul.f32 %v10465_v13, %v4619_v55  ;;  %v4621_v12 = vmul.f32 %v10468_v56, %v4619_v55  ;;  %v4622_v8 = vmul.f32 %v10471_v26, %v4619_v55  ;;  %v4623_v3 = vmul.f32 %v10478_v6, %v4619_v55  ;;  %v10569_v13 = vld [vmem:[%s9852_s24 + $0x230] sm:$0xff] }
 0x4a4   : >>> { %v4624_v27 = vmul.f32 %v10481_v43, %v4619_v55  ;;  %v4698_v40 = vstv %s10546_s12  ;;  %v4625_v18 = vmul.f32 %v10484_v24, %v4619_v55  ;;  %v4626_v60 = vmul.f32 %v10515_v48, %v4619_v55 }
 0x4a5   : >>> { %v4627_v9 = vmul.f32 %v10544_v33, %v4619_v55  ;;  %v4628_v1 = vadd.f32 %v4620_v29, %v4579_v25  ;;  %v4629_v30 = vadd.f32 %v4621_v12, %v4580_v54  ;;  %v4630_v38 = vadd.f32 %v4622_v8, %v4581_v2 }
 0x4a6   : >>> { %v4631_v62 = vadd.f32 %v4623_v3, %v4582_v22  ;;  %v4632_v42 = vadd.f32 %v4624_v27, %v4583_v36  ;;  %v4650_v46 = vmul.f32 %v10468_v56, %v4649_v7  ;;  %v4651_v50 = vmul.f32 %v10471_v26, %v4649_v7 }
 0x4a7   : >>> { %v4652_v20 = vmul.f32 %v10478_v6, %v4649_v7  ;;  %v4653_v35 = vmul.f32 %v10481_v43, %v4649_v7  ;;  %v4654_v17 = vmul.f32 %v10484_v24, %v4649_v7  ;;  %v4655_v58 = vmul.f32 %v10515_v48, %v4649_v7 }
 0x4a8   : >>> { %v4656_v25 = vmul.f32 %v10544_v33, %v4649_v7  ;;  %v4657_v45 = vmul.f32 %v10569_v13, %v4649_v7  ;;  %v4633_v54 = vadd.f32 %v4625_v18, %v4584_v10  ;;  %v4634_v2 = vadd.f32 %v4626_v60, %v4585_v63 }
 0x4a9   : >>> { %v4635_v22 = vadd.f32 %v4627_v9, %v4586_v32  ;;  %v4658_v36 = vadd.f32 %v4650_v46, %v4609_v5  ;;  %v4659_v44 = vadd.f32 %v4651_v50, %v4610_v59  ;;  %v4660_v49 = vadd.f32 %v4652_v20, %v4611_v52 }
 0x4aa   : >>> { %v4661_v55 = vadd.f32 %v4653_v35, %v4612_v53  ;;  %v4662_v29 = vadd.f32 %v4654_v17, %v4613_v23  ;;  %v4669_v12 = vmul.f32 %v10468_v56, %v4668_v37  ;;  %v4670_v8 = vmul.f32 %v10471_v26, %v4668_v37  ;;  %v6137_v53 = vld [vmem:[%s9852_s24 + $0x238] sm:$0xff]  ;;  %s4746_s24 = sld [smem:[#allocation14 + %s5653_s6]] (%p10607_p1)  ;;  %s6140_s6 = sshll.u32 (%p10607_p1), %s10652_s10, 3 }
 0x4ab   : >>> { %v4671_v3 = vmul.f32 %v10478_v6, %v4668_v37  ;;  %v4672_v27 = vmul.f32 %v10481_v43, %v4668_v37  ;;  %v4663_v7 = vadd.f32 %v4655_v58, %v4614_v28  ;;  %v4664_v10 = vadd.f32 %v4656_v25, %v4615_v57  ;;  %s4790_s5 = scalar_lea.vmem (%p10607_p1), [#allocation4], %s6140_s6 }
 0x4ac   : >>> { %v4665_v63 = vadd.f32 %v4657_v45, %v4616_v0  ;;  %v4673_v32 = vmul.f32 %v10484_v24, %v4668_v37  ;;  %v4674_v5 = vmul.f32 %v10515_v48, %v4668_v37  ;;  %v4675_v59 = vmul.f32 %v10544_v33, %v4668_v37 }
 0x4ad   : >>> { %v4676_v52 = vmul.f32 %v10569_v13, %v4668_v37  ;;  %v4677_v56 = vadd.f32 %v4669_v12, %v4628_v1  ;;  %v4678_v23 = vadd.f32 %v4670_v8, %v4629_v30  ;;  %v4679_v18 = vadd.f32 %v4671_v3, %v4630_v38 }
 0x4ae   : >>> { %v4680_v60 = vadd.f32 %v4672_v27, %v4631_v62  ;;  %v4681_v9 = vadd.f32 %v4673_v32, %v4632_v42  ;;  %v4699_v46 = vmul.f32 %v10471_v26, %v4698_v40  ;;  %v4700_v28 = vmul.f32 %v10478_v6, %v4698_v40 }
 0x4af   : >>> { %v4701_v57 = vmul.f32 %v10481_v43, %v4698_v40  ;;  %v4702_v0 = vmul.f32 %v10484_v24, %v4698_v40  ;;  %v4703_v50 = vmul.f32 %v10515_v48, %v4698_v40  ;;  %v4704_v20 = vmul.f32 %v10544_v33, %v4698_v40 }
 0x4b0   : >>> { %v4705_v37 = vmul.f32 %v10569_v13, %v4698_v40  ;;  %v4706_v1 = vmul.f32 %v6137_v53, %v4698_v40  ;;  %v4707_v30 = vadd.f32 %v4699_v46, %v4658_v36   ;;  %v4708_v38 = vadd.f32 %v4700_v28, %v4659_v44  }
 0x4b1   : >>> { %v4709_v62 = vadd.f32 %v4701_v57, %v4660_v49   ;;  %v4710_v42 = vadd.f32 %v4702_v0, %v4661_v55   ;;  %v4711_v35 = vadd.f32 %v4703_v50, %v4662_v29   ;;  %v4712_v17 = vadd.f32 %v4704_v20, %v4663_v7   ;;  %v10915_v20 = vld [vmem:[#allocation50_spill] sm:$0xff] (%p10607_p1) }
 0x4b2   : >>> { %v4713_v58 = vadd.f32 %v4705_v37, %v4664_v10   ;;  %v4714_v25 = vadd.f32 %v4706_v1, %v4665_v63   ;;  %v4682_v45 = vadd.f32 %v4674_v5, %v4633_v54  ;;  %v4683_v12 = vadd.f32 %v4675_v59, %v4634_v2 }
 0x4b3   : >>> { %v4684_v8 = vadd.f32 %v4676_v52, %v4635_v22  ;;  %v4717_v3 = vstv %s10584_s4  ;;  %v10905_v37 = vmov %v4708_v38  ;;  %v4747_v46 = vstv (%p10607_p1), %s4746_s24 }
 0x4b4   : >>> { %v4718_v27 = vmul.f32 %v10471_v26, %v4717_v3  ;;  %v4719_v32 = vmul.f32 %v10478_v6, %v4717_v3  ;;  %v4720_v51 = vmul.f32 %v10481_v43, %v4717_v3  ;;  %v4721_v40 = vmul.f32 %v10484_v24, %v4717_v3  ;;  %v10916_v37 = vld [vmem:[#allocation51_spill] sm:$0xff] (%p10607_p1) }
 0x4b5   : >>> { %v4722_v36 = vmul.f32 %v10515_v48, %v4717_v3  ;;  %v4723_v44 = vmul.f32 %v10544_v33, %v4717_v3  ;;  %v4724_v49 = vmul.f32 %v10569_v13, %v4717_v3  ;;  %v4725_v55 = vmul.f32 %v6137_v53, %v4717_v3 }
 0x4b6   : >>> { %v4726_v29 = vadd.f32 %v4718_v27, %v4677_v56   ;;  %v4727_v54 = vadd.f32 %v4719_v32, %v4678_v23   ;;  %v4728_v2 = vadd.f32 %v4720_v51, %v4679_v18   ;;  %v4729_v22 = vadd.f32 %v4721_v40, %v4680_v60  }
 0x4b7   : >>> { %v4730_v7 = vadd.f32 %v4722_v36, %v4681_v9   ;;  %v4731_v63 = vadd.f32 %v4723_v44, %v4682_v45   ;;  %v4732_v5 = vadd.f32 %v4724_v49, %v4683_v12   ;;  %v4733_v52 = vadd.f32 %v4725_v55, %v4684_v8   ;;  %3483 = sbr.rel (!%p10607_p1) target bundleno = 985 (0x3d9), region = 259 }
 0x4b8   : >>> { %v10895_v40 = vmov %v4729_v22  ;;  %v10896_v28 = vmov %v4728_v2  ;;  %v10897_v8 = vmov %v4727_v54  ;;  %v10898_v59 = vmov %v4726_v29 }
 0x4b9   : >>> { %v10891_v53 = vmov %v4733_v52  ;;  %v10892_v50 = vmov %v4732_v5  ;;  %v10893_v12 = vmov %v4731_v63  ;;  %v10894_v33 = vmov %v4730_v7 }
 0x4ba   : >>> { %v10899_v44 = vmov %v4714_v25  ;;  %v10900_v10 = vmov %v4713_v58  ;;  %v10901_v45 = vmov %v4712_v17  ;;  %v10902_v6 = vmov %v4711_v35 }
 0x4bb   : >>> { %v10903_v26 = vmov %v4710_v42  ;;  %v10904_v9 = vmov %v4709_v62  ;;  %v10906_v55 = vmov %v4707_v30  ;;  %v4734_v51 = vmax.f32 (%p10607_p1), %v4707_v30, %v4708_v38 }
 0x4bc   : >> { %v4735_v43 = vmax.f32 %v4709_v62, %v4710_v42  ;;  %v4736_v24 = vmax.f32 %v4711_v35, %v4712_v17  ;;  %v4737_v48 = vmax.f32 %v4713_v58, %v4714_v25  ;;  %v4738_v13 = vmax.f32 %v4726_v29, %v4727_v54  ;;  %s2205_s14 = sadd.s32 (%p2208_p2), 1, %s6917_s14  }
 0x4bd   : >> { %v4739_v56 = vmax.f32 %v4728_v2, %v4729_v22  ;;  %v10907_v26 = vmax.f32 %v10854_v4, %v10855_v39  ;;  %v10908_v33 = vmax.f32 %v10856_v34, %v10857_v41  ;;  %v10909_v59 = vmax.f32 %v10858_v15, %v10859_v21  ;;  %p2202_p3 = scmp.ge.s32.totalorder (%p2208_p2), %s2205_s14, 4  }
 0x4be   : >> { %v10910_v23 = vmax.f32 %v10860_v11, %v10861_v47  ;;  %v4740_v60 = vmax.f32 %v4730_v7, %v4731_v63  ;;  %v4741_v9 = vmax.f32 %v4732_v5, %v4733_v52  ;;  %v10911_v4 = vmax.f32 %v10862_v19, %v10863_v61  ;;  %v10913_v11 = vld [vmem:[#allocation49_spill] sm:$0xff] }
 0x4bf   : >> { %v4742_v6 = vmax.f32 %v10907_v26, %v4734_v51  ;;  %v4743_v10 = vmax.f32 %v10908_v33, %v4735_v43  ;;  %v4744_v53 = vmax.f32 %v10909_v59, %v4736_v24  ;;  %v10912_v34 = vmax.f32 %v10864_v14, %v10865_v16 }
 0x4c0   : >> { %v4745_v18 = vmax.f32 %v10910_v23, %v4737_v48  ;;  %v4764_v39 = vmax.f32 %v10911_v4, %v4738_v13  ;;  %v4769_v0 = vstv %s4768_s11  ;;  %v10914_v47 = vmax.f32 %v10866_v31, %v10913_v11 }
 0x4c1   : >> { %v4765_v41 = vmax.f32 %v10912_v34, %v4739_v56  ;;  %v4748_v28 = vadd.f32 %v4747_v46, %v4742_v6  ;;  %v4749_v57 = vadd.f32 %v4747_v46, %v4743_v10  ;;  %v4750_v15 = vadd.f32 %v4747_v46, %v4744_v53 }
 0x4c2   : >> { %v4751_v21 = vadd.f32 %v4747_v46, %v4745_v18  ;;  %v4766_v50 = vmax.f32 %v10914_v47, %v4740_v60  ;;  %v10917_v1 = vmax.f32 %v10915_v20, %v10916_v37  ;;  %v4770_v42 = vadd.f32 %v4769_v0, %v4764_v39 }
 0x4c3   : >> { %vm4752_vm8 = vcmp.gt.f32.partialorder %v4748_v28, 0.0  ;;  %v4756_v19 = vmul.f32 0.01, %v4748_v28  ;;  %vm4753_vm9 = vcmp.gt.f32.partialorder %v4749_v57, 0.0  ;;  %v4757_v61 = vmul.f32 0.01, %v4749_v57 }
 0x4c4   : >> { %v4767_v30 = vmax.f32 %v10917_v1, %v4741_v9  ;;  %vm4754_vm10 = vcmp.gt.f32.partialorder %v4750_v15, 0.0  ;;  %v4758_v14 = vmul.f32 0.01, %v4750_v15  ;;  %vm4755_vm11 = vcmp.gt.f32.partialorder %v4751_v21, 0.0 }
 0x4c5   : >> { %v4759_v16 = vmul.f32 0.01, %v4751_v21  ;;  %v4760_v38 = vsel %vm4752_vm8, %v4748_v28, %v4756_v19  ;;  %v4761_v62 = vsel %vm4753_vm9, %v4749_v57, %v4757_v61  ;;  %v4771_v35 = vadd.f32 %v4769_v0, %v4765_v41 }
 0x4c6   : >> { %4791 = vst [vmem:[%s4790_s5] sm:$0xff] %v4760_v38  ;;  %4792 = vst [vmem:[%s4790_s5 + $0x8] sm:$0xff] %v4761_v62  ;;  %v4762_v31 = vsel %vm4754_vm10, %v4750_v15, %v4758_v14  ;;  %v4772_v58 = vadd.f32 %v4769_v0, %v4766_v50  ;;  %v4773_v25 = vadd.f32 %v4769_v0, %v4767_v30  ;;  %vm4774_vm12 = vcmp.gt.f32.partialorder %v4770_v42, 0.0 }
 0x4c7   : >> { %v4763_v17 = vsel %vm4755_vm11, %v4751_v21, %v4759_v16  ;;  %4793 = vst [vmem:[%s4790_s5 + $0x10] sm:$0xff] %v4762_v31  ;;  %v4778_v45 = vmul.f32 0.01, %v4770_v42  ;;  %vm4775_vm13 = vcmp.gt.f32.partialorder %v4771_v35, 0.0  ;;  %v4779_v12 = vmul.f32 0.01, %v4771_v35 }
 0x4c8   : >> { %4794 = vst [vmem:[%s4790_s5 + $0x18] sm:$0xff] %v4763_v17  ;;  %vm4776_vm14 = vcmp.gt.f32.partialorder %v4772_v58, 0.0  ;;  %v4780_v8 = vmul.f32 0.01, %v4772_v58  ;;  %vm4777_vm15 = vcmp.gt.f32.partialorder %v4773_v25, 0.0  ;;  %2210 = sbr.rel (!%p2208_p2) target bundleno = 744 (0x2e8), region = 270 }
 0x4c9   : >> { %v4781_v3 = vmul.f32 0.01, %v4773_v25  ;;  %v4782_v27 = vsel %vm4774_vm12, %v4770_v42, %v4778_v45  ;;  %v4783_v32 = vsel %vm4775_vm13, %v4771_v35, %v4779_v12 }
 0x4ca   : >> { %6145 = vst [vmem:[%s4790_s5 + $0x80] sm:$0xff] %v4782_v27  ;;  %6146 = vst [vmem:[%s4790_s5 + $0x88] sm:$0xff] %v4783_v32  ;;  %v4784_v40 = vsel %vm4776_vm14, %v4772_v58, %v4780_v8 }
 0x4cb   : >> { %v4785_v36 = vsel %vm4777_vm15, %v4773_v25, %v4781_v3  ;;  %6147 = vst [vmem:[%s4790_s5 + $0x90] sm:$0xff] %v4784_v40 }
 0x4cc   : >> { %6148 = vst [vmem:[%s4790_s5 + $0x98] sm:$0xff] %v4785_v36 }
 0x4cd   :  { %2204 = sbr.rel (!%p2202_p3) target bundleno = 743 (0x2e7), region = 281  ;;  %v10685_v44 = vmov (%p2202_p3), 0.0   ;;  %v10687_v49 = vmov (%p2202_p3), 0.0   ;;  %v10689_v55 = vmov (%p2202_p3), 0.0   ;;  %v10691_v29 = vmov (%p2202_p3), 0.0   ;;  %s10705_s14 = smov (%p2202_p3), 0  }
 0x4ce   :  { %v10693_v54 = vmov (%p2202_p3), 0.0   ;;  %v10695_v2 = vmov (%p2202_p3), 0.0   ;;  %v10697_v22 = vmov (%p2202_p3), 0.0   ;;  %v10699_v7 = vmov (%p2202_p3), 0.0  }
 0x4cf   :  { %v10701_v63 = vmov (%p2202_p3), 0.0   ;;  %v10703_v5 = vmov (%p2202_p3), 0.0  }
 0x4d2 LB: > { %s6149_s8 = sshll.u32 %s7101_s14, 3  ;;  %s4822_s30 = sld [smem:[#allocation15 + %s7101_s14]]  ;;  %s7101_s14 = sphi %s10705_s14, %s4808_s14   ;;  %v7097_v5 = vphi %v10703_v5, %v10927_v5   ;;  %v7093_v63 = vphi %v10701_v63, %v10926_v63   ;;  %v7089_v7 = vphi %v10699_v7, %v10925_v7   ;;  %v7085_v22 = vphi %v10697_v22, %v10924_v22   ;;  %v7081_v2 = vphi %v10695_v2, %v10923_v2   ;;  %v7077_v54 = vphi %v10693_v54, %v10922_v54   ;;  %v7073_v29 = vphi %v10691_v29, %v10921_v29   ;;  %v7069_v55 = vphi %v10689_v55, %v10920_v55   ;;  %v7065_v49 = vphi %v10687_v49, %v10919_v49   ;;  %v7061_v44 = vphi %v10685_v44, %v10918_v44  }
 0x4d3   : > { %s4826_s15 = sadd.s32 256, %s7101_s14  ;;  %s4831_s29 = sadd.s32 512, %s7101_s14 }
 0x4d4   : > { %s4827_s17 = sld [smem:[#allocation15 + %s4826_s15]]  ;;  %s4836_s21 = sadd.s32 768, %s7101_s14 }
 0x4d5   : > { %s4832_s20 = sld [smem:[#allocation15 + %s4831_s29]]  ;;  %s4820_s1 = scalar_lea.vmem [#allocation4], %s6149_s8 }
 0x4d6   : > { %v4821_v52 = vld [vmem:[%s4820_s1] sm:$0xff]  ;;  %s4837_s22 = sld [smem:[#allocation15 + %s4836_s21]]  ;;  %s4841_s23 = sadd.s32 1024, %s7101_s14 }
 0x4d7   : > { %s4842_s25 = sld [smem:[#allocation15 + %s4841_s23]]  ;;  %s4846_s13 = sadd.s32 1280, %s7101_s14 }
 0x4d8   : > { %v4823_v51 = vstv %s4822_s30  ;;  %s4847_s19 = sld [smem:[#allocation15 + %s4846_s13]]  ;;  %s4851_s3 = sadd.s32 1536, %s7101_s14 }
 0x4d9   : > { %v4824_v43 = vmul.f32 %v4823_v51, %v4821_v52  ;;  %s4852_s26 = sld [smem:[#allocation15 + %s4851_s3]]  ;;  %s4856_s27 = sadd.s32 1792, %s7101_s14 }
 0x4da   : > { %v4828_v24 = vstv %s4827_s17  ;;  %s4857_s12 = sld [smem:[#allocation15 + %s4856_s27]]  ;;  %s4861_s18 = sadd.s32 2048, %s7101_s14 }
 0x4db   : > { %v4825_v48 = vadd.f32 %v7097_v5, %v4824_v43   ;;  %v4829_v13 = vmul.f32 %v4828_v24, %v4821_v52  ;;  %v4833_v56 = vstv %s4832_s20  ;;  %s4862_s4 = sld [smem:[#allocation15 + %s4861_s18]]  ;;  %s4866_s16 = sadd.s32 2304, %s7101_s14 }
 0x4dc   : > { %v4834_v26 = vmul.f32 %v4833_v56, %v4821_v52  ;;  %v4838_v6 = vstv %s4837_s22  ;;  %s4867_s24 = sld [smem:[#allocation15 + %s4866_s16]]  ;;  %s4808_s14 = sadd.s32 1, %s7101_s14  }
 0x4dd   : > { %v4830_v33 = vadd.f32 %v7093_v63, %v4829_v13   ;;  %v4839_v10 = vmul.f32 %v4838_v6, %v4821_v52  ;;  %v4843_v59 = vstv %s4842_s25  ;;  %p4805_p4 = scmp.ge.s32.totalorder %s4808_s14, 256   ;;  %v10927_v5 = vmov %v4825_v48 }
 0x4de   : > { %v4835_v53 = vadd.f32 %v7089_v7, %v4834_v26   ;;  %v4844_v23 = vmul.f32 %v4843_v59, %v4821_v52  ;;  %v4848_v18 = vstv %s4847_s19  ;;  %s4871_s28 = sld [smem:[#allocation17]] (%p4805_p4)  ;;  %s7113_s14 = smov (%p4805_p4), [#allocation19]  }
 0x4df   : > { %v4840_v60 = vadd.f32 %v7085_v22, %v4839_v10   ;;  %v4849_v9 = vmul.f32 %v4848_v18, %v4821_v52  ;;  %v4853_v46 = vstv %s4852_s26  ;;  %v10926_v63 = vmov %v4830_v33  ;;  %s6150_s0 = sld [smem:[#allocation17 + $0x1]] (%p4805_p4)  ;;  %s4925_s29 = sshll.u32 (%p4805_p4), %s7113_s14, 4  ;;  %s4926_s29 = int_to_ptr.vmem [resolvable:$true] %s4925_s29 }
 0x4e0   : > { %v4845_v4 = vadd.f32 %v7081_v2, %v4844_v23   ;;  %v4854_v39 = vmul.f32 %v4853_v46, %v4821_v52  ;;  %v4858_v34 = vstv %s4857_s12  ;;  %v10925_v7 = vmov %v4835_v53  ;;  %s6151_s11 = sld [smem:[#allocation17 + $0x2]] (%p4805_p4)  ;;  %s6667_s20 = scalar_lea.vmem (%p4805_p4), %s4926_s29, 1280 }
 0x4e1   : > { %v4850_v41 = vadd.f32 %v7077_v54, %v4849_v9   ;;  %v4859_v28 = vmul.f32 %v4858_v34, %v4821_v52  ;;  %v4863_v57 = vstv %s4862_s4  ;;  %v10924_v22 = vmov %v4840_v60  ;;  %s6152_s10 = sld [smem:[#allocation17 + $0x3]] (%p4805_p4)  ;;  %p6668_p5 = scmp.ne.s32.totalorder (%p4805_p4), %s4926_s29, %s6667_s20 }
 0x4e2   : > { %v4855_v15 = vadd.f32 %v7073_v29, %v4854_v39   ;;  %v4864_v21 = vmul.f32 %v4863_v57, %v4821_v52  ;;  %v4868_v0 = vstv %s4867_s24  ;;  %v10923_v2 = vmov %v4845_v4  ;;  %s6153_s6 = sld [smem:[#allocation17 + $0x4]] (%p4805_p4)  ;;  %p6672_p6 = scmp.lt.s32.totalorder (%p4805_p4), %s4926_s29, %s4926_s29 }
 0x4e3   : > { %v4860_v11 = vadd.f32 %v7069_v55, %v4859_v28   ;;  %v4869_v47 = vmul.f32 %v4868_v0, %v4821_v52  ;;  %v10922_v54 = vmov %v4850_v41  ;;  %4807 = sbr.rel (!%p4805_p4) target bundleno = 1234 (0x4d2), region = 292  ;;  %s6154_s5 = sld [smem:[#allocation17 + $0x5]] (%p4805_p4) }
 0x4e4   : > { %v4865_v50 = vadd.f32 %v7065_v49, %v4864_v21   ;;  %v10921_v29 = vmov %v4855_v15  ;;  %v4872_v37 = vstv (%p4805_p4), %s4871_s28  ;;  %s6155_s8 = sld [smem:[#allocation17 + $0x6]] (%p4805_p4)  ;;  %p6673_p7 = scmp.lt.s32.totalorder (%p4805_p4), %s6667_s20, %s6667_s20 }
 0x4e5   : > { %v4870_v20 = vadd.f32 %v7061_v44, %v4869_v47   ;;  %v10920_v55 = vmov %v4860_v11  ;;  %v4873_v1 = vadd.f32 (%p4805_p4), %v4872_v37, %v4825_v48  ;;  %v4876_v30 = vstv (%p4805_p4), %s6150_s0  ;;  %s6156_s30 = sld [smem:[#allocation17 + $0x7]] (%p4805_p4) }
 0x4e6   : > { %v10919_v49 = vmov %v4865_v50  ;;  %v4877_v19 = vadd.f32 (%p4805_p4), %v4876_v30, %v4830_v33  ;;  %v4881_v61 = vstv (%p4805_p4), %s6151_s11  ;;  %s6157_s15 = sld [smem:[#allocation17 + $0x8]] (%p4805_p4)  ;;  %p6674_p8 = por (%p4805_p4), %p6673_p7, %p6672_p6 }
 0x4e7   : > { %v10918_v44 = vmov %v4870_v20  ;;  %4874 = vst [vmem:[#allocation19] sm:$0xff] (%p4805_p4), %v4873_v1  ;;  %v4882_v14 = vadd.f32 (%p4805_p4), %v4881_v61, %v4835_v53  ;;  %v4886_v16 = vstv (%p4805_p4), %s6152_s10  ;;  %s6158_s17 = sld [smem:[#allocation17 + $0x9]] (%p4805_p4) }
 0x4e8   :  { %4879 = vst [vmem:[#allocation19 + $0x8] sm:$0xff] %v4877_v19  ;;  %v4887_v38 = vadd.f32 %v4886_v16, %v4840_v60  ;;  %v4891_v62 = vstv %s6153_s6  ;;  %p6675_p9 = pnand %p6674_p8, %p6668_p5 }
 0x4e9   :  { %4884 = vst [vmem:[#allocation19 + $0x10] sm:$0xff] %v4882_v14  ;;  %v4892_v42 = vadd.f32 %v4891_v62, %v4845_v4  ;;  %v4896_v35 = vstv %s6154_s5 }
 0x4ea   :  { %4889 = vst [vmem:[#allocation19 + $0x18] sm:$0xff] %v4887_v38  ;;  %v4897_v31 = vadd.f32 %v4896_v35, %v4850_v41  ;;  %v4901_v17 = vstv %s6155_s8 }
 0x4eb   :  { %4894 = vst [vmem:[#allocation19 + $0x20] sm:$0xff] %v4892_v42  ;;  %v4902_v58 = vadd.f32 %v4901_v17, %v4855_v15  ;;  %v4906_v25 = vstv %s6156_s30 }
 0x4ec   :  { %4899 = vst [vmem:[#allocation19 + $0x28] sm:$0xff] %v4897_v31  ;;  %v4907_v45 = vadd.f32 %v4906_v25, %v4860_v11  ;;  %v4911_v12 = vstv %s6157_s15 }
 0x4ed   :  { %4904 = vst [vmem:[#allocation19 + $0x30] sm:$0xff] %v4902_v58  ;;  %v4912_v8 = vadd.f32 %v4911_v12, %v4865_v50  ;;  %v4916_v3 = vstv %s6158_s17 }
 0x4ee   :  { %4909 = vst [vmem:[#allocation19 + $0x38] sm:$0xff] %v4907_v45  ;;  %v4917_v27 = vadd.f32 %v4916_v3, %v4870_v20 }
 0x4ef   :  { %4914 = vst [vmem:[#allocation19 + $0x40] sm:$0xff] %v4912_v8 }
 0x4f0   :  { %4919 = vst [vmem:[#allocation19 + $0x48] sm:$0xff] %v4917_v27 }
 0x4f1   :  { %6678 = shalt.err (!%p6675_p9)
}
 0x4f2   :  { %4931 = dma.vmem_to_hbm [thread:$0]  %s4926_s29, 1280, %s10767_s7, [#allocation7], %s7105_s2, %s7105_s2, %s7106_s9  }
 0x4f3   :  { %6901 = dma.done.wait [#allocation7], 1280  }
 0x4f4   :  { %6902 = vsyncadd [#allocation7], 4294966016 }
 0x4f5   :  { %4935 = vsyncpa [#allocation6], 1 }
 0x4f6   :  { %4936 = vsyncpa [#allocation7], 1 }
 0x4f7   :  { %4937 = vsyncpa [#allocation8], 1 }
 0x4f8   :  { %4938 = vsyncpa [#allocation16], 1 }
 0x4f9   :  { %4939 = vsyncpa [#allocation9], 1 }
 0x4fa   :  { %4940 = vsyncpa [#allocation12], 1 }
 0x4fb   :  { %4941 = vsyncpa [#allocation18], 1 }

</bundles_post_ra>
